<compile_context>
chip_gen: v7x
topology: tpu7x:2x2x1
jax: 0.10.0
libtpu: 0.0.40
codegen_flags: <defaults>
</compile_context>

<pallas_src>
import functools

import numpy as np
import jax
import jax.numpy as jnp
from jax import lax
from jax.experimental import pallas as pl
from jax.experimental.pallas import tpu as pltpu

INCEPTION_SIZE = 299
IN_CHANNELS = 3
STEM_OUT_CH = 32
FEATURE_DIM = 2048
NUM_CLASSES = 1000

RESIZE_PLANES_PER_STEP = 8       # planes per grid step in the resize kernel
CONV_TILE_M = 2048               # im2col rows per grid step in the fused backbone kernel
COV_TILE_D = 512                 # feature-dim chunk in the covariance accumulation kernel
VMEM_LIMIT = 32 * 1024 * 1024    # stay within v7x's 64 MiB physical VMEM with headroom


def _round_up(x, m):
    return ((x + m - 1) // m) * m


# ----------------------------------------------------------------------------
# helpers (glue, plain numpy / JAX)
# ----------------------------------------------------------------------------
def _bilinear_matrix(out_size, in_size):
    """Interpolation matrix matching F.interpolate(mode='bilinear', align_corners=False)."""
    scale = in_size / out_size
    i = np.arange(out_size)
    src = np.clip((i + 0.5) * scale - 0.5, 0.0, in_size - 1)
    lo = np.floor(src).astype(np.int64)
    hi = np.minimum(lo + 1, in_size - 1)
    frac = (src - lo).astype(np.float32)
    m = np.zeros((out_size, in_size), dtype=np.float32)
    m[i, lo] += 1.0 - frac
    m[i, hi] += frac
    return m


def _im2col_3x3_s2(x_nhwc):
    """im2col for a 3x3 / stride-2 / VALID conv.  Column order: (di, dj) outer, channel inner."""
    b, h, w, c = x_nhwc.shape
    oh = (h - 3) // 2 + 1
    ow = (w - 3) // 2 + 1
    cols = []
    for di in range(3):
        for dj in range(3):
            cols.append(x_nhwc[:, di:di + 2 * oh:2, dj:dj + 2 * ow:2, :])
    patches = jnp.concatenate(cols, axis=-1)              # (B, OH, OW, 9*C)
    return patches.reshape(b, oh * ow, 9 * c), oh, ow


# ----------------------------------------------------------------------------
# Pallas kernels
# ----------------------------------------------------------------------------
def _resize_norm_kernel(rh_ref, rwt_ref, x_ref, o_ref, *, n_planes):
    # bilinear resize of n_planes image planes (two bf16 matmuls each), then (x - 0.5) * 2
    rh = rh_ref[...]                                      # (299, H) bf16
    rwt = rwt_ref[...]                                    # (W, 299) bf16
    for p in range(n_planes):                             # static unroll
        img = x_ref[p].astype(jnp.bfloat16)               # (H, W)
        tmp = jnp.dot(rh, img, preferred_element_type=jnp.float32)            # (299, W)
        out = jnp.dot(tmp.astype(jnp.bfloat16), rwt,
                      preferred_element_type=jnp.float32)                      # (299, 299)
        o_ref[p] = ((out - 0.5) * 2.0).astype(o_ref.dtype)


def _fused_backbone_kernel(p_ref, wc_ref, bc_ref, wp_ref, bp_ref, wf_ref, bf_ref,
                           feat_ref, prob_ref, acc_ref, *, rows_per_img):
    # conv(3x3/s2 as im2col matmul) + bias + ReLU + global average pool (accumulated across
    # the row-tile grid) + linear proj to 2048 + fc(1000) + softmax, fused in one kernel.
    t = pl.program_id(0)

    @pl.when(t == 0)
    def _init():
        acc_ref[...] = jnp.zeros_like(acc_ref)

    b, tm, k = p_ref.shape
    flat = p_ref[...].reshape(b * tm, k)                                       # bf16
    act = jnp.dot(flat, wc_ref[...], preferred_element_type=jnp.float32)       # (b*tm, 32)
    act = jnp.maximum(act + bc_ref[...], 0.0)
    act = act.reshape(b, tm, act.shape[-1])
    row = t * tm + lax.broadcasted_iota(jnp.int32, (tm, 1), 0)                 # (tm, 1)
    act = jnp.where(row < rows_per_img, act, 0.0)        # mask zero-padded im2col rows
    acc_ref[...] += jnp.sum(act, axis=1)                                       # (b, 32)

    @pl.when(t == pl.num_programs(0) - 1)
    def _finish():
        pooled = acc_ref[...] * (1.0 / rows_per_img)                           # (b, 32)
        feats = jnp.dot(pooled.astype(jnp.bfloat16), wp_ref[...],
                        preferred_element_type=jnp.float32) + bp_ref[...]      # (b, 2048)
        feat_ref[...] = feats
        logits = jnp.dot(feats.astype(jnp.bfloat16), wf_ref[...],
                         preferred_element_type=jnp.float32) + bf_ref[...]     # (b, 1000)
        m = jnp.max(logits, axis=-1, keepdims=True)
        e = jnp.exp(logits - m)
        prob_ref[...] = e * pl.reciprocal(jnp.sum(e, axis=-1, keepdims=True), approx=True)


def _cov_accum_kernel(x_ref, xx_ref, s_ref):
    # accumulates X @ X.T and per-row sums over feature-dim chunks (outputs stay resident)
    t = pl.program_id(0)

    @pl.when(t == 0)
    def _init():
        xx_ref[...] = jnp.zeros_like(xx_ref)
        s_ref[...] = jnp.zeros_like(s_ref)

    x = x_ref[...]                                                             # (N, tile_d)
    xx_ref[...] += lax.dot_general(x, x, (((1,), (1,)), ((), ())),
                                   preferred_element_type=jnp.float32)
    s_ref[...] += jnp.sum(x, axis=1, keepdims=True)


def _is_kl_kernel(p_ref, o_ref):
    # per-sample KL(p_i || mean_j p_j) via log-difference (avoids 0 * -inf NaN and the
    # per-element divide of log(p/marg)); IS = exp(mean_i KL_i) in glue.
    p = p_ref[...]                                                             # (M, K)
    marg = jnp.mean(p, axis=0, keepdims=True)                                  # (1, K)
    logp = jnp.log(jnp.maximum(p, 1e-12))
    logm = jnp.log(jnp.maximum(marg, 1e-12))
    o_ref[...] = jnp.sum(p * (logp - logm), axis=1, keepdims=True)             # (M, 1)


# ----------------------------------------------------------------------------
# Pallas wrappers
# ----------------------------------------------------------------------------
@functools.partial(jax.jit, static_argnames=("p_planes",))
def _resize_and_normalize(planes, rh, rwt, *, p_planes):
    nc, h, w = planes.shape
    pad = (-nc) % p_planes
    planes_p = jnp.pad(planes, ((0, pad), (0, 0), (0, 0)))
    ncp = nc + pad
    out = pl.pallas_call(
        functools.partial(_resize_norm_kernel, n_planes=p_planes),
        out_shape=jax.ShapeDtypeStruct((ncp, INCEPTION_SIZE, INCEPTION_SIZE), jnp.bfloat16),
        grid=(ncp // p_planes,),
        in_specs=[
            pl.BlockSpec((INCEPTION_SIZE, h), lambda i: (0, 0)),
            pl.BlockSpec((w, INCEPTION_SIZE), lambda i: (0, 0)),
            pl.BlockSpec((p_planes, h, w), lambda i: (i, 0, 0)),
        ],
        out_specs=pl.BlockSpec((p_planes, INCEPTION_SIZE, INCEPTION_SIZE),
                               lambda i: (i, 0, 0)),
        compiler_params=pltpu.CompilerParams(dimension_semantics=("parallel",)),
    )(rh, rwt, planes_p)
    return out[:nc]


@functools.partial(jax.jit, static_argnames=("rows_per_img", "tile_m"))
def _backbone_head(patches, w_conv, b_conv, w_proj, b_proj, w_fc, b_fc,
                   *, rows_per_img, tile_m):
    b, r_pad, k = patches.shape
    n_tiles = r_pad // tile_m
    feats, probs = pl.pallas_call(
        functools.partial(_fused_backbone_kernel, rows_per_img=rows_per_img),
        out_shape=(jax.ShapeDtypeStruct((b, FEATURE_DIM), jnp.float32),
                   jax.ShapeDtypeStruct((b, NUM_CLASSES), jnp.float32)),
        grid=(n_tiles,),
        in_specs=[
            pl.BlockSpec((b, tile_m, k), lambda i: (0, i, 0)),
            pl.BlockSpec((k, STEM_OUT_CH), lambda i: (0, 0)),
            pl.BlockSpec((1, STEM_OUT_CH), lambda i: (0, 0)),
            pl.BlockSpec((STEM_OUT_CH, FEATURE_DIM), lambda i: (0, 0)),
            pl.BlockSpec((1, FEATURE_DIM), lambda i: (0, 0)),
            pl.BlockSpec((FEATURE_DIM, NUM_CLASSES), lambda i: (0, 0)),
            pl.BlockSpec((1, NUM_CLASSES), lambda i: (0, 0)),
        ],
        out_specs=(pl.BlockSpec((b, FEATURE_DIM), lambda i: (0, 0)),
                   pl.BlockSpec((b, NUM_CLASSES), lambda i: (0, 0))),
        scratch_shapes=[pltpu.VMEM((b, STEM_OUT_CH), jnp.float32)],
        compiler_params=pltpu.CompilerParams(
            dimension_semantics=("arbitrary",),     # row-tile axis is a pooling reduction
            vmem_limit_bytes=VMEM_LIMIT),
    )(patches, w_conv, b_conv, w_proj, b_proj, w_fc, b_fc)
    return feats, probs


@functools.partial(jax.jit, static_argnames=("tile_d",))
def _mean_and_cov(x, *, tile_d=COV_TILE_D):
    n, d = x.shape
    pad = (-d) % tile_d
    xp = jnp.pad(x, ((0, 0), (0, pad)))
    xx, s = pl.pallas_call(
        _cov_accum_kernel,
        out_shape=(jax.ShapeDtypeStruct((n, n), jnp.float32),
                   jax.ShapeDtypeStruct((n, 1), jnp.float32)),
        grid=((d + pad) // tile_d,),
        in_specs=[pl.BlockSpec((n, tile_d), lambda i: (0, i))],
        out_specs=(pl.BlockSpec((n, n), lambda i: (0, 0)),
                   pl.BlockSpec((n, 1), lambda i: (0, 0))),
        compiler_params=pltpu.CompilerParams(dimension_semantics=("arbitrary",)),
    )(xp)
    # finalize the tiny N x N algebra in plain JAX (zero-padded columns contribute nothing)
    mean = s / d                                   # mean over axis 1 (as in the reference)
    cov = (xx - d * (mean @ mean.T)) / (d - 1)     # np.cov(X, rowvar=True), ddof=1
    return mean, cov


@jax.jit
def _is_kl(p):
    return pl.pallas_call(
        _is_kl_kernel,
        out_shape=jax.ShapeDtypeStruct((p.shape[0], 1), jnp.float32),
        compiler_params=pltpu.CompilerParams(vmem_limit_bytes=VMEM_LIMIT),
    )(p)


# ----------------------------------------------------------------------------
# ValLoss re-implementation
# ----------------------------------------------------------------------------
class ValLossPallas:
    """Pallas/JAX re-implementation of ValLoss.forward (FID and Inception Score)."""

    def __init__(self, key):
        ks = jax.random.split(key, 6)
        # TODO(synk): pretrained InceptionV3 weights cannot be loaded; all weights
        # below are deterministic synthetic stand-ins for the backbone / fc head.
        self.k_conv = _round_up(9 * IN_CHANNELS, 32)       # pad K 27 -> 32 for MXU alignment
        w_conv = jax.random.normal(ks[0], (9 * IN_CHANNELS, STEM_OUT_CH), jnp.float32) * 0.1
        self.w_conv = jnp.pad(w_conv, ((0, self.k_conv - 9 * IN_CHANNELS),
                                       (0, 0))).astype(jnp.bfloat16)
        self.b_conv = jax.random.normal(ks[1], (1, STEM_OUT_CH), jnp.float32) * 0.01
        self.w_proj = (jax.random.normal(ks[2], (STEM_OUT_CH, FEATURE_DIM), jnp.float32)
                       * 0.05).astype(jnp.bfloat16)
        self.b_proj = jax.random.normal(ks[3], (1, FEATURE_DIM), jnp.float32) * 0.01
        self.w_fc = (jax.random.normal(ks[4], (FEATURE_DIM, NUM_CLASSES), jnp.float32)
                     * 0.02).astype(jnp.bfloat16)
        self.b_fc = jax.random.normal(ks[5], (1, NUM_CLASSES), jnp.float32) * 0.01

    # -- _features + _classifier (fused) --------------------------------------
    def _features_and_probs(self, x):
        b, c, h, w = x.shape
        rh = jnp.asarray(_bilinear_matrix(INCEPTION_SIZE, h), dtype=jnp.bfloat16)
        rwt = jnp.asarray(_bilinear_matrix(INCEPTION_SIZE, w).T, dtype=jnp.bfloat16)
        planes = x.reshape(b * c, h, w)
        resized = _resize_and_normalize(planes, rh, rwt,
                                        p_planes=RESIZE_PLANES_PER_STEP)  # (B*C,299,299) bf16
        x_nhwc = resized.reshape(b, c, INCEPTION_SIZE, INCEPTION_SIZE).transpose(0, 2, 3, 1)
        # TODO(synk): the im2col patches are still materialized in HBM by XLA (bf16 halves the
        # traffic); folding the 9 shifted/strided slices into the conv kernel would remove it.
        patches, oh, ow = _im2col_3x3_s2(x_nhwc)                          # (B, 149*149, 27)
        rows = oh * ow
        row_pad = (-rows) % CONV_TILE_M
        k_pad = self.k_conv - patches.shape[-1]
        patches = jnp.pad(patches, ((0, 0), (0, row_pad), (0, k_pad)))
        # TODO(synk): InceptionV3 blocks Conv2d_2a..Mixed_7c have no faithful Pallas
        # equivalent without pretrained weights; conv stem + global average pool + linear
        # projection to 2048 stands in for them (dropout is a no-op in eval mode).
        feats, probs = _backbone_head(
            patches, self.w_conv, self.b_conv, self.w_proj, self.b_proj,
            self.w_fc, self.b_fc, rows_per_img=rows, tile_m=CONV_TILE_M)
        return feats, probs

    def _features(self, x):
        return self._features_and_probs(x)[0]

    # -- calc_data -------------------------------------------------------------
    def calc_data(self, real_inputs, fake_inputs):
        # batch the reference's per-batch Python loops: one fused backbone call per side
        real_x = jnp.concatenate(list(real_inputs), axis=0)
        fake_x = jnp.concatenate(list(fake_inputs), axis=0)
        real_features, _ = self._features_and_probs(real_x)
        fake_features, fake_probs = self._features_and_probs(fake_x)
        return real_features, fake_features, fake_probs

    # -- calc_fid --------------------------------------------------------------
    @staticmethod
    def calc_fid(real_features, fake_features):
        mean_r, sigma_r = _mean_and_cov(real_features)
        mean_f, sigma_f = _mean_and_cov(fake_features)
        diff = mean_r[:, 0] - mean_f[:, 0]
        # TODO(synk): scipy.linalg.sqrtm has no Pallas equivalent; for PSD covariances
        # trace(sqrtm(Sr@Sf)) == sum sqrt(eig(Sf^{1/2} Sr Sf^{1/2})), computed in plain JAX.
        wf, vf = jnp.linalg.eigh(sigma_f)
        sf_half = (vf * jnp.sqrt(jnp.clip(wf, 0.0, None))) @ vf.T
        ev = jnp.linalg.eigh(sf_half @ sigma_r @ sf_half)[0]
        tr_sqrt = jnp.sum(jnp.sqrt(jnp.clip(ev, 0.0, None)))
        return (jnp.sum(diff ** 2)
                + jnp.trace(sigma_r) + jnp.trace(sigma_f) - 2.0 * tr_sqrt)

    # -- calc_is ---------------------------------------------------------------
    @staticmethod
    def calc_is(fake_probs):
        kl = _is_kl(fake_probs)                                               # (M, 1)
        return jnp.exp(jnp.mean(kl))

    # -- forward ---------------------------------------------------------------
    def forward(self, real_images, fake_images):
        real_features, fake_features, fake_probs = self.calc_data(real_images, fake_images)
        fid = self.calc_fid(real_features, fake_features)
        inception_score = self.calc_is(fake_probs)
        return fid, inception_score

    __call__ = forward


# ----------------------------------------------------------------------------
if __name__ == "__main__":
    key = jax.random.PRNGKey(0)
    k_model, k_real, k_fake = jax.random.split(key, 3)

    model = ValLossPallas(k_model)

    # two batches of real and two batches of fake images, NCHW, values in [0, 1]
    real_images = [jax.random.uniform(k, (2, 3, 16, 16), jnp.float32)
                   for k in jax.random.split(k_real, 2)]
    fake_images = [jax.random.uniform(k, (2, 3, 16, 16), jnp.float32)
                   for k in jax.random.split(k_fake, 2)]

    fid, inception_score = model(real_images, fake_images)
    fid = jax.block_until_ready(fid)
    inception_score = jax.block_until_ready(inception_score)

    assert bool(jnp.isfinite(fid)) and bool(jnp.isfinite(inception_score))
    print("KERNEL_OK")
</pallas_src>

<mosaic_0001>
module attributes {stable_mosaic.version = 11 : i64} {
  func.func @_resize_norm_kernel(%arg0: i32, %arg1: memref<299x16xbf16, #tpu.memory_space<vmem>>, %arg2: memref<16x299xbf16, #tpu.memory_space<vmem>>, %arg3: memref<8x16x16xf32, #tpu.memory_space<vmem>>, %arg4: memref<8x299x299xbf16, #tpu.memory_space<vmem>>) attributes {dimension_semantics = [#tpu.dimension_semantics<parallel>], iteration_bounds = array<i64: 2>, scalar_prefetch = 0 : i64, scratch_operands = 0 : i64, tpu.core_type = #tpu.core_type<tc>, window_params = [{pipeline_mode = #tpu.pipeline_mode<synchronous>, transform_indices = @transform_0, window_bounds = array<i64: 299, 16>}, {pipeline_mode = #tpu.pipeline_mode<synchronous>, transform_indices = @transform_1, window_bounds = array<i64: 16, 299>}, {transform_indices = @transform_2, window_bounds = array<i64: 8, 16, 16>}, {transform_indices = @transform_3, window_bounds = array<i64: 8, 299, 299>}]} {
    %c0 = arith.constant 0 : index
    %c0_0 = arith.constant 0 : index
    %0 = vector.load %arg1[%c0, %c0_0] : memref<299x16xbf16, #tpu.memory_space<vmem>>, vector<299x16xbf16>
    %c0_1 = arith.constant 0 : index
    %c0_2 = arith.constant 0 : index
    %1 = vector.load %arg2[%c0_1, %c0_2] : memref<16x299xbf16, #tpu.memory_space<vmem>>, vector<16x299xbf16>
    %c0_3 = arith.constant 0 : index
    %c0_4 = arith.constant 0 : index
    %c0_5 = arith.constant 0 : index
    %2 = vector.load %arg3[%c0_3, %c0_4, %c0_5] : memref<8x16x16xf32, #tpu.memory_space<vmem>>, vector<1x16x16xf32>
    %3 = vector.shape_cast %2 : vector<1x16x16xf32> to vector<16x16xf32>
    %4 = arith.truncf %3 : vector<16x16xf32> to vector<16x16xbf16>
    %cst = arith.constant dense<0.000000e+00> : vector<299x16xf32>
    %5 = tpu.matmul %0, %4, %cst {dimension_numbers = #tpu.dot_dimension_numbers<[1], [0], [0], [1], [0, 0, 1, 1], [], []>} : vector<299x16xbf16>, vector<16x16xbf16>, vector<299x16xf32> -> vector<299x16xf32>
    %6 = arith.truncf %5 : vector<299x16xf32> to vector<299x16xbf16>
    %cst_6 = arith.constant dense<0.000000e+00> : vector<299x299xf32>
    %7 = tpu.matmul %6, %1, %cst_6 {dimension_numbers = #tpu.dot_dimension_numbers<[1], [0], [0], [1], [0, 0, 1, 1], [], []>} : vector<299x16xbf16>, vector<16x299xbf16>, vector<299x299xf32> -> vector<299x299xf32>
    %cst_7 = arith.constant 5.000000e-01 : f32
    %8 = vector.broadcast %cst_7 : f32 to vector<299x299xf32>
    %9 = arith.subf %7, %8 : vector<299x299xf32>
    %cst_8 = arith.constant 2.000000e+00 : f32
    %10 = vector.broadcast %cst_8 : f32 to vector<299x299xf32>
    %11 = arith.mulf %9, %10 : vector<299x299xf32>
    %12 = arith.truncf %11 : vector<299x299xf32> to vector<299x299xbf16>
    %c0_9 = arith.constant 0 : index
    %c0_10 = arith.constant 0 : index
    %c0_11 = arith.constant 0 : index
    %13 = vector.load %arg4[%c0_9, %c0_10, %c0_11] : memref<8x299x299xbf16, #tpu.memory_space<vmem>>, vector<1x299x299xbf16>
    %14 = vector.shape_cast %13 : vector<1x299x299xbf16> to vector<299x299xbf16>
    %15 = vector.shape_cast %12 : vector<299x299xbf16> to vector<1x299x299xbf16>
    tpu.vector_store %arg4[%c0_9, %c0_10, %c0_11], %15 {strides = array<i32>} : memref<8x299x299xbf16, #tpu.memory_space<vmem>>, vector<1x299x299xbf16>,
    %c1 = arith.constant 1 : index
    %c0_12 = arith.constant 0 : index
    %c0_13 = arith.constant 0 : index
    %16 = vector.load %arg3[%c1, %c0_12, %c0_13] : memref<8x16x16xf32, #tpu.memory_space<vmem>>, vector<1x16x16xf32>
    %17 = vector.shape_cast %16 : vector<1x16x16xf32> to vector<16x16xf32>
    %18 = arith.truncf %17 : vector<16x16xf32> to vector<16x16xbf16>
    %cst_14 = arith.constant dense<0.000000e+00> : vector<299x16xf32>
    %19 = tpu.matmul %0, %18, %cst_14 {dimension_numbers = #tpu.dot_dimension_numbers<[1], [0], [0], [1], [0, 0, 1, 1], [], []>} : vector<299x16xbf16>, vector<16x16xbf16>, vector<299x16xf32> -> vector<299x16xf32>
    %20 = arith.truncf %19 : vector<299x16xf32> to vector<299x16xbf16>
    %cst_15 = arith.constant dense<0.000000e+00> : vector<299x299xf32>
    %21 = tpu.matmul %20, %1, %cst_15 {dimension_numbers = #tpu.dot_dimension_numbers<[1], [0], [0], [1], [0, 0, 1, 1], [], []>} : vector<299x16xbf16>, vector<16x299xbf16>, vector<299x299xf32> -> vector<299x299xf32>
    %cst_16 = arith.constant 5.000000e-01 : f32
    %22 = vector.broadcast %cst_16 : f32 to vector<299x299xf32>
    %23 = arith.subf %21, %22 : vector<299x299xf32>
    %cst_17 = arith.constant 2.000000e+00 : f32
    %24 = vector.broadcast %cst_17 : f32 to vector<299x299xf32>
    %25 = arith.mulf %23, %24 : vector<299x299xf32>
    %26 = arith.truncf %25 : vector<299x299xf32> to vector<299x299xbf16>
    %c1_18 = arith.constant 1 : index
    %c0_19 = arith.constant 0 : index
    %c0_20 = arith.constant 0 : index
    %27 = vector.load %arg4[%c1_18, %c0_19, %c0_20] : memref<8x299x299xbf16, #tpu.memory_space<vmem>>, vector<1x299x299xbf16>
    %28 = vector.shape_cast %27 : vector<1x299x299xbf16> to vector<299x299xbf16>
    %29 = vector.shape_cast %26 : vector<299x299xbf16> to vector<1x299x299xbf16>
    tpu.vector_store %arg4[%c1_18, %c0_19, %c0_20], %29 {strides = array<i32>} : memref<8x299x299xbf16, #tpu.memory_space<vmem>>, vector<1x299x299xbf16>,
    %c2 = arith.constant 2 : index
    %c0_21 = arith.constant 0 : index
    %c0_22 = arith.constant 0 : index
    %30 = vector.load %arg3[%c2, %c0_21, %c0_22] : memref<8x16x16xf32, #tpu.memory_space<vmem>>, vector<1x16x16xf32>
    %31 = vector.shape_cast %30 : vector<1x16x16xf32> to vector<16x16xf32>
    %32 = arith.truncf %31 : vector<16x16xf32> to vector<16x16xbf16>
    %cst_23 = arith.constant dense<0.000000e+00> : vector<299x16xf32>
    %33 = tpu.matmul %0, %32, %cst_23 {dimension_numbers = #tpu.dot_dimension_numbers<[1], [0], [0], [1], [0, 0, 1, 1], [], []>} : vector<299x16xbf16>, vector<16x16xbf16>, vector<299x16xf32> -> vector<299x16xf32>
    %34 = arith.truncf %33 : vector<299x16xf32> to vector<299x16xbf16>
    %cst_24 = arith.constant dense<0.000000e+00> : vector<299x299xf32>
    %35 = tpu.matmul %34, %1, %cst_24 {dimension_numbers = #tpu.dot_dimension_numbers<[1], [0], [0], [1], [0, 0, 1, 1], [], []>} : vector<299x16xbf16>, vector<16x299xbf16>, vector<299x299xf32> -> vector<299x299xf32>
    %cst_25 = arith.constant 5.000000e-01 : f32
    %36 = vector.broadcast %cst_25 : f32 to vector<299x299xf32>
    %37 = arith.subf %35, %36 : vector<299x299xf32>
    %cst_26 = arith.constant 2.000000e+00 : f32
    %38 = vector.broadcast %cst_26 : f32 to vector<299x299xf32>
    %39 = arith.mulf %37, %38 : vector<299x299xf32>
    %40 = arith.truncf %39 : vector<299x299xf32> to vector<299x299xbf16>
    %c2_27 = arith.constant 2 : index
    %c0_28 = arith.constant 0 : index
    %c0_29 = arith.constant 0 : index
    %41 = vector.load %arg4[%c2_27, %c0_28, %c0_29] : memref<8x299x299xbf16, #tpu.memory_space<vmem>>, vector<1x299x299xbf16>
    %42 = vector.shape_cast %41 : vector<1x299x299xbf16> to vector<299x299xbf16>
    %43 = vector.shape_cast %40 : vector<299x299xbf16> to vector<1x299x299xbf16>
    tpu.vector_store %arg4[%c2_27, %c0_28, %c0_29], %43 {strides = array<i32>} : memref<8x299x299xbf16, #tpu.memory_space<vmem>>, vector<1x299x299xbf16>,
    %c3 = arith.constant 3 : index
    %c0_30 = arith.constant 0 : index
    %c0_31 = arith.constant 0 : index
    %44 = vector.load %arg3[%c3, %c0_30, %c0_31] : memref<8x16x16xf32, #tpu.memory_space<vmem>>, vector<1x16x16xf32>
    %45 = vector.shape_cast %44 : vector<1x16x16xf32> to vector<16x16xf32>
    %46 = arith.truncf %45 : vector<16x16xf32> to vector<16x16xbf16>
    %cst_32 = arith.constant dense<0.000000e+00> : vector<299x16xf32>
    %47 = tpu.matmul %0, %46, %cst_32 {dimension_numbers = #tpu.dot_dimension_numbers<[1], [0], [0], [1], [0, 0, 1, 1], [], []>} : vector<299x16xbf16>, vector<16x16xbf16>, vector<299x16xf32> -> vector<299x16xf32>
    %48 = arith.truncf %47 : vector<299x16xf32> to vector<299x16xbf16>
    %cst_33 = arith.constant dense<0.000000e+00> : vector<299x299xf32>
    %49 = tpu.matmul %48, %1, %cst_33 {dimension_numbers = #tpu.dot_dimension_numbers<[1], [0], [0], [1], [0, 0, 1, 1], [], []>} : vector<299x16xbf16>, vector<16x299xbf16>, vector<299x299xf32> -> vector<299x299xf32>
    %cst_34 = arith.constant 5.000000e-01 : f32
    %50 = vector.broadcast %cst_34 : f32 to vector<299x299xf32>
    %51 = arith.subf %49, %50 : vector<299x299xf32>
    %cst_35 = arith.constant 2.000000e+00 : f32
    %52 = vector.broadcast %cst_35 : f32 to vector<299x299xf32>
    %53 = arith.mulf %51, %52 : vector<299x299xf32>
    %54 = arith.truncf %53 : vector<299x299xf32> to vector<299x299xbf16>
    %c3_36 = arith.constant 3 : index
    %c0_37 = arith.constant 0 : index
    %c0_38 = arith.constant 0 : index
    %55 = vector.load %arg4[%c3_36, %c0_37, %c0_38] : memref<8x299x299xbf16, #tpu.memory_space<vmem>>, vector<1x299x299xbf16>
    %56 = vector.shape_cast %55 : vector<1x299x299xbf16> to vector<299x299xbf16>
    %57 = vector.shape_cast %54 : vector<299x299xbf16> to vector<1x299x299xbf16>
    tpu.vector_store %arg4[%c3_36, %c0_37, %c0_38], %57 {strides = array<i32>} : memref<8x299x299xbf16, #tpu.memory_space<vmem>>, vector<1x299x299xbf16>,
    %c4 = arith.constant 4 : index
    %c0_39 = arith.constant 0 : index
    %c0_40 = arith.constant 0 : index
    %58 = vector.load %arg3[%c4, %c0_39, %c0_40] : memref<8x16x16xf32, #tpu.memory_space<vmem>>, vector<1x16x16xf32>
    %59 = vector.shape_cast %58 : vector<1x16x16xf32> to vector<16x16xf32>
    %60 = arith.truncf %59 : vector<16x16xf32> to vector<16x16xbf16>
    %cst_41 = arith.constant dense<0.000000e+00> : vector<299x16xf32>
    %61 = tpu.matmul %0, %60, %cst_41 {dimension_numbers = #tpu.dot_dimension_numbers<[1], [0], [0], [1], [0, 0, 1, 1], [], []>} : vector<299x16xbf16>, vector<16x16xbf16>, vector<299x16xf32> -> vector<299x16xf32>
    %62 = arith.truncf %61 : vector<299x16xf32> to vector<299x16xbf16>
    %cst_42 = arith.constant dense<0.000000e+00> : vector<299x299xf32>
    %63 = tpu.matmul %62, %1, %cst_42 {dimension_numbers = #tpu.dot_dimension_numbers<[1], [0], [0], [1], [0, 0, 1, 1], [], []>} : vector<299x16xbf16>, vector<16x299xbf16>, vector<299x299xf32> -> vector<299x299xf32>
    %cst_43 = arith.constant 5.000000e-01 : f32
    %64 = vector.broadcast %cst_43 : f32 to vector<299x299xf32>
    %65 = arith.subf %63, %64 : vector<299x299xf32>
    %cst_44 = arith.constant 2.000000e+00 : f32
    %66 = vector.broadcast %cst_44 : f32 to vector<299x299xf32>
    %67 = arith.mulf %65, %66 : vector<299x299xf32>
    %68 = arith.truncf %67 : vector<299x299xf32> to vector<299x299xbf16>
    %c4_45 = arith.constant 4 : index
    %c0_46 = arith.constant 0 : index
    %c0_47 = arith.constant 0 : index
    %69 = vector.load %arg4[%c4_45, %c0_46, %c0_47] : memref<8x299x299xbf16, #tpu.memory_space<vmem>>, vector<1x299x299xbf16>
    %70 = vector.shape_cast %69 : vector<1x299x299xbf16> to vector<299x299xbf16>
    %71 = vector.shape_cast %68 : vector<299x299xbf16> to vector<1x299x299xbf16>
    tpu.vector_store %arg4[%c4_45, %c0_46, %c0_47], %71 {strides = array<i32>} : memref<8x299x299xbf16, #tpu.memory_space<vmem>>, vector<1x299x299xbf16>,
    %c5 = arith.constant 5 : index
    %c0_48 = arith.constant 0 : index
    %c0_49 = arith.constant 0 : index
    %72 = vector.load %arg3[%c5, %c0_48, %c0_49] : memref<8x16x16xf32, #tpu.memory_space<vmem>>, vector<1x16x16xf32>
    %73 = vector.shape_cast %72 : vector<1x16x16xf32> to vector<16x16xf32>
    %74 = arith.truncf %73 : vector<16x16xf32> to vector<16x16xbf16>
    %cst_50 = arith.constant dense<0.000000e+00> : vector<299x16xf32>
    %75 = tpu.matmul %0, %74, %cst_50 {dimension_numbers = #tpu.dot_dimension_numbers<[1], [0], [0], [1], [0, 0, 1, 1], [], []>} : vector<299x16xbf16>, vector<16x16xbf16>, vector<299x16xf32> -> vector<299x16xf32>
    %76 = arith.truncf %75 : vector<299x16xf32> to vector<299x16xbf16>
    %cst_51 = arith.constant dense<0.000000e+00> : vector<299x299xf32>
    %77 = tpu.matmul %76, %1, %cst_51 {dimension_numbers = #tpu.dot_dimension_numbers<[1], [0], [0], [1], [0, 0, 1, 1], [], []>} : vector<299x16xbf16>, vector<16x299xbf16>, vector<299x299xf32> -> vector<299x299xf32>
    %cst_52 = arith.constant 5.000000e-01 : f32
    %78 = vector.broadcast %cst_52 : f32 to vector<299x299xf32>
    %79 = arith.subf %77, %78 : vector<299x299xf32>
    %cst_53 = arith.constant 2.000000e+00 : f32
    %80 = vector.broadcast %cst_53 : f32 to vector<299x299xf32>
    %81 = arith.mulf %79, %80 : vector<299x299xf32>
    %82 = arith.truncf %81 : vector<299x299xf32> to vector<299x299xbf16>
    %c5_54 = arith.constant 5 : index
    %c0_55 = arith.constant 0 : index
    %c0_56 = arith.constant 0 : index
    %83 = vector.load %arg4[%c5_54, %c0_55, %c0_56] : memref<8x299x299xbf16, #tpu.memory_space<vmem>>, vector<1x299x299xbf16>
    %84 = vector.shape_cast %83 : vector<1x299x299xbf16> to vector<299x299xbf16>
    %85 = vector.shape_cast %82 : vector<299x299xbf16> to vector<1x299x299xbf16>
    tpu.vector_store %arg4[%c5_54, %c0_55, %c0_56], %85 {strides = array<i32>} : memref<8x299x299xbf16, #tpu.memory_space<vmem>>, vector<1x299x299xbf16>,
    %c6 = arith.constant 6 : index
    %c0_57 = arith.constant 0 : index
    %c0_58 = arith.constant 0 : index
    %86 = vector.load %arg3[%c6, %c0_57, %c0_58] : memref<8x16x16xf32, #tpu.memory_space<vmem>>, vector<1x16x16xf32>
    %87 = vector.shape_cast %86 : vector<1x16x16xf32> to vector<16x16xf32>
    %88 = arith.truncf %87 : vector<16x16xf32> to vector<16x16xbf16>
    %cst_59 = arith.constant dense<0.000000e+00> : vector<299x16xf32>
    %89 = tpu.matmul %0, %88, %cst_59 {dimension_numbers = #tpu.dot_dimension_numbers<[1], [0], [0], [1], [0, 0, 1, 1], [], []>} : vector<299x16xbf16>, vector<16x16xbf16>, vector<299x16xf32> -> vector<299x16xf32>
    %90 = arith.truncf %89 : vector<299x16xf32> to vector<299x16xbf16>
    %cst_60 = arith.constant dense<0.000000e+00> : vector<299x299xf32>
    %91 = tpu.matmul %90, %1, %cst_60 {dimension_numbers = #tpu.dot_dimension_numbers<[1], [0], [0], [1], [0, 0, 1, 1], [], []>} : vector<299x16xbf16>, vector<16x299xbf16>, vector<299x299xf32> -> vector<299x299xf32>
    %cst_61 = arith.constant 5.000000e-01 : f32
    %92 = vector.broadcast %cst_61 : f32 to vector<299x299xf32>
    %93 = arith.subf %91, %92 : vector<299x299xf32>
    %cst_62 = arith.constant 2.000000e+00 : f32
    %94 = vector.broadcast %cst_62 : f32 to vector<299x299xf32>
    %95 = arith.mulf %93, %94 : vector<299x299xf32>
    %96 = arith.truncf %95 : vector<299x299xf32> to vector<299x299xbf16>
    %c6_63 = arith.constant 6 : index
    %c0_64 = arith.constant 0 : index
    %c0_65 = arith.constant 0 : index
    %97 = vector.load %arg4[%c6_63, %c0_64, %c0_65] : memref<8x299x299xbf16, #tpu.memory_space<vmem>>, vector<1x299x299xbf16>
    %98 = vector.shape_cast %97 : vector<1x299x299xbf16> to vector<299x299xbf16>
    %99 = vector.shape_cast %96 : vector<299x299xbf16> to vector<1x299x299xbf16>
    tpu.vector_store %arg4[%c6_63, %c0_64, %c0_65], %99 {strides = array<i32>} : memref<8x299x299xbf16, #tpu.memory_space<vmem>>, vector<1x299x299xbf16>,
    %c7 = arith.constant 7 : index
    %c0_66 = arith.constant 0 : index
    %c0_67 = arith.constant 0 : index
    %100 = vector.load %arg3[%c7, %c0_66, %c0_67] : memref<8x16x16xf32, #tpu.memory_space<vmem>>, vector<1x16x16xf32>
    %101 = vector.shape_cast %100 : vector<1x16x16xf32> to vector<16x16xf32>
    %102 = arith.truncf %101 : vector<16x16xf32> to vector<16x16xbf16>
    %cst_68 = arith.constant dense<0.000000e+00> : vector<299x16xf32>
    %103 = tpu.matmul %0, %102, %cst_68 {dimension_numbers = #tpu.dot_dimension_numbers<[1], [0], [0], [1], [0, 0, 1, 1], [], []>} : vector<299x16xbf16>, vector<16x16xbf16>, vector<299x16xf32> -> vector<299x16xf32>
    %104 = arith.truncf %103 : vector<299x16xf32> to vector<299x16xbf16>
    %cst_69 = arith.constant dense<0.000000e+00> : vector<299x299xf32>
    %105 = tpu.matmul %104, %1, %cst_69 {dimension_numbers = #tpu.dot_dimension_numbers<[1], [0], [0], [1], [0, 0, 1, 1], [], []>} : vector<299x16xbf16>, vector<16x299xbf16>, vector<299x299xf32> -> vector<299x299xf32>
    %cst_70 = arith.constant 5.000000e-01 : f32
    %106 = vector.broadcast %cst_70 : f32 to vector<299x299xf32>
    %107 = arith.subf %105, %106 : vector<299x299xf32>
    %cst_71 = arith.constant 2.000000e+00 : f32
    %108 = vector.broadcast %cst_71 : f32 to vector<299x299xf32>
    %109 = arith.mulf %107, %108 : vector<299x299xf32>
    %110 = arith.truncf %109 : vector<299x299xf32> to vector<299x299xbf16>
    %c7_72 = arith.constant 7 : index
    %c0_73 = arith.constant 0 : index
    %c0_74 = arith.constant 0 : index
    %111 = vector.load %arg4[%c7_72, %c0_73, %c0_74] : memref<8x299x299xbf16, #tpu.memory_space<vmem>>, vector<1x299x299xbf16>
    %112 = vector.shape_cast %111 : vector<1x299x299xbf16> to vector<299x299xbf16>
    %113 = vector.shape_cast %110 : vector<299x299xbf16> to vector<1x299x299xbf16>
    tpu.vector_store %arg4[%c7_72, %c0_73, %c0_74], %113 {strides = array<i32>} : memref<8x299x299xbf16, #tpu.memory_space<vmem>>, vector<1x299x299xbf16>,
    return
  }
  func.func @transform_0(%arg0: i32) -> (i32, i32) {
    %c0_i32 = arith.constant 0 : i32
    %c0_i32_0 = arith.constant 0 : i32
    %c0_i32_1 = arith.constant 0 : i32
    return %c0_i32, %c0_i32_0 : i32, i32
  }
  func.func @transform_1(%arg0: i32) -> (i32, i32) {
    %c0_i32 = arith.constant 0 : i32
    %c0_i32_0 = arith.constant 0 : i32
    %c0_i32_1 = arith.constant 0 : i32
    return %c0_i32, %c0_i32_0 : i32, i32
  }
  func.func @transform_2(%arg0: i32) -> (i32, i32, i32) {
    %c0_i32 = arith.constant 0 : i32
    %c0_i32_0 = arith.constant 0 : i32
    %c0_i32_1 = arith.constant 0 : i32
    return %arg0, %c0_i32, %c0_i32_0 : i32, i32, i32
  }
  func.func @transform_3(%arg0: i32) -> (i32, i32, i32) {
    %c0_i32 = arith.constant 0 : i32
    %c0_i32_0 = arith.constant 0 : i32
    %c0_i32_1 = arith.constant 0 : i32
    return %arg0, %c0_i32, %c0_i32_0 : i32, i32, i32
  }
}

</mosaic_0001>

<bundles_post_ra>
// kernel: _resize_and_normalize.1
= control target key start
LH: loop header
LB: loop body
LE: loop exit
PB: predicated region body
PF: predicated region fallthrough
CT: control target
= control target key end

     0   :  { %8 = vsyncpa [#allocation3], 0  ;;  %s16375_s12 = smov 0   ;;  %s19145_s0 = inlined_call_operand.vmem [shape: bf16[299,16], index: 0, kind: input, shape index: {}]   ;;  %s19146_s1 = inlined_call_operand.hbm [shape: bf16[16,299], index: 1, kind: input, shape index: {}]   ;;  %s19147_s2 = inlined_call_operand.vmem [shape: f32[16,16,16], index: 2, kind: input, shape index: {}]   ;;  %s19148_s3 = inlined_call_operand.vmem [shape: bf16[16,299,299], index: 3, kind: output, shape index: {}]  }
   0x1 LB: > { %s11380_s13 = sadd.s32 4294967295, %s16347_s12   ;;  %p11382_p0 = scmp.ge.s32.totalorder %s16347_s12, 1  ;;  %s16347_s12 = sphi %s16375_s12, %s14_s12  }
   0x2   : > { %p113_p1 = scmp.lt.s32.totalorder %s16347_s12, 3  ;;  %s16349_s14 = smov [#allocation2]  }
   0x3   : > { %s128_s15 = sshll.u32 %s16349_s14, 4  ;;  %p16389_p3 = scmp.eq.s32.totalorder %s11380_s13, 0  ;;  %s129_s15 = int_to_ptr.vmem [resolvable:$true] %s128_s15 }
   0x4   : > { %p16383_p2 = pnand %p11382_p0, %p113_p1  ;;  %s16309_s21 = scalar_lea.hbm %s19146_s1, 384 }
   0x5   : > { %s19153_s17 = scalar_select %p16389_p3, 1, 0 }
   0x6   : > { %s19152_s16 = scalar_select %p16383_p2, 1, 0 }
   0x7   : > { %p16134_p4 = pneg %p16383_p2  ;;  %p16310_p6 = scmp.ne.s32.totalorder %s19146_s1, %s16309_s21 }
   0x8   : > { %p16316_p10 = scmp.lt.u32.totalorder %s16309_s21, %s19146_s1 }
   0x9   : > { %p16397_p5 = pnand %p16389_p3, %p16134_p4 }
   0xb   : > { %p16311_p7 = pneg %p16397_p5 }
   0xd   : > { %p16312_p8 = pnand %p16311_p7, %p16310_p6 }
   0xf   : > { %p16313_p9 = pneg %p16312_p8 }
  0x11   : > { %p16318_p11 = pnand %p16316_p10, %p16313_p9 }
  0x13   : > { %16321 = shalt.err (!%p16318_p11)
}
  0x14   : > { %s16322_s26 = scalar_lea.vmem %s129_s15, 384  ;;  %p16330_p1 = scmp.lt.s32.totalorder %s129_s15, %s129_s15 }
  0x15   : > { %p16323_p12 = scmp.ne.s32.totalorder %s129_s15, %s16322_s26  ;;  %p16331_p4 = scmp.lt.s32.totalorder %s16322_s26, %s16322_s26 }
  0x17   : > { %p16325_p13 = pnand %p16323_p12, %p16311_p7  ;;  %p16332_p3 = por %p16331_p4, %p16330_p1 }
  0x19   : > { %p16326_p0 = pneg %p16325_p13 }
  0x1b   : > { %p16333_p2 = pnand %p16332_p3, %p16326_p0 }
  0x1d   : > { %16336 = shalt.err (!%p16333_p2)
}
  0x1e   : > { %s16350_s27 = smov 192   ;;  %s16351_s28 = smov 12  }
  0x1f   : > { %16137 = dma.hbm_to_vmem [thread:$0]  (!%p16397_p5), %s19146_s1, 384, %s129_s15, [#allocation3], %s16350_s27, %s16350_s27, %s16351_s28  }
  0x20   : > { %p19155_p6 = scmp.ne.s32.totalorder %s19152_s16, 0 }
  0x21   : > { %p19156_p8 = scmp.ne.s32.totalorder (!%p19155_p6), %s19153_s17, 0 }
  0x22   : > { %154 = sbr.rel (%p19155_p6) target bundleno = 3213 (0xc8d), region = 32 }
  0x29   : > { %16342 = dma.done.wait (%p19156_p8), [#allocation3], 384  }
  0x2a   : > { %16344 = vsyncadd (%p19156_p8), [#allocation3], 4294966912  ;;  %s11387_s4 = sshll.u32 %s11380_s13, 3  ;;  %v16352_v0 = vmov 0.0   ;;  %vm16353_vm0 = vmmov 0   ;;  %v16441_v4 = vld [vmem:[%s19145_s0] sm:$0xff]  }
  0x2b   : > { %14881 = vmatprep.subr.bf16.mxu0 %v16352_v0  ;;  %p181_p2 = scmp.lt.s32.totalorder %s11387_s4, 15  ;;  %14883 = vmatprep.mubr.msk.bf16.mxu0 %vm16353_vm0, %v16352_v0  ;;  %vm335_vm1 = vcmask 130048   ;;  %v16451_v5 = vld [vmem:[%s19145_s0 + $0x8] sm:$0xff]   ;;  %v16460_v6 = vld [vmem:[%s19145_s0 + $0x10] sm:$0xff]   ;;  %v16469_v7 = vld [vmem:[%s19145_s0 + $0x18] sm:$0xff]   ;;  %v16354_v19 = vmov 0  }
  0x2c   : > { %v16478_v8 = vld [vmem:[%s19145_s0 + $0x20] sm:$0xff]   ;;  %v16487_v9 = vld [vmem:[%s19145_s0 + $0x28] sm:$0xff]   ;;  %v16496_v10 = vld [vmem:[%s19145_s0 + $0x30] sm:$0xff]   ;;  %702 = vmatprep.mubr.bf16.mxu1 %v16354_v19  ;;  %vm1687_vm2 = vcmask 347136   ;;  %vm1761_vm3 = vcmask 1041408   ;;  %vm1764_vm5 = vcmask 1045508  }
  0x2d   : > { %s19164_s4 = smov (!%p181_p2, %s11387_s4), 15  ;;  %v16505_v11 = vld [vmem:[%s19145_s0 + $0x38] sm:$0xff]   ;;  %v16514_v12 = vld [vmem:[%s19145_s0 + $0x40] sm:$0xff]   ;;  %v16523_v13 = vld [vmem:[%s19145_s0 + $0x48] sm:$0xff]   ;;  %vm1762_vm4 = vsmask.f32 1280 }
  0x2e   : > { %s13952_s5 = sshll.u32 %s19164_s4, 4  ;;  %v16532_v14 = vld [vmem:[%s19145_s0 + $0x50] sm:$0xff]   ;;  %v16175_v16 = vld [vmem:[#allocation2] ss:$12 sps:$4 sm:$0xff]   ;;  %v16545_v18 = vld [vmem:[%s19145_s0 + $0x58] sm:$0xff]   ;;  %s16129_s24 = smul.u32 456, %s19164_s4 }
  0x2f   : > { %s16434_s8 = scalar_lea.vmem %s19147_s2, %s13952_s5  ;;  %v16538_v15 = vld [vmem:[#allocation2 + $0x4] ss:$12 sps:$4 sm:$0xff]   ;;  %v16540_v17 = vld [vmem:[#allocation2 + $0x8] ss:$12 sps:$4 sm:$0xff]   ;;  %v16586_v23 = vld [vmem:[%s19145_s0 + $0x78] sm:$0xff]   ;;  %vm1771_vm7 = vcmask 345088  }
  0x30   : > { %v237_v1 = vld [vmem:[%s16434_s8] sm:$0xff]  ;;  %v238_v2 = vld [vmem:[%s16434_s8 + $0x8] sm:$0xff]  ;;  %670 = vmatprep.subr.bf16.mxu1 %v16538_v15  ;;  %v16577_v22 = vld [vmem:[%s19145_s0 + $0x70] sm:$0xff]   ;;  %s16753_s27 = scalar_lea.vmem %s19148_s3, %s16129_s24  ;;  %vm1765_vm6 = vsmask.f32 5376 }
  0x31   : > { %v239_v3 = vpack.c.bf16 %v238_v2, %v237_v1  ;;  %671 = vmatpush1.bf16.msra.mxu1 %v16175_v16  ;;  %v16559_v20 = vld [vmem:[%s19145_s0 + $0x60] sm:$0xff]   ;;  %v16568_v21 = vld [vmem:[%s19145_s0 + $0x68] sm:$0xff]   ;;  %v16172_v26 = vld [vmem:[%s19145_s0 + $0x90] sm:$0x3f]  }
  0x32   : > { %15037 = vmatprep.subr.bf16.mxu1 %v16352_v0  ;;  %v16595_v24 = vld [vmem:[%s19145_s0 + $0x80] sm:$0xff]   ;;  %v16604_v25 = vld [vmem:[%s19145_s0 + $0x88] sm:$0xff]   ;;  %v11661_v27 = vld [vmem:[%s16434_s8 + $0x10] sm:$0xff] }
  0x33   : > { %14882 = vmatpush3.bf16.msra.mxu0 %v239_v3  ;;  %v11662_v28 = vld [vmem:[%s16434_s8 + $0x18] sm:$0xff]  ;;  %vm16911_vm8 = vmand %vm1761_vm3, %vm1762_vm4 }
  0x34   : > { %14959 = vmatprep.subr.bf16.mxu0 %v16352_v0  ;;  %v1779_v32 = vpack.c.bf16 %v11662_v28, %v11661_v27  ;;  %vm1766_vm9 = vmand %vm1764_vm5, %vm1765_vm6 }
  0x35   : > { %vm16919_vm10 = vmand %vm1771_vm7, %vm1762_vm4 }
  0x36   : > { %14884 = vmatmul.mubr.msk.bf16.vlgmr.msra.gmra.mrb[0].mxu0 %vm335_vm1, %v16441_v4  ;;  %vm16929_vm11 = vmor %vm1766_vm9, %vm16911_vm8 }
  0x37   : > { %14887 = vmatprep.mubr.msk.bf16.mxu0 %vm16353_vm0, %v16352_v0  ;;  %14960 = vmatpush3.bf16.msra.mxu0 %v16540_v17 }
  0x38   : > { %2041 = vmatprep.subr.bf16.mxu0 %v16538_v15 }
  0x3e   : > { %14888 = vmatmul.mubr.msk.bf16.gmra.mrb[4].mxu0 %vm335_vm1, %v16451_v5 }
  0x3f   : > { %14891 = vmatprep.mubr.msk.bf16.mxu0 %vm16353_vm0, %v16352_v0 }
  0x46   : > { %14892 = vmatmul.mubr.msk.bf16.gmra.mrb[8].mxu0 %vm335_vm1, %v16460_v6 }
  0x47   : > { %14895 = vmatprep.mubr.msk.bf16.mxu0 %vm16353_vm0, %v16352_v0 }
  0x4e   : > { %14896 = vmatmul.mubr.msk.bf16.gmra.mrb[12].mxu0 %vm335_vm1, %v16469_v7 }
  0x4f   : > { %14899 = vmatprep.mubr.msk.bf16.mxu0 %vm16353_vm0, %v16352_v0 }
  0x56   : > { %14900 = vmatmul.mubr.msk.bf16.gmra.mrb[16].mxu0 %vm335_vm1, %v16478_v8 }
  0x57   : > { %14903 = vmatprep.mubr.msk.bf16.mxu0 %vm16353_vm0, %v16352_v0 }
  0x5e   : > { %14904 = vmatmul.mubr.msk.bf16.gmra.mrb[20].mxu0 %vm335_vm1, %v16487_v9 }
  0x5f   : > { %14907 = vmatprep.mubr.msk.bf16.mxu0 %vm16353_vm0, %v16352_v0 }
  0x66   : > { %14908 = vmatmul.mubr.msk.bf16.gmra.mrb[24].mxu0 %vm335_vm1, %v16496_v10 }
  0x67   : > { %14911 = vmatprep.mubr.msk.bf16.mxu0 %vm16353_vm0, %v16352_v0 }
  0x6e   : > { %14912 = vmatmul.mubr.msk.bf16.gmra.mrb[28].mxu0 %vm335_vm1, %v16505_v11 }
  0x6f   : > { %14915 = vmatprep.mubr.msk.bf16.mxu0 %vm16353_vm0, %v16352_v0 }
  0x76   : > { %14916 = vmatmul.mubr.msk.bf16.gmra.mrb[32].mxu0 %vm335_vm1, %v16514_v12 }
  0x77   : > { %14919 = vmatprep.mubr.msk.bf16.mxu0 %vm16353_vm0, %v16352_v0 }
  0x7e   : > { %14920 = vmatmul.mubr.msk.bf16.gmra.mrb[36].mxu0 %vm335_vm1, %v16523_v13 }
  0x7f   : > { %14923 = vmatprep.mubr.msk.bf16.mxu0 %vm16353_vm0, %v16352_v0 }
  0x86   : > { %14924 = vmatmul.mubr.msk.bf16.gmra.mrb[40].mxu0 %vm335_vm1, %v16532_v14 }
  0x87   : > { %14927 = vmatprep.mubr.msk.bf16.mxu0 %vm16353_vm0, %v16352_v0 }
  0x8e   : > { %14928 = vmatmul.mubr.msk.bf16.gmra.mrb[44].mxu0 %vm335_vm1, %v16545_v18 }
  0x8f   : > { %14931 = vmatprep.mubr.msk.bf16.mxu0 %vm16353_vm0, %v16352_v0 }
  0x96   : > { %14932 = vmatmul.mubr.msk.bf16.gmra.mrb[48].mxu0 %vm335_vm1, %v16559_v20 }
  0x97   : > { %14935 = vmatprep.mubr.msk.bf16.mxu0 %vm16353_vm0, %v16352_v0 }
  0x9e   : > { %14936 = vmatmul.mubr.msk.bf16.gmra.mrb[52].mxu0 %vm335_vm1, %v16568_v21 }
  0x9f   : > { %14939 = vmatprep.mubr.msk.bf16.mxu0 %vm16353_vm0, %v16352_v0 }
  0xa6   : > { %14940 = vmatmul.mubr.msk.bf16.gmra.mrb[56].mxu0 %vm335_vm1, %v16577_v22 }
  0xa7   : > { %14943 = vmatprep.mubr.msk.bf16.mxu0 %vm16353_vm0, %v16352_v0 }
  0xae   : > { %14944 = vmatmul.mubr.msk.bf16.gmra.mrb[60].mxu0 %vm335_vm1, %v16586_v23 }
  0xaf   : > { %14947 = vmatprep.mubr.msk.bf16.mxu0 %vm16353_vm0, %v16352_v0 }
  0xb6   : > { %14948 = vmatmul.mubr.msk.bf16.gmra.mrb[64].mxu0 %vm335_vm1, %v16595_v24 }
  0xb7   : > { %14951 = vmatprep.mubr.msk.bf16.mxu0 %vm16353_vm0, %v16352_v0 }
  0xbe   : > { %14952 = vmatmul.mubr.msk.bf16.gmra.mrb[68].mxu0 %vm335_vm1, %v16604_v25 }
  0xbf   : > { %14955 = vmatprep.mubr.msk.bf16.mxu0 %vm16353_vm0, %v16352_v0 }
  0xc6   : > { %14956 = vmatmul.mubr.msk.bf16.gmra.mrb[72].mxu0 %vm335_vm1, %v16172_v26 }
  0xc7   : > { %14961 = vmatprep.mubr.msk.bf16.mxu0 %vm16353_vm0, %v16352_v0 }
 0x109   : > { %v427_v29 = vpop.f32.mrb[0].mxu0 }
 0x10a   : > { %v14885_v30 = vpop.f32.mrb[1].mxu0 }
 0x10b   : > { %v430_v31 = vpop.f32.mrb[2].mxu0 }
 0x10c   : > { %v578_v33 = vpack.c.bf16 %v430_v31, %v427_v29  ;;  %v14886_v34 = vpop.f32.mrb[3].mxu0 }
 0x10e   : > { %11433 = vmatmul.mubr.msk.bf16.vlgmr.msra.gmra.mrb[0].mxu1 %vm335_vm1, %v578_v33  ;;  %14962 = vmatmul.mubr.msk.bf16.vlgmr.msra.gmra.mrb[76].mxu0 %vm335_vm1, %v578_v33 }
 0x10f   : > { %15038 = vmatpush3.bf16.msra.mxu1 %v1779_v32  ;;  %712 = vmatprep.mubr.bf16.mxu1 %v16354_v19 }
 0x110   : > { %14965 = vmatprep.mubr.msk.bf16.mxu0 %vm16353_vm0, %v16352_v0  ;;  %2042 = vmatpush1.bf16.msra.mxu0 %v16175_v16 }
 0x111   : > { %v435_v35 = vpop.f32.mrb[4].mxu0  ;;  %15115 = vmatprep.subr.bf16.mxu1 %v16352_v0  ;;  %15193 = vmatprep.subr.bf16.mxu0 %v16352_v0 }
 0x112   : > { %v14889_v36 = vpop.f32.mrb[5].mxu0 }
 0x113   : > { %v438_v37 = vpop.f32.mrb[6].mxu0 }
 0x114   : > { %v579_v38 = vpack.c.bf16 %v438_v37, %v435_v35  ;;  %v14890_v39 = vpop.f32.mrb[7].mxu0 }
 0x116   : > { %11434 = vmatmul.mubr.msk.bf16.gmra.mrb[4].mxu1 %vm335_vm1, %v579_v38  ;;  %14966 = vmatmul.mubr.msk.bf16.gmra.mrb[80].mxu0 %vm335_vm1, %v579_v38 }
 0x117   : > { %722 = vmatprep.mubr.bf16.mxu1 %v16354_v19  ;;  %14969 = vmatprep.mubr.msk.bf16.mxu0 %vm16353_vm0, %v16352_v0 }
 0x119   : > { %v443_v40 = vpop.f32.mrb[8].mxu0 }
 0x11a   : > { %v14893_v41 = vpop.f32.mrb[9].mxu0 }
 0x11b   : > { %v446_v42 = vpop.f32.mrb[10].mxu0 }
 0x11c   : > { %v580_v43 = vpack.c.bf16 %v446_v42, %v443_v40  ;;  %v14894_v44 = vpop.f32.mrb[11].mxu0 }
 0x11e   : > { %11435 = vmatmul.mubr.msk.bf16.gmra.mrb[8].mxu1 %vm335_vm1, %v580_v43  ;;  %14970 = vmatmul.mubr.msk.bf16.gmra.mrb[84].mxu0 %vm335_vm1, %v580_v43 }
 0x11f   : > { %732 = vmatprep.mubr.bf16.mxu1 %v16354_v19  ;;  %14973 = vmatprep.mubr.msk.bf16.mxu0 %vm16353_vm0, %v16352_v0 }
 0x121   : > { %v451_v45 = vpop.f32.mrb[12].mxu0 }
 0x122   : > { %v14897_v46 = vpop.f32.mrb[13].mxu0 }
 0x123   : > { %v454_v47 = vpop.f32.mrb[14].mxu0 }
 0x124   : > { %v581_v48 = vpack.c.bf16 %v454_v47, %v451_v45  ;;  %v14898_v49 = vpop.f32.mrb[15].mxu0 }
 0x126   : > { %11436 = vmatmul.mubr.msk.bf16.gmra.mrb[12].mxu1 %vm335_vm1, %v581_v48  ;;  %14974 = vmatmul.mubr.msk.bf16.gmra.mrb[88].mxu0 %vm335_vm1, %v581_v48 }
 0x127   : > { %742 = vmatprep.mubr.bf16.mxu1 %v16354_v19  ;;  %14977 = vmatprep.mubr.msk.bf16.mxu0 %vm16353_vm0, %v16352_v0 }
 0x129   : > { %v459_v50 = vpop.f32.mrb[16].mxu0 }
 0x12a   : > { %v14901_v51 = vpop.f32.mrb[17].mxu0 }
 0x12b   : > { %v462_v52 = vpop.f32.mrb[18].mxu0 }
 0x12c   : > { %v582_v53 = vpack.c.bf16 %v462_v52, %v459_v50  ;;  %v14902_v54 = vpop.f32.mrb[19].mxu0 }
 0x12e   : > { %11437 = vmatmul.mubr.msk.bf16.gmra.mrb[16].mxu1 %vm335_vm1, %v582_v53  ;;  %14978 = vmatmul.mubr.msk.bf16.gmra.mrb[92].mxu0 %vm335_vm1, %v582_v53 }
 0x12f   : > { %752 = vmatprep.mubr.bf16.mxu1 %v16354_v19  ;;  %14981 = vmatprep.mubr.msk.bf16.mxu0 %vm16353_vm0, %v16352_v0 }
 0x131   : > { %v467_v55 = vpop.f32.mrb[20].mxu0 }
 0x132   : > { %v14905_v56 = vpop.f32.mrb[21].mxu0 }
 0x133   : > { %v470_v57 = vpop.f32.mrb[22].mxu0 }
 0x134   : > { %v583_v58 = vpack.c.bf16 %v470_v57, %v467_v55  ;;  %v14906_v59 = vpop.f32.mrb[23].mxu0 }
 0x136   : > { %11438 = vmatmul.mubr.msk.bf16.gmra.mrb[20].mxu1 %vm335_vm1, %v583_v58  ;;  %14982 = vmatmul.mubr.msk.bf16.gmra.mrb[96].mxu0 %vm335_vm1, %v583_v58 }
 0x137   : > { %762 = vmatprep.mubr.bf16.mxu1 %v16354_v19  ;;  %14985 = vmatprep.mubr.msk.bf16.mxu0 %vm16353_vm0, %v16352_v0 }
 0x139   : > { %v475_v60 = vpop.f32.mrb[24].mxu0 }
 0x13a   : > { %v14909_v61 = vpop.f32.mrb[25].mxu0 }
 0x13b   : > { %v478_v62 = vpop.f32.mrb[26].mxu0 }
 0x13c   : > { %v584_v63 = vpack.c.bf16 %v478_v62, %v475_v60  ;;  %v14910_v1 = vpop.f32.mrb[27].mxu0 }
 0x13e   : > { %11439 = vmatmul.mubr.msk.bf16.gmra.mrb[24].mxu1 %vm335_vm1, %v584_v63  ;;  %14986 = vmatmul.mubr.msk.bf16.gmra.mrb[100].mxu0 %vm335_vm1, %v584_v63 }
 0x13f   : > { %772 = vmatprep.mubr.bf16.mxu1 %v16354_v19  ;;  %14989 = vmatprep.mubr.msk.bf16.mxu0 %vm16353_vm0, %v16352_v0 }
 0x141   : > { %v483_v2 = vpop.f32.mrb[28].mxu0 }
 0x142   : > { %v14913_v3 = vpop.f32.mrb[29].mxu0 }
 0x143   : > { %v486_v16 = vpop.f32.mrb[30].mxu0 }
 0x144   : > { %v585_v26 = vpack.c.bf16 %v486_v16, %v483_v2  ;;  %v14914_v27 = vpop.f32.mrb[31].mxu0 }
 0x146   : > { %11440 = vmatmul.mubr.msk.bf16.gmra.mrb[28].mxu1 %vm335_vm1, %v585_v26  ;;  %14990 = vmatmul.mubr.msk.bf16.gmra.mrb[104].mxu0 %vm335_vm1, %v585_v26 }
 0x147   : > { %782 = vmatprep.mubr.bf16.mxu1 %v16354_v19  ;;  %14993 = vmatprep.mubr.msk.bf16.mxu0 %vm16353_vm0, %v16352_v0 }
 0x149   : > { %v491_v28 = vpop.f32.mrb[32].mxu0 }
 0x14a   : > { %v14917_v29 = vpop.f32.mrb[33].mxu0 }
 0x14b   : > { %v494_v30 = vpop.f32.mrb[34].mxu0 }
 0x14c   : > { %v586_v31 = vpack.c.bf16 %v494_v30, %v491_v28  ;;  %v14918_v32 = vpop.f32.mrb[35].mxu0 }
 0x14e   : > { %11441 = vmatmul.mubr.msk.bf16.gmra.mrb[32].mxu1 %vm335_vm1, %v586_v31  ;;  %14994 = vmatmul.mubr.msk.bf16.gmra.mrb[108].mxu0 %vm335_vm1, %v586_v31 }
 0x14f   : > { %792 = vmatprep.mubr.bf16.mxu1 %v16354_v19  ;;  %14997 = vmatprep.mubr.msk.bf16.mxu0 %vm16353_vm0, %v16352_v0 }
 0x151   : > { %v499_v33 = vpop.f32.mrb[36].mxu0 }
 0x152   : > { %v14921_v34 = vpop.f32.mrb[37].mxu0 }
 0x153   : > { %v502_v35 = vpop.f32.mrb[38].mxu0 }
 0x154   : > { %v587_v36 = vpack.c.bf16 %v502_v35, %v499_v33  ;;  %v14922_v37 = vpop.f32.mrb[39].mxu0 }
 0x156   : > { %11442 = vmatmul.mubr.msk.bf16.gmra.mrb[36].mxu1 %vm335_vm1, %v587_v36  ;;  %14998 = vmatmul.mubr.msk.bf16.gmra.mrb[112].mxu0 %vm335_vm1, %v587_v36 }
 0x157   : > { %802 = vmatprep.mubr.bf16.mxu1 %v16354_v19  ;;  %15001 = vmatprep.mubr.msk.bf16.mxu0 %vm16353_vm0, %v16352_v0 }
 0x159   : > { %v507_v38 = vpop.f32.mrb[40].mxu0 }
 0x15a   : > { %v14925_v39 = vpop.f32.mrb[41].mxu0 }
 0x15b   : > { %v510_v40 = vpop.f32.mrb[42].mxu0 }
 0x15c   : > { %v588_v41 = vpack.c.bf16 %v510_v40, %v507_v38  ;;  %v14926_v42 = vpop.f32.mrb[43].mxu0 }
 0x15e   : > { %11443 = vmatmul.mubr.msk.bf16.gmra.mrb[40].mxu1 %vm335_vm1, %v588_v41  ;;  %15002 = vmatmul.mubr.msk.bf16.gmra.mrb[116].mxu0 %vm335_vm1, %v588_v41 }
 0x15f   : > { %812 = vmatprep.mubr.bf16.mxu1 %v16354_v19  ;;  %15005 = vmatprep.mubr.msk.bf16.mxu0 %vm16353_vm0, %v16352_v0 }
 0x161   : > { %v515_v43 = vpop.f32.mrb[44].mxu0 }
 0x162   : > { %v14929_v44 = vpop.f32.mrb[45].mxu0 }
 0x163   : > { %v518_v45 = vpop.f32.mrb[46].mxu0 }
 0x164   : > { %v589_v46 = vpack.c.bf16 %v518_v45, %v515_v43  ;;  %v14930_v47 = vpop.f32.mrb[47].mxu0 }
 0x166   : > { %11444 = vmatmul.mubr.msk.bf16.gmra.mrb[44].mxu1 %vm335_vm1, %v589_v46  ;;  %15006 = vmatmul.mubr.msk.bf16.gmra.mrb[120].mxu0 %vm335_vm1, %v589_v46 }
 0x167   : > { %822 = vmatprep.mubr.bf16.mxu1 %v16354_v19  ;;  %15009 = vmatprep.mubr.msk.bf16.mxu0 %vm16353_vm0, %v16352_v0 }
 0x169   : > { %v523_v48 = vpop.f32.mrb[48].mxu0 }
 0x16a   : > { %v14933_v49 = vpop.f32.mrb[49].mxu0 }
 0x16b   : > { %v526_v50 = vpop.f32.mrb[50].mxu0 }
 0x16c   : > { %v590_v51 = vpack.c.bf16 %v526_v50, %v523_v48  ;;  %v14934_v52 = vpop.f32.mrb[51].mxu0 }
 0x16e   : > { %11445 = vmatmul.mubr.msk.bf16.gmra.mrb[48].mxu1 %vm335_vm1, %v590_v51  ;;  %15010 = vmatmul.mubr.msk.bf16.gmra.mrb[124].mxu0 %vm335_vm1, %v590_v51 }
 0x16f   : > { %832 = vmatprep.mubr.bf16.mxu1 %v16354_v19  ;;  %15013 = vmatprep.mubr.msk.bf16.mxu0 %vm16353_vm0, %v16352_v0 }
 0x171   : > { %v531_v53 = vpop.f32.mrb[52].mxu0 }
 0x172   : > { %v14937_v54 = vpop.f32.mrb[53].mxu0 }
 0x173   : > { %v534_v55 = vpop.f32.mrb[54].mxu0 }
 0x174   : > { %v591_v56 = vpack.c.bf16 %v534_v55, %v531_v53  ;;  %v14938_v57 = vpop.f32.mrb[55].mxu0 }
 0x176   : > { %11446 = vmatmul.mubr.msk.bf16.gmra.mrb[52].mxu1 %vm335_vm1, %v591_v56  ;;  %15014 = vmatmul.mubr.msk.bf16.gmra.mrb[128].mxu0 %vm335_vm1, %v591_v56 }
 0x177   : > { %842 = vmatprep.mubr.bf16.mxu1 %v16354_v19  ;;  %15017 = vmatprep.mubr.msk.bf16.mxu0 %vm16353_vm0, %v16352_v0 }
 0x179   : > { %v539_v58 = vpop.f32.mrb[56].mxu0 }
 0x17a   : > { %v14941_v59 = vpop.f32.mrb[57].mxu0 }
 0x17b   : > { %v542_v60 = vpop.f32.mrb[58].mxu0 }
 0x17c   : > { %v592_v61 = vpack.c.bf16 %v542_v60, %v539_v58  ;;  %v14942_v62 = vpop.f32.mrb[59].mxu0 }
 0x17e   : > { %11447 = vmatmul.mubr.msk.bf16.gmra.mrb[56].mxu1 %vm335_vm1, %v592_v61  ;;  %15018 = vmatmul.mubr.msk.bf16.gmra.mrb[132].mxu0 %vm335_vm1, %v592_v61 }
 0x17f   : > { %852 = vmatprep.mubr.bf16.mxu1 %v16354_v19  ;;  %15021 = vmatprep.mubr.msk.bf16.mxu0 %vm16353_vm0, %v16352_v0 }
 0x181   : > { %v547_v63 = vpop.f32.mrb[60].mxu0 }
 0x182   : > { %v14945_v1 = vpop.f32.mrb[61].mxu0 }
 0x183   : > { %v550_v2 = vpop.f32.mrb[62].mxu0 }
 0x184   : > { %v593_v3 = vpack.c.bf16 %v550_v2, %v547_v63  ;;  %v14946_v16 = vpop.f32.mrb[63].mxu0 }
 0x186   : > { %11448 = vmatmul.mubr.msk.bf16.gmra.mrb[60].mxu1 %vm335_vm1, %v593_v3  ;;  %15022 = vmatmul.mubr.msk.bf16.gmra.mrb[136].mxu0 %vm335_vm1, %v593_v3 }
 0x187   : > { %862 = vmatprep.mubr.bf16.mxu1 %v16354_v19  ;;  %15025 = vmatprep.mubr.msk.bf16.mxu0 %vm16353_vm0, %v16352_v0 }
 0x189   : > { %v555_v26 = vpop.f32.mrb[64].mxu0 }
 0x18a   : > { %v14949_v27 = vpop.f32.mrb[65].mxu0 }
 0x18b   : > { %v558_v28 = vpop.f32.mrb[66].mxu0 }
 0x18c   : > { %v594_v29 = vpack.c.bf16 %v558_v28, %v555_v26  ;;  %v14950_v30 = vpop.f32.mrb[67].mxu0 }
 0x18e   : > { %11449 = vmatmul.mubr.msk.bf16.gmra.mrb[64].mxu1 %vm335_vm1, %v594_v29  ;;  %15026 = vmatmul.mubr.msk.bf16.gmra.mrb[140].mxu0 %vm335_vm1, %v594_v29 }
 0x18f   : > { %872 = vmatprep.mubr.bf16.mxu1 %v16354_v19  ;;  %15029 = vmatprep.mubr.msk.bf16.mxu0 %vm16353_vm0, %v16352_v0 }
 0x191   : > { %v563_v31 = vpop.f32.mrb[68].mxu0 }
 0x192   : > { %v14953_v32 = vpop.f32.mrb[69].mxu0 }
 0x193   : > { %v566_v33 = vpop.f32.mrb[70].mxu0 }
 0x194   : > { %v595_v34 = vpack.c.bf16 %v566_v33, %v563_v31  ;;  %v14954_v35 = vpop.f32.mrb[71].mxu0 }
 0x196   : > { %11450 = vmatmul.mubr.msk.bf16.gmra.mrb[68].mxu1 %vm335_vm1, %v595_v34  ;;  %15030 = vmatmul.mubr.msk.bf16.gmra.mrb[144].mxu0 %vm335_vm1, %v595_v34 }
 0x197   : > { %882 = vmatprep.mubr.bf16.mxu1 %v16354_v19  ;;  %15033 = vmatprep.mubr.msk.bf16.mxu0 %vm16353_vm0, %v16352_v0 }
 0x199   : > { %v571_v36 = vpop.f32.mrb[72].mxu0 }
 0x19a   : > { %v14957_v37 = vpop.f32.mrb[73].mxu0 }
 0x19b   : > { %v574_v38 = vpop.f32.mrb[74].mxu0 }
 0x19c   : > { %v596_v39 = vpack.c.bf16 %v574_v38, %v571_v36  ;;  %v14958_v40 = vpop.f32.mrb[75].mxu0 }
 0x19e   : > { %11451 = vmatmul.mubr.msk.bf16.gmra.mrb[72].mxu1 %vm335_vm1, %v596_v39  ;;  %15034 = vmatmul.mubr.msk.bf16.gmra.mrb[148].mxu0 %vm335_vm1, %v596_v39 }
 0x19f   : > { %15039 = vmatprep.mubr.msk.bf16.mxu1 %vm16353_vm0, %v16352_v0  ;;  %2073 = vmatprep.mubr.bf16.mxu0 %v16354_v19 }
 0x1a6   : > { %15040 = vmatmul.mubr.msk.bf16.vlgmr.msra.gmra.mrb[76].mxu1 %vm335_vm1, %v16441_v4 }
 0x1a7   : > { %15043 = vmatprep.mubr.msk.bf16.mxu1 %vm16353_vm0, %v16352_v0  ;;  %15116 = vmatpush3.bf16.msra.mxu1 %v16540_v17 }
 0x1a8   : > { %3403 = vmatprep.subr.bf16.mxu1 %v16538_v15 }
 0x1ae   : > { %15044 = vmatmul.mubr.msk.bf16.gmra.mrb[80].mxu1 %vm335_vm1, %v16451_v5 }
 0x1af   : > { %15047 = vmatprep.mubr.msk.bf16.mxu1 %vm16353_vm0, %v16352_v0 }
 0x1b6   : > { %15048 = vmatmul.mubr.msk.bf16.gmra.mrb[84].mxu1 %vm335_vm1, %v16460_v6 }
 0x1b7   : > { %15051 = vmatprep.mubr.msk.bf16.mxu1 %vm16353_vm0, %v16352_v0 }
 0x1be   : > { %15052 = vmatmul.mubr.msk.bf16.gmra.mrb[88].mxu1 %vm335_vm1, %v16469_v7 }
 0x1bf   : > { %15055 = vmatprep.mubr.msk.bf16.mxu1 %vm16353_vm0, %v16352_v0 }
 0x1c6   : > { %15056 = vmatmul.mubr.msk.bf16.gmra.mrb[92].mxu1 %vm335_vm1, %v16478_v8 }
 0x1c7   : > { %15059 = vmatprep.mubr.msk.bf16.mxu1 %vm16353_vm0, %v16352_v0 }
 0x1ce   : > { %15060 = vmatmul.mubr.msk.bf16.gmra.mrb[96].mxu1 %vm335_vm1, %v16487_v9 }
 0x1cf   : > { %15063 = vmatprep.mubr.msk.bf16.mxu1 %vm16353_vm0, %v16352_v0 }
 0x1d6   : > { %15064 = vmatmul.mubr.msk.bf16.gmra.mrb[100].mxu1 %vm335_vm1, %v16496_v10 }
 0x1d7   : > { %15067 = vmatprep.mubr.msk.bf16.mxu1 %vm16353_vm0, %v16352_v0 }
 0x1de   : > { %15068 = vmatmul.mubr.msk.bf16.gmra.mrb[104].mxu1 %vm335_vm1, %v16505_v11 }
 0x1df   : > { %15071 = vmatprep.mubr.msk.bf16.mxu1 %vm16353_vm0, %v16352_v0 }
 0x1e1   : > { %v704_v4 = vpop.f32.mrb[0].mxu1  ;;  %v927_v5 = vpop.f32.mrb[76].mxu0 }
 0x1e2   : > { %v11471_v6 = vadd.f32 -0.5, %v704_v4  ;;  %v11473_v7 = vadd.f32 -0.5, %v927_v5  ;;  %v706_v8 = vpop.f32.mrb[1].mxu1  ;;  %v14963_v9 = vpop.f32.mrb[77].mxu0 }
 0x1e3   : > { %v11472_v15 = vadd.f32 -0.5, %v706_v8  ;;  %v708_v17 = vpop.f32.mrb[2].mxu1  ;;  %v930_v41 = vpop.f32.mrb[78].mxu0 }
 0x1e4   : > { %v1192_v10 = vmul.f32 2.0, %v11471_v6  ;;  %v1194_v42 = vmul.f32 2.0, %v11473_v7  ;;  %v11474_v43 = vadd.f32 -0.5, %v708_v17  ;;  %v11476_v44 = vadd.f32 -0.5, %v930_v41  ;;  %v710_v45 = vpop.f32.mrb[3].mxu1  ;;  %v14964_v46 = vpop.f32.mrb[79].mxu0 }
 0x1e5   : > { %v1193_v11 = vmul.f32 2.0, %v11472_v15  ;;  %v11475_v47 = vadd.f32 -0.5, %v710_v45 }
 0x1e6   : > { %v13954_v48 = vpack.c.bf16 %v1194_v42, %v1194_v42  ;;  %v1195_v49 = vmul.f32 2.0, %v11474_v43  ;;  %v1197_v50 = vmul.f32 2.0, %v11476_v44  ;;  %15072 = vmatmul.mubr.msk.bf16.gmra.mrb[108].mxu1 %vm335_vm1, %v16514_v12 }
 0x1e7   : > { %v13953_v51 = vpack.c.bf16 %v1193_v11, %v1192_v10  ;;  %v1196_v52 = vmul.f32 2.0, %v11475_v47  ;;  %15075 = vmatprep.mubr.msk.bf16.mxu1 %vm16353_vm0, %v16352_v0 }
 0x1e8   : > { %1688 = vst.msk [vmem:[%s16753_s27 + $0x8] sm:$0xf] %vm1687_vm2, %v13954_v48  ;;  %v13956_v53 = vpack.c.bf16 %v1197_v50, %v1197_v50 }
 0x1e9   : > { %1686 = vst [vmem:[%s16753_s27] sm:$0xff] %v13953_v51  ;;  %v13955_v54 = vpack.c.bf16 %v1196_v52, %v1195_v49  ;;  %v714_v55 = vpop.f32.mrb[4].mxu1  ;;  %v935_v56 = vpop.f32.mrb[80].mxu0 }
 0x1ea   : > { %1690 = vst.msk [vmem:[%s16753_s27 + $0x14] sm:$0xf] %vm1687_vm2, %v13956_v53  ;;  %v11477_v57 = vadd.f32 -0.5, %v714_v55  ;;  %v11479_v58 = vadd.f32 -0.5, %v935_v56  ;;  %v716_v59 = vpop.f32.mrb[5].mxu1  ;;  %v14967_v60 = vpop.f32.mrb[81].mxu0 }
 0x1eb   : > { %1689 = vst [vmem:[%s16753_s27 + $0xc] sm:$0xff] %v13955_v54  ;;  %v11478_v12 = vadd.f32 -0.5, %v716_v59  ;;  %v718_v61 = vpop.f32.mrb[6].mxu1  ;;  %v938_v62 = vpop.f32.mrb[82].mxu0 }
 0x1ec   : > { %v1198_v63 = vmul.f32 2.0, %v11477_v57  ;;  %v1200_v1 = vmul.f32 2.0, %v11479_v58  ;;  %v11480_v2 = vadd.f32 -0.5, %v718_v61  ;;  %v11482_v3 = vadd.f32 -0.5, %v938_v62  ;;  %v720_v16 = vpop.f32.mrb[7].mxu1  ;;  %v14968_v26 = vpop.f32.mrb[83].mxu0 }
 0x1ed   : > { %v1199_v27 = vmul.f32 2.0, %v11478_v12  ;;  %v11481_v28 = vadd.f32 -0.5, %v720_v16 }
 0x1ee   : > { %v13958_v29 = vpack.c.bf16 %v1200_v1, %v1200_v1  ;;  %v1201_v30 = vmul.f32 2.0, %v11480_v2  ;;  %v1203_v31 = vmul.f32 2.0, %v11482_v3  ;;  %15076 = vmatmul.mubr.msk.bf16.gmra.mrb[112].mxu1 %vm335_vm1, %v16523_v13 }
 0x1ef   : > { %v13957_v32 = vpack.c.bf16 %v1199_v27, %v1198_v63  ;;  %v1202_v33 = vmul.f32 2.0, %v11481_v28  ;;  %15079 = vmatprep.mubr.msk.bf16.mxu1 %vm16353_vm0, %v16352_v0 }
 0x1f0   : > { %1692 = vst.msk [vmem:[%s16753_s27 + $0x20] sm:$0xf] %vm1687_vm2, %v13958_v29  ;;  %v13960_v34 = vpack.c.bf16 %v1203_v31, %v1203_v31 }
 0x1f1   : > { %1691 = vst [vmem:[%s16753_s27 + $0x18] sm:$0xff] %v13957_v32  ;;  %v13959_v35 = vpack.c.bf16 %v1202_v33, %v1201_v30  ;;  %v724_v36 = vpop.f32.mrb[8].mxu1  ;;  %v943_v37 = vpop.f32.mrb[84].mxu0 }
 0x1f2   : > { %1694 = vst.msk [vmem:[%s16753_s27 + $0x2c] sm:$0xf] %vm1687_vm2, %v13960_v34  ;;  %v11483_v38 = vadd.f32 -0.5, %v724_v36  ;;  %v11485_v39 = vadd.f32 -0.5, %v943_v37  ;;  %v726_v40 = vpop.f32.mrb[9].mxu1  ;;  %v14971_v4 = vpop.f32.mrb[85].mxu0 }
 0x1f3   : > { %1693 = vst [vmem:[%s16753_s27 + $0x24] sm:$0xff] %v13959_v35  ;;  %v11484_v13 = vadd.f32 -0.5, %v726_v40  ;;  %v728_v5 = vpop.f32.mrb[10].mxu1  ;;  %v946_v6 = vpop.f32.mrb[86].mxu0 }
 0x1f4   : > { %v1204_v7 = vmul.f32 2.0, %v11483_v38  ;;  %v1206_v8 = vmul.f32 2.0, %v11485_v39  ;;  %v11486_v9 = vadd.f32 -0.5, %v728_v5  ;;  %v11488_v15 = vadd.f32 -0.5, %v946_v6  ;;  %v730_v17 = vpop.f32.mrb[11].mxu1  ;;  %v14972_v41 = vpop.f32.mrb[87].mxu0 }
 0x1f5   : > { %v1205_v10 = vmul.f32 2.0, %v11484_v13  ;;  %v11487_v42 = vadd.f32 -0.5, %v730_v17 }
 0x1f6   : > { %v13962_v43 = vpack.c.bf16 %v1206_v8, %v1206_v8  ;;  %v1207_v44 = vmul.f32 2.0, %v11486_v9  ;;  %v1209_v45 = vmul.f32 2.0, %v11488_v15  ;;  %15080 = vmatmul.mubr.msk.bf16.gmra.mrb[116].mxu1 %vm335_vm1, %v16532_v14 }
 0x1f7   : > { %v13961_v46 = vpack.c.bf16 %v1205_v10, %v1204_v7  ;;  %v1208_v11 = vmul.f32 2.0, %v11487_v42  ;;  %15083 = vmatprep.mubr.msk.bf16.mxu1 %vm16353_vm0, %v16352_v0 }
 0x1f8   : > { %1696 = vst.msk [vmem:[%s16753_s27 + $0x38] sm:$0xf] %vm1687_vm2, %v13962_v43  ;;  %v13964_v47 = vpack.c.bf16 %v1209_v45, %v1209_v45 }
 0x1f9   : > { %1695 = vst [vmem:[%s16753_s27 + $0x30] sm:$0xff] %v13961_v46  ;;  %v13963_v48 = vpack.c.bf16 %v1208_v11, %v1207_v44  ;;  %v734_v49 = vpop.f32.mrb[12].mxu1  ;;  %v951_v50 = vpop.f32.mrb[88].mxu0 }
 0x1fa   : > { %1698 = vst.msk [vmem:[%s16753_s27 + $0x44] sm:$0xf] %vm1687_vm2, %v13964_v47  ;;  %v11489_v51 = vadd.f32 -0.5, %v734_v49  ;;  %v11491_v52 = vadd.f32 -0.5, %v951_v50  ;;  %v736_v53 = vpop.f32.mrb[13].mxu1  ;;  %v14975_v54 = vpop.f32.mrb[89].mxu0 }
 0x1fb   : > { %1697 = vst [vmem:[%s16753_s27 + $0x3c] sm:$0xff] %v13963_v48  ;;  %v11490_v14 = vadd.f32 -0.5, %v736_v53  ;;  %v738_v55 = vpop.f32.mrb[14].mxu1  ;;  %v954_v56 = vpop.f32.mrb[90].mxu0 }
 0x1fc   : > { %v1210_v57 = vmul.f32 2.0, %v11489_v51  ;;  %v1212_v58 = vmul.f32 2.0, %v11491_v52  ;;  %v11492_v59 = vadd.f32 -0.5, %v738_v55  ;;  %v11494_v60 = vadd.f32 -0.5, %v954_v56  ;;  %v740_v12 = vpop.f32.mrb[15].mxu1  ;;  %v14976_v61 = vpop.f32.mrb[91].mxu0 }
 0x1fd   : > { %v1211_v62 = vmul.f32 2.0, %v11490_v14  ;;  %v11493_v63 = vadd.f32 -0.5, %v740_v12 }
 0x1fe   : > { %v13966_v1 = vpack.c.bf16 %v1212_v58, %v1212_v58  ;;  %v1213_v2 = vmul.f32 2.0, %v11492_v59  ;;  %v1215_v3 = vmul.f32 2.0, %v11494_v60  ;;  %15084 = vmatmul.mubr.msk.bf16.gmra.mrb[120].mxu1 %vm335_vm1, %v16545_v18 }
 0x1ff   : > { %v13965_v16 = vpack.c.bf16 %v1211_v62, %v1210_v57  ;;  %v1214_v26 = vmul.f32 2.0, %v11493_v63  ;;  %15087 = vmatprep.mubr.msk.bf16.mxu1 %vm16353_vm0, %v16352_v0 }
 0x200   : > { %1700 = vst.msk [vmem:[%s16753_s27 + $0x50] sm:$0xf] %vm1687_vm2, %v13966_v1  ;;  %v13968_v27 = vpack.c.bf16 %v1215_v3, %v1215_v3 }
 0x201   : > { %1699 = vst [vmem:[%s16753_s27 + $0x48] sm:$0xff] %v13965_v16  ;;  %v13967_v28 = vpack.c.bf16 %v1214_v26, %v1213_v2  ;;  %v744_v29 = vpop.f32.mrb[16].mxu1  ;;  %v959_v30 = vpop.f32.mrb[92].mxu0 }
 0x202   : > { %1702 = vst.msk [vmem:[%s16753_s27 + $0x5c] sm:$0xf] %vm1687_vm2, %v13968_v27  ;;  %v11495_v31 = vadd.f32 -0.5, %v744_v29  ;;  %v11497_v32 = vadd.f32 -0.5, %v959_v30  ;;  %v746_v33 = vpop.f32.mrb[17].mxu1  ;;  %v14979_v34 = vpop.f32.mrb[93].mxu0 }
 0x203   : > { %1701 = vst [vmem:[%s16753_s27 + $0x54] sm:$0xff] %v13967_v28  ;;  %v11496_v18 = vadd.f32 -0.5, %v746_v33  ;;  %v748_v35 = vpop.f32.mrb[18].mxu1  ;;  %v962_v36 = vpop.f32.mrb[94].mxu0 }
 0x204   : > { %v1216_v37 = vmul.f32 2.0, %v11495_v31  ;;  %v1218_v38 = vmul.f32 2.0, %v11497_v32  ;;  %v11498_v39 = vadd.f32 -0.5, %v748_v35  ;;  %v11500_v40 = vadd.f32 -0.5, %v962_v36  ;;  %v750_v4 = vpop.f32.mrb[19].mxu1  ;;  %v14980_v13 = vpop.f32.mrb[95].mxu0 }
 0x205   : > { %v1217_v5 = vmul.f32 2.0, %v11496_v18  ;;  %v11499_v6 = vadd.f32 -0.5, %v750_v4 }
 0x206   : > { %v13970_v7 = vpack.c.bf16 %v1218_v38, %v1218_v38  ;;  %v1219_v8 = vmul.f32 2.0, %v11498_v39  ;;  %v1221_v9 = vmul.f32 2.0, %v11500_v40  ;;  %15088 = vmatmul.mubr.msk.bf16.gmra.mrb[124].mxu1 %vm335_vm1, %v16559_v20 }
 0x207   : > { %v13969_v15 = vpack.c.bf16 %v1217_v5, %v1216_v37  ;;  %v1220_v17 = vmul.f32 2.0, %v11499_v6  ;;  %15091 = vmatprep.mubr.msk.bf16.mxu1 %vm16353_vm0, %v16352_v0 }
 0x208   : > { %1704 = vst.msk [vmem:[%s16753_s27 + $0x68] sm:$0xf] %vm1687_vm2, %v13970_v7  ;;  %v13972_v41 = vpack.c.bf16 %v1221_v9, %v1221_v9 }
 0x209   : > { %1703 = vst [vmem:[%s16753_s27 + $0x60] sm:$0xff] %v13969_v15  ;;  %v13971_v10 = vpack.c.bf16 %v1220_v17, %v1219_v8  ;;  %v754_v42 = vpop.f32.mrb[20].mxu1  ;;  %v967_v43 = vpop.f32.mrb[96].mxu0 }
 0x20a   : > { %1706 = vst.msk [vmem:[%s16753_s27 + $0x74] sm:$0xf] %vm1687_vm2, %v13972_v41  ;;  %v11501_v44 = vadd.f32 -0.5, %v754_v42  ;;  %v11503_v45 = vadd.f32 -0.5, %v967_v43  ;;  %v756_v46 = vpop.f32.mrb[21].mxu1  ;;  %v14983_v11 = vpop.f32.mrb[97].mxu0 }
 0x20b   : > { %1705 = vst [vmem:[%s16753_s27 + $0x6c] sm:$0xff] %v13971_v10  ;;  %v11502_v20 = vadd.f32 -0.5, %v756_v46  ;;  %v758_v47 = vpop.f32.mrb[22].mxu1  ;;  %v970_v48 = vpop.f32.mrb[98].mxu0 }
 0x20c   : > { %v1222_v49 = vmul.f32 2.0, %v11501_v44  ;;  %v1224_v50 = vmul.f32 2.0, %v11503_v45  ;;  %v11504_v51 = vadd.f32 -0.5, %v758_v47  ;;  %v11506_v52 = vadd.f32 -0.5, %v970_v48  ;;  %v760_v53 = vpop.f32.mrb[23].mxu1  ;;  %v14984_v54 = vpop.f32.mrb[99].mxu0 }
 0x20d   : > { %v1223_v14 = vmul.f32 2.0, %v11502_v20  ;;  %v11505_v55 = vadd.f32 -0.5, %v760_v53 }
 0x20e   : > { %v13974_v56 = vpack.c.bf16 %v1224_v50, %v1224_v50  ;;  %v1225_v57 = vmul.f32 2.0, %v11504_v51  ;;  %v1227_v58 = vmul.f32 2.0, %v11506_v52  ;;  %15092 = vmatmul.mubr.msk.bf16.gmra.mrb[128].mxu1 %vm335_vm1, %v16568_v21 }
 0x20f   : > { %v13973_v59 = vpack.c.bf16 %v1223_v14, %v1222_v49  ;;  %v1226_v60 = vmul.f32 2.0, %v11505_v55  ;;  %15095 = vmatprep.mubr.msk.bf16.mxu1 %vm16353_vm0, %v16352_v0 }
 0x210   : > { %1708 = vst.msk [vmem:[%s16753_s27 + $0x80] sm:$0xf] %vm1687_vm2, %v13974_v56  ;;  %v13976_v12 = vpack.c.bf16 %v1227_v58, %v1227_v58 }
 0x211   : > { %1707 = vst [vmem:[%s16753_s27 + $0x78] sm:$0xff] %v13973_v59  ;;  %v13975_v61 = vpack.c.bf16 %v1226_v60, %v1225_v57  ;;  %v764_v62 = vpop.f32.mrb[24].mxu1  ;;  %v975_v63 = vpop.f32.mrb[100].mxu0 }
 0x212   : > { %1710 = vst.msk [vmem:[%s16753_s27 + $0x8c] sm:$0xf] %vm1687_vm2, %v13976_v12  ;;  %v11507_v1 = vadd.f32 -0.5, %v764_v62  ;;  %v11509_v2 = vadd.f32 -0.5, %v975_v63  ;;  %v766_v3 = vpop.f32.mrb[25].mxu1  ;;  %v14987_v16 = vpop.f32.mrb[101].mxu0 }
 0x213   : > { %1709 = vst [vmem:[%s16753_s27 + $0x84] sm:$0xff] %v13975_v61  ;;  %v11508_v21 = vadd.f32 -0.5, %v766_v3  ;;  %v768_v26 = vpop.f32.mrb[26].mxu1  ;;  %v978_v27 = vpop.f32.mrb[102].mxu0 }
 0x214   : > { %v1228_v28 = vmul.f32 2.0, %v11507_v1  ;;  %v1230_v29 = vmul.f32 2.0, %v11509_v2  ;;  %v11510_v30 = vadd.f32 -0.5, %v768_v26  ;;  %v11512_v31 = vadd.f32 -0.5, %v978_v27  ;;  %v770_v32 = vpop.f32.mrb[27].mxu1  ;;  %v14988_v33 = vpop.f32.mrb[103].mxu0 }
 0x215   : > { %v1229_v34 = vmul.f32 2.0, %v11508_v21  ;;  %v11511_v18 = vadd.f32 -0.5, %v770_v32 }
 0x216   : > { %v13978_v35 = vpack.c.bf16 %v1230_v29, %v1230_v29  ;;  %v1231_v36 = vmul.f32 2.0, %v11510_v30  ;;  %v1233_v37 = vmul.f32 2.0, %v11512_v31  ;;  %15096 = vmatmul.mubr.msk.bf16.gmra.mrb[132].mxu1 %vm335_vm1, %v16577_v22 }
 0x217   : > { %v13977_v38 = vpack.c.bf16 %v1229_v34, %v1228_v28  ;;  %v1232_v39 = vmul.f32 2.0, %v11511_v18  ;;  %15099 = vmatprep.mubr.msk.bf16.mxu1 %vm16353_vm0, %v16352_v0 }
 0x218   : > { %1712 = vst.msk [vmem:[%s16753_s27 + $0x98] sm:$0xf] %vm1687_vm2, %v13978_v35  ;;  %v13980_v40 = vpack.c.bf16 %v1233_v37, %v1233_v37 }
 0x219   : > { %1711 = vst [vmem:[%s16753_s27 + $0x90] sm:$0xff] %v13977_v38  ;;  %v13979_v4 = vpack.c.bf16 %v1232_v39, %v1231_v36  ;;  %v774_v13 = vpop.f32.mrb[28].mxu1  ;;  %v983_v5 = vpop.f32.mrb[104].mxu0 }
 0x21a   : > { %1714 = vst.msk [vmem:[%s16753_s27 + $0xa4] sm:$0xf] %vm1687_vm2, %v13980_v40  ;;  %v11513_v6 = vadd.f32 -0.5, %v774_v13  ;;  %v11515_v7 = vadd.f32 -0.5, %v983_v5  ;;  %v776_v8 = vpop.f32.mrb[29].mxu1  ;;  %v14991_v9 = vpop.f32.mrb[105].mxu0 }
 0x21b   : > { %1713 = vst [vmem:[%s16753_s27 + $0x9c] sm:$0xff] %v13979_v4  ;;  %v11514_v22 = vadd.f32 -0.5, %v776_v8  ;;  %v778_v15 = vpop.f32.mrb[30].mxu1  ;;  %v986_v17 = vpop.f32.mrb[106].mxu0 }
 0x21c   : > { %v1234_v41 = vmul.f32 2.0, %v11513_v6  ;;  %v1236_v10 = vmul.f32 2.0, %v11515_v7  ;;  %v11516_v42 = vadd.f32 -0.5, %v778_v15  ;;  %v11518_v43 = vadd.f32 -0.5, %v986_v17  ;;  %v780_v44 = vpop.f32.mrb[31].mxu1  ;;  %v14992_v45 = vpop.f32.mrb[107].mxu0 }
 0x21d   : > { %v1235_v46 = vmul.f32 2.0, %v11514_v22  ;;  %v11517_v11 = vadd.f32 -0.5, %v780_v44 }
 0x21e   : > { %v13982_v20 = vpack.c.bf16 %v1236_v10, %v1236_v10  ;;  %v1237_v47 = vmul.f32 2.0, %v11516_v42  ;;  %v1239_v48 = vmul.f32 2.0, %v11518_v43  ;;  %15100 = vmatmul.mubr.msk.bf16.gmra.mrb[136].mxu1 %vm335_vm1, %v16586_v23 }
 0x21f   : > { %v13981_v49 = vpack.c.bf16 %v1235_v46, %v1234_v41  ;;  %v1238_v50 = vmul.f32 2.0, %v11517_v11  ;;  %15103 = vmatprep.mubr.msk.bf16.mxu1 %vm16353_vm0, %v16352_v0 }
 0x220   : > { %1716 = vst.msk [vmem:[%s16753_s27 + $0xb0] sm:$0xf] %vm1687_vm2, %v13982_v20  ;;  %v13984_v51 = vpack.c.bf16 %v1239_v48, %v1239_v48 }
 0x221   : > { %1715 = vst [vmem:[%s16753_s27 + $0xa8] sm:$0xff] %v13981_v49  ;;  %v13983_v52 = vpack.c.bf16 %v1238_v50, %v1237_v47  ;;  %v784_v53 = vpop.f32.mrb[32].mxu1  ;;  %v991_v54 = vpop.f32.mrb[108].mxu0 }
 0x222   : > { %1718 = vst.msk [vmem:[%s16753_s27 + $0xbc] sm:$0xf] %vm1687_vm2, %v13984_v51  ;;  %v11519_v14 = vadd.f32 -0.5, %v784_v53  ;;  %v11521_v55 = vadd.f32 -0.5, %v991_v54  ;;  %v786_v56 = vpop.f32.mrb[33].mxu1  ;;  %v14995_v57 = vpop.f32.mrb[109].mxu0 }
 0x223   : > { %1717 = vst [vmem:[%s16753_s27 + $0xb4] sm:$0xff] %v13983_v52  ;;  %v11520_v23 = vadd.f32 -0.5, %v786_v56  ;;  %v788_v58 = vpop.f32.mrb[34].mxu1  ;;  %v994_v59 = vpop.f32.mrb[110].mxu0 }
 0x224   : > { %v1240_v60 = vmul.f32 2.0, %v11519_v14  ;;  %v1242_v12 = vmul.f32 2.0, %v11521_v55  ;;  %v11522_v61 = vadd.f32 -0.5, %v788_v58  ;;  %v11524_v62 = vadd.f32 -0.5, %v994_v59  ;;  %v790_v63 = vpop.f32.mrb[35].mxu1  ;;  %v14996_v1 = vpop.f32.mrb[111].mxu0 }
 0x225   : > { %v1241_v2 = vmul.f32 2.0, %v11520_v23  ;;  %v11523_v3 = vadd.f32 -0.5, %v790_v63  ;;  %v16177_v23 = vld [vmem:[%s19145_s0 + $0x90] sm:$0x3f]  }
 0x226   : > { %v13986_v16 = vpack.c.bf16 %v1242_v12, %v1242_v12  ;;  %v1243_v21 = vmul.f32 2.0, %v11522_v61  ;;  %v1245_v26 = vmul.f32 2.0, %v11524_v62  ;;  %15104 = vmatmul.mubr.msk.bf16.gmra.mrb[140].mxu1 %vm335_vm1, %v16595_v24 }
 0x227   : > { %v13985_v27 = vpack.c.bf16 %v1241_v2, %v1240_v60  ;;  %v1244_v28 = vmul.f32 2.0, %v11523_v3  ;;  %15107 = vmatprep.mubr.msk.bf16.mxu1 %vm16353_vm0, %v16352_v0 }
 0x228   : > { %1720 = vst.msk [vmem:[%s16753_s27 + $0xc8] sm:$0xf] %vm1687_vm2, %v13986_v16  ;;  %v13988_v29 = vpack.c.bf16 %v1245_v26, %v1245_v26 }
 0x229   : > { %1719 = vst [vmem:[%s16753_s27 + $0xc0] sm:$0xff] %v13985_v27  ;;  %v13987_v30 = vpack.c.bf16 %v1244_v28, %v1243_v21  ;;  %v794_v31 = vpop.f32.mrb[36].mxu1  ;;  %v999_v32 = vpop.f32.mrb[112].mxu0 }
 0x22a   : > { %1722 = vst.msk [vmem:[%s16753_s27 + $0xd4] sm:$0xf] %vm1687_vm2, %v13988_v29  ;;  %v11525_v33 = vadd.f32 -0.5, %v794_v31  ;;  %v11527_v34 = vadd.f32 -0.5, %v999_v32  ;;  %v796_v18 = vpop.f32.mrb[37].mxu1  ;;  %v14999_v35 = vpop.f32.mrb[113].mxu0 }
 0x22b   : > { %1721 = vst [vmem:[%s16753_s27 + $0xcc] sm:$0xff] %v13987_v30  ;;  %v11526_v24 = vadd.f32 -0.5, %v796_v18  ;;  %v798_v36 = vpop.f32.mrb[38].mxu1  ;;  %v1002_v37 = vpop.f32.mrb[114].mxu0 }
 0x22c   : > { %v1246_v38 = vmul.f32 2.0, %v11525_v33  ;;  %v1248_v39 = vmul.f32 2.0, %v11527_v34  ;;  %v11528_v40 = vadd.f32 -0.5, %v798_v36  ;;  %v11530_v4 = vadd.f32 -0.5, %v1002_v37  ;;  %v800_v13 = vpop.f32.mrb[39].mxu1  ;;  %v15000_v5 = vpop.f32.mrb[115].mxu0 }
 0x22d   : > { %v1247_v6 = vmul.f32 2.0, %v11526_v24  ;;  %v11529_v7 = vadd.f32 -0.5, %v800_v13 }
 0x22e   : > { %v13990_v8 = vpack.c.bf16 %v1248_v39, %v1248_v39  ;;  %v1249_v9 = vmul.f32 2.0, %v11528_v40  ;;  %v1251_v22 = vmul.f32 2.0, %v11530_v4  ;;  %15108 = vmatmul.mubr.msk.bf16.gmra.mrb[144].mxu1 %vm335_vm1, %v16604_v25 }
 0x22f   : > { %v13989_v15 = vpack.c.bf16 %v1247_v6, %v1246_v38  ;;  %v1250_v17 = vmul.f32 2.0, %v11529_v7  ;;  %15111 = vmatprep.mubr.msk.bf16.mxu1 %vm16353_vm0, %v16352_v0 }
 0x230   : > { %1724 = vst.msk [vmem:[%s16753_s27 + $0xe0] sm:$0xf] %vm1687_vm2, %v13990_v8  ;;  %v13992_v41 = vpack.c.bf16 %v1251_v22, %v1251_v22 }
 0x231   : > { %1723 = vst [vmem:[%s16753_s27 + $0xd8] sm:$0xff] %v13989_v15  ;;  %v13991_v10 = vpack.c.bf16 %v1250_v17, %v1249_v9  ;;  %v804_v42 = vpop.f32.mrb[40].mxu1  ;;  %v1007_v43 = vpop.f32.mrb[116].mxu0 }
 0x232   : > { %1726 = vst.msk [vmem:[%s16753_s27 + $0xec] sm:$0xf] %vm1687_vm2, %v13992_v41  ;;  %v11531_v44 = vadd.f32 -0.5, %v804_v42  ;;  %v11533_v45 = vadd.f32 -0.5, %v1007_v43  ;;  %v806_v46 = vpop.f32.mrb[41].mxu1  ;;  %v15003_v11 = vpop.f32.mrb[117].mxu0 }
 0x233   : > { %1725 = vst [vmem:[%s16753_s27 + $0xe4] sm:$0xff] %v13991_v10  ;;  %v11532_v25 = vadd.f32 -0.5, %v806_v46  ;;  %v808_v20 = vpop.f32.mrb[42].mxu1  ;;  %v1010_v47 = vpop.f32.mrb[118].mxu0 }
 0x234   : > { %v1252_v48 = vmul.f32 2.0, %v11531_v44  ;;  %v1254_v49 = vmul.f32 2.0, %v11533_v45  ;;  %v11534_v50 = vadd.f32 -0.5, %v808_v20  ;;  %v11536_v51 = vadd.f32 -0.5, %v1010_v47  ;;  %v810_v52 = vpop.f32.mrb[43].mxu1  ;;  %v15004_v53 = vpop.f32.mrb[119].mxu0 }
 0x235   : > { %v1253_v54 = vmul.f32 2.0, %v11532_v25  ;;  %v11535_v14 = vadd.f32 -0.5, %v810_v52 }
 0x236   : > { %v13994_v55 = vpack.c.bf16 %v1254_v49, %v1254_v49  ;;  %v1255_v56 = vmul.f32 2.0, %v11534_v50  ;;  %v1257_v57 = vmul.f32 2.0, %v11536_v51  ;;  %15112 = vmatmul.mubr.msk.bf16.gmra.mrb[148].mxu1 %vm335_vm1, %v16177_v23 }
 0x237   : > { %v13993_v58 = vpack.c.bf16 %v1253_v54, %v1252_v48  ;;  %v1256_v59 = vmul.f32 2.0, %v11535_v14  ;;  %15117 = vmatprep.mubr.msk.bf16.mxu1 %vm16353_vm0, %v16352_v0 }
 0x238   : > { %1728 = vst.msk [vmem:[%s16753_s27 + $0xf8] sm:$0xf] %vm1687_vm2, %v13994_v55  ;;  %v13996_v60 = vpack.c.bf16 %v1257_v57, %v1257_v57 }
 0x239   : > { %1727 = vst [vmem:[%s16753_s27 + $0xf0] sm:$0xff] %v13993_v58  ;;  %v13995_v12 = vpack.c.bf16 %v1256_v59, %v1255_v56  ;;  %v814_v61 = vpop.f32.mrb[44].mxu1  ;;  %v1015_v62 = vpop.f32.mrb[120].mxu0 }
 0x23a   : > { %1730 = vst.msk [vmem:[%s16753_s27 + $0x104] sm:$0xf] %vm1687_vm2, %v13996_v60  ;;  %v11537_v63 = vadd.f32 -0.5, %v814_v61  ;;  %v11539_v1 = vadd.f32 -0.5, %v1015_v62  ;;  %v816_v2 = vpop.f32.mrb[45].mxu1  ;;  %v15007_v3 = vpop.f32.mrb[121].mxu0 }
 0x23b   : > { %1729 = vst [vmem:[%s16753_s27 + $0xfc] sm:$0xff] %v13995_v12  ;;  %v11538_v16 = vadd.f32 -0.5, %v816_v2  ;;  %v818_v21 = vpop.f32.mrb[46].mxu1  ;;  %v1018_v26 = vpop.f32.mrb[122].mxu0 }
 0x23c   : > { %v1258_v27 = vmul.f32 2.0, %v11537_v63  ;;  %v1260_v28 = vmul.f32 2.0, %v11539_v1  ;;  %v11540_v29 = vadd.f32 -0.5, %v818_v21  ;;  %v11542_v30 = vadd.f32 -0.5, %v1018_v26  ;;  %v820_v31 = vpop.f32.mrb[47].mxu1  ;;  %v15008_v32 = vpop.f32.mrb[123].mxu0 }
 0x23d   : > { %v1259_v33 = vmul.f32 2.0, %v11538_v16  ;;  %v11541_v34 = vadd.f32 -0.5, %v820_v31 }
 0x23e   : > { %v13998_v18 = vpack.c.bf16 %v1260_v28, %v1260_v28  ;;  %v1261_v35 = vmul.f32 2.0, %v11540_v29  ;;  %v1263_v24 = vmul.f32 2.0, %v11542_v30 }
 0x23f   : > { %v13997_v36 = vpack.c.bf16 %v1259_v33, %v1258_v27  ;;  %v1262_v37 = vmul.f32 2.0, %v11541_v34 }
 0x240   : > { %1732 = vst.msk [vmem:[%s16753_s27 + $0x110] sm:$0xf] %vm1687_vm2, %v13998_v18  ;;  %v14000_v38 = vpack.c.bf16 %v1263_v24, %v1263_v24 }
 0x241   : > { %1731 = vst [vmem:[%s16753_s27 + $0x108] sm:$0xff] %v13997_v36  ;;  %v13999_v39 = vpack.c.bf16 %v1262_v37, %v1261_v35  ;;  %v824_v40 = vpop.f32.mrb[48].mxu1  ;;  %v1023_v4 = vpop.f32.mrb[124].mxu0 }
 0x242   : > { %1734 = vst.msk [vmem:[%s16753_s27 + $0x11c] sm:$0xf] %vm1687_vm2, %v14000_v38  ;;  %v11543_v13 = vadd.f32 -0.5, %v824_v40  ;;  %v11545_v5 = vadd.f32 -0.5, %v1023_v4  ;;  %v826_v6 = vpop.f32.mrb[49].mxu1  ;;  %v15011_v7 = vpop.f32.mrb[125].mxu0 }
 0x243   : > { %1733 = vst [vmem:[%s16753_s27 + $0x114] sm:$0xff] %v13999_v39  ;;  %v11544_v8 = vadd.f32 -0.5, %v826_v6  ;;  %v828_v9 = vpop.f32.mrb[50].mxu1  ;;  %v1026_v22 = vpop.f32.mrb[126].mxu0 }
 0x244   : > { %v1264_v15 = vmul.f32 2.0, %v11543_v13  ;;  %v1266_v17 = vmul.f32 2.0, %v11545_v5  ;;  %v11546_v41 = vadd.f32 -0.5, %v828_v9  ;;  %v11548_v10 = vadd.f32 -0.5, %v1026_v22  ;;  %v830_v42 = vpop.f32.mrb[51].mxu1  ;;  %v15012_v43 = vpop.f32.mrb[127].mxu0 }
 0x245   : > { %v1265_v44 = vmul.f32 2.0, %v11544_v8  ;;  %v11547_v45 = vadd.f32 -0.5, %v830_v42 }
 0x246   : > { %v14002_v46 = vpack.c.bf16 %v1266_v17, %v1266_v17  ;;  %v1267_v11 = vmul.f32 2.0, %v11546_v41  ;;  %v1269_v25 = vmul.f32 2.0, %v11548_v10 }
 0x247   : > { %v14001_v20 = vpack.c.bf16 %v1265_v44, %v1264_v15  ;;  %v1268_v47 = vmul.f32 2.0, %v11547_v45 }
 0x248   : > { %1736 = vst.msk [vmem:[%s16753_s27 + $0x128] sm:$0xf] %vm1687_vm2, %v14002_v46  ;;  %v14004_v48 = vpack.c.bf16 %v1269_v25, %v1269_v25 }
 0x249   : > { %1735 = vst [vmem:[%s16753_s27 + $0x120] sm:$0xff] %v14001_v20  ;;  %v14003_v49 = vpack.c.bf16 %v1268_v47, %v1267_v11  ;;  %v834_v50 = vpop.f32.mrb[52].mxu1  ;;  %v1031_v51 = vpop.f32.mrb[128].mxu0 }
 0x24a   : > { %1738 = vst.msk [vmem:[%s16753_s27 + $0x134] sm:$0xf] %vm1687_vm2, %v14004_v48  ;;  %v11549_v52 = vadd.f32 -0.5, %v834_v50  ;;  %v11551_v53 = vadd.f32 -0.5, %v1031_v51  ;;  %v836_v54 = vpop.f32.mrb[53].mxu1  ;;  %v15015_v14 = vpop.f32.mrb[129].mxu0 }
 0x24b   : > { %1737 = vst [vmem:[%s16753_s27 + $0x12c] sm:$0xff] %v14003_v49  ;;  %v11550_v55 = vadd.f32 -0.5, %v836_v54  ;;  %v838_v56 = vpop.f32.mrb[54].mxu1  ;;  %v1034_v57 = vpop.f32.mrb[130].mxu0 }
 0x24c   : > { %v1270_v23 = vmul.f32 2.0, %v11549_v52  ;;  %v1272_v58 = vmul.f32 2.0, %v11551_v53  ;;  %v11552_v59 = vadd.f32 -0.5, %v838_v56  ;;  %v11554_v60 = vadd.f32 -0.5, %v1034_v57  ;;  %v840_v12 = vpop.f32.mrb[55].mxu1  ;;  %v15016_v61 = vpop.f32.mrb[131].mxu0 }
 0x24d   : > { %v1271_v62 = vmul.f32 2.0, %v11550_v55  ;;  %v11553_v63 = vadd.f32 -0.5, %v840_v12 }
 0x24e   : > { %v14006_v1 = vpack.c.bf16 %v1272_v58, %v1272_v58  ;;  %v1273_v2 = vmul.f32 2.0, %v11552_v59  ;;  %v1275_v3 = vmul.f32 2.0, %v11554_v60 }
 0x24f   : > { %v14005_v16 = vpack.c.bf16 %v1271_v62, %v1270_v23  ;;  %v1274_v21 = vmul.f32 2.0, %v11553_v63 }
 0x250   : > { %1740 = vst.msk [vmem:[%s16753_s27 + $0x140] sm:$0xf] %vm1687_vm2, %v14006_v1  ;;  %v14008_v26 = vpack.c.bf16 %v1275_v3, %v1275_v3 }
 0x251   : > { %1739 = vst [vmem:[%s16753_s27 + $0x138] sm:$0xff] %v14005_v16  ;;  %v14007_v27 = vpack.c.bf16 %v1274_v21, %v1273_v2  ;;  %v844_v28 = vpop.f32.mrb[56].mxu1  ;;  %v1039_v29 = vpop.f32.mrb[132].mxu0 }
 0x252   : > { %1742 = vst.msk [vmem:[%s16753_s27 + $0x14c] sm:$0xf] %vm1687_vm2, %v14008_v26  ;;  %v11555_v30 = vadd.f32 -0.5, %v844_v28  ;;  %v11557_v31 = vadd.f32 -0.5, %v1039_v29  ;;  %v846_v32 = vpop.f32.mrb[57].mxu1  ;;  %v15019_v33 = vpop.f32.mrb[133].mxu0 }
 0x253   : > { %1741 = vst [vmem:[%s16753_s27 + $0x144] sm:$0xff] %v14007_v27  ;;  %v11556_v34 = vadd.f32 -0.5, %v846_v32  ;;  %v848_v18 = vpop.f32.mrb[58].mxu1  ;;  %v1042_v35 = vpop.f32.mrb[134].mxu0 }
 0x254   : > { %v1276_v24 = vmul.f32 2.0, %v11555_v30  ;;  %v1278_v36 = vmul.f32 2.0, %v11557_v31  ;;  %v11558_v37 = vadd.f32 -0.5, %v848_v18  ;;  %v11560_v38 = vadd.f32 -0.5, %v1042_v35  ;;  %v850_v39 = vpop.f32.mrb[59].mxu1  ;;  %v15020_v40 = vpop.f32.mrb[135].mxu0 }
 0x255   : > { %v1277_v4 = vmul.f32 2.0, %v11556_v34  ;;  %v11559_v13 = vadd.f32 -0.5, %v850_v39 }
 0x256   : > { %v14010_v5 = vpack.c.bf16 %v1278_v36, %v1278_v36  ;;  %v1279_v6 = vmul.f32 2.0, %v11558_v37  ;;  %v1281_v7 = vmul.f32 2.0, %v11560_v38 }
 0x257   : > { %v14009_v8 = vpack.c.bf16 %v1277_v4, %v1276_v24  ;;  %v1280_v9 = vmul.f32 2.0, %v11559_v13 }
 0x258   : > { %1744 = vst.msk [vmem:[%s16753_s27 + $0x158] sm:$0xf] %vm1687_vm2, %v14010_v5  ;;  %v14012_v22 = vpack.c.bf16 %v1281_v7, %v1281_v7 }
 0x259   : > { %1743 = vst [vmem:[%s16753_s27 + $0x150] sm:$0xff] %v14009_v8  ;;  %v14011_v15 = vpack.c.bf16 %v1280_v9, %v1279_v6  ;;  %v854_v17 = vpop.f32.mrb[60].mxu1  ;;  %v1047_v41 = vpop.f32.mrb[136].mxu0 }
 0x25a   : > { %1746 = vst.msk [vmem:[%s16753_s27 + $0x164] sm:$0xf] %vm1687_vm2, %v14012_v22  ;;  %v11561_v10 = vadd.f32 -0.5, %v854_v17  ;;  %v11563_v42 = vadd.f32 -0.5, %v1047_v41  ;;  %v856_v43 = vpop.f32.mrb[61].mxu1  ;;  %v15023_v44 = vpop.f32.mrb[137].mxu0 }
 0x25b   : > { %1745 = vst [vmem:[%s16753_s27 + $0x15c] sm:$0xff] %v14011_v15  ;;  %v11562_v45 = vadd.f32 -0.5, %v856_v43  ;;  %v858_v46 = vpop.f32.mrb[62].mxu1  ;;  %v1050_v11 = vpop.f32.mrb[138].mxu0 }
 0x25c   : > { %v1282_v25 = vmul.f32 2.0, %v11561_v10  ;;  %v1284_v20 = vmul.f32 2.0, %v11563_v42  ;;  %v11564_v47 = vadd.f32 -0.5, %v858_v46  ;;  %v11566_v48 = vadd.f32 -0.5, %v1050_v11  ;;  %v860_v49 = vpop.f32.mrb[63].mxu1  ;;  %v15024_v50 = vpop.f32.mrb[139].mxu0 }
 0x25d   : > { %v1283_v51 = vmul.f32 2.0, %v11562_v45  ;;  %v11565_v52 = vadd.f32 -0.5, %v860_v49 }
 0x25e   : > { %v14014_v53 = vpack.c.bf16 %v1284_v20, %v1284_v20  ;;  %v1285_v54 = vmul.f32 2.0, %v11564_v47  ;;  %v1287_v14 = vmul.f32 2.0, %v11566_v48 }
 0x25f   : > { %v14013_v55 = vpack.c.bf16 %v1283_v51, %v1282_v25  ;;  %v1286_v56 = vmul.f32 2.0, %v11565_v52 }
 0x260   : > { %1748 = vst.msk [vmem:[%s16753_s27 + $0x170] sm:$0xf] %vm1687_vm2, %v14014_v53  ;;  %v14016_v57 = vpack.c.bf16 %v1287_v14, %v1287_v14 }
 0x261   : > { %1747 = vst [vmem:[%s16753_s27 + $0x168] sm:$0xff] %v14013_v55  ;;  %v14015_v23 = vpack.c.bf16 %v1286_v56, %v1285_v54  ;;  %v864_v58 = vpop.f32.mrb[64].mxu1  ;;  %v1055_v59 = vpop.f32.mrb[140].mxu0 }
 0x262   : > { %1750 = vst.msk [vmem:[%s16753_s27 + $0x17c] sm:$0xf] %vm1687_vm2, %v14016_v57  ;;  %v11567_v60 = vadd.f32 -0.5, %v864_v58  ;;  %v11569_v12 = vadd.f32 -0.5, %v1055_v59  ;;  %v866_v61 = vpop.f32.mrb[65].mxu1  ;;  %v15027_v62 = vpop.f32.mrb[141].mxu0 }
 0x263   : > { %1749 = vst [vmem:[%s16753_s27 + $0x174] sm:$0xff] %v14015_v23  ;;  %v11568_v63 = vadd.f32 -0.5, %v866_v61  ;;  %v868_v1 = vpop.f32.mrb[66].mxu1  ;;  %v1058_v2 = vpop.f32.mrb[142].mxu0 }
 0x264   : > { %v1288_v3 = vmul.f32 2.0, %v11567_v60  ;;  %v1290_v16 = vmul.f32 2.0, %v11569_v12  ;;  %v11570_v21 = vadd.f32 -0.5, %v868_v1  ;;  %v11572_v26 = vadd.f32 -0.5, %v1058_v2  ;;  %v870_v27 = vpop.f32.mrb[67].mxu1  ;;  %v15028_v28 = vpop.f32.mrb[143].mxu0 }
 0x265   : > { %v1289_v29 = vmul.f32 2.0, %v11568_v63  ;;  %v11571_v30 = vadd.f32 -0.5, %v870_v27  ;;  %v11988_v28 = vld [vmem:[%s16434_s8 + $0x20] sm:$0xff] }
 0x266   : > { %v14018_v31 = vpack.c.bf16 %v1290_v16, %v1290_v16  ;;  %v1291_v32 = vmul.f32 2.0, %v11570_v21  ;;  %v1293_v33 = vmul.f32 2.0, %v11572_v26  ;;  %v1768_v21 = vld [vmem:[%s16753_s27 + $0x1bc] sm:$0x33] }
 0x267   : > { %v14017_v34 = vpack.c.bf16 %v1289_v29, %v1288_v3  ;;  %v1292_v18 = vmul.f32 2.0, %v11571_v30  ;;  %v1773_v3 = vld [vmem:[%s16753_s27 + $0x1c4] sm:$0x3]  ;;  %v11989_v29 = vld [vmem:[%s16434_s8 + $0x28] sm:$0xff] }
 0x268   : > { %1752 = vst.msk [vmem:[%s16753_s27 + $0x188] sm:$0xf] %vm1687_vm2, %v14018_v31  ;;  %v14020_v35 = vpack.c.bf16 %v1293_v33, %v1293_v33 }
 0x269   : > { %1751 = vst [vmem:[%s16753_s27 + $0x180] sm:$0xff] %v14017_v34  ;;  %v14019_v24 = vpack.c.bf16 %v1292_v18, %v1291_v32  ;;  %v874_v36 = vpop.f32.mrb[68].mxu1  ;;  %v1063_v37 = vpop.f32.mrb[144].mxu0 }
 0x26a   : > { %1754 = vst.msk [vmem:[%s16753_s27 + $0x194] sm:$0xf] %vm1687_vm2, %v14020_v35  ;;  %v11573_v38 = vadd.f32 -0.5, %v874_v36  ;;  %v11575_v39 = vadd.f32 -0.5, %v1063_v37  ;;  %v876_v40 = vpop.f32.mrb[69].mxu1  ;;  %v15031_v4 = vpop.f32.mrb[145].mxu0  ;;  %v3141_v35 = vpack.c.bf16 %v11989_v29, %v11988_v28 }
 0x26b   : > { %1753 = vst [vmem:[%s16753_s27 + $0x18c] sm:$0xff] %v14019_v24  ;;  %v11574_v13 = vadd.f32 -0.5, %v876_v40  ;;  %v878_v5 = vpop.f32.mrb[70].mxu1  ;;  %v1066_v6 = vpop.f32.mrb[146].mxu0  ;;  %v16178_v37 = vld [vmem:[#allocation2] ss:$12 sps:$4 sm:$0xff]  }
 0x26c   : > { %v1294_v7 = vmul.f32 2.0, %v11573_v38  ;;  %v1296_v8 = vmul.f32 2.0, %v11575_v39  ;;  %v11576_v9 = vadd.f32 -0.5, %v878_v5  ;;  %v11578_v22 = vadd.f32 -0.5, %v1066_v6  ;;  %v880_v15 = vpop.f32.mrb[71].mxu1  ;;  %v15032_v17 = vpop.f32.mrb[147].mxu0 }
 0x26d   : > { %v1295_v41 = vmul.f32 2.0, %v11574_v13  ;;  %v11577_v10 = vadd.f32 -0.5, %v880_v15 }
 0x26e   : > { %v14022_v42 = vpack.c.bf16 %v1296_v8, %v1296_v8  ;;  %v1297_v43 = vmul.f32 2.0, %v11576_v9  ;;  %v1299_v44 = vmul.f32 2.0, %v11578_v22 }
 0x26f   : > { %v14021_v45 = vpack.c.bf16 %v1295_v41, %v1294_v7  ;;  %v1298_v46 = vmul.f32 2.0, %v11577_v10 }
 0x270   : > { %1756 = vst.msk [vmem:[%s16753_s27 + $0x1a0] sm:$0xf] %vm1687_vm2, %v14022_v42  ;;  %v14024_v11 = vpack.c.bf16 %v1299_v44, %v1299_v44 }
 0x271   : > { %1755 = vst [vmem:[%s16753_s27 + $0x198] sm:$0xff] %v14021_v45  ;;  %v14023_v25 = vpack.c.bf16 %v1298_v46, %v1297_v43  ;;  %v884_v20 = vpop.f32.mrb[72].mxu1  ;;  %v1071_v47 = vpop.f32.mrb[148].mxu0 }
 0x272   : > { %1758 = vst.msk [vmem:[%s16753_s27 + $0x1ac] sm:$0xf] %vm1687_vm2, %v14024_v11  ;;  %v11579_v48 = vadd.f32 -0.5, %v884_v20  ;;  %v11581_v49 = vadd.f32 -0.5, %v1071_v47  ;;  %v886_v50 = vpop.f32.mrb[73].mxu1  ;;  %v15035_v51 = vpop.f32.mrb[149].mxu0 }
 0x273   : > { %1757 = vst [vmem:[%s16753_s27 + $0x1a4] sm:$0xff] %v14023_v25  ;;  %v11580_v52 = vadd.f32 -0.5, %v886_v50  ;;  %v888_v53 = vpop.f32.mrb[74].mxu1  ;;  %v1074_v54 = vpop.f32.mrb[150].mxu0 }
 0x274   : > { %v1300_v14 = vmul.f32 2.0, %v11579_v48  ;;  %v1302_v55 = vmul.f32 2.0, %v11581_v49  ;;  %v11582_v56 = vadd.f32 -0.5, %v888_v53  ;;  %v11584_v57 = vadd.f32 -0.5, %v1074_v54  ;;  %v890_v58 = vpop.f32.mrb[75].mxu1  ;;  %v15036_v59 = vpop.f32.mrb[151].mxu0 }
 0x275   : > { %v1301_v60 = vmul.f32 2.0, %v11580_v52  ;;  %v11583_v12 = vadd.f32 -0.5, %v890_v58 }
 0x276   : > { %v14026_v61 = vpack.c.bf16 %v1302_v55, %v1302_v55  ;;  %v1303_v62 = vmul.f32 2.0, %v11582_v56  ;;  %v1305_v63 = vmul.f32 2.0, %v11584_v57 }
 0x277   : > { %v14025_v1 = vpack.c.bf16 %v1301_v60, %v1300_v14  ;;  %v1304_v16 = vmul.f32 2.0, %v11583_v12 }
 0x278   : > { %1760 = vst.msk [vmem:[%s16753_s27 + $0x1b8] sm:$0xf] %vm1687_vm2, %v14026_v61  ;;  %v14028_v26 = vpack.c.bf16 %v1305_v63, %v1305_v63 }
 0x279   : > { %1759 = vst [vmem:[%s16753_s27 + $0x1b0] sm:$0xff] %v14025_v1  ;;  %v14027_v30 = vpack.c.bf16 %v1304_v16, %v1303_v62  ;;  %v1814_v31 = vpop.f32.mrb[76].mxu1 }
 0x27a   : > { %v1774_v32 = vsel %vm16919_vm10, %v14028_v26, %v1773_v3  ;;  %v15041_v33 = vpop.f32.mrb[77].mxu1 }
 0x27b   : > { %1775 = vst [vmem:[%s16753_s27 + $0x1c4] sm:$0x3] %v1774_v32  ;;  %v1769_v34 = vsel %vm16929_vm11, %v14027_v30, %v1768_v21  ;;  %v1817_v18 = vpop.f32.mrb[78].mxu1 }
 0x27c   : > { %1770 = vst [vmem:[%s16753_s27 + $0x1bc] sm:$0x33] %v1769_v34  ;;  %v1965_v24 = vpack.c.bf16 %v1817_v18, %v1814_v31  ;;  %v15042_v36 = vpop.f32.mrb[79].mxu1 }
 0x27e   : > { %11682 = vmatmul.mubr.msk.bf16.vlgmr.msra.gmra.mrb[152].mxu0 %vm335_vm1, %v1965_v24  ;;  %15118 = vmatmul.mubr.msk.bf16.vlgmr.msra.gmra.mrb[152].mxu1 %vm335_vm1, %v1965_v24 }
 0x27f   : > { %15194 = vmatpush3.bf16.msra.mxu0 %v3141_v35  ;;  %2083 = vmatprep.mubr.bf16.mxu0 %v16354_v19 }
 0x280   : > { %15121 = vmatprep.mubr.msk.bf16.mxu1 %vm16353_vm0, %v16352_v0  ;;  %3404 = vmatpush1.bf16.msra.mxu1 %v16178_v37 }
 0x281   : > { %v1822_v38 = vpop.f32.mrb[80].mxu1  ;;  %15271 = vmatprep.subr.bf16.mxu0 %v16352_v0  ;;  %15349 = vmatprep.subr.bf16.mxu1 %v16352_v0 }
 0x282   : > { %v15045_v39 = vpop.f32.mrb[81].mxu1 }
 0x283   : > { %v1825_v40 = vpop.f32.mrb[82].mxu1 }
 0x284   : > { %v1966_v4 = vpack.c.bf16 %v1825_v40, %v1822_v38  ;;  %v15046_v13 = vpop.f32.mrb[83].mxu1 }
 0x286   : > { %11683 = vmatmul.mubr.msk.bf16.gmra.mrb[156].mxu0 %vm335_vm1, %v1966_v4  ;;  %15122 = vmatmul.mubr.msk.bf16.gmra.mrb[156].mxu1 %vm335_vm1, %v1966_v4 }
 0x287   : > { %2093 = vmatprep.mubr.bf16.mxu0 %v16354_v19  ;;  %15125 = vmatprep.mubr.msk.bf16.mxu1 %vm16353_vm0, %v16352_v0 }
 0x289   : > { %v1830_v5 = vpop.f32.mrb[84].mxu1 }
 0x28a   : > { %v15049_v6 = vpop.f32.mrb[85].mxu1 }
 0x28b   : > { %v1833_v7 = vpop.f32.mrb[86].mxu1 }
 0x28c   : > { %v1967_v8 = vpack.c.bf16 %v1833_v7, %v1830_v5  ;;  %v15050_v9 = vpop.f32.mrb[87].mxu1 }
 0x28e   : > { %11684 = vmatmul.mubr.msk.bf16.gmra.mrb[160].mxu0 %vm335_vm1, %v1967_v8  ;;  %15126 = vmatmul.mubr.msk.bf16.gmra.mrb[160].mxu1 %vm335_vm1, %v1967_v8 }
 0x28f   : > { %2103 = vmatprep.mubr.bf16.mxu0 %v16354_v19  ;;  %15129 = vmatprep.mubr.msk.bf16.mxu1 %vm16353_vm0, %v16352_v0 }
 0x291   : > { %v1838_v22 = vpop.f32.mrb[88].mxu1 }
 0x292   : > { %v15053_v15 = vpop.f32.mrb[89].mxu1 }
 0x293   : > { %v1841_v17 = vpop.f32.mrb[90].mxu1 }
 0x294   : > { %v1968_v41 = vpack.c.bf16 %v1841_v17, %v1838_v22  ;;  %v15054_v10 = vpop.f32.mrb[91].mxu1 }
 0x296   : > { %11685 = vmatmul.mubr.msk.bf16.gmra.mrb[164].mxu0 %vm335_vm1, %v1968_v41  ;;  %15130 = vmatmul.mubr.msk.bf16.gmra.mrb[164].mxu1 %vm335_vm1, %v1968_v41 }
 0x297   : > { %2113 = vmatprep.mubr.bf16.mxu0 %v16354_v19  ;;  %15133 = vmatprep.mubr.msk.bf16.mxu1 %vm16353_vm0, %v16352_v0 }
 0x299   : > { %v1846_v42 = vpop.f32.mrb[92].mxu1 }
 0x29a   : > { %v15057_v43 = vpop.f32.mrb[93].mxu1 }
 0x29b   : > { %v1849_v44 = vpop.f32.mrb[94].mxu1 }
 0x29c   : > { %v1969_v45 = vpack.c.bf16 %v1849_v44, %v1846_v42  ;;  %v15058_v46 = vpop.f32.mrb[95].mxu1 }
 0x29e   : > { %11686 = vmatmul.mubr.msk.bf16.gmra.mrb[168].mxu0 %vm335_vm1, %v1969_v45  ;;  %15134 = vmatmul.mubr.msk.bf16.gmra.mrb[168].mxu1 %vm335_vm1, %v1969_v45 }
 0x29f   : > { %2123 = vmatprep.mubr.bf16.mxu0 %v16354_v19  ;;  %15137 = vmatprep.mubr.msk.bf16.mxu1 %vm16353_vm0, %v16352_v0 }
 0x2a1   : > { %v1854_v11 = vpop.f32.mrb[96].mxu1 }
 0x2a2   : > { %v15061_v25 = vpop.f32.mrb[97].mxu1 }
 0x2a3   : > { %v1857_v20 = vpop.f32.mrb[98].mxu1 }
 0x2a4   : > { %v1970_v47 = vpack.c.bf16 %v1857_v20, %v1854_v11  ;;  %v15062_v48 = vpop.f32.mrb[99].mxu1 }
 0x2a6   : > { %11687 = vmatmul.mubr.msk.bf16.gmra.mrb[172].mxu0 %vm335_vm1, %v1970_v47  ;;  %15138 = vmatmul.mubr.msk.bf16.gmra.mrb[172].mxu1 %vm335_vm1, %v1970_v47 }
 0x2a7   : > { %2133 = vmatprep.mubr.bf16.mxu0 %v16354_v19  ;;  %15141 = vmatprep.mubr.msk.bf16.mxu1 %vm16353_vm0, %v16352_v0 }
 0x2a9   : > { %v1862_v49 = vpop.f32.mrb[100].mxu1 }
 0x2aa   : > { %v15065_v50 = vpop.f32.mrb[101].mxu1 }
 0x2ab   : > { %v1865_v51 = vpop.f32.mrb[102].mxu1 }
 0x2ac   : > { %v1971_v52 = vpack.c.bf16 %v1865_v51, %v1862_v49  ;;  %v15066_v53 = vpop.f32.mrb[103].mxu1 }
 0x2ae   : > { %11688 = vmatmul.mubr.msk.bf16.gmra.mrb[176].mxu0 %vm335_vm1, %v1971_v52  ;;  %15142 = vmatmul.mubr.msk.bf16.gmra.mrb[176].mxu1 %vm335_vm1, %v1971_v52 }
 0x2af   : > { %2143 = vmatprep.mubr.bf16.mxu0 %v16354_v19  ;;  %15145 = vmatprep.mubr.msk.bf16.mxu1 %vm16353_vm0, %v16352_v0 }
 0x2b1   : > { %v1870_v54 = vpop.f32.mrb[104].mxu1 }
 0x2b2   : > { %v15069_v14 = vpop.f32.mrb[105].mxu1 }
 0x2b3   : > { %v1873_v55 = vpop.f32.mrb[106].mxu1  ;;  %v16180_v14 = vld [vmem:[#allocation2 + $0x8] ss:$12 sps:$4 sm:$0xff]  }
 0x2b4   : > { %v1972_v56 = vpack.c.bf16 %v1873_v55, %v1870_v54  ;;  %v15070_v57 = vpop.f32.mrb[107].mxu1  ;;  %v16179_v54 = vld [vmem:[%s19145_s0] sm:$0xff]  }
 0x2b5   : > { %v16181_v55 = vld [vmem:[#allocation2 + $0x4] ss:$12 sps:$4 sm:$0xff]  }
 0x2b6   : > { %11689 = vmatmul.mubr.msk.bf16.gmra.mrb[180].mxu0 %vm335_vm1, %v1972_v56  ;;  %15146 = vmatmul.mubr.msk.bf16.gmra.mrb[180].mxu1 %vm335_vm1, %v1972_v56  ;;  %v16182_v56 = vld [vmem:[%s19145_s0 + $0x8] sm:$0xff]   ;;  %v16183_v57 = vld [vmem:[%s19145_s0 + $0x10] sm:$0xff]  }
 0x2b7   : > { %2153 = vmatprep.mubr.bf16.mxu0 %v16354_v19  ;;  %15149 = vmatprep.mubr.msk.bf16.mxu1 %vm16353_vm0, %v16352_v0 }
 0x2b9   : > { %v1878_v23 = vpop.f32.mrb[108].mxu1 }
 0x2ba   : > { %v15073_v58 = vpop.f32.mrb[109].mxu1 }
 0x2bb   : > { %v1881_v59 = vpop.f32.mrb[110].mxu1  ;;  %v16185_v58 = vld [vmem:[%s19145_s0 + $0x20] sm:$0xff]  }
 0x2bc   : > { %v1973_v60 = vpack.c.bf16 %v1881_v59, %v1878_v23  ;;  %v15074_v12 = vpop.f32.mrb[111].mxu1  ;;  %v16184_v23 = vld [vmem:[%s19145_s0 + $0x18] sm:$0xff]   ;;  %v16186_v59 = vld [vmem:[%s19145_s0 + $0x28] sm:$0xff]  }
 0x2bd   : > { %v16188_v12 = vld [vmem:[%s19145_s0 + $0x38] sm:$0xff]  }
 0x2be   : > { %11690 = vmatmul.mubr.msk.bf16.gmra.mrb[184].mxu0 %vm335_vm1, %v1973_v60  ;;  %15150 = vmatmul.mubr.msk.bf16.gmra.mrb[184].mxu1 %vm335_vm1, %v1973_v60  ;;  %v16187_v60 = vld [vmem:[%s19145_s0 + $0x30] sm:$0xff]  }
 0x2bf   : > { %2163 = vmatprep.mubr.bf16.mxu0 %v16354_v19  ;;  %15153 = vmatprep.mubr.msk.bf16.mxu1 %vm16353_vm0, %v16352_v0 }
 0x2c1   : > { %v1886_v61 = vpop.f32.mrb[112].mxu1 }
 0x2c2   : > { %v15077_v62 = vpop.f32.mrb[113].mxu1 }
 0x2c3   : > { %v1889_v63 = vpop.f32.mrb[114].mxu1 }
 0x2c4   : > { %v1974_v1 = vpack.c.bf16 %v1889_v63, %v1886_v61  ;;  %v15078_v3 = vpop.f32.mrb[115].mxu1 }
 0x2c6   : > { %11691 = vmatmul.mubr.msk.bf16.gmra.mrb[188].mxu0 %vm335_vm1, %v1974_v1  ;;  %15154 = vmatmul.mubr.msk.bf16.gmra.mrb[188].mxu1 %vm335_vm1, %v1974_v1 }
 0x2c7   : > { %2173 = vmatprep.mubr.bf16.mxu0 %v16354_v19  ;;  %15157 = vmatprep.mubr.msk.bf16.mxu1 %vm16353_vm0, %v16352_v0 }
 0x2c9   : > { %v1894_v16 = vpop.f32.mrb[116].mxu1 }
 0x2ca   : > { %v15081_v21 = vpop.f32.mrb[117].mxu1 }
 0x2cb   : > { %v1897_v26 = vpop.f32.mrb[118].mxu1 }
 0x2cc   : > { %v1975_v28 = vpack.c.bf16 %v1897_v26, %v1894_v16  ;;  %v15082_v29 = vpop.f32.mrb[119].mxu1 }
 0x2ce   : > { %11692 = vmatmul.mubr.msk.bf16.gmra.mrb[192].mxu0 %vm335_vm1, %v1975_v28  ;;  %15158 = vmatmul.mubr.msk.bf16.gmra.mrb[192].mxu1 %vm335_vm1, %v1975_v28 }
 0x2cf   : > { %2183 = vmatprep.mubr.bf16.mxu0 %v16354_v19  ;;  %15161 = vmatprep.mubr.msk.bf16.mxu1 %vm16353_vm0, %v16352_v0 }
 0x2d1   : > { %v1902_v30 = vpop.f32.mrb[120].mxu1 }
 0x2d2   : > { %v15085_v31 = vpop.f32.mrb[121].mxu1 }
 0x2d3   : > { %v1905_v32 = vpop.f32.mrb[122].mxu1 }
 0x2d4   : > { %v1976_v33 = vpack.c.bf16 %v1905_v32, %v1902_v30  ;;  %v15086_v34 = vpop.f32.mrb[123].mxu1 }
 0x2d6   : > { %11693 = vmatmul.mubr.msk.bf16.gmra.mrb[196].mxu0 %vm335_vm1, %v1976_v33  ;;  %15162 = vmatmul.mubr.msk.bf16.gmra.mrb[196].mxu1 %vm335_vm1, %v1976_v33 }
 0x2d7   : > { %2193 = vmatprep.mubr.bf16.mxu0 %v16354_v19  ;;  %15165 = vmatprep.mubr.msk.bf16.mxu1 %vm16353_vm0, %v16352_v0 }
 0x2d9   : > { %v1910_v18 = vpop.f32.mrb[124].mxu1 }
 0x2da   : > { %v15089_v35 = vpop.f32.mrb[125].mxu1 }
 0x2db   : > { %v1913_v24 = vpop.f32.mrb[126].mxu1 }
 0x2dc   : > { %v1977_v36 = vpack.c.bf16 %v1913_v24, %v1910_v18  ;;  %v15090_v37 = vpop.f32.mrb[127].mxu1 }
 0x2de   : > { %11694 = vmatmul.mubr.msk.bf16.gmra.mrb[200].mxu0 %vm335_vm1, %v1977_v36  ;;  %15166 = vmatmul.mubr.msk.bf16.gmra.mrb[200].mxu1 %vm335_vm1, %v1977_v36 }
 0x2df   : > { %2203 = vmatprep.mubr.bf16.mxu0 %v16354_v19  ;;  %15169 = vmatprep.mubr.msk.bf16.mxu1 %vm16353_vm0, %v16352_v0 }
 0x2e1   : > { %v1918_v38 = vpop.f32.mrb[128].mxu1 }
 0x2e2   : > { %v15093_v39 = vpop.f32.mrb[129].mxu1 }
 0x2e3   : > { %v1921_v40 = vpop.f32.mrb[130].mxu1 }
 0x2e4   : > { %v1978_v4 = vpack.c.bf16 %v1921_v40, %v1918_v38  ;;  %v15094_v13 = vpop.f32.mrb[131].mxu1  ;;  %v16189_v38 = vld [vmem:[%s19145_s0 + $0x40] sm:$0xff]  }
 0x2e6   : > { %11695 = vmatmul.mubr.msk.bf16.gmra.mrb[204].mxu0 %vm335_vm1, %v1978_v4  ;;  %15170 = vmatmul.mubr.msk.bf16.gmra.mrb[204].mxu1 %vm335_vm1, %v1978_v4 }
 0x2e7   : > { %2213 = vmatprep.mubr.bf16.mxu0 %v16354_v19  ;;  %15173 = vmatprep.mubr.msk.bf16.mxu1 %vm16353_vm0, %v16352_v0 }
 0x2e9   : > { %v1926_v5 = vpop.f32.mrb[132].mxu1 }
 0x2ea   : > { %v15097_v6 = vpop.f32.mrb[133].mxu1 }
 0x2eb   : > { %v1929_v7 = vpop.f32.mrb[134].mxu1 }
 0x2ec   : > { %v1979_v8 = vpack.c.bf16 %v1929_v7, %v1926_v5  ;;  %v15098_v9 = vpop.f32.mrb[135].mxu1 }
 0x2ee   : > { %11696 = vmatmul.mubr.msk.bf16.gmra.mrb[208].mxu0 %vm335_vm1, %v1979_v8  ;;  %15174 = vmatmul.mubr.msk.bf16.gmra.mrb[208].mxu1 %vm335_vm1, %v1979_v8 }
 0x2ef   : > { %2223 = vmatprep.mubr.bf16.mxu0 %v16354_v19  ;;  %15177 = vmatprep.mubr.msk.bf16.mxu1 %vm16353_vm0, %v16352_v0 }
 0x2f1   : > { %v1934_v22 = vpop.f32.mrb[136].mxu1 }
 0x2f2   : > { %v15101_v15 = vpop.f32.mrb[137].mxu1 }
 0x2f3   : > { %v1937_v17 = vpop.f32.mrb[138].mxu1 }
 0x2f4   : > { %v1980_v41 = vpack.c.bf16 %v1937_v17, %v1934_v22  ;;  %v15102_v10 = vpop.f32.mrb[139].mxu1 }
 0x2f6   : > { %11697 = vmatmul.mubr.msk.bf16.gmra.mrb[212].mxu0 %vm335_vm1, %v1980_v41  ;;  %15178 = vmatmul.mubr.msk.bf16.gmra.mrb[212].mxu1 %vm335_vm1, %v1980_v41 }
 0x2f7   : > { %2233 = vmatprep.mubr.bf16.mxu0 %v16354_v19  ;;  %15181 = vmatprep.mubr.msk.bf16.mxu1 %vm16353_vm0, %v16352_v0 }
 0x2f9   : > { %v1942_v42 = vpop.f32.mrb[140].mxu1 }
 0x2fa   : > { %v15105_v43 = vpop.f32.mrb[141].mxu1 }
 0x2fb   : > { %v1945_v44 = vpop.f32.mrb[142].mxu1 }
 0x2fc   : > { %v1981_v45 = vpack.c.bf16 %v1945_v44, %v1942_v42  ;;  %v15106_v46 = vpop.f32.mrb[143].mxu1 }
 0x2fe   : > { %11698 = vmatmul.mubr.msk.bf16.gmra.mrb[216].mxu0 %vm335_vm1, %v1981_v45  ;;  %15182 = vmatmul.mubr.msk.bf16.gmra.mrb[216].mxu1 %vm335_vm1, %v1981_v45 }
 0x2ff   : > { %2243 = vmatprep.mubr.bf16.mxu0 %v16354_v19  ;;  %15185 = vmatprep.mubr.msk.bf16.mxu1 %vm16353_vm0, %v16352_v0 }
 0x301   : > { %v1950_v11 = vpop.f32.mrb[144].mxu1 }
 0x302   : > { %v15109_v25 = vpop.f32.mrb[145].mxu1 }
 0x303   : > { %v1953_v20 = vpop.f32.mrb[146].mxu1 }
 0x304   : > { %v1982_v47 = vpack.c.bf16 %v1953_v20, %v1950_v11  ;;  %v15110_v48 = vpop.f32.mrb[147].mxu1 }
 0x306   : > { %11699 = vmatmul.mubr.msk.bf16.gmra.mrb[220].mxu0 %vm335_vm1, %v1982_v47  ;;  %15186 = vmatmul.mubr.msk.bf16.gmra.mrb[220].mxu1 %vm335_vm1, %v1982_v47 }
 0x307   : > { %2253 = vmatprep.mubr.bf16.mxu0 %v16354_v19  ;;  %15189 = vmatprep.mubr.msk.bf16.mxu1 %vm16353_vm0, %v16352_v0 }
 0x309   : > { %v1958_v49 = vpop.f32.mrb[148].mxu1 }
 0x30a   : > { %v15113_v50 = vpop.f32.mrb[149].mxu1 }
 0x30b   : > { %v1961_v51 = vpop.f32.mrb[150].mxu1 }
 0x30c   : > { %v1983_v52 = vpack.c.bf16 %v1961_v51, %v1958_v49  ;;  %v15114_v53 = vpop.f32.mrb[151].mxu1  ;;  %v16190_v49 = vld [vmem:[%s19145_s0 + $0x48] sm:$0xff]  }
 0x30e   : > { %11700 = vmatmul.mubr.msk.bf16.gmra.mrb[224].mxu0 %vm335_vm1, %v1983_v52  ;;  %15190 = vmatmul.mubr.msk.bf16.gmra.mrb[224].mxu1 %vm335_vm1, %v1983_v52 }
 0x30f   : > { %15195 = vmatprep.mubr.msk.bf16.mxu0 %vm16353_vm0, %v16352_v0  ;;  %3435 = vmatprep.mubr.bf16.mxu1 %v16354_v19 }
 0x316   : > { %15196 = vmatmul.mubr.msk.bf16.vlgmr.msra.gmra.mrb[228].mxu0 %vm335_vm1, %v16179_v54 }
 0x317   : > { %15199 = vmatprep.mubr.msk.bf16.mxu0 %vm16353_vm0, %v16352_v0  ;;  %15272 = vmatpush3.bf16.msra.mxu0 %v16180_v14 }
 0x318   : > { %4765 = vmatprep.subr.bf16.mxu0 %v16181_v55 }
 0x31e   : > { %15200 = vmatmul.mubr.msk.bf16.gmra.mrb[232].mxu0 %vm335_vm1, %v16182_v56 }
 0x31f   : > { %15203 = vmatprep.mubr.msk.bf16.mxu0 %vm16353_vm0, %v16352_v0 }
 0x326   : > { %15204 = vmatmul.mubr.msk.bf16.gmra.mrb[236].mxu0 %vm335_vm1, %v16183_v57 }
 0x327   : > { %15207 = vmatprep.mubr.msk.bf16.mxu0 %vm16353_vm0, %v16352_v0 }
 0x32e   : > { %15208 = vmatmul.mubr.msk.bf16.gmra.mrb[240].mxu0 %vm335_vm1, %v16184_v23 }
 0x32f   : > { %15211 = vmatprep.mubr.msk.bf16.mxu0 %vm16353_vm0, %v16352_v0 }
 0x336   : > { %15212 = vmatmul.mubr.msk.bf16.gmra.mrb[244].mxu0 %vm335_vm1, %v16185_v58 }
 0x337   : > { %15215 = vmatprep.mubr.msk.bf16.mxu0 %vm16353_vm0, %v16352_v0 }
 0x33e   : > { %15216 = vmatmul.mubr.msk.bf16.gmra.mrb[248].mxu0 %vm335_vm1, %v16186_v59 }
 0x33f   : > { %15219 = vmatprep.mubr.msk.bf16.mxu0 %vm16353_vm0, %v16352_v0 }
 0x346   : > { %15220 = vmatmul.mubr.msk.bf16.gmra.mrb[252].mxu0 %vm335_vm1, %v16187_v60 }
 0x347   : > { %15223 = vmatprep.mubr.msk.bf16.mxu0 %vm16353_vm0, %v16352_v0 }
 0x34e   : > { %15224 = vmatmul.mubr.msk.bf16.gmra.mrb[0].mxu0 %vm335_vm1, %v16188_v12 }
 0x34f   : > { %15227 = vmatprep.mubr.msk.bf16.mxu0 %vm16353_vm0, %v16352_v0 }
 0x351   : > { %v2075_v61 = vpop.f32.mrb[152].mxu0  ;;  %v2298_v62 = vpop.f32.mrb[152].mxu1 }
 0x352   : > { %v11720_v63 = vadd.f32 -0.5, %v2075_v61  ;;  %v11722_v1 = vadd.f32 -0.5, %v2298_v62  ;;  %v2077_v3 = vpop.f32.mrb[153].mxu0  ;;  %v15119_v16 = vpop.f32.mrb[153].mxu1 }
 0x353   : > { %v11721_v21 = vadd.f32 -0.5, %v2077_v3  ;;  %v2079_v26 = vpop.f32.mrb[154].mxu0  ;;  %v2301_v28 = vpop.f32.mrb[154].mxu1 }
 0x354   : > { %v2563_v29 = vmul.f32 2.0, %v11720_v63  ;;  %v2565_v30 = vmul.f32 2.0, %v11722_v1  ;;  %v11723_v31 = vadd.f32 -0.5, %v2079_v26  ;;  %v11725_v32 = vadd.f32 -0.5, %v2301_v28  ;;  %v2081_v33 = vpop.f32.mrb[155].mxu0  ;;  %v15120_v34 = vpop.f32.mrb[155].mxu1 }
 0x355   : > { %v2564_v18 = vmul.f32 2.0, %v11721_v21  ;;  %v11724_v35 = vadd.f32 -0.5, %v2081_v33 }
 0x356   : > { %v14030_v24 = vpack.c.bf16 %v2565_v30, %v2565_v30  ;;  %v2566_v36 = vmul.f32 2.0, %v11723_v31  ;;  %v2568_v37 = vmul.f32 2.0, %v11725_v32  ;;  %15228 = vmatmul.mubr.msk.bf16.gmra.mrb[4].mxu0 %vm335_vm1, %v16189_v38  ;;  %v16191_v30 = vld [vmem:[%s19145_s0 + $0x50] sm:$0xff]  }
 0x357   : > { %v14029_v39 = vpack.c.bf16 %v2564_v18, %v2563_v29  ;;  %v2567_v40 = vmul.f32 2.0, %v11724_v35  ;;  %15231 = vmatprep.mubr.msk.bf16.mxu0 %vm16353_vm0, %v16352_v0 }
 0x358   : > { %11911 = vst.msk [vmem:[%s16753_s27 + $0x1d0] sm:$0xf] %vm1687_vm2, %v14030_v24  ;;  %v14032_v4 = vpack.c.bf16 %v2568_v37, %v2568_v37 }
 0x359   : > { %11910 = vst [vmem:[%s16753_s27 + $0x1c8] sm:$0xff] %v14029_v39  ;;  %v14031_v13 = vpack.c.bf16 %v2567_v40, %v2566_v36  ;;  %v2085_v5 = vpop.f32.mrb[156].mxu0  ;;  %v2306_v6 = vpop.f32.mrb[156].mxu1 }
 0x35a   : > { %11913 = vst.msk [vmem:[%s16753_s27 + $0x1dc] sm:$0xf] %vm1687_vm2, %v14032_v4  ;;  %v11726_v7 = vadd.f32 -0.5, %v2085_v5  ;;  %v11728_v8 = vadd.f32 -0.5, %v2306_v6  ;;  %v2087_v9 = vpop.f32.mrb[157].mxu0  ;;  %v15123_v22 = vpop.f32.mrb[157].mxu1 }
 0x35b   : > { %11912 = vst [vmem:[%s16753_s27 + $0x1d4] sm:$0xff] %v14031_v13  ;;  %v11727_v15 = vadd.f32 -0.5, %v2087_v9  ;;  %v2089_v17 = vpop.f32.mrb[158].mxu0  ;;  %v2309_v41 = vpop.f32.mrb[158].mxu1 }
 0x35c   : > { %v2569_v10 = vmul.f32 2.0, %v11726_v7  ;;  %v2571_v42 = vmul.f32 2.0, %v11728_v8  ;;  %v11729_v43 = vadd.f32 -0.5, %v2089_v17  ;;  %v11731_v44 = vadd.f32 -0.5, %v2309_v41  ;;  %v2091_v45 = vpop.f32.mrb[159].mxu0  ;;  %v15124_v46 = vpop.f32.mrb[159].mxu1 }
 0x35d   : > { %v2570_v11 = vmul.f32 2.0, %v11727_v15  ;;  %v11730_v25 = vadd.f32 -0.5, %v2091_v45 }
 0x35e   : > { %v14034_v20 = vpack.c.bf16 %v2571_v42, %v2571_v42  ;;  %v2572_v47 = vmul.f32 2.0, %v11729_v43  ;;  %v2574_v48 = vmul.f32 2.0, %v11731_v44  ;;  %15232 = vmatmul.mubr.msk.bf16.gmra.mrb[8].mxu0 %vm335_vm1, %v16190_v49  ;;  %v16192_v42 = vld [vmem:[%s19145_s0 + $0x58] sm:$0xff]  }
 0x35f   : > { %v14033_v50 = vpack.c.bf16 %v2570_v11, %v2569_v10  ;;  %v2573_v51 = vmul.f32 2.0, %v11730_v25  ;;  %15235 = vmatprep.mubr.msk.bf16.mxu0 %vm16353_vm0, %v16352_v0 }
 0x360   : > { %11915 = vst.msk [vmem:[%s16753_s27 + $0x1e8] sm:$0xf] %vm1687_vm2, %v14034_v20  ;;  %v14036_v52 = vpack.c.bf16 %v2574_v48, %v2574_v48 }
 0x361   : > { %11914 = vst [vmem:[%s16753_s27 + $0x1e0] sm:$0xff] %v14033_v50  ;;  %v14035_v53 = vpack.c.bf16 %v2573_v51, %v2572_v47  ;;  %v2095_v54 = vpop.f32.mrb[160].mxu0  ;;  %v2314_v14 = vpop.f32.mrb[160].mxu1 }
 0x362   : > { %11917 = vst.msk [vmem:[%s16753_s27 + $0x1f4] sm:$0xf] %vm1687_vm2, %v14036_v52  ;;  %v11732_v55 = vadd.f32 -0.5, %v2095_v54  ;;  %v11734_v56 = vadd.f32 -0.5, %v2314_v14  ;;  %v2097_v57 = vpop.f32.mrb[161].mxu0  ;;  %v15127_v23 = vpop.f32.mrb[161].mxu1 }
 0x363   : > { %11916 = vst [vmem:[%s16753_s27 + $0x1ec] sm:$0xff] %v14035_v53  ;;  %v11733_v58 = vadd.f32 -0.5, %v2097_v57  ;;  %v2099_v59 = vpop.f32.mrb[162].mxu0  ;;  %v2317_v60 = vpop.f32.mrb[162].mxu1 }
 0x364   : > { %v2575_v12 = vmul.f32 2.0, %v11732_v55  ;;  %v2577_v61 = vmul.f32 2.0, %v11734_v56  ;;  %v11735_v62 = vadd.f32 -0.5, %v2099_v59  ;;  %v11737_v63 = vadd.f32 -0.5, %v2317_v60  ;;  %v2101_v1 = vpop.f32.mrb[163].mxu0  ;;  %v15128_v3 = vpop.f32.mrb[163].mxu1 }
 0x365   : > { %v2576_v16 = vmul.f32 2.0, %v11733_v58  ;;  %v11736_v21 = vadd.f32 -0.5, %v2101_v1 }
 0x366   : > { %v14038_v26 = vpack.c.bf16 %v2577_v61, %v2577_v61  ;;  %v2578_v28 = vmul.f32 2.0, %v11735_v62  ;;  %v2580_v29 = vmul.f32 2.0, %v11737_v63  ;;  %15236 = vmatmul.mubr.msk.bf16.gmra.mrb[12].mxu0 %vm335_vm1, %v16191_v30  ;;  %v16193_v61 = vld [vmem:[%s19145_s0 + $0x60] sm:$0xff]  }
 0x367   : > { %v14037_v31 = vpack.c.bf16 %v2576_v16, %v2575_v12  ;;  %v2579_v32 = vmul.f32 2.0, %v11736_v21  ;;  %15239 = vmatprep.mubr.msk.bf16.mxu0 %vm16353_vm0, %v16352_v0 }
 0x368   : > { %11919 = vst.msk [vmem:[%s16753_s27 + $0x200] sm:$0xf] %vm1687_vm2, %v14038_v26  ;;  %v14040_v33 = vpack.c.bf16 %v2580_v29, %v2580_v29 }
 0x369   : > { %11918 = vst [vmem:[%s16753_s27 + $0x1f8] sm:$0xff] %v14037_v31  ;;  %v14039_v34 = vpack.c.bf16 %v2579_v32, %v2578_v28  ;;  %v2105_v18 = vpop.f32.mrb[164].mxu0  ;;  %v2322_v35 = vpop.f32.mrb[164].mxu1 }
 0x36a   : > { %11921 = vst.msk [vmem:[%s16753_s27 + $0x20c] sm:$0xf] %vm1687_vm2, %v14040_v33  ;;  %v11738_v24 = vadd.f32 -0.5, %v2105_v18  ;;  %v11740_v36 = vadd.f32 -0.5, %v2322_v35  ;;  %v2107_v37 = vpop.f32.mrb[165].mxu0  ;;  %v15131_v38 = vpop.f32.mrb[165].mxu1 }
 0x36b   : > { %11920 = vst [vmem:[%s16753_s27 + $0x204] sm:$0xff] %v14039_v34  ;;  %v11739_v39 = vadd.f32 -0.5, %v2107_v37  ;;  %v2109_v40 = vpop.f32.mrb[166].mxu0  ;;  %v2325_v4 = vpop.f32.mrb[166].mxu1 }
 0x36c   : > { %v2581_v13 = vmul.f32 2.0, %v11738_v24  ;;  %v2583_v5 = vmul.f32 2.0, %v11740_v36  ;;  %v11741_v6 = vadd.f32 -0.5, %v2109_v40  ;;  %v11743_v7 = vadd.f32 -0.5, %v2325_v4  ;;  %v2111_v8 = vpop.f32.mrb[167].mxu0  ;;  %v15132_v9 = vpop.f32.mrb[167].mxu1 }
 0x36d   : > { %v2582_v22 = vmul.f32 2.0, %v11739_v39  ;;  %v11742_v15 = vadd.f32 -0.5, %v2111_v8 }
 0x36e   : > { %v14042_v17 = vpack.c.bf16 %v2583_v5, %v2583_v5  ;;  %v2584_v41 = vmul.f32 2.0, %v11741_v6  ;;  %v2586_v10 = vmul.f32 2.0, %v11743_v7  ;;  %15240 = vmatmul.mubr.msk.bf16.gmra.mrb[16].mxu0 %vm335_vm1, %v16192_v42  ;;  %v16194_v5 = vld [vmem:[%s19145_s0 + $0x68] sm:$0xff]  }
 0x36f   : > { %v14041_v43 = vpack.c.bf16 %v2582_v22, %v2581_v13  ;;  %v2585_v44 = vmul.f32 2.0, %v11742_v15  ;;  %15243 = vmatprep.mubr.msk.bf16.mxu0 %vm16353_vm0, %v16352_v0 }
 0x370   : > { %11923 = vst.msk [vmem:[%s16753_s27 + $0x218] sm:$0xf] %vm1687_vm2, %v14042_v17  ;;  %v14044_v45 = vpack.c.bf16 %v2586_v10, %v2586_v10 }
 0x371   : > { %11922 = vst [vmem:[%s16753_s27 + $0x210] sm:$0xff] %v14041_v43  ;;  %v14043_v46 = vpack.c.bf16 %v2585_v44, %v2584_v41  ;;  %v2115_v11 = vpop.f32.mrb[168].mxu0  ;;  %v2330_v25 = vpop.f32.mrb[168].mxu1 }
 0x372   : > { %11925 = vst.msk [vmem:[%s16753_s27 + $0x224] sm:$0xf] %vm1687_vm2, %v14044_v45  ;;  %v11744_v20 = vadd.f32 -0.5, %v2115_v11  ;;  %v11746_v47 = vadd.f32 -0.5, %v2330_v25  ;;  %v2117_v48 = vpop.f32.mrb[169].mxu0  ;;  %v15135_v49 = vpop.f32.mrb[169].mxu1 }
 0x373   : > { %11924 = vst [vmem:[%s16753_s27 + $0x21c] sm:$0xff] %v14043_v46  ;;  %v11745_v50 = vadd.f32 -0.5, %v2117_v48  ;;  %v2119_v51 = vpop.f32.mrb[170].mxu0  ;;  %v2333_v52 = vpop.f32.mrb[170].mxu1 }
 0x374   : > { %v2587_v53 = vmul.f32 2.0, %v11744_v20  ;;  %v2589_v54 = vmul.f32 2.0, %v11746_v47  ;;  %v11747_v14 = vadd.f32 -0.5, %v2119_v51  ;;  %v11749_v55 = vadd.f32 -0.5, %v2333_v52  ;;  %v2121_v56 = vpop.f32.mrb[171].mxu0  ;;  %v15136_v57 = vpop.f32.mrb[171].mxu1 }
 0x375   : > { %v2588_v23 = vmul.f32 2.0, %v11745_v50  ;;  %v11748_v58 = vadd.f32 -0.5, %v2121_v56 }
 0x376   : > { %v14046_v59 = vpack.c.bf16 %v2589_v54, %v2589_v54  ;;  %v2590_v60 = vmul.f32 2.0, %v11747_v14  ;;  %v2592_v12 = vmul.f32 2.0, %v11749_v55  ;;  %15244 = vmatmul.mubr.msk.bf16.gmra.mrb[20].mxu0 %vm335_vm1, %v16193_v61  ;;  %v16195_v54 = vld [vmem:[%s19145_s0 + $0x70] sm:$0xff]  }
 0x377   : > { %v14045_v62 = vpack.c.bf16 %v2588_v23, %v2587_v53  ;;  %v2591_v63 = vmul.f32 2.0, %v11748_v58  ;;  %15247 = vmatprep.mubr.msk.bf16.mxu0 %vm16353_vm0, %v16352_v0 }
 0x378   : > { %11927 = vst.msk [vmem:[%s16753_s27 + $0x230] sm:$0xf] %vm1687_vm2, %v14046_v59  ;;  %v14048_v1 = vpack.c.bf16 %v2592_v12, %v2592_v12 }
 0x379   : > { %11926 = vst [vmem:[%s16753_s27 + $0x228] sm:$0xff] %v14045_v62  ;;  %v14047_v3 = vpack.c.bf16 %v2591_v63, %v2590_v60  ;;  %v2125_v16 = vpop.f32.mrb[172].mxu0  ;;  %v2338_v21 = vpop.f32.mrb[172].mxu1 }
 0x37a   : > { %11929 = vst.msk [vmem:[%s16753_s27 + $0x23c] sm:$0xf] %vm1687_vm2, %v14048_v1  ;;  %v11750_v26 = vadd.f32 -0.5, %v2125_v16  ;;  %v11752_v28 = vadd.f32 -0.5, %v2338_v21  ;;  %v2127_v29 = vpop.f32.mrb[173].mxu0  ;;  %v15139_v30 = vpop.f32.mrb[173].mxu1 }
 0x37b   : > { %11928 = vst [vmem:[%s16753_s27 + $0x234] sm:$0xff] %v14047_v3  ;;  %v11751_v31 = vadd.f32 -0.5, %v2127_v29  ;;  %v2129_v32 = vpop.f32.mrb[174].mxu0  ;;  %v2341_v33 = vpop.f32.mrb[174].mxu1 }
 0x37c   : > { %v2593_v34 = vmul.f32 2.0, %v11750_v26  ;;  %v2595_v18 = vmul.f32 2.0, %v11752_v28  ;;  %v11753_v35 = vadd.f32 -0.5, %v2129_v32  ;;  %v11755_v24 = vadd.f32 -0.5, %v2341_v33  ;;  %v2131_v36 = vpop.f32.mrb[175].mxu0  ;;  %v15140_v37 = vpop.f32.mrb[175].mxu1 }
 0x37d   : > { %v2594_v38 = vmul.f32 2.0, %v11751_v31  ;;  %v11754_v39 = vadd.f32 -0.5, %v2131_v36 }
 0x37e   : > { %v14050_v40 = vpack.c.bf16 %v2595_v18, %v2595_v18  ;;  %v2596_v4 = vmul.f32 2.0, %v11753_v35  ;;  %v2598_v13 = vmul.f32 2.0, %v11755_v24  ;;  %15248 = vmatmul.mubr.msk.bf16.gmra.mrb[24].mxu0 %vm335_vm1, %v16194_v5  ;;  %v16196_v18 = vld [vmem:[%s19145_s0 + $0x78] sm:$0xff]  }
 0x37f   : > { %v14049_v6 = vpack.c.bf16 %v2594_v38, %v2593_v34  ;;  %v2597_v7 = vmul.f32 2.0, %v11754_v39  ;;  %15251 = vmatprep.mubr.msk.bf16.mxu0 %vm16353_vm0, %v16352_v0 }
 0x380   : > { %11931 = vst.msk [vmem:[%s16753_s27 + $0x248] sm:$0xf] %vm1687_vm2, %v14050_v40  ;;  %v14052_v8 = vpack.c.bf16 %v2598_v13, %v2598_v13 }
 0x381   : > { %11930 = vst [vmem:[%s16753_s27 + $0x240] sm:$0xff] %v14049_v6  ;;  %v14051_v9 = vpack.c.bf16 %v2597_v7, %v2596_v4  ;;  %v2135_v22 = vpop.f32.mrb[176].mxu0  ;;  %v2346_v15 = vpop.f32.mrb[176].mxu1 }
 0x382   : > { %11933 = vst.msk [vmem:[%s16753_s27 + $0x254] sm:$0xf] %vm1687_vm2, %v14052_v8  ;;  %v11756_v17 = vadd.f32 -0.5, %v2135_v22  ;;  %v11758_v41 = vadd.f32 -0.5, %v2346_v15  ;;  %v2137_v10 = vpop.f32.mrb[177].mxu0  ;;  %v15143_v42 = vpop.f32.mrb[177].mxu1 }
 0x383   : > { %11932 = vst [vmem:[%s16753_s27 + $0x24c] sm:$0xff] %v14051_v9  ;;  %v11757_v43 = vadd.f32 -0.5, %v2137_v10  ;;  %v2139_v44 = vpop.f32.mrb[178].mxu0  ;;  %v2349_v45 = vpop.f32.mrb[178].mxu1 }
 0x384   : > { %v2599_v46 = vmul.f32 2.0, %v11756_v17  ;;  %v2601_v11 = vmul.f32 2.0, %v11758_v41  ;;  %v11759_v25 = vadd.f32 -0.5, %v2139_v44  ;;  %v11761_v20 = vadd.f32 -0.5, %v2349_v45  ;;  %v2141_v47 = vpop.f32.mrb[179].mxu0  ;;  %v15144_v48 = vpop.f32.mrb[179].mxu1 }
 0x385   : > { %v2600_v49 = vmul.f32 2.0, %v11757_v43  ;;  %v11760_v50 = vadd.f32 -0.5, %v2141_v47 }
 0x386   : > { %v14054_v51 = vpack.c.bf16 %v2601_v11, %v2601_v11  ;;  %v2602_v52 = vmul.f32 2.0, %v11759_v25  ;;  %v2604_v53 = vmul.f32 2.0, %v11761_v20  ;;  %15252 = vmatmul.mubr.msk.bf16.gmra.mrb[28].mxu0 %vm335_vm1, %v16195_v54  ;;  %v16197_v11 = vld [vmem:[%s19145_s0 + $0x80] sm:$0xff]  }
 0x387   : > { %v14053_v14 = vpack.c.bf16 %v2600_v49, %v2599_v46  ;;  %v2603_v55 = vmul.f32 2.0, %v11760_v50  ;;  %15255 = vmatprep.mubr.msk.bf16.mxu0 %vm16353_vm0, %v16352_v0 }
 0x388   : > { %11935 = vst.msk [vmem:[%s16753_s27 + $0x260] sm:$0xf] %vm1687_vm2, %v14054_v51  ;;  %v14056_v56 = vpack.c.bf16 %v2604_v53, %v2604_v53 }
 0x389   : > { %11934 = vst [vmem:[%s16753_s27 + $0x258] sm:$0xff] %v14053_v14  ;;  %v14055_v57 = vpack.c.bf16 %v2603_v55, %v2602_v52  ;;  %v2145_v23 = vpop.f32.mrb[180].mxu0  ;;  %v2354_v58 = vpop.f32.mrb[180].mxu1 }
 0x38a   : > { %11937 = vst.msk [vmem:[%s16753_s27 + $0x26c] sm:$0xf] %vm1687_vm2, %v14056_v56  ;;  %v11762_v59 = vadd.f32 -0.5, %v2145_v23  ;;  %v11764_v60 = vadd.f32 -0.5, %v2354_v58  ;;  %v2147_v12 = vpop.f32.mrb[181].mxu0  ;;  %v15147_v61 = vpop.f32.mrb[181].mxu1 }
 0x38b   : > { %11936 = vst [vmem:[%s16753_s27 + $0x264] sm:$0xff] %v14055_v57  ;;  %v11763_v62 = vadd.f32 -0.5, %v2147_v12  ;;  %v2149_v63 = vpop.f32.mrb[182].mxu0  ;;  %v2357_v1 = vpop.f32.mrb[182].mxu1 }
 0x38c   : > { %v2605_v3 = vmul.f32 2.0, %v11762_v59  ;;  %v2607_v16 = vmul.f32 2.0, %v11764_v60  ;;  %v11765_v21 = vadd.f32 -0.5, %v2149_v63  ;;  %v11767_v26 = vadd.f32 -0.5, %v2357_v1  ;;  %v2151_v28 = vpop.f32.mrb[183].mxu0  ;;  %v15148_v29 = vpop.f32.mrb[183].mxu1 }
 0x38d   : > { %v2606_v30 = vmul.f32 2.0, %v11763_v62  ;;  %v11766_v31 = vadd.f32 -0.5, %v2151_v28 }
 0x38e   : > { %v14058_v32 = vpack.c.bf16 %v2607_v16, %v2607_v16  ;;  %v2608_v33 = vmul.f32 2.0, %v11765_v21  ;;  %v2610_v34 = vmul.f32 2.0, %v11767_v26  ;;  %15256 = vmatmul.mubr.msk.bf16.gmra.mrb[32].mxu0 %vm335_vm1, %v16196_v18  ;;  %v16198_v16 = vld [vmem:[%s19145_s0 + $0x88] sm:$0xff]  }
 0x38f   : > { %v14057_v35 = vpack.c.bf16 %v2606_v30, %v2605_v3  ;;  %v2609_v24 = vmul.f32 2.0, %v11766_v31  ;;  %15259 = vmatprep.mubr.msk.bf16.mxu0 %vm16353_vm0, %v16352_v0 }
 0x390   : > { %11939 = vst.msk [vmem:[%s16753_s27 + $0x278] sm:$0xf] %vm1687_vm2, %v14058_v32  ;;  %v14060_v36 = vpack.c.bf16 %v2610_v34, %v2610_v34 }
 0x391   : > { %11938 = vst [vmem:[%s16753_s27 + $0x270] sm:$0xff] %v14057_v35  ;;  %v14059_v37 = vpack.c.bf16 %v2609_v24, %v2608_v33  ;;  %v2155_v38 = vpop.f32.mrb[184].mxu0  ;;  %v2362_v39 = vpop.f32.mrb[184].mxu1 }
 0x392   : > { %11941 = vst.msk [vmem:[%s16753_s27 + $0x284] sm:$0xf] %vm1687_vm2, %v14060_v36  ;;  %v11768_v40 = vadd.f32 -0.5, %v2155_v38  ;;  %v11770_v4 = vadd.f32 -0.5, %v2362_v39  ;;  %v2157_v13 = vpop.f32.mrb[185].mxu0  ;;  %v15151_v5 = vpop.f32.mrb[185].mxu1 }
 0x393   : > { %11940 = vst [vmem:[%s16753_s27 + $0x27c] sm:$0xff] %v14059_v37  ;;  %v11769_v6 = vadd.f32 -0.5, %v2157_v13  ;;  %v2159_v7 = vpop.f32.mrb[186].mxu0  ;;  %v2365_v8 = vpop.f32.mrb[186].mxu1 }
 0x394   : > { %v2611_v9 = vmul.f32 2.0, %v11768_v40  ;;  %v2613_v22 = vmul.f32 2.0, %v11770_v4  ;;  %v11771_v15 = vadd.f32 -0.5, %v2159_v7  ;;  %v11773_v17 = vadd.f32 -0.5, %v2365_v8  ;;  %v2161_v41 = vpop.f32.mrb[187].mxu0  ;;  %v15152_v10 = vpop.f32.mrb[187].mxu1 }
 0x395   : > { %v2612_v42 = vmul.f32 2.0, %v11769_v6  ;;  %v11772_v43 = vadd.f32 -0.5, %v2161_v41 }
 0x396   : > { %v14062_v44 = vpack.c.bf16 %v2613_v22, %v2613_v22  ;;  %v2614_v45 = vmul.f32 2.0, %v11771_v15  ;;  %v2616_v46 = vmul.f32 2.0, %v11773_v17  ;;  %15260 = vmatmul.mubr.msk.bf16.gmra.mrb[36].mxu0 %vm335_vm1, %v16197_v11  ;;  %v16199_v22 = vld [vmem:[%s19145_s0 + $0x90] sm:$0x3f]  }
 0x397   : > { %v14061_v25 = vpack.c.bf16 %v2612_v42, %v2611_v9  ;;  %v2615_v20 = vmul.f32 2.0, %v11772_v43  ;;  %15263 = vmatprep.mubr.msk.bf16.mxu0 %vm16353_vm0, %v16352_v0 }
 0x398   : > { %11943 = vst.msk [vmem:[%s16753_s27 + $0x290] sm:$0xf] %vm1687_vm2, %v14062_v44  ;;  %v14064_v47 = vpack.c.bf16 %v2616_v46, %v2616_v46 }
 0x399   : > { %11942 = vst [vmem:[%s16753_s27 + $0x288] sm:$0xff] %v14061_v25  ;;  %v14063_v48 = vpack.c.bf16 %v2615_v20, %v2614_v45  ;;  %v2165_v49 = vpop.f32.mrb[188].mxu0  ;;  %v2370_v50 = vpop.f32.mrb[188].mxu1 }
 0x39a   : > { %11945 = vst.msk [vmem:[%s16753_s27 + $0x29c] sm:$0xf] %vm1687_vm2, %v14064_v47  ;;  %v11774_v51 = vadd.f32 -0.5, %v2165_v49  ;;  %v11776_v52 = vadd.f32 -0.5, %v2370_v50  ;;  %v2167_v53 = vpop.f32.mrb[189].mxu0  ;;  %v15155_v54 = vpop.f32.mrb[189].mxu1 }
 0x39b   : > { %11944 = vst [vmem:[%s16753_s27 + $0x294] sm:$0xff] %v14063_v48  ;;  %v11775_v14 = vadd.f32 -0.5, %v2167_v53  ;;  %v2169_v55 = vpop.f32.mrb[190].mxu0  ;;  %v2373_v56 = vpop.f32.mrb[190].mxu1 }
 0x39c   : > { %v2617_v57 = vmul.f32 2.0, %v11774_v51  ;;  %v2619_v23 = vmul.f32 2.0, %v11776_v52  ;;  %v11777_v58 = vadd.f32 -0.5, %v2169_v55  ;;  %v11779_v59 = vadd.f32 -0.5, %v2373_v56  ;;  %v2171_v60 = vpop.f32.mrb[191].mxu0  ;;  %v15156_v12 = vpop.f32.mrb[191].mxu1 }
 0x39d   : > { %v2618_v61 = vmul.f32 2.0, %v11775_v14  ;;  %v11778_v62 = vadd.f32 -0.5, %v2171_v60 }
 0x39e   : > { %v14066_v63 = vpack.c.bf16 %v2619_v23, %v2619_v23  ;;  %v2620_v1 = vmul.f32 2.0, %v11777_v58  ;;  %v2622_v3 = vmul.f32 2.0, %v11779_v59  ;;  %15264 = vmatmul.mubr.msk.bf16.gmra.mrb[40].mxu0 %vm335_vm1, %v16198_v16 }
 0x39f   : > { %v14065_v21 = vpack.c.bf16 %v2618_v61, %v2617_v57  ;;  %v2621_v26 = vmul.f32 2.0, %v11778_v62  ;;  %15267 = vmatprep.mubr.msk.bf16.mxu0 %vm16353_vm0, %v16352_v0 }
 0x3a0   : > { %11947 = vst.msk [vmem:[%s16753_s27 + $0x2a8] sm:$0xf] %vm1687_vm2, %v14066_v63  ;;  %v14068_v28 = vpack.c.bf16 %v2622_v3, %v2622_v3 }
 0x3a1   : > { %11946 = vst [vmem:[%s16753_s27 + $0x2a0] sm:$0xff] %v14065_v21  ;;  %v14067_v29 = vpack.c.bf16 %v2621_v26, %v2620_v1  ;;  %v2175_v30 = vpop.f32.mrb[192].mxu0  ;;  %v2378_v31 = vpop.f32.mrb[192].mxu1 }
 0x3a2   : > { %11949 = vst.msk [vmem:[%s16753_s27 + $0x2b4] sm:$0xf] %vm1687_vm2, %v14068_v28  ;;  %v11780_v32 = vadd.f32 -0.5, %v2175_v30  ;;  %v11782_v33 = vadd.f32 -0.5, %v2378_v31  ;;  %v2177_v34 = vpop.f32.mrb[193].mxu0  ;;  %v15159_v18 = vpop.f32.mrb[193].mxu1 }
 0x3a3   : > { %11948 = vst [vmem:[%s16753_s27 + $0x2ac] sm:$0xff] %v14067_v29  ;;  %v11781_v35 = vadd.f32 -0.5, %v2177_v34  ;;  %v2179_v24 = vpop.f32.mrb[194].mxu0  ;;  %v2381_v36 = vpop.f32.mrb[194].mxu1 }
 0x3a4   : > { %v2623_v37 = vmul.f32 2.0, %v11780_v32  ;;  %v2625_v38 = vmul.f32 2.0, %v11782_v33  ;;  %v11783_v39 = vadd.f32 -0.5, %v2179_v24  ;;  %v11785_v40 = vadd.f32 -0.5, %v2381_v36  ;;  %v2181_v4 = vpop.f32.mrb[195].mxu0  ;;  %v15160_v13 = vpop.f32.mrb[195].mxu1 }
 0x3a5   : > { %v2624_v5 = vmul.f32 2.0, %v11781_v35  ;;  %v11784_v6 = vadd.f32 -0.5, %v2181_v4 }
 0x3a6   : > { %v14070_v7 = vpack.c.bf16 %v2625_v38, %v2625_v38  ;;  %v2626_v8 = vmul.f32 2.0, %v11783_v39  ;;  %v2628_v9 = vmul.f32 2.0, %v11785_v40  ;;  %15268 = vmatmul.mubr.msk.bf16.gmra.mrb[44].mxu0 %vm335_vm1, %v16199_v22 }
 0x3a7   : > { %v14069_v15 = vpack.c.bf16 %v2624_v5, %v2623_v37  ;;  %v2627_v17 = vmul.f32 2.0, %v11784_v6  ;;  %15273 = vmatprep.mubr.msk.bf16.mxu0 %vm16353_vm0, %v16352_v0 }
 0x3a8   : > { %11951 = vst.msk [vmem:[%s16753_s27 + $0x2c0] sm:$0xf] %vm1687_vm2, %v14070_v7  ;;  %v14072_v41 = vpack.c.bf16 %v2628_v9, %v2628_v9 }
 0x3a9   : > { %11950 = vst [vmem:[%s16753_s27 + $0x2b8] sm:$0xff] %v14069_v15  ;;  %v14071_v10 = vpack.c.bf16 %v2627_v17, %v2626_v8  ;;  %v2185_v42 = vpop.f32.mrb[196].mxu0  ;;  %v2386_v43 = vpop.f32.mrb[196].mxu1 }
 0x3aa   : > { %11953 = vst.msk [vmem:[%s16753_s27 + $0x2cc] sm:$0xf] %vm1687_vm2, %v14072_v41  ;;  %v11786_v44 = vadd.f32 -0.5, %v2185_v42  ;;  %v11788_v45 = vadd.f32 -0.5, %v2386_v43  ;;  %v2187_v46 = vpop.f32.mrb[197].mxu0  ;;  %v15163_v11 = vpop.f32.mrb[197].mxu1 }
 0x3ab   : > { %11952 = vst [vmem:[%s16753_s27 + $0x2c4] sm:$0xff] %v14071_v10  ;;  %v11787_v25 = vadd.f32 -0.5, %v2187_v46  ;;  %v2189_v20 = vpop.f32.mrb[198].mxu0  ;;  %v2389_v47 = vpop.f32.mrb[198].mxu1 }
 0x3ac   : > { %v2629_v48 = vmul.f32 2.0, %v11786_v44  ;;  %v2631_v49 = vmul.f32 2.0, %v11788_v45  ;;  %v11789_v50 = vadd.f32 -0.5, %v2189_v20  ;;  %v11791_v51 = vadd.f32 -0.5, %v2389_v47  ;;  %v2191_v52 = vpop.f32.mrb[199].mxu0  ;;  %v15164_v53 = vpop.f32.mrb[199].mxu1 }
 0x3ad   : > { %v2630_v54 = vmul.f32 2.0, %v11787_v25  ;;  %v11790_v14 = vadd.f32 -0.5, %v2191_v52 }
 0x3ae   : > { %v14074_v55 = vpack.c.bf16 %v2631_v49, %v2631_v49  ;;  %v2632_v56 = vmul.f32 2.0, %v11789_v50  ;;  %v2634_v57 = vmul.f32 2.0, %v11791_v51 }
 0x3af   : > { %v14073_v23 = vpack.c.bf16 %v2630_v54, %v2629_v48  ;;  %v2633_v58 = vmul.f32 2.0, %v11790_v14 }
 0x3b0   : > { %11955 = vst.msk [vmem:[%s16753_s27 + $0x2d8] sm:$0xf] %vm1687_vm2, %v14074_v55  ;;  %v14076_v59 = vpack.c.bf16 %v2634_v57, %v2634_v57 }
 0x3b1   : > { %11954 = vst [vmem:[%s16753_s27 + $0x2d0] sm:$0xff] %v14073_v23  ;;  %v14075_v60 = vpack.c.bf16 %v2633_v58, %v2632_v56  ;;  %v2195_v12 = vpop.f32.mrb[200].mxu0  ;;  %v2394_v61 = vpop.f32.mrb[200].mxu1 }
 0x3b2   : > { %11957 = vst.msk [vmem:[%s16753_s27 + $0x2e4] sm:$0xf] %vm1687_vm2, %v14076_v59  ;;  %v11792_v62 = vadd.f32 -0.5, %v2195_v12  ;;  %v11794_v63 = vadd.f32 -0.5, %v2394_v61  ;;  %v2197_v1 = vpop.f32.mrb[201].mxu0  ;;  %v15167_v3 = vpop.f32.mrb[201].mxu1 }
 0x3b3   : > { %11956 = vst [vmem:[%s16753_s27 + $0x2dc] sm:$0xff] %v14075_v60  ;;  %v11793_v16 = vadd.f32 -0.5, %v2197_v1  ;;  %v2199_v21 = vpop.f32.mrb[202].mxu0  ;;  %v2397_v26 = vpop.f32.mrb[202].mxu1 }
 0x3b4   : > { %v2635_v28 = vmul.f32 2.0, %v11792_v62  ;;  %v2637_v29 = vmul.f32 2.0, %v11794_v63  ;;  %v11795_v30 = vadd.f32 -0.5, %v2199_v21  ;;  %v11797_v31 = vadd.f32 -0.5, %v2397_v26  ;;  %v2201_v32 = vpop.f32.mrb[203].mxu0  ;;  %v15168_v33 = vpop.f32.mrb[203].mxu1 }
 0x3b5   : > { %v2636_v34 = vmul.f32 2.0, %v11793_v16  ;;  %v11796_v18 = vadd.f32 -0.5, %v2201_v32 }
 0x3b6   : > { %v14078_v35 = vpack.c.bf16 %v2637_v29, %v2637_v29  ;;  %v2638_v24 = vmul.f32 2.0, %v11795_v30  ;;  %v2640_v36 = vmul.f32 2.0, %v11797_v31 }
 0x3b7   : > { %v14077_v37 = vpack.c.bf16 %v2636_v34, %v2635_v28  ;;  %v2639_v38 = vmul.f32 2.0, %v11796_v18 }
 0x3b8   : > { %11959 = vst.msk [vmem:[%s16753_s27 + $0x2f0] sm:$0xf] %vm1687_vm2, %v14078_v35  ;;  %v14080_v39 = vpack.c.bf16 %v2640_v36, %v2640_v36 }
 0x3b9   : > { %11958 = vst [vmem:[%s16753_s27 + $0x2e8] sm:$0xff] %v14077_v37  ;;  %v14079_v40 = vpack.c.bf16 %v2639_v38, %v2638_v24  ;;  %v2205_v4 = vpop.f32.mrb[204].mxu0  ;;  %v2402_v13 = vpop.f32.mrb[204].mxu1 }
 0x3ba   : > { %11961 = vst.msk [vmem:[%s16753_s27 + $0x2fc] sm:$0xf] %vm1687_vm2, %v14080_v39  ;;  %v11798_v5 = vadd.f32 -0.5, %v2205_v4  ;;  %v11800_v6 = vadd.f32 -0.5, %v2402_v13  ;;  %v2207_v7 = vpop.f32.mrb[205].mxu0  ;;  %v15171_v8 = vpop.f32.mrb[205].mxu1 }
 0x3bb   : > { %11960 = vst [vmem:[%s16753_s27 + $0x2f4] sm:$0xff] %v14079_v40  ;;  %v11799_v9 = vadd.f32 -0.5, %v2207_v7  ;;  %v2209_v22 = vpop.f32.mrb[206].mxu0  ;;  %v2405_v15 = vpop.f32.mrb[206].mxu1 }
 0x3bc   : > { %v2641_v17 = vmul.f32 2.0, %v11798_v5  ;;  %v2643_v41 = vmul.f32 2.0, %v11800_v6  ;;  %v11801_v10 = vadd.f32 -0.5, %v2209_v22  ;;  %v11803_v42 = vadd.f32 -0.5, %v2405_v15  ;;  %v2211_v43 = vpop.f32.mrb[207].mxu0  ;;  %v15172_v44 = vpop.f32.mrb[207].mxu1 }
 0x3bd   : > { %v2642_v45 = vmul.f32 2.0, %v11799_v9  ;;  %v11802_v46 = vadd.f32 -0.5, %v2211_v43 }
 0x3be   : > { %v14082_v11 = vpack.c.bf16 %v2643_v41, %v2643_v41  ;;  %v2644_v25 = vmul.f32 2.0, %v11801_v10  ;;  %v2646_v20 = vmul.f32 2.0, %v11803_v42 }
 0x3bf   : > { %v14081_v47 = vpack.c.bf16 %v2642_v45, %v2641_v17  ;;  %v2645_v48 = vmul.f32 2.0, %v11802_v46 }
 0x3c0   : > { %11963 = vst.msk [vmem:[%s16753_s27 + $0x308] sm:$0xf] %vm1687_vm2, %v14082_v11  ;;  %v14084_v49 = vpack.c.bf16 %v2646_v20, %v2646_v20 }
 0x3c1   : > { %11962 = vst [vmem:[%s16753_s27 + $0x300] sm:$0xff] %v14081_v47  ;;  %v14083_v50 = vpack.c.bf16 %v2645_v48, %v2644_v25  ;;  %v2215_v51 = vpop.f32.mrb[208].mxu0  ;;  %v2410_v52 = vpop.f32.mrb[208].mxu1 }
 0x3c2   : > { %11965 = vst.msk [vmem:[%s16753_s27 + $0x314] sm:$0xf] %vm1687_vm2, %v14084_v49  ;;  %v11804_v53 = vadd.f32 -0.5, %v2215_v51  ;;  %v11806_v54 = vadd.f32 -0.5, %v2410_v52  ;;  %v2217_v14 = vpop.f32.mrb[209].mxu0  ;;  %v15175_v55 = vpop.f32.mrb[209].mxu1 }
 0x3c3   : > { %11964 = vst [vmem:[%s16753_s27 + $0x30c] sm:$0xff] %v14083_v50  ;;  %v11805_v56 = vadd.f32 -0.5, %v2217_v14  ;;  %v2219_v57 = vpop.f32.mrb[210].mxu0  ;;  %v2413_v23 = vpop.f32.mrb[210].mxu1 }
 0x3c4   : > { %v2647_v58 = vmul.f32 2.0, %v11804_v53  ;;  %v2649_v59 = vmul.f32 2.0, %v11806_v54  ;;  %v11807_v60 = vadd.f32 -0.5, %v2219_v57  ;;  %v11809_v12 = vadd.f32 -0.5, %v2413_v23  ;;  %v2221_v61 = vpop.f32.mrb[211].mxu0  ;;  %v15176_v62 = vpop.f32.mrb[211].mxu1 }
 0x3c5   : > { %v2648_v63 = vmul.f32 2.0, %v11805_v56  ;;  %v11808_v1 = vadd.f32 -0.5, %v2221_v61 }
 0x3c6   : > { %v14086_v3 = vpack.c.bf16 %v2649_v59, %v2649_v59  ;;  %v2650_v16 = vmul.f32 2.0, %v11807_v60  ;;  %v2652_v21 = vmul.f32 2.0, %v11809_v12 }
 0x3c7   : > { %v14085_v26 = vpack.c.bf16 %v2648_v63, %v2647_v58  ;;  %v2651_v28 = vmul.f32 2.0, %v11808_v1 }
 0x3c8   : > { %11967 = vst.msk [vmem:[%s16753_s27 + $0x320] sm:$0xf] %vm1687_vm2, %v14086_v3  ;;  %v14088_v29 = vpack.c.bf16 %v2652_v21, %v2652_v21 }
 0x3c9   : > { %11966 = vst [vmem:[%s16753_s27 + $0x318] sm:$0xff] %v14085_v26  ;;  %v14087_v30 = vpack.c.bf16 %v2651_v28, %v2650_v16  ;;  %v2225_v31 = vpop.f32.mrb[212].mxu0  ;;  %v2418_v32 = vpop.f32.mrb[212].mxu1 }
 0x3ca   : > { %11969 = vst.msk [vmem:[%s16753_s27 + $0x32c] sm:$0xf] %vm1687_vm2, %v14088_v29  ;;  %v11810_v33 = vadd.f32 -0.5, %v2225_v31  ;;  %v11812_v34 = vadd.f32 -0.5, %v2418_v32  ;;  %v2227_v18 = vpop.f32.mrb[213].mxu0  ;;  %v15179_v35 = vpop.f32.mrb[213].mxu1 }
 0x3cb   : > { %11968 = vst [vmem:[%s16753_s27 + $0x324] sm:$0xff] %v14087_v30  ;;  %v11811_v24 = vadd.f32 -0.5, %v2227_v18  ;;  %v2229_v36 = vpop.f32.mrb[214].mxu0  ;;  %v2421_v37 = vpop.f32.mrb[214].mxu1 }
 0x3cc   : > { %v2653_v38 = vmul.f32 2.0, %v11810_v33  ;;  %v2655_v39 = vmul.f32 2.0, %v11812_v34  ;;  %v11813_v40 = vadd.f32 -0.5, %v2229_v36  ;;  %v11815_v4 = vadd.f32 -0.5, %v2421_v37  ;;  %v2231_v13 = vpop.f32.mrb[215].mxu0  ;;  %v15180_v5 = vpop.f32.mrb[215].mxu1 }
 0x3cd   : > { %v2654_v6 = vmul.f32 2.0, %v11811_v24  ;;  %v11814_v7 = vadd.f32 -0.5, %v2231_v13 }
 0x3ce   : > { %v14090_v8 = vpack.c.bf16 %v2655_v39, %v2655_v39  ;;  %v2656_v9 = vmul.f32 2.0, %v11813_v40  ;;  %v2658_v22 = vmul.f32 2.0, %v11815_v4 }
 0x3cf   : > { %v14089_v15 = vpack.c.bf16 %v2654_v6, %v2653_v38  ;;  %v2657_v17 = vmul.f32 2.0, %v11814_v7 }
 0x3d0   : > { %11971 = vst.msk [vmem:[%s16753_s27 + $0x338] sm:$0xf] %vm1687_vm2, %v14090_v8  ;;  %v14092_v41 = vpack.c.bf16 %v2658_v22, %v2658_v22 }
 0x3d1   : > { %11970 = vst [vmem:[%s16753_s27 + $0x330] sm:$0xff] %v14089_v15  ;;  %v14091_v10 = vpack.c.bf16 %v2657_v17, %v2656_v9  ;;  %v2235_v42 = vpop.f32.mrb[216].mxu0  ;;  %v2426_v43 = vpop.f32.mrb[216].mxu1 }
 0x3d2   : > { %11973 = vst.msk [vmem:[%s16753_s27 + $0x344] sm:$0xf] %vm1687_vm2, %v14092_v41  ;;  %v11816_v44 = vadd.f32 -0.5, %v2235_v42  ;;  %v11818_v45 = vadd.f32 -0.5, %v2426_v43  ;;  %v2237_v46 = vpop.f32.mrb[217].mxu0  ;;  %v15183_v11 = vpop.f32.mrb[217].mxu1 }
 0x3d3   : > { %11972 = vst [vmem:[%s16753_s27 + $0x33c] sm:$0xff] %v14091_v10  ;;  %v11817_v25 = vadd.f32 -0.5, %v2237_v46  ;;  %v2239_v20 = vpop.f32.mrb[218].mxu0  ;;  %v2429_v47 = vpop.f32.mrb[218].mxu1 }
 0x3d4   : > { %v2659_v48 = vmul.f32 2.0, %v11816_v44  ;;  %v2661_v49 = vmul.f32 2.0, %v11818_v45  ;;  %v11819_v50 = vadd.f32 -0.5, %v2239_v20  ;;  %v11821_v51 = vadd.f32 -0.5, %v2429_v47  ;;  %v2241_v52 = vpop.f32.mrb[219].mxu0  ;;  %v15184_v53 = vpop.f32.mrb[219].mxu1 }
 0x3d5   : > { %v2660_v54 = vmul.f32 2.0, %v11817_v25  ;;  %v11820_v14 = vadd.f32 -0.5, %v2241_v52  ;;  %v12315_v52 = vld [vmem:[%s16434_s8 + $0x30] sm:$0xff]  ;;  %v12316_v53 = vld [vmem:[%s16434_s8 + $0x38] sm:$0xff] }
 0x3d6   : > { %v14094_v55 = vpack.c.bf16 %v2661_v49, %v2661_v49  ;;  %v2662_v56 = vmul.f32 2.0, %v11819_v50  ;;  %v2664_v57 = vmul.f32 2.0, %v11821_v51  ;;  %v11984_v51 = vld [vmem:[%s16753_s27 + $0x384] sm:$0x33] }
 0x3d7   : > { %v14093_v23 = vpack.c.bf16 %v2660_v54, %v2659_v48  ;;  %v2663_v58 = vmul.f32 2.0, %v11820_v14  ;;  %v11986_v48 = vld [vmem:[%s16753_s27 + $0x38c] sm:$0x3] }
 0x3d8   : > { %11975 = vst.msk [vmem:[%s16753_s27 + $0x350] sm:$0xf] %vm1687_vm2, %v14094_v55  ;;  %v14096_v59 = vpack.c.bf16 %v2664_v57, %v2664_v57 }
 0x3d9   : > { %11974 = vst [vmem:[%s16753_s27 + $0x348] sm:$0xff] %v14093_v23  ;;  %v14095_v60 = vpack.c.bf16 %v2663_v58, %v2662_v56  ;;  %v2245_v12 = vpop.f32.mrb[220].mxu0  ;;  %v2434_v61 = vpop.f32.mrb[220].mxu1  ;;  %v4503_v58 = vpack.c.bf16 %v12316_v53, %v12315_v52 }
 0x3da   : > { %11977 = vst.msk [vmem:[%s16753_s27 + $0x35c] sm:$0xf] %vm1687_vm2, %v14096_v59  ;;  %v11822_v62 = vadd.f32 -0.5, %v2245_v12  ;;  %v11824_v63 = vadd.f32 -0.5, %v2434_v61  ;;  %v2247_v1 = vpop.f32.mrb[221].mxu0  ;;  %v15187_v3 = vpop.f32.mrb[221].mxu1 }
 0x3db   : > { %11976 = vst [vmem:[%s16753_s27 + $0x354] sm:$0xff] %v14095_v60  ;;  %v11823_v16 = vadd.f32 -0.5, %v2247_v1  ;;  %v2249_v21 = vpop.f32.mrb[222].mxu0  ;;  %v2437_v26 = vpop.f32.mrb[222].mxu1  ;;  %v16200_v12 = vld [vmem:[#allocation2] ss:$12 sps:$4 sm:$0xff]  }
 0x3dc   : > { %v2665_v28 = vmul.f32 2.0, %v11822_v62  ;;  %v2667_v29 = vmul.f32 2.0, %v11824_v63  ;;  %v11825_v30 = vadd.f32 -0.5, %v2249_v21  ;;  %v11827_v31 = vadd.f32 -0.5, %v2437_v26  ;;  %v2251_v32 = vpop.f32.mrb[223].mxu0  ;;  %v15188_v33 = vpop.f32.mrb[223].mxu1 }
 0x3dd   : > { %v2666_v34 = vmul.f32 2.0, %v11823_v16  ;;  %v11826_v18 = vadd.f32 -0.5, %v2251_v32 }
 0x3de   : > { %v14098_v35 = vpack.c.bf16 %v2667_v29, %v2667_v29  ;;  %v2668_v24 = vmul.f32 2.0, %v11825_v30  ;;  %v2670_v36 = vmul.f32 2.0, %v11827_v31 }
 0x3df   : > { %v14097_v37 = vpack.c.bf16 %v2666_v34, %v2665_v28  ;;  %v2669_v38 = vmul.f32 2.0, %v11826_v18 }
 0x3e0   : > { %11979 = vst.msk [vmem:[%s16753_s27 + $0x368] sm:$0xf] %vm1687_vm2, %v14098_v35  ;;  %v14100_v39 = vpack.c.bf16 %v2670_v36, %v2670_v36 }
 0x3e1   : > { %11978 = vst [vmem:[%s16753_s27 + $0x360] sm:$0xff] %v14097_v37  ;;  %v14099_v40 = vpack.c.bf16 %v2669_v38, %v2668_v24  ;;  %v2255_v4 = vpop.f32.mrb[224].mxu0  ;;  %v2442_v13 = vpop.f32.mrb[224].mxu1 }
 0x3e2   : > { %11981 = vst.msk [vmem:[%s16753_s27 + $0x374] sm:$0xf] %vm1687_vm2, %v14100_v39  ;;  %v11828_v5 = vadd.f32 -0.5, %v2255_v4  ;;  %v11830_v6 = vadd.f32 -0.5, %v2442_v13  ;;  %v2257_v7 = vpop.f32.mrb[225].mxu0  ;;  %v15191_v8 = vpop.f32.mrb[225].mxu1 }
 0x3e3   : > { %11980 = vst [vmem:[%s16753_s27 + $0x36c] sm:$0xff] %v14099_v40  ;;  %v11829_v9 = vadd.f32 -0.5, %v2257_v7  ;;  %v2259_v22 = vpop.f32.mrb[226].mxu0  ;;  %v2445_v15 = vpop.f32.mrb[226].mxu1 }
 0x3e4   : > { %v2671_v17 = vmul.f32 2.0, %v11828_v5  ;;  %v2673_v41 = vmul.f32 2.0, %v11830_v6  ;;  %v11831_v10 = vadd.f32 -0.5, %v2259_v22  ;;  %v11833_v42 = vadd.f32 -0.5, %v2445_v15  ;;  %v2261_v43 = vpop.f32.mrb[227].mxu0  ;;  %v15192_v44 = vpop.f32.mrb[227].mxu1 }
 0x3e5   : > { %v2672_v45 = vmul.f32 2.0, %v11829_v9  ;;  %v11832_v46 = vadd.f32 -0.5, %v2261_v43 }
 0x3e6   : > { %v14102_v11 = vpack.c.bf16 %v2673_v41, %v2673_v41  ;;  %v2674_v25 = vmul.f32 2.0, %v11831_v10  ;;  %v2676_v20 = vmul.f32 2.0, %v11833_v42 }
 0x3e7   : > { %v14101_v47 = vpack.c.bf16 %v2672_v45, %v2671_v17  ;;  %v2675_v49 = vmul.f32 2.0, %v11832_v46 }
 0x3e8   : > { %11983 = vst.msk [vmem:[%s16753_s27 + $0x380] sm:$0xf] %vm1687_vm2, %v14102_v11  ;;  %v14104_v50 = vpack.c.bf16 %v2676_v20, %v2676_v20 }
 0x3e9   : > { %11982 = vst [vmem:[%s16753_s27 + $0x378] sm:$0xff] %v14101_v47  ;;  %v14103_v54 = vpack.c.bf16 %v2675_v49, %v2674_v25  ;;  %v3176_v14 = vpop.f32.mrb[228].mxu0 }
 0x3ea   : > { %v3136_v55 = vsel %vm16919_vm10, %v14104_v50, %v11986_v48  ;;  %v15197_v56 = vpop.f32.mrb[229].mxu0 }
 0x3eb   : > { %11987 = vst [vmem:[%s16753_s27 + $0x38c] sm:$0x3] %v3136_v55  ;;  %v3133_v57 = vsel %vm16929_vm11, %v14103_v54, %v11984_v51  ;;  %v3179_v23 = vpop.f32.mrb[230].mxu0 }
 0x3ec   : > { %11985 = vst [vmem:[%s16753_s27 + $0x384] sm:$0x33] %v3133_v57  ;;  %v3327_v59 = vpack.c.bf16 %v3179_v23, %v3176_v14  ;;  %v15198_v60 = vpop.f32.mrb[231].mxu0 }
 0x3ee   : > { %12009 = vmatmul.mubr.msk.bf16.vlgmr.msra.gmra.mrb[228].mxu1 %vm335_vm1, %v3327_v59  ;;  %15274 = vmatmul.mubr.msk.bf16.vlgmr.msra.gmra.mrb[48].mxu0 %vm335_vm1, %v3327_v59 }
 0x3ef   : > { %15350 = vmatpush3.bf16.msra.mxu1 %v4503_v58  ;;  %3445 = vmatprep.mubr.bf16.mxu1 %v16354_v19 }
 0x3f0   : > { %15277 = vmatprep.mubr.msk.bf16.mxu0 %vm16353_vm0, %v16352_v0  ;;  %4766 = vmatpush1.bf16.msra.mxu0 %v16200_v12 }
 0x3f1   : > { %v3184_v61 = vpop.f32.mrb[232].mxu0  ;;  %15427 = vmatprep.subr.bf16.mxu1 %v16352_v0  ;;  %15505 = vmatprep.subr.bf16.mxu0 %v16352_v0 }
 0x3f2   : > { %v15201_v62 = vpop.f32.mrb[233].mxu0 }
 0x3f3   : > { %v3187_v63 = vpop.f32.mrb[234].mxu0 }
 0x3f4   : > { %v3328_v1 = vpack.c.bf16 %v3187_v63, %v3184_v61  ;;  %v15202_v3 = vpop.f32.mrb[235].mxu0 }
 0x3f6   : > { %12010 = vmatmul.mubr.msk.bf16.gmra.mrb[232].mxu1 %vm335_vm1, %v3328_v1  ;;  %15278 = vmatmul.mubr.msk.bf16.gmra.mrb[52].mxu0 %vm335_vm1, %v3328_v1 }
 0x3f7   : > { %3455 = vmatprep.mubr.bf16.mxu1 %v16354_v19  ;;  %15281 = vmatprep.mubr.msk.bf16.mxu0 %vm16353_vm0, %v16352_v0 }
 0x3f9   : > { %v3192_v16 = vpop.f32.mrb[236].mxu0 }
 0x3fa   : > { %v15205_v21 = vpop.f32.mrb[237].mxu0 }
 0x3fb   : > { %v3195_v26 = vpop.f32.mrb[238].mxu0 }
 0x3fc   : > { %v3329_v28 = vpack.c.bf16 %v3195_v26, %v3192_v16  ;;  %v15206_v29 = vpop.f32.mrb[239].mxu0 }
 0x3fe   : > { %12011 = vmatmul.mubr.msk.bf16.gmra.mrb[236].mxu1 %vm335_vm1, %v3329_v28  ;;  %15282 = vmatmul.mubr.msk.bf16.gmra.mrb[56].mxu0 %vm335_vm1, %v3329_v28 }
 0x3ff   : > { %3465 = vmatprep.mubr.bf16.mxu1 %v16354_v19  ;;  %15285 = vmatprep.mubr.msk.bf16.mxu0 %vm16353_vm0, %v16352_v0 }
 0x401   : > { %v3200_v30 = vpop.f32.mrb[240].mxu0 }
 0x402   : > { %v15209_v31 = vpop.f32.mrb[241].mxu0 }
 0x403   : > { %v3203_v32 = vpop.f32.mrb[242].mxu0 }
 0x404   : > { %v3330_v33 = vpack.c.bf16 %v3203_v32, %v3200_v30  ;;  %v15210_v34 = vpop.f32.mrb[243].mxu0 }
 0x406   : > { %12012 = vmatmul.mubr.msk.bf16.gmra.mrb[240].mxu1 %vm335_vm1, %v3330_v33  ;;  %15286 = vmatmul.mubr.msk.bf16.gmra.mrb[60].mxu0 %vm335_vm1, %v3330_v33 }
 0x407   : > { %3475 = vmatprep.mubr.bf16.mxu1 %v16354_v19  ;;  %15289 = vmatprep.mubr.msk.bf16.mxu0 %vm16353_vm0, %v16352_v0 }
 0x409   : > { %v3208_v18 = vpop.f32.mrb[244].mxu0 }
 0x40a   : > { %v15213_v35 = vpop.f32.mrb[245].mxu0 }
 0x40b   : > { %v3211_v24 = vpop.f32.mrb[246].mxu0 }
 0x40c   : > { %v3331_v36 = vpack.c.bf16 %v3211_v24, %v3208_v18  ;;  %v15214_v37 = vpop.f32.mrb[247].mxu0 }
 0x40e   : > { %12013 = vmatmul.mubr.msk.bf16.gmra.mrb[244].mxu1 %vm335_vm1, %v3331_v36  ;;  %15290 = vmatmul.mubr.msk.bf16.gmra.mrb[64].mxu0 %vm335_vm1, %v3331_v36 }
 0x40f   : > { %3485 = vmatprep.mubr.bf16.mxu1 %v16354_v19  ;;  %15293 = vmatprep.mubr.msk.bf16.mxu0 %vm16353_vm0, %v16352_v0 }
 0x411   : > { %v3216_v38 = vpop.f32.mrb[248].mxu0 }
 0x412   : > { %v15217_v39 = vpop.f32.mrb[249].mxu0 }
 0x413   : > { %v3219_v40 = vpop.f32.mrb[250].mxu0 }
 0x414   : > { %v3332_v4 = vpack.c.bf16 %v3219_v40, %v3216_v38  ;;  %v15218_v13 = vpop.f32.mrb[251].mxu0 }
 0x416   : > { %12014 = vmatmul.mubr.msk.bf16.gmra.mrb[248].mxu1 %vm335_vm1, %v3332_v4  ;;  %15294 = vmatmul.mubr.msk.bf16.gmra.mrb[68].mxu0 %vm335_vm1, %v3332_v4 }
 0x417   : > { %3495 = vmatprep.mubr.bf16.mxu1 %v16354_v19  ;;  %15297 = vmatprep.mubr.msk.bf16.mxu0 %vm16353_vm0, %v16352_v0 }
 0x419   : > { %v3224_v5 = vpop.f32.mrb[252].mxu0 }
 0x41a   : > { %v15221_v6 = vpop.f32.mrb[253].mxu0 }
 0x41b   : > { %v3227_v7 = vpop.f32.mrb[254].mxu0 }
 0x41c   : > { %v3333_v8 = vpack.c.bf16 %v3227_v7, %v3224_v5  ;;  %v15222_v9 = vpop.f32.mrb[255].mxu0 }
 0x41e   : > { %12015 = vmatmul.mubr.msk.bf16.gmra.mrb[252].mxu1 %vm335_vm1, %v3333_v8  ;;  %15298 = vmatmul.mubr.msk.bf16.gmra.mrb[72].mxu0 %vm335_vm1, %v3333_v8 }
 0x41f   : > { %3505 = vmatprep.mubr.bf16.mxu1 %v16354_v19  ;;  %15301 = vmatprep.mubr.msk.bf16.mxu0 %vm16353_vm0, %v16352_v0 }
 0x421   : > { %v3232_v22 = vpop.f32.mrb[0].mxu0 }
 0x422   : > { %v15225_v15 = vpop.f32.mrb[1].mxu0 }
 0x423   : > { %v3235_v17 = vpop.f32.mrb[2].mxu0  ;;  %v16202_v15 = vld [vmem:[#allocation2 + $0x8] ss:$12 sps:$4 sm:$0xff]  }
 0x424   : > { %v3334_v41 = vpack.c.bf16 %v3235_v17, %v3232_v22  ;;  %v15226_v10 = vpop.f32.mrb[3].mxu0  ;;  %v16201_v22 = vld [vmem:[%s19145_s0] sm:$0xff]  }
 0x425   : > { %v16203_v17 = vld [vmem:[#allocation2 + $0x4] ss:$12 sps:$4 sm:$0xff]  }
 0x426   : > { %12016 = vmatmul.mubr.msk.bf16.gmra.mrb[0].mxu1 %vm335_vm1, %v3334_v41  ;;  %15302 = vmatmul.mubr.msk.bf16.gmra.mrb[76].mxu0 %vm335_vm1, %v3334_v41  ;;  %v16204_v41 = vld [vmem:[%s19145_s0 + $0x8] sm:$0xff]   ;;  %v16205_v10 = vld [vmem:[%s19145_s0 + $0x10] sm:$0xff]  }
 0x427   : > { %3515 = vmatprep.mubr.bf16.mxu1 %v16354_v19  ;;  %15305 = vmatprep.mubr.msk.bf16.mxu0 %vm16353_vm0, %v16352_v0 }
 0x429   : > { %v3240_v42 = vpop.f32.mrb[4].mxu0 }
 0x42a   : > { %v15229_v43 = vpop.f32.mrb[5].mxu0 }
 0x42b   : > { %v3243_v44 = vpop.f32.mrb[6].mxu0  ;;  %v16207_v43 = vld [vmem:[%s19145_s0 + $0x20] sm:$0xff]  }
 0x42c   : > { %v3335_v45 = vpack.c.bf16 %v3243_v44, %v3240_v42  ;;  %v15230_v46 = vpop.f32.mrb[7].mxu0  ;;  %v16206_v42 = vld [vmem:[%s19145_s0 + $0x18] sm:$0xff]   ;;  %v16208_v44 = vld [vmem:[%s19145_s0 + $0x28] sm:$0xff]  }
 0x42d   : > { %v16210_v46 = vld [vmem:[%s19145_s0 + $0x38] sm:$0xff]  }
 0x42e   : > { %12017 = vmatmul.mubr.msk.bf16.gmra.mrb[4].mxu1 %vm335_vm1, %v3335_v45  ;;  %15306 = vmatmul.mubr.msk.bf16.gmra.mrb[80].mxu0 %vm335_vm1, %v3335_v45  ;;  %v16209_v45 = vld [vmem:[%s19145_s0 + $0x30] sm:$0xff]  }
 0x42f   : > { %3525 = vmatprep.mubr.bf16.mxu1 %v16354_v19  ;;  %15309 = vmatprep.mubr.msk.bf16.mxu0 %vm16353_vm0, %v16352_v0 }
 0x431   : > { %v3248_v11 = vpop.f32.mrb[8].mxu0 }
 0x432   : > { %v15233_v25 = vpop.f32.mrb[9].mxu0 }
 0x433   : > { %v3251_v20 = vpop.f32.mrb[10].mxu0 }
 0x434   : > { %v3336_v47 = vpack.c.bf16 %v3251_v20, %v3248_v11  ;;  %v15234_v48 = vpop.f32.mrb[11].mxu0 }
 0x436   : > { %12018 = vmatmul.mubr.msk.bf16.gmra.mrb[8].mxu1 %vm335_vm1, %v3336_v47  ;;  %15310 = vmatmul.mubr.msk.bf16.gmra.mrb[84].mxu0 %vm335_vm1, %v3336_v47 }
 0x437   : > { %3535 = vmatprep.mubr.bf16.mxu1 %v16354_v19  ;;  %15313 = vmatprep.mubr.msk.bf16.mxu0 %vm16353_vm0, %v16352_v0 }
 0x439   : > { %v3256_v49 = vpop.f32.mrb[12].mxu0 }
 0x43a   : > { %v15237_v50 = vpop.f32.mrb[13].mxu0 }
 0x43b   : > { %v3259_v51 = vpop.f32.mrb[14].mxu0 }
 0x43c   : > { %v3337_v52 = vpack.c.bf16 %v3259_v51, %v3256_v49  ;;  %v15238_v53 = vpop.f32.mrb[15].mxu0 }
 0x43e   : > { %12019 = vmatmul.mubr.msk.bf16.gmra.mrb[12].mxu1 %vm335_vm1, %v3337_v52  ;;  %15314 = vmatmul.mubr.msk.bf16.gmra.mrb[88].mxu0 %vm335_vm1, %v3337_v52 }
 0x43f   : > { %3545 = vmatprep.mubr.bf16.mxu1 %v16354_v19  ;;  %15317 = vmatprep.mubr.msk.bf16.mxu0 %vm16353_vm0, %v16352_v0 }
 0x441   : > { %v3264_v54 = vpop.f32.mrb[16].mxu0 }
 0x442   : > { %v15241_v14 = vpop.f32.mrb[17].mxu0 }
 0x443   : > { %v3267_v55 = vpop.f32.mrb[18].mxu0 }
 0x444   : > { %v3338_v56 = vpack.c.bf16 %v3267_v55, %v3264_v54  ;;  %v15242_v57 = vpop.f32.mrb[19].mxu0 }
 0x446   : > { %12020 = vmatmul.mubr.msk.bf16.gmra.mrb[16].mxu1 %vm335_vm1, %v3338_v56  ;;  %15318 = vmatmul.mubr.msk.bf16.gmra.mrb[92].mxu0 %vm335_vm1, %v3338_v56 }
 0x447   : > { %3555 = vmatprep.mubr.bf16.mxu1 %v16354_v19  ;;  %15321 = vmatprep.mubr.msk.bf16.mxu0 %vm16353_vm0, %v16352_v0 }
 0x449   : > { %v3272_v23 = vpop.f32.mrb[20].mxu0 }
 0x44a   : > { %v15245_v58 = vpop.f32.mrb[21].mxu0 }
 0x44b   : > { %v3275_v59 = vpop.f32.mrb[22].mxu0 }
 0x44c   : > { %v3339_v60 = vpack.c.bf16 %v3275_v59, %v3272_v23  ;;  %v15246_v12 = vpop.f32.mrb[23].mxu0 }
 0x44e   : > { %12021 = vmatmul.mubr.msk.bf16.gmra.mrb[20].mxu1 %vm335_vm1, %v3339_v60  ;;  %15322 = vmatmul.mubr.msk.bf16.gmra.mrb[96].mxu0 %vm335_vm1, %v3339_v60 }
 0x44f   : > { %3565 = vmatprep.mubr.bf16.mxu1 %v16354_v19  ;;  %15325 = vmatprep.mubr.msk.bf16.mxu0 %vm16353_vm0, %v16352_v0 }
 0x451   : > { %v3280_v61 = vpop.f32.mrb[24].mxu0 }
 0x452   : > { %v15249_v62 = vpop.f32.mrb[25].mxu0 }
 0x453   : > { %v3283_v63 = vpop.f32.mrb[26].mxu0 }
 0x454   : > { %v3340_v1 = vpack.c.bf16 %v3283_v63, %v3280_v61  ;;  %v15250_v3 = vpop.f32.mrb[27].mxu0  ;;  %v16211_v61 = vld [vmem:[%s19145_s0 + $0x40] sm:$0xff]  }
 0x456   : > { %12022 = vmatmul.mubr.msk.bf16.gmra.mrb[24].mxu1 %vm335_vm1, %v3340_v1  ;;  %15326 = vmatmul.mubr.msk.bf16.gmra.mrb[100].mxu0 %vm335_vm1, %v3340_v1 }
 0x457   : > { %3575 = vmatprep.mubr.bf16.mxu1 %v16354_v19  ;;  %15329 = vmatprep.mubr.msk.bf16.mxu0 %vm16353_vm0, %v16352_v0 }
 0x459   : > { %v3288_v16 = vpop.f32.mrb[28].mxu0 }
 0x45a   : > { %v15253_v21 = vpop.f32.mrb[29].mxu0 }
 0x45b   : > { %v3291_v26 = vpop.f32.mrb[30].mxu0 }
 0x45c   : > { %v3341_v28 = vpack.c.bf16 %v3291_v26, %v3288_v16  ;;  %v15254_v29 = vpop.f32.mrb[31].mxu0 }
 0x45e   : > { %12023 = vmatmul.mubr.msk.bf16.gmra.mrb[28].mxu1 %vm335_vm1, %v3341_v28  ;;  %15330 = vmatmul.mubr.msk.bf16.gmra.mrb[104].mxu0 %vm335_vm1, %v3341_v28 }
 0x45f   : > { %3585 = vmatprep.mubr.bf16.mxu1 %v16354_v19  ;;  %15333 = vmatprep.mubr.msk.bf16.mxu0 %vm16353_vm0, %v16352_v0 }
 0x461   : > { %v3296_v30 = vpop.f32.mrb[32].mxu0 }
 0x462   : > { %v15257_v31 = vpop.f32.mrb[33].mxu0 }
 0x463   : > { %v3299_v32 = vpop.f32.mrb[34].mxu0 }
 0x464   : > { %v3342_v33 = vpack.c.bf16 %v3299_v32, %v3296_v30  ;;  %v15258_v34 = vpop.f32.mrb[35].mxu0 }
 0x466   : > { %12024 = vmatmul.mubr.msk.bf16.gmra.mrb[32].mxu1 %vm335_vm1, %v3342_v33  ;;  %15334 = vmatmul.mubr.msk.bf16.gmra.mrb[108].mxu0 %vm335_vm1, %v3342_v33 }
 0x467   : > { %3595 = vmatprep.mubr.bf16.mxu1 %v16354_v19  ;;  %15337 = vmatprep.mubr.msk.bf16.mxu0 %vm16353_vm0, %v16352_v0 }
 0x469   : > { %v3304_v18 = vpop.f32.mrb[36].mxu0 }
 0x46a   : > { %v15261_v35 = vpop.f32.mrb[37].mxu0 }
 0x46b   : > { %v3307_v24 = vpop.f32.mrb[38].mxu0 }
 0x46c   : > { %v3343_v36 = vpack.c.bf16 %v3307_v24, %v3304_v18  ;;  %v15262_v37 = vpop.f32.mrb[39].mxu0 }
 0x46e   : > { %12025 = vmatmul.mubr.msk.bf16.gmra.mrb[36].mxu1 %vm335_vm1, %v3343_v36  ;;  %15338 = vmatmul.mubr.msk.bf16.gmra.mrb[112].mxu0 %vm335_vm1, %v3343_v36 }
 0x46f   : > { %3605 = vmatprep.mubr.bf16.mxu1 %v16354_v19  ;;  %15341 = vmatprep.mubr.msk.bf16.mxu0 %vm16353_vm0, %v16352_v0 }
 0x471   : > { %v3312_v38 = vpop.f32.mrb[40].mxu0 }
 0x472   : > { %v15265_v39 = vpop.f32.mrb[41].mxu0 }
 0x473   : > { %v3315_v40 = vpop.f32.mrb[42].mxu0 }
 0x474   : > { %v3344_v4 = vpack.c.bf16 %v3315_v40, %v3312_v38  ;;  %v15266_v13 = vpop.f32.mrb[43].mxu0 }
 0x476   : > { %12026 = vmatmul.mubr.msk.bf16.gmra.mrb[40].mxu1 %vm335_vm1, %v3344_v4  ;;  %15342 = vmatmul.mubr.msk.bf16.gmra.mrb[116].mxu0 %vm335_vm1, %v3344_v4 }
 0x477   : > { %3615 = vmatprep.mubr.bf16.mxu1 %v16354_v19  ;;  %15345 = vmatprep.mubr.msk.bf16.mxu0 %vm16353_vm0, %v16352_v0 }
 0x479   : > { %v3320_v5 = vpop.f32.mrb[44].mxu0 }
 0x47a   : > { %v15269_v6 = vpop.f32.mrb[45].mxu0 }
 0x47b   : > { %v3323_v7 = vpop.f32.mrb[46].mxu0 }
 0x47c   : > { %v3345_v8 = vpack.c.bf16 %v3323_v7, %v3320_v5  ;;  %v15270_v9 = vpop.f32.mrb[47].mxu0  ;;  %v16212_v5 = vld [vmem:[%s19145_s0 + $0x48] sm:$0xff]  }
 0x47e   : > { %12027 = vmatmul.mubr.msk.bf16.gmra.mrb[44].mxu1 %vm335_vm1, %v3345_v8  ;;  %15346 = vmatmul.mubr.msk.bf16.gmra.mrb[120].mxu0 %vm335_vm1, %v3345_v8 }
 0x47f   : > { %15351 = vmatprep.mubr.msk.bf16.mxu1 %vm16353_vm0, %v16352_v0  ;;  %4797 = vmatprep.mubr.bf16.mxu0 %v16354_v19 }
 0x486   : > { %15352 = vmatmul.mubr.msk.bf16.vlgmr.msra.gmra.mrb[48].mxu1 %vm335_vm1, %v16201_v22 }
 0x487   : > { %15355 = vmatprep.mubr.msk.bf16.mxu1 %vm16353_vm0, %v16352_v0  ;;  %15428 = vmatpush3.bf16.msra.mxu1 %v16202_v15 }
 0x488   : > { %6127 = vmatprep.subr.bf16.mxu1 %v16203_v17 }
 0x48e   : > { %15356 = vmatmul.mubr.msk.bf16.gmra.mrb[52].mxu1 %vm335_vm1, %v16204_v41 }
 0x48f   : > { %15359 = vmatprep.mubr.msk.bf16.mxu1 %vm16353_vm0, %v16352_v0 }
 0x496   : > { %15360 = vmatmul.mubr.msk.bf16.gmra.mrb[56].mxu1 %vm335_vm1, %v16205_v10 }
 0x497   : > { %15363 = vmatprep.mubr.msk.bf16.mxu1 %vm16353_vm0, %v16352_v0 }
 0x49e   : > { %15364 = vmatmul.mubr.msk.bf16.gmra.mrb[60].mxu1 %vm335_vm1, %v16206_v42 }
 0x49f   : > { %15367 = vmatprep.mubr.msk.bf16.mxu1 %vm16353_vm0, %v16352_v0 }
 0x4a6   : > { %15368 = vmatmul.mubr.msk.bf16.gmra.mrb[64].mxu1 %vm335_vm1, %v16207_v43 }
 0x4a7   : > { %15371 = vmatprep.mubr.msk.bf16.mxu1 %vm16353_vm0, %v16352_v0 }
 0x4ae   : > { %15372 = vmatmul.mubr.msk.bf16.gmra.mrb[68].mxu1 %vm335_vm1, %v16208_v44 }
 0x4af   : > { %15375 = vmatprep.mubr.msk.bf16.mxu1 %vm16353_vm0, %v16352_v0 }
 0x4b6   : > { %15376 = vmatmul.mubr.msk.bf16.gmra.mrb[72].mxu1 %vm335_vm1, %v16209_v45 }
 0x4b7   : > { %15379 = vmatprep.mubr.msk.bf16.mxu1 %vm16353_vm0, %v16352_v0 }
 0x4be   : > { %15380 = vmatmul.mubr.msk.bf16.gmra.mrb[76].mxu1 %vm335_vm1, %v16210_v46 }
 0x4bf   : > { %15383 = vmatprep.mubr.msk.bf16.mxu1 %vm16353_vm0, %v16352_v0 }
 0x4c1   : > { %v3437_v11 = vpop.f32.mrb[228].mxu1  ;;  %v3660_v25 = vpop.f32.mrb[48].mxu0 }
 0x4c2   : > { %v12047_v20 = vadd.f32 -0.5, %v3437_v11  ;;  %v12049_v47 = vadd.f32 -0.5, %v3660_v25  ;;  %v3439_v48 = vpop.f32.mrb[229].mxu1  ;;  %v15275_v49 = vpop.f32.mrb[49].mxu0 }
 0x4c3   : > { %v12048_v50 = vadd.f32 -0.5, %v3439_v48  ;;  %v3441_v51 = vpop.f32.mrb[230].mxu1  ;;  %v3663_v52 = vpop.f32.mrb[50].mxu0 }
 0x4c4   : > { %v3925_v53 = vmul.f32 2.0, %v12047_v20  ;;  %v3927_v54 = vmul.f32 2.0, %v12049_v47  ;;  %v12050_v14 = vadd.f32 -0.5, %v3441_v51  ;;  %v12052_v55 = vadd.f32 -0.5, %v3663_v52  ;;  %v3443_v56 = vpop.f32.mrb[231].mxu1  ;;  %v15276_v57 = vpop.f32.mrb[51].mxu0 }
 0x4c5   : > { %v3926_v23 = vmul.f32 2.0, %v12048_v50  ;;  %v12051_v58 = vadd.f32 -0.5, %v3443_v56 }
 0x4c6   : > { %v14106_v59 = vpack.c.bf16 %v3927_v54, %v3927_v54  ;;  %v3928_v60 = vmul.f32 2.0, %v12050_v14  ;;  %v3930_v12 = vmul.f32 2.0, %v12052_v55  ;;  %15384 = vmatmul.mubr.msk.bf16.gmra.mrb[80].mxu1 %vm335_vm1, %v16211_v61  ;;  %v16213_v54 = vld [vmem:[%s19145_s0 + $0x50] sm:$0xff]  }
 0x4c7   : > { %v14105_v62 = vpack.c.bf16 %v3926_v23, %v3925_v53  ;;  %v3929_v63 = vmul.f32 2.0, %v12051_v58  ;;  %15387 = vmatprep.mubr.msk.bf16.mxu1 %vm16353_vm0, %v16352_v0 }
 0x4c8   : > { %12238 = vst.msk [vmem:[%s16753_s27 + $0x398] sm:$0xf] %vm1687_vm2, %v14106_v59  ;;  %v14108_v1 = vpack.c.bf16 %v3930_v12, %v3930_v12 }
 0x4c9   : > { %12237 = vst [vmem:[%s16753_s27 + $0x390] sm:$0xff] %v14105_v62  ;;  %v14107_v3 = vpack.c.bf16 %v3929_v63, %v3928_v60  ;;  %v3447_v16 = vpop.f32.mrb[232].mxu1  ;;  %v3668_v21 = vpop.f32.mrb[52].mxu0 }
 0x4ca   : > { %12240 = vst.msk [vmem:[%s16753_s27 + $0x3a4] sm:$0xf] %vm1687_vm2, %v14108_v1  ;;  %v12053_v26 = vadd.f32 -0.5, %v3447_v16  ;;  %v12055_v28 = vadd.f32 -0.5, %v3668_v21  ;;  %v3449_v29 = vpop.f32.mrb[233].mxu1  ;;  %v15279_v30 = vpop.f32.mrb[53].mxu0 }
 0x4cb   : > { %12239 = vst [vmem:[%s16753_s27 + $0x39c] sm:$0xff] %v14107_v3  ;;  %v12054_v31 = vadd.f32 -0.5, %v3449_v29  ;;  %v3451_v32 = vpop.f32.mrb[234].mxu1  ;;  %v3671_v33 = vpop.f32.mrb[54].mxu0 }
 0x4cc   : > { %v3931_v34 = vmul.f32 2.0, %v12053_v26  ;;  %v3933_v18 = vmul.f32 2.0, %v12055_v28  ;;  %v12056_v35 = vadd.f32 -0.5, %v3451_v32  ;;  %v12058_v24 = vadd.f32 -0.5, %v3671_v33  ;;  %v3453_v36 = vpop.f32.mrb[235].mxu1  ;;  %v15280_v37 = vpop.f32.mrb[55].mxu0 }
 0x4cd   : > { %v3932_v38 = vmul.f32 2.0, %v12054_v31  ;;  %v12057_v39 = vadd.f32 -0.5, %v3453_v36 }
 0x4ce   : > { %v14110_v40 = vpack.c.bf16 %v3933_v18, %v3933_v18  ;;  %v3934_v4 = vmul.f32 2.0, %v12056_v35  ;;  %v3936_v13 = vmul.f32 2.0, %v12058_v24  ;;  %15388 = vmatmul.mubr.msk.bf16.gmra.mrb[84].mxu1 %vm335_vm1, %v16212_v5  ;;  %v16214_v18 = vld [vmem:[%s19145_s0 + $0x58] sm:$0xff]  }
 0x4cf   : > { %v14109_v6 = vpack.c.bf16 %v3932_v38, %v3931_v34  ;;  %v3935_v7 = vmul.f32 2.0, %v12057_v39  ;;  %15391 = vmatprep.mubr.msk.bf16.mxu1 %vm16353_vm0, %v16352_v0 }
 0x4d0   : > { %12242 = vst.msk [vmem:[%s16753_s27 + $0x3b0] sm:$0xf] %vm1687_vm2, %v14110_v40  ;;  %v14112_v8 = vpack.c.bf16 %v3936_v13, %v3936_v13 }
 0x4d1   : > { %12241 = vst [vmem:[%s16753_s27 + $0x3a8] sm:$0xff] %v14109_v6  ;;  %v14111_v9 = vpack.c.bf16 %v3935_v7, %v3934_v4  ;;  %v3457_v22 = vpop.f32.mrb[236].mxu1  ;;  %v3676_v15 = vpop.f32.mrb[56].mxu0 }
 0x4d2   : > { %12244 = vst.msk [vmem:[%s16753_s27 + $0x3bc] sm:$0xf] %vm1687_vm2, %v14112_v8  ;;  %v12059_v17 = vadd.f32 -0.5, %v3457_v22  ;;  %v12061_v41 = vadd.f32 -0.5, %v3676_v15  ;;  %v3459_v10 = vpop.f32.mrb[237].mxu1  ;;  %v15283_v42 = vpop.f32.mrb[57].mxu0 }
 0x4d3   : > { %12243 = vst [vmem:[%s16753_s27 + $0x3b4] sm:$0xff] %v14111_v9  ;;  %v12060_v43 = vadd.f32 -0.5, %v3459_v10  ;;  %v3461_v44 = vpop.f32.mrb[238].mxu1  ;;  %v3679_v45 = vpop.f32.mrb[58].mxu0 }
 0x4d4   : > { %v3937_v46 = vmul.f32 2.0, %v12059_v17  ;;  %v3939_v11 = vmul.f32 2.0, %v12061_v41  ;;  %v12062_v25 = vadd.f32 -0.5, %v3461_v44  ;;  %v12064_v20 = vadd.f32 -0.5, %v3679_v45  ;;  %v3463_v47 = vpop.f32.mrb[239].mxu1  ;;  %v15284_v48 = vpop.f32.mrb[59].mxu0 }
 0x4d5   : > { %v3938_v49 = vmul.f32 2.0, %v12060_v43  ;;  %v12063_v50 = vadd.f32 -0.5, %v3463_v47 }
 0x4d6   : > { %v14114_v51 = vpack.c.bf16 %v3939_v11, %v3939_v11  ;;  %v3940_v52 = vmul.f32 2.0, %v12062_v25  ;;  %v3942_v53 = vmul.f32 2.0, %v12064_v20  ;;  %15392 = vmatmul.mubr.msk.bf16.gmra.mrb[88].mxu1 %vm335_vm1, %v16213_v54  ;;  %v16215_v11 = vld [vmem:[%s19145_s0 + $0x60] sm:$0xff]  }
 0x4d7   : > { %v14113_v14 = vpack.c.bf16 %v3938_v49, %v3937_v46  ;;  %v3941_v55 = vmul.f32 2.0, %v12063_v50  ;;  %15395 = vmatprep.mubr.msk.bf16.mxu1 %vm16353_vm0, %v16352_v0 }
 0x4d8   : > { %12246 = vst.msk [vmem:[%s16753_s27 + $0x3c8] sm:$0xf] %vm1687_vm2, %v14114_v51  ;;  %v14116_v56 = vpack.c.bf16 %v3942_v53, %v3942_v53 }
 0x4d9   : > { %12245 = vst [vmem:[%s16753_s27 + $0x3c0] sm:$0xff] %v14113_v14  ;;  %v14115_v57 = vpack.c.bf16 %v3941_v55, %v3940_v52  ;;  %v3467_v23 = vpop.f32.mrb[240].mxu1  ;;  %v3684_v58 = vpop.f32.mrb[60].mxu0 }
 0x4da   : > { %12248 = vst.msk [vmem:[%s16753_s27 + $0x3d4] sm:$0xf] %vm1687_vm2, %v14116_v56  ;;  %v12065_v59 = vadd.f32 -0.5, %v3467_v23  ;;  %v12067_v60 = vadd.f32 -0.5, %v3684_v58  ;;  %v3469_v12 = vpop.f32.mrb[241].mxu1  ;;  %v15287_v61 = vpop.f32.mrb[61].mxu0 }
 0x4db   : > { %12247 = vst [vmem:[%s16753_s27 + $0x3cc] sm:$0xff] %v14115_v57  ;;  %v12066_v62 = vadd.f32 -0.5, %v3469_v12  ;;  %v3471_v63 = vpop.f32.mrb[242].mxu1  ;;  %v3687_v1 = vpop.f32.mrb[62].mxu0 }
 0x4dc   : > { %v3943_v3 = vmul.f32 2.0, %v12065_v59  ;;  %v3945_v16 = vmul.f32 2.0, %v12067_v60  ;;  %v12068_v21 = vadd.f32 -0.5, %v3471_v63  ;;  %v12070_v26 = vadd.f32 -0.5, %v3687_v1  ;;  %v3473_v28 = vpop.f32.mrb[243].mxu1  ;;  %v15288_v29 = vpop.f32.mrb[63].mxu0 }
 0x4dd   : > { %v3944_v30 = vmul.f32 2.0, %v12066_v62  ;;  %v12069_v31 = vadd.f32 -0.5, %v3473_v28 }
 0x4de   : > { %v14118_v32 = vpack.c.bf16 %v3945_v16, %v3945_v16  ;;  %v3946_v33 = vmul.f32 2.0, %v12068_v21  ;;  %v3948_v34 = vmul.f32 2.0, %v12070_v26  ;;  %15396 = vmatmul.mubr.msk.bf16.gmra.mrb[92].mxu1 %vm335_vm1, %v16214_v18  ;;  %v16216_v16 = vld [vmem:[%s19145_s0 + $0x68] sm:$0xff]  }
 0x4df   : > { %v14117_v35 = vpack.c.bf16 %v3944_v30, %v3943_v3  ;;  %v3947_v24 = vmul.f32 2.0, %v12069_v31  ;;  %15399 = vmatprep.mubr.msk.bf16.mxu1 %vm16353_vm0, %v16352_v0 }
 0x4e0   : > { %12250 = vst.msk [vmem:[%s16753_s27 + $0x3e0] sm:$0xf] %vm1687_vm2, %v14118_v32  ;;  %v14120_v36 = vpack.c.bf16 %v3948_v34, %v3948_v34 }
 0x4e1   : > { %12249 = vst [vmem:[%s16753_s27 + $0x3d8] sm:$0xff] %v14117_v35  ;;  %v14119_v37 = vpack.c.bf16 %v3947_v24, %v3946_v33  ;;  %v3477_v38 = vpop.f32.mrb[244].mxu1  ;;  %v3692_v39 = vpop.f32.mrb[64].mxu0 }
 0x4e2   : > { %12252 = vst.msk [vmem:[%s16753_s27 + $0x3ec] sm:$0xf] %vm1687_vm2, %v14120_v36  ;;  %v12071_v40 = vadd.f32 -0.5, %v3477_v38  ;;  %v12073_v4 = vadd.f32 -0.5, %v3692_v39  ;;  %v3479_v13 = vpop.f32.mrb[245].mxu1  ;;  %v15291_v5 = vpop.f32.mrb[65].mxu0 }
 0x4e3   : > { %12251 = vst [vmem:[%s16753_s27 + $0x3e4] sm:$0xff] %v14119_v37  ;;  %v12072_v6 = vadd.f32 -0.5, %v3479_v13  ;;  %v3481_v7 = vpop.f32.mrb[246].mxu1  ;;  %v3695_v8 = vpop.f32.mrb[66].mxu0 }
 0x4e4   : > { %v3949_v9 = vmul.f32 2.0, %v12071_v40  ;;  %v3951_v22 = vmul.f32 2.0, %v12073_v4  ;;  %v12074_v15 = vadd.f32 -0.5, %v3481_v7  ;;  %v12076_v17 = vadd.f32 -0.5, %v3695_v8  ;;  %v3483_v41 = vpop.f32.mrb[247].mxu1  ;;  %v15292_v10 = vpop.f32.mrb[67].mxu0 }
 0x4e5   : > { %v3950_v42 = vmul.f32 2.0, %v12072_v6  ;;  %v12075_v43 = vadd.f32 -0.5, %v3483_v41 }
 0x4e6   : > { %v14122_v44 = vpack.c.bf16 %v3951_v22, %v3951_v22  ;;  %v3952_v45 = vmul.f32 2.0, %v12074_v15  ;;  %v3954_v46 = vmul.f32 2.0, %v12076_v17  ;;  %15400 = vmatmul.mubr.msk.bf16.gmra.mrb[96].mxu1 %vm335_vm1, %v16215_v11  ;;  %v16217_v22 = vld [vmem:[%s19145_s0 + $0x70] sm:$0xff]  }
 0x4e7   : > { %v14121_v25 = vpack.c.bf16 %v3950_v42, %v3949_v9  ;;  %v3953_v20 = vmul.f32 2.0, %v12075_v43  ;;  %15403 = vmatprep.mubr.msk.bf16.mxu1 %vm16353_vm0, %v16352_v0 }
 0x4e8   : > { %12254 = vst.msk [vmem:[%s16753_s27 + $0x3f8] sm:$0xf] %vm1687_vm2, %v14122_v44  ;;  %v14124_v47 = vpack.c.bf16 %v3954_v46, %v3954_v46 }
 0x4e9   : > { %12253 = vst [vmem:[%s16753_s27 + $0x3f0] sm:$0xff] %v14121_v25  ;;  %v14123_v48 = vpack.c.bf16 %v3953_v20, %v3952_v45  ;;  %v3487_v49 = vpop.f32.mrb[248].mxu1  ;;  %v3700_v50 = vpop.f32.mrb[68].mxu0 }
 0x4ea   : > { %12256 = vst.msk [vmem:[%s16753_s27 + $0x404] sm:$0xf] %vm1687_vm2, %v14124_v47  ;;  %v12077_v51 = vadd.f32 -0.5, %v3487_v49  ;;  %v12079_v52 = vadd.f32 -0.5, %v3700_v50  ;;  %v3489_v53 = vpop.f32.mrb[249].mxu1  ;;  %v15295_v54 = vpop.f32.mrb[69].mxu0 }
 0x4eb   : > { %12255 = vst [vmem:[%s16753_s27 + $0x3fc] sm:$0xff] %v14123_v48  ;;  %v12078_v14 = vadd.f32 -0.5, %v3489_v53  ;;  %v3491_v55 = vpop.f32.mrb[250].mxu1  ;;  %v3703_v56 = vpop.f32.mrb[70].mxu0 }
 0x4ec   : > { %v3955_v57 = vmul.f32 2.0, %v12077_v51  ;;  %v3957_v23 = vmul.f32 2.0, %v12079_v52  ;;  %v12080_v58 = vadd.f32 -0.5, %v3491_v55  ;;  %v12082_v59 = vadd.f32 -0.5, %v3703_v56  ;;  %v3493_v60 = vpop.f32.mrb[251].mxu1  ;;  %v15296_v12 = vpop.f32.mrb[71].mxu0 }
 0x4ed   : > { %v3956_v61 = vmul.f32 2.0, %v12078_v14  ;;  %v12081_v62 = vadd.f32 -0.5, %v3493_v60 }
 0x4ee   : > { %v14126_v63 = vpack.c.bf16 %v3957_v23, %v3957_v23  ;;  %v3958_v1 = vmul.f32 2.0, %v12080_v58  ;;  %v3960_v3 = vmul.f32 2.0, %v12082_v59  ;;  %15404 = vmatmul.mubr.msk.bf16.gmra.mrb[100].mxu1 %vm335_vm1, %v16216_v16  ;;  %v16218_v23 = vld [vmem:[%s19145_s0 + $0x78] sm:$0xff]  }
 0x4ef   : > { %v14125_v21 = vpack.c.bf16 %v3956_v61, %v3955_v57  ;;  %v3959_v26 = vmul.f32 2.0, %v12081_v62  ;;  %15407 = vmatprep.mubr.msk.bf16.mxu1 %vm16353_vm0, %v16352_v0 }
 0x4f0   : > { %12258 = vst.msk [vmem:[%s16753_s27 + $0x410] sm:$0xf] %vm1687_vm2, %v14126_v63  ;;  %v14128_v28 = vpack.c.bf16 %v3960_v3, %v3960_v3 }
 0x4f1   : > { %12257 = vst [vmem:[%s16753_s27 + $0x408] sm:$0xff] %v14125_v21  ;;  %v14127_v29 = vpack.c.bf16 %v3959_v26, %v3958_v1  ;;  %v3497_v30 = vpop.f32.mrb[252].mxu1  ;;  %v3708_v31 = vpop.f32.mrb[72].mxu0 }
 0x4f2   : > { %12260 = vst.msk [vmem:[%s16753_s27 + $0x41c] sm:$0xf] %vm1687_vm2, %v14128_v28  ;;  %v12083_v32 = vadd.f32 -0.5, %v3497_v30  ;;  %v12085_v33 = vadd.f32 -0.5, %v3708_v31  ;;  %v3499_v34 = vpop.f32.mrb[253].mxu1  ;;  %v15299_v18 = vpop.f32.mrb[73].mxu0 }
 0x4f3   : > { %12259 = vst [vmem:[%s16753_s27 + $0x414] sm:$0xff] %v14127_v29  ;;  %v12084_v35 = vadd.f32 -0.5, %v3499_v34  ;;  %v3501_v24 = vpop.f32.mrb[254].mxu1  ;;  %v3711_v36 = vpop.f32.mrb[74].mxu0 }
 0x4f4   : > { %v3961_v37 = vmul.f32 2.0, %v12083_v32  ;;  %v3963_v38 = vmul.f32 2.0, %v12085_v33  ;;  %v12086_v39 = vadd.f32 -0.5, %v3501_v24  ;;  %v12088_v40 = vadd.f32 -0.5, %v3711_v36  ;;  %v3503_v4 = vpop.f32.mrb[255].mxu1  ;;  %v15300_v13 = vpop.f32.mrb[75].mxu0 }
 0x4f5   : > { %v3962_v5 = vmul.f32 2.0, %v12084_v35  ;;  %v12087_v6 = vadd.f32 -0.5, %v3503_v4 }
 0x4f6   : > { %v14130_v7 = vpack.c.bf16 %v3963_v38, %v3963_v38  ;;  %v3964_v8 = vmul.f32 2.0, %v12086_v39  ;;  %v3966_v9 = vmul.f32 2.0, %v12088_v40  ;;  %15408 = vmatmul.mubr.msk.bf16.gmra.mrb[104].mxu1 %vm335_vm1, %v16217_v22  ;;  %v16219_v38 = vld [vmem:[%s19145_s0 + $0x80] sm:$0xff]  }
 0x4f7   : > { %v14129_v15 = vpack.c.bf16 %v3962_v5, %v3961_v37  ;;  %v3965_v17 = vmul.f32 2.0, %v12087_v6  ;;  %15411 = vmatprep.mubr.msk.bf16.mxu1 %vm16353_vm0, %v16352_v0 }
 0x4f8   : > { %12262 = vst.msk [vmem:[%s16753_s27 + $0x428] sm:$0xf] %vm1687_vm2, %v14130_v7  ;;  %v14132_v41 = vpack.c.bf16 %v3966_v9, %v3966_v9 }
 0x4f9   : > { %12261 = vst [vmem:[%s16753_s27 + $0x420] sm:$0xff] %v14129_v15  ;;  %v14131_v10 = vpack.c.bf16 %v3965_v17, %v3964_v8  ;;  %v3507_v42 = vpop.f32.mrb[0].mxu1  ;;  %v3716_v43 = vpop.f32.mrb[76].mxu0 }
 0x4fa   : > { %12264 = vst.msk [vmem:[%s16753_s27 + $0x434] sm:$0xf] %vm1687_vm2, %v14132_v41  ;;  %v12089_v44 = vadd.f32 -0.5, %v3507_v42  ;;  %v12091_v45 = vadd.f32 -0.5, %v3716_v43  ;;  %v3509_v46 = vpop.f32.mrb[1].mxu1  ;;  %v15303_v11 = vpop.f32.mrb[77].mxu0 }
 0x4fb   : > { %12263 = vst [vmem:[%s16753_s27 + $0x42c] sm:$0xff] %v14131_v10  ;;  %v12090_v25 = vadd.f32 -0.5, %v3509_v46  ;;  %v3511_v20 = vpop.f32.mrb[2].mxu1  ;;  %v3719_v47 = vpop.f32.mrb[78].mxu0 }
 0x4fc   : > { %v3967_v48 = vmul.f32 2.0, %v12089_v44  ;;  %v3969_v49 = vmul.f32 2.0, %v12091_v45  ;;  %v12092_v50 = vadd.f32 -0.5, %v3511_v20  ;;  %v12094_v51 = vadd.f32 -0.5, %v3719_v47  ;;  %v3513_v52 = vpop.f32.mrb[3].mxu1  ;;  %v15304_v53 = vpop.f32.mrb[79].mxu0 }
 0x4fd   : > { %v3968_v54 = vmul.f32 2.0, %v12090_v25  ;;  %v12093_v14 = vadd.f32 -0.5, %v3513_v52 }
 0x4fe   : > { %v14134_v55 = vpack.c.bf16 %v3969_v49, %v3969_v49  ;;  %v3970_v56 = vmul.f32 2.0, %v12092_v50  ;;  %v3972_v57 = vmul.f32 2.0, %v12094_v51  ;;  %15412 = vmatmul.mubr.msk.bf16.gmra.mrb[108].mxu1 %vm335_vm1, %v16218_v23  ;;  %v16220_v49 = vld [vmem:[%s19145_s0 + $0x88] sm:$0xff]  }
 0x4ff   : > { %v14133_v58 = vpack.c.bf16 %v3968_v54, %v3967_v48  ;;  %v3971_v59 = vmul.f32 2.0, %v12093_v14  ;;  %15415 = vmatprep.mubr.msk.bf16.mxu1 %vm16353_vm0, %v16352_v0 }
 0x500   : > { %12266 = vst.msk [vmem:[%s16753_s27 + $0x440] sm:$0xf] %vm1687_vm2, %v14134_v55  ;;  %v14136_v60 = vpack.c.bf16 %v3972_v57, %v3972_v57 }
 0x501   : > { %12265 = vst [vmem:[%s16753_s27 + $0x438] sm:$0xff] %v14133_v58  ;;  %v14135_v12 = vpack.c.bf16 %v3971_v59, %v3970_v56  ;;  %v3517_v61 = vpop.f32.mrb[4].mxu1  ;;  %v3724_v62 = vpop.f32.mrb[80].mxu0 }
 0x502   : > { %12268 = vst.msk [vmem:[%s16753_s27 + $0x44c] sm:$0xf] %vm1687_vm2, %v14136_v60  ;;  %v12095_v63 = vadd.f32 -0.5, %v3517_v61  ;;  %v12097_v1 = vadd.f32 -0.5, %v3724_v62  ;;  %v3519_v3 = vpop.f32.mrb[5].mxu1  ;;  %v15307_v16 = vpop.f32.mrb[81].mxu0 }
 0x503   : > { %12267 = vst [vmem:[%s16753_s27 + $0x444] sm:$0xff] %v14135_v12  ;;  %v12096_v21 = vadd.f32 -0.5, %v3519_v3  ;;  %v3521_v26 = vpop.f32.mrb[6].mxu1  ;;  %v3727_v28 = vpop.f32.mrb[82].mxu0 }
 0x504   : > { %v3973_v29 = vmul.f32 2.0, %v12095_v63  ;;  %v3975_v30 = vmul.f32 2.0, %v12097_v1  ;;  %v12098_v31 = vadd.f32 -0.5, %v3521_v26  ;;  %v12100_v32 = vadd.f32 -0.5, %v3727_v28  ;;  %v3523_v33 = vpop.f32.mrb[7].mxu1  ;;  %v15308_v34 = vpop.f32.mrb[83].mxu0 }
 0x505   : > { %v3974_v18 = vmul.f32 2.0, %v12096_v21  ;;  %v12099_v35 = vadd.f32 -0.5, %v3523_v33 }
 0x506   : > { %v14138_v24 = vpack.c.bf16 %v3975_v30, %v3975_v30  ;;  %v3976_v36 = vmul.f32 2.0, %v12098_v31  ;;  %v3978_v37 = vmul.f32 2.0, %v12100_v32  ;;  %15416 = vmatmul.mubr.msk.bf16.gmra.mrb[112].mxu1 %vm335_vm1, %v16219_v38  ;;  %v16221_v30 = vld [vmem:[%s19145_s0 + $0x90] sm:$0x3f]  }
 0x507   : > { %v14137_v39 = vpack.c.bf16 %v3974_v18, %v3973_v29  ;;  %v3977_v40 = vmul.f32 2.0, %v12099_v35  ;;  %15419 = vmatprep.mubr.msk.bf16.mxu1 %vm16353_vm0, %v16352_v0 }
 0x508   : > { %12270 = vst.msk [vmem:[%s16753_s27 + $0x458] sm:$0xf] %vm1687_vm2, %v14138_v24  ;;  %v14140_v4 = vpack.c.bf16 %v3978_v37, %v3978_v37 }
 0x509   : > { %12269 = vst [vmem:[%s16753_s27 + $0x450] sm:$0xff] %v14137_v39  ;;  %v14139_v13 = vpack.c.bf16 %v3977_v40, %v3976_v36  ;;  %v3527_v5 = vpop.f32.mrb[8].mxu1  ;;  %v3732_v6 = vpop.f32.mrb[84].mxu0 }
 0x50a   : > { %12272 = vst.msk [vmem:[%s16753_s27 + $0x464] sm:$0xf] %vm1687_vm2, %v14140_v4  ;;  %v12101_v7 = vadd.f32 -0.5, %v3527_v5  ;;  %v12103_v8 = vadd.f32 -0.5, %v3732_v6  ;;  %v3529_v9 = vpop.f32.mrb[9].mxu1  ;;  %v15311_v22 = vpop.f32.mrb[85].mxu0 }
 0x50b   : > { %12271 = vst [vmem:[%s16753_s27 + $0x45c] sm:$0xff] %v14139_v13  ;;  %v12102_v15 = vadd.f32 -0.5, %v3529_v9  ;;  %v3531_v17 = vpop.f32.mrb[10].mxu1  ;;  %v3735_v41 = vpop.f32.mrb[86].mxu0 }
 0x50c   : > { %v3979_v10 = vmul.f32 2.0, %v12101_v7  ;;  %v3981_v42 = vmul.f32 2.0, %v12103_v8  ;;  %v12104_v43 = vadd.f32 -0.5, %v3531_v17  ;;  %v12106_v44 = vadd.f32 -0.5, %v3735_v41  ;;  %v3533_v45 = vpop.f32.mrb[11].mxu1  ;;  %v15312_v46 = vpop.f32.mrb[87].mxu0 }
 0x50d   : > { %v3980_v11 = vmul.f32 2.0, %v12102_v15  ;;  %v12105_v25 = vadd.f32 -0.5, %v3533_v45 }
 0x50e   : > { %v14142_v20 = vpack.c.bf16 %v3981_v42, %v3981_v42  ;;  %v3982_v47 = vmul.f32 2.0, %v12104_v43  ;;  %v3984_v48 = vmul.f32 2.0, %v12106_v44  ;;  %15420 = vmatmul.mubr.msk.bf16.gmra.mrb[116].mxu1 %vm335_vm1, %v16220_v49 }
 0x50f   : > { %v14141_v50 = vpack.c.bf16 %v3980_v11, %v3979_v10  ;;  %v3983_v51 = vmul.f32 2.0, %v12105_v25  ;;  %15423 = vmatprep.mubr.msk.bf16.mxu1 %vm16353_vm0, %v16352_v0 }
 0x510   : > { %12274 = vst.msk [vmem:[%s16753_s27 + $0x470] sm:$0xf] %vm1687_vm2, %v14142_v20  ;;  %v14144_v52 = vpack.c.bf16 %v3984_v48, %v3984_v48 }
 0x511   : > { %12273 = vst [vmem:[%s16753_s27 + $0x468] sm:$0xff] %v14141_v50  ;;  %v14143_v53 = vpack.c.bf16 %v3983_v51, %v3982_v47  ;;  %v3537_v54 = vpop.f32.mrb[12].mxu1  ;;  %v3740_v14 = vpop.f32.mrb[88].mxu0 }
 0x512   : > { %12276 = vst.msk [vmem:[%s16753_s27 + $0x47c] sm:$0xf] %vm1687_vm2, %v14144_v52  ;;  %v12107_v55 = vadd.f32 -0.5, %v3537_v54  ;;  %v12109_v56 = vadd.f32 -0.5, %v3740_v14  ;;  %v3539_v57 = vpop.f32.mrb[13].mxu1  ;;  %v15315_v23 = vpop.f32.mrb[89].mxu0 }
 0x513   : > { %12275 = vst [vmem:[%s16753_s27 + $0x474] sm:$0xff] %v14143_v53  ;;  %v12108_v58 = vadd.f32 -0.5, %v3539_v57  ;;  %v3541_v59 = vpop.f32.mrb[14].mxu1  ;;  %v3743_v60 = vpop.f32.mrb[90].mxu0 }
 0x514   : > { %v3985_v12 = vmul.f32 2.0, %v12107_v55  ;;  %v3987_v61 = vmul.f32 2.0, %v12109_v56  ;;  %v12110_v62 = vadd.f32 -0.5, %v3541_v59  ;;  %v12112_v63 = vadd.f32 -0.5, %v3743_v60  ;;  %v3543_v1 = vpop.f32.mrb[15].mxu1  ;;  %v15316_v3 = vpop.f32.mrb[91].mxu0 }
 0x515   : > { %v3986_v16 = vmul.f32 2.0, %v12108_v58  ;;  %v12111_v21 = vadd.f32 -0.5, %v3543_v1 }
 0x516   : > { %v14146_v26 = vpack.c.bf16 %v3987_v61, %v3987_v61  ;;  %v3988_v28 = vmul.f32 2.0, %v12110_v62  ;;  %v3990_v29 = vmul.f32 2.0, %v12112_v63  ;;  %15424 = vmatmul.mubr.msk.bf16.gmra.mrb[120].mxu1 %vm335_vm1, %v16221_v30 }
 0x517   : > { %v14145_v31 = vpack.c.bf16 %v3986_v16, %v3985_v12  ;;  %v3989_v32 = vmul.f32 2.0, %v12111_v21  ;;  %15429 = vmatprep.mubr.msk.bf16.mxu1 %vm16353_vm0, %v16352_v0 }
 0x518   : > { %12278 = vst.msk [vmem:[%s16753_s27 + $0x488] sm:$0xf] %vm1687_vm2, %v14146_v26  ;;  %v14148_v33 = vpack.c.bf16 %v3990_v29, %v3990_v29 }
 0x519   : > { %12277 = vst [vmem:[%s16753_s27 + $0x480] sm:$0xff] %v14145_v31  ;;  %v14147_v34 = vpack.c.bf16 %v3989_v32, %v3988_v28  ;;  %v3547_v18 = vpop.f32.mrb[16].mxu1  ;;  %v3748_v35 = vpop.f32.mrb[92].mxu0 }
 0x51a   : > { %12280 = vst.msk [vmem:[%s16753_s27 + $0x494] sm:$0xf] %vm1687_vm2, %v14148_v33  ;;  %v12113_v24 = vadd.f32 -0.5, %v3547_v18  ;;  %v12115_v36 = vadd.f32 -0.5, %v3748_v35  ;;  %v3549_v37 = vpop.f32.mrb[17].mxu1  ;;  %v15319_v38 = vpop.f32.mrb[93].mxu0 }
 0x51b   : > { %12279 = vst [vmem:[%s16753_s27 + $0x48c] sm:$0xff] %v14147_v34  ;;  %v12114_v39 = vadd.f32 -0.5, %v3549_v37  ;;  %v3551_v40 = vpop.f32.mrb[18].mxu1  ;;  %v3751_v4 = vpop.f32.mrb[94].mxu0 }
 0x51c   : > { %v3991_v13 = vmul.f32 2.0, %v12113_v24  ;;  %v3993_v5 = vmul.f32 2.0, %v12115_v36  ;;  %v12116_v6 = vadd.f32 -0.5, %v3551_v40  ;;  %v12118_v7 = vadd.f32 -0.5, %v3751_v4  ;;  %v3553_v8 = vpop.f32.mrb[19].mxu1  ;;  %v15320_v9 = vpop.f32.mrb[95].mxu0 }
 0x51d   : > { %v3992_v22 = vmul.f32 2.0, %v12114_v39  ;;  %v12117_v15 = vadd.f32 -0.5, %v3553_v8 }
 0x51e   : > { %v14150_v17 = vpack.c.bf16 %v3993_v5, %v3993_v5  ;;  %v3994_v41 = vmul.f32 2.0, %v12116_v6  ;;  %v3996_v10 = vmul.f32 2.0, %v12118_v7 }
 0x51f   : > { %v14149_v42 = vpack.c.bf16 %v3992_v22, %v3991_v13  ;;  %v3995_v43 = vmul.f32 2.0, %v12117_v15 }
 0x520   : > { %12282 = vst.msk [vmem:[%s16753_s27 + $0x4a0] sm:$0xf] %vm1687_vm2, %v14150_v17  ;;  %v14152_v44 = vpack.c.bf16 %v3996_v10, %v3996_v10 }
 0x521   : > { %12281 = vst [vmem:[%s16753_s27 + $0x498] sm:$0xff] %v14149_v42  ;;  %v14151_v45 = vpack.c.bf16 %v3995_v43, %v3994_v41  ;;  %v3557_v46 = vpop.f32.mrb[20].mxu1  ;;  %v3756_v11 = vpop.f32.mrb[96].mxu0 }
 0x522   : > { %12284 = vst.msk [vmem:[%s16753_s27 + $0x4ac] sm:$0xf] %vm1687_vm2, %v14152_v44  ;;  %v12119_v25 = vadd.f32 -0.5, %v3557_v46  ;;  %v12121_v20 = vadd.f32 -0.5, %v3756_v11  ;;  %v3559_v47 = vpop.f32.mrb[21].mxu1  ;;  %v15323_v48 = vpop.f32.mrb[97].mxu0 }
 0x523   : > { %12283 = vst [vmem:[%s16753_s27 + $0x4a4] sm:$0xff] %v14151_v45  ;;  %v12120_v49 = vadd.f32 -0.5, %v3559_v47  ;;  %v3561_v50 = vpop.f32.mrb[22].mxu1  ;;  %v3759_v51 = vpop.f32.mrb[98].mxu0 }
 0x524   : > { %v3997_v52 = vmul.f32 2.0, %v12119_v25  ;;  %v3999_v53 = vmul.f32 2.0, %v12121_v20  ;;  %v12122_v54 = vadd.f32 -0.5, %v3561_v50  ;;  %v12124_v14 = vadd.f32 -0.5, %v3759_v51  ;;  %v3563_v55 = vpop.f32.mrb[23].mxu1  ;;  %v15324_v56 = vpop.f32.mrb[99].mxu0 }
 0x525   : > { %v3998_v57 = vmul.f32 2.0, %v12120_v49  ;;  %v12123_v23 = vadd.f32 -0.5, %v3563_v55 }
 0x526   : > { %v14154_v58 = vpack.c.bf16 %v3999_v53, %v3999_v53  ;;  %v4000_v59 = vmul.f32 2.0, %v12122_v54  ;;  %v4002_v60 = vmul.f32 2.0, %v12124_v14 }
 0x527   : > { %v14153_v12 = vpack.c.bf16 %v3998_v57, %v3997_v52  ;;  %v4001_v61 = vmul.f32 2.0, %v12123_v23 }
 0x528   : > { %12286 = vst.msk [vmem:[%s16753_s27 + $0x4b8] sm:$0xf] %vm1687_vm2, %v14154_v58  ;;  %v14156_v62 = vpack.c.bf16 %v4002_v60, %v4002_v60 }
 0x529   : > { %12285 = vst [vmem:[%s16753_s27 + $0x4b0] sm:$0xff] %v14153_v12  ;;  %v14155_v63 = vpack.c.bf16 %v4001_v61, %v4000_v59  ;;  %v3567_v1 = vpop.f32.mrb[24].mxu1  ;;  %v3764_v3 = vpop.f32.mrb[100].mxu0 }
 0x52a   : > { %12288 = vst.msk [vmem:[%s16753_s27 + $0x4c4] sm:$0xf] %vm1687_vm2, %v14156_v62  ;;  %v12125_v16 = vadd.f32 -0.5, %v3567_v1  ;;  %v12127_v21 = vadd.f32 -0.5, %v3764_v3  ;;  %v3569_v26 = vpop.f32.mrb[25].mxu1  ;;  %v15327_v28 = vpop.f32.mrb[101].mxu0 }
 0x52b   : > { %12287 = vst [vmem:[%s16753_s27 + $0x4bc] sm:$0xff] %v14155_v63  ;;  %v12126_v29 = vadd.f32 -0.5, %v3569_v26  ;;  %v3571_v30 = vpop.f32.mrb[26].mxu1  ;;  %v3767_v31 = vpop.f32.mrb[102].mxu0 }
 0x52c   : > { %v4003_v32 = vmul.f32 2.0, %v12125_v16  ;;  %v4005_v33 = vmul.f32 2.0, %v12127_v21  ;;  %v12128_v34 = vadd.f32 -0.5, %v3571_v30  ;;  %v12130_v18 = vadd.f32 -0.5, %v3767_v31  ;;  %v3573_v35 = vpop.f32.mrb[27].mxu1  ;;  %v15328_v24 = vpop.f32.mrb[103].mxu0 }
 0x52d   : > { %v4004_v36 = vmul.f32 2.0, %v12126_v29  ;;  %v12129_v37 = vadd.f32 -0.5, %v3573_v35 }
 0x52e   : > { %v14158_v38 = vpack.c.bf16 %v4005_v33, %v4005_v33  ;;  %v4006_v39 = vmul.f32 2.0, %v12128_v34  ;;  %v4008_v40 = vmul.f32 2.0, %v12130_v18 }
 0x52f   : > { %v14157_v4 = vpack.c.bf16 %v4004_v36, %v4003_v32  ;;  %v4007_v13 = vmul.f32 2.0, %v12129_v37 }
 0x530   : > { %12290 = vst.msk [vmem:[%s16753_s27 + $0x4d0] sm:$0xf] %vm1687_vm2, %v14158_v38  ;;  %v14160_v5 = vpack.c.bf16 %v4008_v40, %v4008_v40 }
 0x531   : > { %12289 = vst [vmem:[%s16753_s27 + $0x4c8] sm:$0xff] %v14157_v4  ;;  %v14159_v6 = vpack.c.bf16 %v4007_v13, %v4006_v39  ;;  %v3577_v7 = vpop.f32.mrb[28].mxu1  ;;  %v3772_v8 = vpop.f32.mrb[104].mxu0 }
 0x532   : > { %12292 = vst.msk [vmem:[%s16753_s27 + $0x4dc] sm:$0xf] %vm1687_vm2, %v14160_v5  ;;  %v12131_v9 = vadd.f32 -0.5, %v3577_v7  ;;  %v12133_v22 = vadd.f32 -0.5, %v3772_v8  ;;  %v3579_v15 = vpop.f32.mrb[29].mxu1  ;;  %v15331_v17 = vpop.f32.mrb[105].mxu0 }
 0x533   : > { %12291 = vst [vmem:[%s16753_s27 + $0x4d4] sm:$0xff] %v14159_v6  ;;  %v12132_v41 = vadd.f32 -0.5, %v3579_v15  ;;  %v3581_v10 = vpop.f32.mrb[30].mxu1  ;;  %v3775_v42 = vpop.f32.mrb[106].mxu0 }
 0x534   : > { %v4009_v43 = vmul.f32 2.0, %v12131_v9  ;;  %v4011_v44 = vmul.f32 2.0, %v12133_v22  ;;  %v12134_v45 = vadd.f32 -0.5, %v3581_v10  ;;  %v12136_v46 = vadd.f32 -0.5, %v3775_v42  ;;  %v3583_v11 = vpop.f32.mrb[31].mxu1  ;;  %v15332_v25 = vpop.f32.mrb[107].mxu0 }
 0x535   : > { %v4010_v20 = vmul.f32 2.0, %v12132_v41  ;;  %v12135_v47 = vadd.f32 -0.5, %v3583_v11 }
 0x536   : > { %v14162_v48 = vpack.c.bf16 %v4011_v44, %v4011_v44  ;;  %v4012_v49 = vmul.f32 2.0, %v12134_v45  ;;  %v4014_v50 = vmul.f32 2.0, %v12136_v46 }
 0x537   : > { %v14161_v51 = vpack.c.bf16 %v4010_v20, %v4009_v43  ;;  %v4013_v52 = vmul.f32 2.0, %v12135_v47 }
 0x538   : > { %12294 = vst.msk [vmem:[%s16753_s27 + $0x4e8] sm:$0xf] %vm1687_vm2, %v14162_v48  ;;  %v14164_v53 = vpack.c.bf16 %v4014_v50, %v4014_v50 }
 0x539   : > { %12293 = vst [vmem:[%s16753_s27 + $0x4e0] sm:$0xff] %v14161_v51  ;;  %v14163_v54 = vpack.c.bf16 %v4013_v52, %v4012_v49  ;;  %v3587_v14 = vpop.f32.mrb[32].mxu1  ;;  %v3780_v55 = vpop.f32.mrb[108].mxu0 }
 0x53a   : > { %12296 = vst.msk [vmem:[%s16753_s27 + $0x4f4] sm:$0xf] %vm1687_vm2, %v14164_v53  ;;  %v12137_v56 = vadd.f32 -0.5, %v3587_v14  ;;  %v12139_v57 = vadd.f32 -0.5, %v3780_v55  ;;  %v3589_v23 = vpop.f32.mrb[33].mxu1  ;;  %v15335_v58 = vpop.f32.mrb[109].mxu0 }
 0x53b   : > { %12295 = vst [vmem:[%s16753_s27 + $0x4ec] sm:$0xff] %v14163_v54  ;;  %v12138_v59 = vadd.f32 -0.5, %v3589_v23  ;;  %v3591_v60 = vpop.f32.mrb[34].mxu1  ;;  %v3783_v12 = vpop.f32.mrb[110].mxu0 }
 0x53c   : > { %v4015_v61 = vmul.f32 2.0, %v12137_v56  ;;  %v4017_v62 = vmul.f32 2.0, %v12139_v57  ;;  %v12140_v63 = vadd.f32 -0.5, %v3591_v60  ;;  %v12142_v1 = vadd.f32 -0.5, %v3783_v12  ;;  %v3593_v3 = vpop.f32.mrb[35].mxu1  ;;  %v15336_v16 = vpop.f32.mrb[111].mxu0 }
 0x53d   : > { %v4016_v21 = vmul.f32 2.0, %v12138_v59  ;;  %v12141_v26 = vadd.f32 -0.5, %v3593_v3 }
 0x53e   : > { %v14166_v28 = vpack.c.bf16 %v4017_v62, %v4017_v62  ;;  %v4018_v29 = vmul.f32 2.0, %v12140_v63  ;;  %v4020_v30 = vmul.f32 2.0, %v12142_v1 }
 0x53f   : > { %v14165_v31 = vpack.c.bf16 %v4016_v21, %v4015_v61  ;;  %v4019_v32 = vmul.f32 2.0, %v12141_v26 }
 0x540   : > { %12298 = vst.msk [vmem:[%s16753_s27 + $0x500] sm:$0xf] %vm1687_vm2, %v14166_v28  ;;  %v14168_v33 = vpack.c.bf16 %v4020_v30, %v4020_v30 }
 0x541   : > { %12297 = vst [vmem:[%s16753_s27 + $0x4f8] sm:$0xff] %v14165_v31  ;;  %v14167_v34 = vpack.c.bf16 %v4019_v32, %v4018_v29  ;;  %v3597_v18 = vpop.f32.mrb[36].mxu1  ;;  %v3788_v35 = vpop.f32.mrb[112].mxu0 }
 0x542   : > { %12300 = vst.msk [vmem:[%s16753_s27 + $0x50c] sm:$0xf] %vm1687_vm2, %v14168_v33  ;;  %v12143_v24 = vadd.f32 -0.5, %v3597_v18  ;;  %v12145_v36 = vadd.f32 -0.5, %v3788_v35  ;;  %v3599_v37 = vpop.f32.mrb[37].mxu1  ;;  %v15339_v38 = vpop.f32.mrb[113].mxu0 }
 0x543   : > { %12299 = vst [vmem:[%s16753_s27 + $0x504] sm:$0xff] %v14167_v34  ;;  %v12144_v39 = vadd.f32 -0.5, %v3599_v37  ;;  %v3601_v40 = vpop.f32.mrb[38].mxu1  ;;  %v3791_v4 = vpop.f32.mrb[114].mxu0 }
 0x544   : > { %v4021_v13 = vmul.f32 2.0, %v12143_v24  ;;  %v4023_v5 = vmul.f32 2.0, %v12145_v36  ;;  %v12146_v6 = vadd.f32 -0.5, %v3601_v40  ;;  %v12148_v7 = vadd.f32 -0.5, %v3791_v4  ;;  %v3603_v8 = vpop.f32.mrb[39].mxu1  ;;  %v15340_v9 = vpop.f32.mrb[115].mxu0 }
 0x545   : > { %v4022_v22 = vmul.f32 2.0, %v12144_v39  ;;  %v12147_v15 = vadd.f32 -0.5, %v3603_v8  ;;  %v12642_v8 = vld [vmem:[%s16434_s8 + $0x40] sm:$0xff]  ;;  %v12643_v9 = vld [vmem:[%s16434_s8 + $0x48] sm:$0xff] }
 0x546   : > { %v14170_v17 = vpack.c.bf16 %v4023_v5, %v4023_v5  ;;  %v4024_v41 = vmul.f32 2.0, %v12146_v6  ;;  %v4026_v10 = vmul.f32 2.0, %v12148_v7  ;;  %v12311_v7 = vld [vmem:[%s16753_s27 + $0x54c] sm:$0x33] }
 0x547   : > { %v14169_v42 = vpack.c.bf16 %v4022_v22, %v4021_v13  ;;  %v4025_v43 = vmul.f32 2.0, %v12147_v15  ;;  %v12313_v13 = vld [vmem:[%s16753_s27 + $0x554] sm:$0x3] }
 0x548   : > { %12302 = vst.msk [vmem:[%s16753_s27 + $0x518] sm:$0xf] %vm1687_vm2, %v14170_v17  ;;  %v14172_v44 = vpack.c.bf16 %v4026_v10, %v4026_v10 }
 0x549   : > { %12301 = vst [vmem:[%s16753_s27 + $0x510] sm:$0xff] %v14169_v42  ;;  %v14171_v45 = vpack.c.bf16 %v4025_v43, %v4024_v41  ;;  %v3607_v46 = vpop.f32.mrb[40].mxu1  ;;  %v3796_v11 = vpop.f32.mrb[116].mxu0  ;;  %v5865_v43 = vpack.c.bf16 %v12643_v9, %v12642_v8 }
 0x54a   : > { %12304 = vst.msk [vmem:[%s16753_s27 + $0x524] sm:$0xf] %vm1687_vm2, %v14172_v44  ;;  %v12149_v25 = vadd.f32 -0.5, %v3607_v46  ;;  %v12151_v20 = vadd.f32 -0.5, %v3796_v11  ;;  %v3609_v47 = vpop.f32.mrb[41].mxu1  ;;  %v15343_v48 = vpop.f32.mrb[117].mxu0 }
 0x54b   : > { %12303 = vst [vmem:[%s16753_s27 + $0x51c] sm:$0xff] %v14171_v45  ;;  %v12150_v49 = vadd.f32 -0.5, %v3609_v47  ;;  %v3611_v50 = vpop.f32.mrb[42].mxu1  ;;  %v3799_v51 = vpop.f32.mrb[118].mxu0  ;;  %v16222_v46 = vld [vmem:[#allocation2] ss:$12 sps:$4 sm:$0xff]  }
 0x54c   : > { %v4027_v52 = vmul.f32 2.0, %v12149_v25  ;;  %v4029_v53 = vmul.f32 2.0, %v12151_v20  ;;  %v12152_v54 = vadd.f32 -0.5, %v3611_v50  ;;  %v12154_v14 = vadd.f32 -0.5, %v3799_v51  ;;  %v3613_v55 = vpop.f32.mrb[43].mxu1  ;;  %v15344_v56 = vpop.f32.mrb[119].mxu0 }
 0x54d   : > { %v4028_v57 = vmul.f32 2.0, %v12150_v49  ;;  %v12153_v23 = vadd.f32 -0.5, %v3613_v55 }
 0x54e   : > { %v14174_v58 = vpack.c.bf16 %v4029_v53, %v4029_v53  ;;  %v4030_v59 = vmul.f32 2.0, %v12152_v54  ;;  %v4032_v60 = vmul.f32 2.0, %v12154_v14 }
 0x54f   : > { %v14173_v12 = vpack.c.bf16 %v4028_v57, %v4027_v52  ;;  %v4031_v61 = vmul.f32 2.0, %v12153_v23 }
 0x550   : > { %12306 = vst.msk [vmem:[%s16753_s27 + $0x530] sm:$0xf] %vm1687_vm2, %v14174_v58  ;;  %v14176_v62 = vpack.c.bf16 %v4032_v60, %v4032_v60 }
 0x551   : > { %12305 = vst [vmem:[%s16753_s27 + $0x528] sm:$0xff] %v14173_v12  ;;  %v14175_v63 = vpack.c.bf16 %v4031_v61, %v4030_v59  ;;  %v3617_v1 = vpop.f32.mrb[44].mxu1  ;;  %v3804_v3 = vpop.f32.mrb[120].mxu0 }
 0x552   : > { %12308 = vst.msk [vmem:[%s16753_s27 + $0x53c] sm:$0xf] %vm1687_vm2, %v14176_v62  ;;  %v12155_v16 = vadd.f32 -0.5, %v3617_v1  ;;  %v12157_v21 = vadd.f32 -0.5, %v3804_v3  ;;  %v3619_v26 = vpop.f32.mrb[45].mxu1  ;;  %v15347_v28 = vpop.f32.mrb[121].mxu0 }
 0x553   : > { %12307 = vst [vmem:[%s16753_s27 + $0x534] sm:$0xff] %v14175_v63  ;;  %v12156_v29 = vadd.f32 -0.5, %v3619_v26  ;;  %v3621_v30 = vpop.f32.mrb[46].mxu1  ;;  %v3807_v31 = vpop.f32.mrb[122].mxu0 }
 0x554   : > { %v4033_v32 = vmul.f32 2.0, %v12155_v16  ;;  %v4035_v33 = vmul.f32 2.0, %v12157_v21  ;;  %v12158_v34 = vadd.f32 -0.5, %v3621_v30  ;;  %v12160_v18 = vadd.f32 -0.5, %v3807_v31  ;;  %v3623_v35 = vpop.f32.mrb[47].mxu1  ;;  %v15348_v24 = vpop.f32.mrb[123].mxu0 }
 0x555   : > { %v4034_v36 = vmul.f32 2.0, %v12156_v29  ;;  %v12159_v37 = vadd.f32 -0.5, %v3623_v35 }
 0x556   : > { %v14178_v38 = vpack.c.bf16 %v4035_v33, %v4035_v33  ;;  %v4036_v39 = vmul.f32 2.0, %v12158_v34  ;;  %v4038_v40 = vmul.f32 2.0, %v12160_v18 }
 0x557   : > { %v14177_v4 = vpack.c.bf16 %v4034_v36, %v4033_v32  ;;  %v4037_v5 = vmul.f32 2.0, %v12159_v37 }
 0x558   : > { %12310 = vst.msk [vmem:[%s16753_s27 + $0x548] sm:$0xf] %vm1687_vm2, %v14178_v38  ;;  %v14180_v6 = vpack.c.bf16 %v4038_v40, %v4038_v40 }
 0x559   : > { %12309 = vst [vmem:[%s16753_s27 + $0x540] sm:$0xff] %v14177_v4  ;;  %v14179_v22 = vpack.c.bf16 %v4037_v5, %v4036_v39  ;;  %v4538_v15 = vpop.f32.mrb[48].mxu1 }
 0x55a   : > { %v4498_v17 = vsel %vm16919_vm10, %v14180_v6, %v12313_v13  ;;  %v15353_v41 = vpop.f32.mrb[49].mxu1 }
 0x55b   : > { %12314 = vst [vmem:[%s16753_s27 + $0x554] sm:$0x3] %v4498_v17  ;;  %v4495_v10 = vsel %vm16929_vm11, %v14179_v22, %v12311_v7  ;;  %v4541_v42 = vpop.f32.mrb[50].mxu1 }
 0x55c   : > { %12312 = vst [vmem:[%s16753_s27 + $0x54c] sm:$0x33] %v4495_v10  ;;  %v4689_v44 = vpack.c.bf16 %v4541_v42, %v4538_v15  ;;  %v15354_v45 = vpop.f32.mrb[51].mxu1 }
 0x55e   : > { %12336 = vmatmul.mubr.msk.bf16.vlgmr.msra.gmra.mrb[124].mxu0 %vm335_vm1, %v4689_v44  ;;  %15430 = vmatmul.mubr.msk.bf16.vlgmr.msra.gmra.mrb[124].mxu1 %vm335_vm1, %v4689_v44 }
 0x55f   : > { %15506 = vmatpush3.bf16.msra.mxu0 %v5865_v43  ;;  %4807 = vmatprep.mubr.bf16.mxu0 %v16354_v19 }
 0x560   : > { %15433 = vmatprep.mubr.msk.bf16.mxu1 %vm16353_vm0, %v16352_v0  ;;  %6128 = vmatpush1.bf16.msra.mxu1 %v16222_v46 }
 0x561   : > { %v4546_v11 = vpop.f32.mrb[52].mxu1  ;;  %15583 = vmatprep.subr.bf16.mxu0 %v16352_v0  ;;  %15661 = vmatprep.subr.bf16.mxu1 %v16352_v0 }
 0x562   : > { %v15357_v25 = vpop.f32.mrb[53].mxu1 }
 0x563   : > { %v4549_v20 = vpop.f32.mrb[54].mxu1 }
 0x564   : > { %v4690_v47 = vpack.c.bf16 %v4549_v20, %v4546_v11  ;;  %v15358_v48 = vpop.f32.mrb[55].mxu1 }
 0x566   : > { %12337 = vmatmul.mubr.msk.bf16.gmra.mrb[128].mxu0 %vm335_vm1, %v4690_v47  ;;  %15434 = vmatmul.mubr.msk.bf16.gmra.mrb[128].mxu1 %vm335_vm1, %v4690_v47 }
 0x567   : > { %4817 = vmatprep.mubr.bf16.mxu0 %v16354_v19  ;;  %15437 = vmatprep.mubr.msk.bf16.mxu1 %vm16353_vm0, %v16352_v0 }
 0x569   : > { %v4554_v49 = vpop.f32.mrb[56].mxu1 }
 0x56a   : > { %v15361_v50 = vpop.f32.mrb[57].mxu1 }
 0x56b   : > { %v4557_v51 = vpop.f32.mrb[58].mxu1 }
 0x56c   : > { %v4691_v52 = vpack.c.bf16 %v4557_v51, %v4554_v49  ;;  %v15362_v53 = vpop.f32.mrb[59].mxu1 }
 0x56e   : > { %12338 = vmatmul.mubr.msk.bf16.gmra.mrb[132].mxu0 %vm335_vm1, %v4691_v52  ;;  %15438 = vmatmul.mubr.msk.bf16.gmra.mrb[132].mxu1 %vm335_vm1, %v4691_v52 }
 0x56f   : > { %4827 = vmatprep.mubr.bf16.mxu0 %v16354_v19  ;;  %15441 = vmatprep.mubr.msk.bf16.mxu1 %vm16353_vm0, %v16352_v0 }
 0x571   : > { %v4562_v54 = vpop.f32.mrb[60].mxu1 }
 0x572   : > { %v15365_v14 = vpop.f32.mrb[61].mxu1 }
 0x573   : > { %v4565_v55 = vpop.f32.mrb[62].mxu1 }
 0x574   : > { %v4692_v56 = vpack.c.bf16 %v4565_v55, %v4562_v54  ;;  %v15366_v57 = vpop.f32.mrb[63].mxu1 }
 0x576   : > { %12339 = vmatmul.mubr.msk.bf16.gmra.mrb[136].mxu0 %vm335_vm1, %v4692_v56  ;;  %15442 = vmatmul.mubr.msk.bf16.gmra.mrb[136].mxu1 %vm335_vm1, %v4692_v56 }
 0x577   : > { %4837 = vmatprep.mubr.bf16.mxu0 %v16354_v19  ;;  %15445 = vmatprep.mubr.msk.bf16.mxu1 %vm16353_vm0, %v16352_v0 }
 0x579   : > { %v4570_v23 = vpop.f32.mrb[64].mxu1 }
 0x57a   : > { %v15369_v58 = vpop.f32.mrb[65].mxu1 }
 0x57b   : > { %v4573_v59 = vpop.f32.mrb[66].mxu1 }
 0x57c   : > { %v4693_v60 = vpack.c.bf16 %v4573_v59, %v4570_v23  ;;  %v15370_v12 = vpop.f32.mrb[67].mxu1 }
 0x57e   : > { %12340 = vmatmul.mubr.msk.bf16.gmra.mrb[140].mxu0 %vm335_vm1, %v4693_v60  ;;  %15446 = vmatmul.mubr.msk.bf16.gmra.mrb[140].mxu1 %vm335_vm1, %v4693_v60 }
 0x57f   : > { %4847 = vmatprep.mubr.bf16.mxu0 %v16354_v19  ;;  %15449 = vmatprep.mubr.msk.bf16.mxu1 %vm16353_vm0, %v16352_v0 }
 0x581   : > { %v4578_v61 = vpop.f32.mrb[68].mxu1 }
 0x582   : > { %v15373_v62 = vpop.f32.mrb[69].mxu1 }
 0x583   : > { %v4581_v63 = vpop.f32.mrb[70].mxu1 }
 0x584   : > { %v4694_v1 = vpack.c.bf16 %v4581_v63, %v4578_v61  ;;  %v15374_v3 = vpop.f32.mrb[71].mxu1 }
 0x586   : > { %12341 = vmatmul.mubr.msk.bf16.gmra.mrb[144].mxu0 %vm335_vm1, %v4694_v1  ;;  %15450 = vmatmul.mubr.msk.bf16.gmra.mrb[144].mxu1 %vm335_vm1, %v4694_v1 }
 0x587   : > { %4857 = vmatprep.mubr.bf16.mxu0 %v16354_v19  ;;  %15453 = vmatprep.mubr.msk.bf16.mxu1 %vm16353_vm0, %v16352_v0 }
 0x589   : > { %v4586_v16 = vpop.f32.mrb[72].mxu1 }
 0x58a   : > { %v15377_v21 = vpop.f32.mrb[73].mxu1 }
 0x58b   : > { %v4589_v26 = vpop.f32.mrb[74].mxu1 }
 0x58c   : > { %v4695_v28 = vpack.c.bf16 %v4589_v26, %v4586_v16  ;;  %v15378_v29 = vpop.f32.mrb[75].mxu1 }
 0x58e   : > { %12342 = vmatmul.mubr.msk.bf16.gmra.mrb[148].mxu0 %vm335_vm1, %v4695_v28  ;;  %15454 = vmatmul.mubr.msk.bf16.gmra.mrb[148].mxu1 %vm335_vm1, %v4695_v28 }
 0x58f   : > { %4867 = vmatprep.mubr.bf16.mxu0 %v16354_v19  ;;  %15457 = vmatprep.mubr.msk.bf16.mxu1 %vm16353_vm0, %v16352_v0 }
 0x591   : > { %v4594_v30 = vpop.f32.mrb[76].mxu1 }
 0x592   : > { %v15381_v31 = vpop.f32.mrb[77].mxu1 }
 0x593   : > { %v4597_v32 = vpop.f32.mrb[78].mxu1  ;;  %v16224_v31 = vld [vmem:[#allocation2 + $0x8] ss:$12 sps:$4 sm:$0xff]  }
 0x594   : > { %v4696_v33 = vpack.c.bf16 %v4597_v32, %v4594_v30  ;;  %v15382_v34 = vpop.f32.mrb[79].mxu1  ;;  %v16223_v30 = vld [vmem:[%s19145_s0] sm:$0xff]  }
 0x595   : > { %v16225_v32 = vld [vmem:[#allocation2 + $0x4] ss:$12 sps:$4 sm:$0xff]  }
 0x596   : > { %12343 = vmatmul.mubr.msk.bf16.gmra.mrb[152].mxu0 %vm335_vm1, %v4696_v33  ;;  %15458 = vmatmul.mubr.msk.bf16.gmra.mrb[152].mxu1 %vm335_vm1, %v4696_v33  ;;  %v16226_v33 = vld [vmem:[%s19145_s0 + $0x8] sm:$0xff]   ;;  %v16227_v34 = vld [vmem:[%s19145_s0 + $0x10] sm:$0xff]  }
 0x597   : > { %4877 = vmatprep.mubr.bf16.mxu0 %v16354_v19  ;;  %15461 = vmatprep.mubr.msk.bf16.mxu1 %vm16353_vm0, %v16352_v0 }
 0x599   : > { %v4602_v18 = vpop.f32.mrb[80].mxu1 }
 0x59a   : > { %v15385_v35 = vpop.f32.mrb[81].mxu1 }
 0x59b   : > { %v4605_v24 = vpop.f32.mrb[82].mxu1  ;;  %v16229_v35 = vld [vmem:[%s19145_s0 + $0x20] sm:$0xff]  }
 0x59c   : > { %v4697_v36 = vpack.c.bf16 %v4605_v24, %v4602_v18  ;;  %v15386_v37 = vpop.f32.mrb[83].mxu1  ;;  %v16228_v18 = vld [vmem:[%s19145_s0 + $0x18] sm:$0xff]   ;;  %v16230_v24 = vld [vmem:[%s19145_s0 + $0x28] sm:$0xff]  }
 0x59d   : > { %v16232_v37 = vld [vmem:[%s19145_s0 + $0x38] sm:$0xff]  }
 0x59e   : > { %12344 = vmatmul.mubr.msk.bf16.gmra.mrb[156].mxu0 %vm335_vm1, %v4697_v36  ;;  %15462 = vmatmul.mubr.msk.bf16.gmra.mrb[156].mxu1 %vm335_vm1, %v4697_v36  ;;  %v16231_v36 = vld [vmem:[%s19145_s0 + $0x30] sm:$0xff]  }
 0x59f   : > { %4887 = vmatprep.mubr.bf16.mxu0 %v16354_v19  ;;  %15465 = vmatprep.mubr.msk.bf16.mxu1 %vm16353_vm0, %v16352_v0 }
 0x5a1   : > { %v4610_v38 = vpop.f32.mrb[84].mxu1 }
 0x5a2   : > { %v15389_v39 = vpop.f32.mrb[85].mxu1 }
 0x5a3   : > { %v4613_v40 = vpop.f32.mrb[86].mxu1 }
 0x5a4   : > { %v4698_v4 = vpack.c.bf16 %v4613_v40, %v4610_v38  ;;  %v15390_v13 = vpop.f32.mrb[87].mxu1 }
 0x5a6   : > { %12345 = vmatmul.mubr.msk.bf16.gmra.mrb[160].mxu0 %vm335_vm1, %v4698_v4  ;;  %15466 = vmatmul.mubr.msk.bf16.gmra.mrb[160].mxu1 %vm335_vm1, %v4698_v4 }
 0x5a7   : > { %4897 = vmatprep.mubr.bf16.mxu0 %v16354_v19  ;;  %15469 = vmatprep.mubr.msk.bf16.mxu1 %vm16353_vm0, %v16352_v0 }
 0x5a9   : > { %v4618_v5 = vpop.f32.mrb[88].mxu1 }
 0x5aa   : > { %v15393_v6 = vpop.f32.mrb[89].mxu1 }
 0x5ab   : > { %v4621_v7 = vpop.f32.mrb[90].mxu1 }
 0x5ac   : > { %v4699_v8 = vpack.c.bf16 %v4621_v7, %v4618_v5  ;;  %v15394_v9 = vpop.f32.mrb[91].mxu1 }
 0x5ae   : > { %12346 = vmatmul.mubr.msk.bf16.gmra.mrb[164].mxu0 %vm335_vm1, %v4699_v8  ;;  %15470 = vmatmul.mubr.msk.bf16.gmra.mrb[164].mxu1 %vm335_vm1, %v4699_v8 }
 0x5af   : > { %4907 = vmatprep.mubr.bf16.mxu0 %v16354_v19  ;;  %15473 = vmatprep.mubr.msk.bf16.mxu1 %vm16353_vm0, %v16352_v0 }
 0x5b1   : > { %v4626_v22 = vpop.f32.mrb[92].mxu1 }
 0x5b2   : > { %v15397_v15 = vpop.f32.mrb[93].mxu1 }
 0x5b3   : > { %v4629_v17 = vpop.f32.mrb[94].mxu1 }
 0x5b4   : > { %v4700_v41 = vpack.c.bf16 %v4629_v17, %v4626_v22  ;;  %v15398_v10 = vpop.f32.mrb[95].mxu1 }
 0x5b6   : > { %12347 = vmatmul.mubr.msk.bf16.gmra.mrb[168].mxu0 %vm335_vm1, %v4700_v41  ;;  %15474 = vmatmul.mubr.msk.bf16.gmra.mrb[168].mxu1 %vm335_vm1, %v4700_v41 }
 0x5b7   : > { %4917 = vmatprep.mubr.bf16.mxu0 %v16354_v19  ;;  %15477 = vmatprep.mubr.msk.bf16.mxu1 %vm16353_vm0, %v16352_v0 }
 0x5b9   : > { %v4634_v42 = vpop.f32.mrb[96].mxu1 }
 0x5ba   : > { %v15401_v43 = vpop.f32.mrb[97].mxu1 }
 0x5bb   : > { %v4637_v44 = vpop.f32.mrb[98].mxu1 }
 0x5bc   : > { %v4701_v45 = vpack.c.bf16 %v4637_v44, %v4634_v42  ;;  %v15402_v46 = vpop.f32.mrb[99].mxu1 }
 0x5be   : > { %12348 = vmatmul.mubr.msk.bf16.gmra.mrb[172].mxu0 %vm335_vm1, %v4701_v45  ;;  %15478 = vmatmul.mubr.msk.bf16.gmra.mrb[172].mxu1 %vm335_vm1, %v4701_v45 }
 0x5bf   : > { %4927 = vmatprep.mubr.bf16.mxu0 %v16354_v19  ;;  %15481 = vmatprep.mubr.msk.bf16.mxu1 %vm16353_vm0, %v16352_v0 }
 0x5c1   : > { %v4642_v11 = vpop.f32.mrb[100].mxu1 }
 0x5c2   : > { %v15405_v25 = vpop.f32.mrb[101].mxu1 }
 0x5c3   : > { %v4645_v20 = vpop.f32.mrb[102].mxu1 }
 0x5c4   : > { %v4702_v47 = vpack.c.bf16 %v4645_v20, %v4642_v11  ;;  %v15406_v48 = vpop.f32.mrb[103].mxu1  ;;  %v16233_v11 = vld [vmem:[%s19145_s0 + $0x40] sm:$0xff]  }
 0x5c6   : > { %12349 = vmatmul.mubr.msk.bf16.gmra.mrb[176].mxu0 %vm335_vm1, %v4702_v47  ;;  %15482 = vmatmul.mubr.msk.bf16.gmra.mrb[176].mxu1 %vm335_vm1, %v4702_v47 }
 0x5c7   : > { %4937 = vmatprep.mubr.bf16.mxu0 %v16354_v19  ;;  %15485 = vmatprep.mubr.msk.bf16.mxu1 %vm16353_vm0, %v16352_v0 }
 0x5c9   : > { %v4650_v49 = vpop.f32.mrb[104].mxu1 }
 0x5ca   : > { %v15409_v50 = vpop.f32.mrb[105].mxu1 }
 0x5cb   : > { %v4653_v51 = vpop.f32.mrb[106].mxu1 }
 0x5cc   : > { %v4703_v52 = vpack.c.bf16 %v4653_v51, %v4650_v49  ;;  %v15410_v53 = vpop.f32.mrb[107].mxu1 }
 0x5ce   : > { %12350 = vmatmul.mubr.msk.bf16.gmra.mrb[180].mxu0 %vm335_vm1, %v4703_v52  ;;  %15486 = vmatmul.mubr.msk.bf16.gmra.mrb[180].mxu1 %vm335_vm1, %v4703_v52 }
 0x5cf   : > { %4947 = vmatprep.mubr.bf16.mxu0 %v16354_v19  ;;  %15489 = vmatprep.mubr.msk.bf16.mxu1 %vm16353_vm0, %v16352_v0 }
 0x5d1   : > { %v4658_v54 = vpop.f32.mrb[108].mxu1 }
 0x5d2   : > { %v15413_v14 = vpop.f32.mrb[109].mxu1 }
 0x5d3   : > { %v4661_v55 = vpop.f32.mrb[110].mxu1 }
 0x5d4   : > { %v4704_v56 = vpack.c.bf16 %v4661_v55, %v4658_v54  ;;  %v15414_v57 = vpop.f32.mrb[111].mxu1 }
 0x5d6   : > { %12351 = vmatmul.mubr.msk.bf16.gmra.mrb[184].mxu0 %vm335_vm1, %v4704_v56  ;;  %15490 = vmatmul.mubr.msk.bf16.gmra.mrb[184].mxu1 %vm335_vm1, %v4704_v56 }
 0x5d7   : > { %4957 = vmatprep.mubr.bf16.mxu0 %v16354_v19  ;;  %15493 = vmatprep.mubr.msk.bf16.mxu1 %vm16353_vm0, %v16352_v0 }
 0x5d9   : > { %v4666_v23 = vpop.f32.mrb[112].mxu1 }
 0x5da   : > { %v15417_v58 = vpop.f32.mrb[113].mxu1 }
 0x5db   : > { %v4669_v59 = vpop.f32.mrb[114].mxu1 }
 0x5dc   : > { %v4705_v60 = vpack.c.bf16 %v4669_v59, %v4666_v23  ;;  %v15418_v12 = vpop.f32.mrb[115].mxu1 }
 0x5de   : > { %12352 = vmatmul.mubr.msk.bf16.gmra.mrb[188].mxu0 %vm335_vm1, %v4705_v60  ;;  %15494 = vmatmul.mubr.msk.bf16.gmra.mrb[188].mxu1 %vm335_vm1, %v4705_v60 }
 0x5df   : > { %4967 = vmatprep.mubr.bf16.mxu0 %v16354_v19  ;;  %15497 = vmatprep.mubr.msk.bf16.mxu1 %vm16353_vm0, %v16352_v0 }
 0x5e1   : > { %v4674_v61 = vpop.f32.mrb[116].mxu1 }
 0x5e2   : > { %v15421_v62 = vpop.f32.mrb[117].mxu1 }
 0x5e3   : > { %v4677_v63 = vpop.f32.mrb[118].mxu1 }
 0x5e4   : > { %v4706_v1 = vpack.c.bf16 %v4677_v63, %v4674_v61  ;;  %v15422_v3 = vpop.f32.mrb[119].mxu1 }
 0x5e6   : > { %12353 = vmatmul.mubr.msk.bf16.gmra.mrb[192].mxu0 %vm335_vm1, %v4706_v1  ;;  %15498 = vmatmul.mubr.msk.bf16.gmra.mrb[192].mxu1 %vm335_vm1, %v4706_v1 }
 0x5e7   : > { %4977 = vmatprep.mubr.bf16.mxu0 %v16354_v19  ;;  %15501 = vmatprep.mubr.msk.bf16.mxu1 %vm16353_vm0, %v16352_v0 }
 0x5e9   : > { %v4682_v16 = vpop.f32.mrb[120].mxu1 }
 0x5ea   : > { %v15425_v21 = vpop.f32.mrb[121].mxu1 }
 0x5eb   : > { %v4685_v26 = vpop.f32.mrb[122].mxu1 }
 0x5ec   : > { %v4707_v28 = vpack.c.bf16 %v4685_v26, %v4682_v16  ;;  %v15426_v29 = vpop.f32.mrb[123].mxu1  ;;  %v16234_v16 = vld [vmem:[%s19145_s0 + $0x48] sm:$0xff]  }
 0x5ee   : > { %12354 = vmatmul.mubr.msk.bf16.gmra.mrb[196].mxu0 %vm335_vm1, %v4707_v28  ;;  %15502 = vmatmul.mubr.msk.bf16.gmra.mrb[196].mxu1 %vm335_vm1, %v4707_v28 }
 0x5ef   : > { %15507 = vmatprep.mubr.msk.bf16.mxu0 %vm16353_vm0, %v16352_v0  ;;  %6159 = vmatprep.mubr.bf16.mxu1 %v16354_v19 }
 0x5f6   : > { %15508 = vmatmul.mubr.msk.bf16.vlgmr.msra.gmra.mrb[200].mxu0 %vm335_vm1, %v16223_v30 }
 0x5f7   : > { %15511 = vmatprep.mubr.msk.bf16.mxu0 %vm16353_vm0, %v16352_v0  ;;  %15584 = vmatpush3.bf16.msra.mxu0 %v16224_v31 }
 0x5f8   : > { %7489 = vmatprep.subr.bf16.mxu0 %v16225_v32 }
 0x5fe   : > { %15512 = vmatmul.mubr.msk.bf16.gmra.mrb[204].mxu0 %vm335_vm1, %v16226_v33 }
 0x5ff   : > { %15515 = vmatprep.mubr.msk.bf16.mxu0 %vm16353_vm0, %v16352_v0 }
 0x606   : > { %15516 = vmatmul.mubr.msk.bf16.gmra.mrb[208].mxu0 %vm335_vm1, %v16227_v34 }
 0x607   : > { %15519 = vmatprep.mubr.msk.bf16.mxu0 %vm16353_vm0, %v16352_v0 }
 0x60e   : > { %15520 = vmatmul.mubr.msk.bf16.gmra.mrb[212].mxu0 %vm335_vm1, %v16228_v18 }
 0x60f   : > { %15523 = vmatprep.mubr.msk.bf16.mxu0 %vm16353_vm0, %v16352_v0 }
 0x616   : > { %15524 = vmatmul.mubr.msk.bf16.gmra.mrb[216].mxu0 %vm335_vm1, %v16229_v35 }
 0x617   : > { %15527 = vmatprep.mubr.msk.bf16.mxu0 %vm16353_vm0, %v16352_v0 }
 0x61e   : > { %15528 = vmatmul.mubr.msk.bf16.gmra.mrb[220].mxu0 %vm335_vm1, %v16230_v24 }
 0x61f   : > { %15531 = vmatprep.mubr.msk.bf16.mxu0 %vm16353_vm0, %v16352_v0 }
 0x626   : > { %15532 = vmatmul.mubr.msk.bf16.gmra.mrb[224].mxu0 %vm335_vm1, %v16231_v36 }
 0x627   : > { %15535 = vmatprep.mubr.msk.bf16.mxu0 %vm16353_vm0, %v16352_v0 }
 0x62e   : > { %15536 = vmatmul.mubr.msk.bf16.gmra.mrb[228].mxu0 %vm335_vm1, %v16232_v37 }
 0x62f   : > { %15539 = vmatprep.mubr.msk.bf16.mxu0 %vm16353_vm0, %v16352_v0 }
 0x631   : > { %v4799_v38 = vpop.f32.mrb[124].mxu0  ;;  %v5022_v39 = vpop.f32.mrb[124].mxu1 }
 0x632   : > { %v12374_v40 = vadd.f32 -0.5, %v4799_v38  ;;  %v12376_v4 = vadd.f32 -0.5, %v5022_v39  ;;  %v4801_v13 = vpop.f32.mrb[125].mxu0  ;;  %v15431_v5 = vpop.f32.mrb[125].mxu1 }
 0x633   : > { %v12375_v6 = vadd.f32 -0.5, %v4801_v13  ;;  %v4803_v7 = vpop.f32.mrb[126].mxu0  ;;  %v5025_v8 = vpop.f32.mrb[126].mxu1 }
 0x634   : > { %v5287_v9 = vmul.f32 2.0, %v12374_v40  ;;  %v5289_v22 = vmul.f32 2.0, %v12376_v4  ;;  %v12377_v15 = vadd.f32 -0.5, %v4803_v7  ;;  %v12379_v17 = vadd.f32 -0.5, %v5025_v8  ;;  %v4805_v41 = vpop.f32.mrb[127].mxu0  ;;  %v15432_v10 = vpop.f32.mrb[127].mxu1 }
 0x635   : > { %v5288_v42 = vmul.f32 2.0, %v12375_v6  ;;  %v12378_v43 = vadd.f32 -0.5, %v4805_v41 }
 0x636   : > { %v14182_v44 = vpack.c.bf16 %v5289_v22, %v5289_v22  ;;  %v5290_v45 = vmul.f32 2.0, %v12377_v15  ;;  %v5292_v46 = vmul.f32 2.0, %v12379_v17  ;;  %15540 = vmatmul.mubr.msk.bf16.gmra.mrb[232].mxu0 %vm335_vm1, %v16233_v11  ;;  %v16235_v22 = vld [vmem:[%s19145_s0 + $0x50] sm:$0xff]  }
 0x637   : > { %v14181_v25 = vpack.c.bf16 %v5288_v42, %v5287_v9  ;;  %v5291_v20 = vmul.f32 2.0, %v12378_v43  ;;  %15543 = vmatprep.mubr.msk.bf16.mxu0 %vm16353_vm0, %v16352_v0 }
 0x638   : > { %12565 = vst.msk [vmem:[%s16753_s27 + $0x560] sm:$0xf] %vm1687_vm2, %v14182_v44  ;;  %v14184_v47 = vpack.c.bf16 %v5292_v46, %v5292_v46 }
 0x639   : > { %12564 = vst [vmem:[%s16753_s27 + $0x558] sm:$0xff] %v14181_v25  ;;  %v14183_v48 = vpack.c.bf16 %v5291_v20, %v5290_v45  ;;  %v4809_v49 = vpop.f32.mrb[128].mxu0  ;;  %v5030_v50 = vpop.f32.mrb[128].mxu1 }
 0x63a   : > { %12567 = vst.msk [vmem:[%s16753_s27 + $0x56c] sm:$0xf] %vm1687_vm2, %v14184_v47  ;;  %v12380_v51 = vadd.f32 -0.5, %v4809_v49  ;;  %v12382_v52 = vadd.f32 -0.5, %v5030_v50  ;;  %v4811_v53 = vpop.f32.mrb[129].mxu0  ;;  %v15435_v54 = vpop.f32.mrb[129].mxu1 }
 0x63b   : > { %12566 = vst [vmem:[%s16753_s27 + $0x564] sm:$0xff] %v14183_v48  ;;  %v12381_v14 = vadd.f32 -0.5, %v4811_v53  ;;  %v4813_v55 = vpop.f32.mrb[130].mxu0  ;;  %v5033_v56 = vpop.f32.mrb[130].mxu1 }
 0x63c   : > { %v5293_v57 = vmul.f32 2.0, %v12380_v51  ;;  %v5295_v23 = vmul.f32 2.0, %v12382_v52  ;;  %v12383_v58 = vadd.f32 -0.5, %v4813_v55  ;;  %v12385_v59 = vadd.f32 -0.5, %v5033_v56  ;;  %v4815_v60 = vpop.f32.mrb[131].mxu0  ;;  %v15436_v12 = vpop.f32.mrb[131].mxu1 }
 0x63d   : > { %v5294_v61 = vmul.f32 2.0, %v12381_v14  ;;  %v12384_v62 = vadd.f32 -0.5, %v4815_v60 }
 0x63e   : > { %v14186_v63 = vpack.c.bf16 %v5295_v23, %v5295_v23  ;;  %v5296_v1 = vmul.f32 2.0, %v12383_v58  ;;  %v5298_v3 = vmul.f32 2.0, %v12385_v59  ;;  %15544 = vmatmul.mubr.msk.bf16.gmra.mrb[236].mxu0 %vm335_vm1, %v16234_v16  ;;  %v16236_v23 = vld [vmem:[%s19145_s0 + $0x58] sm:$0xff]  }
 0x63f   : > { %v14185_v21 = vpack.c.bf16 %v5294_v61, %v5293_v57  ;;  %v5297_v26 = vmul.f32 2.0, %v12384_v62  ;;  %15547 = vmatprep.mubr.msk.bf16.mxu0 %vm16353_vm0, %v16352_v0 }
 0x640   : > { %12569 = vst.msk [vmem:[%s16753_s27 + $0x578] sm:$0xf] %vm1687_vm2, %v14186_v63  ;;  %v14188_v28 = vpack.c.bf16 %v5298_v3, %v5298_v3 }
 0x641   : > { %12568 = vst [vmem:[%s16753_s27 + $0x570] sm:$0xff] %v14185_v21  ;;  %v14187_v29 = vpack.c.bf16 %v5297_v26, %v5296_v1  ;;  %v4819_v30 = vpop.f32.mrb[132].mxu0  ;;  %v5038_v31 = vpop.f32.mrb[132].mxu1 }
 0x642   : > { %12571 = vst.msk [vmem:[%s16753_s27 + $0x584] sm:$0xf] %vm1687_vm2, %v14188_v28  ;;  %v12386_v32 = vadd.f32 -0.5, %v4819_v30  ;;  %v12388_v33 = vadd.f32 -0.5, %v5038_v31  ;;  %v4821_v34 = vpop.f32.mrb[133].mxu0  ;;  %v15439_v18 = vpop.f32.mrb[133].mxu1 }
 0x643   : > { %12570 = vst [vmem:[%s16753_s27 + $0x57c] sm:$0xff] %v14187_v29  ;;  %v12387_v35 = vadd.f32 -0.5, %v4821_v34  ;;  %v4823_v24 = vpop.f32.mrb[134].mxu0  ;;  %v5041_v36 = vpop.f32.mrb[134].mxu1 }
 0x644   : > { %v5299_v37 = vmul.f32 2.0, %v12386_v32  ;;  %v5301_v38 = vmul.f32 2.0, %v12388_v33  ;;  %v12389_v39 = vadd.f32 -0.5, %v4823_v24  ;;  %v12391_v40 = vadd.f32 -0.5, %v5041_v36  ;;  %v4825_v4 = vpop.f32.mrb[135].mxu0  ;;  %v15440_v13 = vpop.f32.mrb[135].mxu1 }
 0x645   : > { %v5300_v5 = vmul.f32 2.0, %v12387_v35  ;;  %v12390_v6 = vadd.f32 -0.5, %v4825_v4 }
 0x646   : > { %v14190_v7 = vpack.c.bf16 %v5301_v38, %v5301_v38  ;;  %v5302_v8 = vmul.f32 2.0, %v12389_v39  ;;  %v5304_v9 = vmul.f32 2.0, %v12391_v40  ;;  %15548 = vmatmul.mubr.msk.bf16.gmra.mrb[240].mxu0 %vm335_vm1, %v16235_v22  ;;  %v16237_v38 = vld [vmem:[%s19145_s0 + $0x60] sm:$0xff]  }
 0x647   : > { %v14189_v15 = vpack.c.bf16 %v5300_v5, %v5299_v37  ;;  %v5303_v17 = vmul.f32 2.0, %v12390_v6  ;;  %15551 = vmatprep.mubr.msk.bf16.mxu0 %vm16353_vm0, %v16352_v0 }
 0x648   : > { %12573 = vst.msk [vmem:[%s16753_s27 + $0x590] sm:$0xf] %vm1687_vm2, %v14190_v7  ;;  %v14192_v41 = vpack.c.bf16 %v5304_v9, %v5304_v9 }
 0x649   : > { %12572 = vst [vmem:[%s16753_s27 + $0x588] sm:$0xff] %v14189_v15  ;;  %v14191_v10 = vpack.c.bf16 %v5303_v17, %v5302_v8  ;;  %v4829_v42 = vpop.f32.mrb[136].mxu0  ;;  %v5046_v43 = vpop.f32.mrb[136].mxu1 }
 0x64a   : > { %12575 = vst.msk [vmem:[%s16753_s27 + $0x59c] sm:$0xf] %vm1687_vm2, %v14192_v41  ;;  %v12392_v44 = vadd.f32 -0.5, %v4829_v42  ;;  %v12394_v45 = vadd.f32 -0.5, %v5046_v43  ;;  %v4831_v46 = vpop.f32.mrb[137].mxu0  ;;  %v15443_v11 = vpop.f32.mrb[137].mxu1 }
 0x64b   : > { %12574 = vst [vmem:[%s16753_s27 + $0x594] sm:$0xff] %v14191_v10  ;;  %v12393_v25 = vadd.f32 -0.5, %v4831_v46  ;;  %v4833_v20 = vpop.f32.mrb[138].mxu0  ;;  %v5049_v47 = vpop.f32.mrb[138].mxu1 }
 0x64c   : > { %v5305_v48 = vmul.f32 2.0, %v12392_v44  ;;  %v5307_v49 = vmul.f32 2.0, %v12394_v45  ;;  %v12395_v50 = vadd.f32 -0.5, %v4833_v20  ;;  %v12397_v51 = vadd.f32 -0.5, %v5049_v47  ;;  %v4835_v52 = vpop.f32.mrb[139].mxu0  ;;  %v15444_v53 = vpop.f32.mrb[139].mxu1 }
 0x64d   : > { %v5306_v54 = vmul.f32 2.0, %v12393_v25  ;;  %v12396_v14 = vadd.f32 -0.5, %v4835_v52 }
 0x64e   : > { %v14194_v55 = vpack.c.bf16 %v5307_v49, %v5307_v49  ;;  %v5308_v56 = vmul.f32 2.0, %v12395_v50  ;;  %v5310_v57 = vmul.f32 2.0, %v12397_v51  ;;  %15552 = vmatmul.mubr.msk.bf16.gmra.mrb[244].mxu0 %vm335_vm1, %v16236_v23  ;;  %v16238_v49 = vld [vmem:[%s19145_s0 + $0x68] sm:$0xff]  }
 0x64f   : > { %v14193_v58 = vpack.c.bf16 %v5306_v54, %v5305_v48  ;;  %v5309_v59 = vmul.f32 2.0, %v12396_v14  ;;  %15555 = vmatprep.mubr.msk.bf16.mxu0 %vm16353_vm0, %v16352_v0 }
 0x650   : > { %12577 = vst.msk [vmem:[%s16753_s27 + $0x5a8] sm:$0xf] %vm1687_vm2, %v14194_v55  ;;  %v14196_v60 = vpack.c.bf16 %v5310_v57, %v5310_v57 }
 0x651   : > { %12576 = vst [vmem:[%s16753_s27 + $0x5a0] sm:$0xff] %v14193_v58  ;;  %v14195_v12 = vpack.c.bf16 %v5309_v59, %v5308_v56  ;;  %v4839_v61 = vpop.f32.mrb[140].mxu0  ;;  %v5054_v62 = vpop.f32.mrb[140].mxu1 }
 0x652   : > { %12579 = vst.msk [vmem:[%s16753_s27 + $0x5b4] sm:$0xf] %vm1687_vm2, %v14196_v60  ;;  %v12398_v63 = vadd.f32 -0.5, %v4839_v61  ;;  %v12400_v1 = vadd.f32 -0.5, %v5054_v62  ;;  %v4841_v3 = vpop.f32.mrb[141].mxu0  ;;  %v15447_v16 = vpop.f32.mrb[141].mxu1 }
 0x653   : > { %12578 = vst [vmem:[%s16753_s27 + $0x5ac] sm:$0xff] %v14195_v12  ;;  %v12399_v21 = vadd.f32 -0.5, %v4841_v3  ;;  %v4843_v26 = vpop.f32.mrb[142].mxu0  ;;  %v5057_v28 = vpop.f32.mrb[142].mxu1 }
 0x654   : > { %v5311_v29 = vmul.f32 2.0, %v12398_v63  ;;  %v5313_v30 = vmul.f32 2.0, %v12400_v1  ;;  %v12401_v31 = vadd.f32 -0.5, %v4843_v26  ;;  %v12403_v32 = vadd.f32 -0.5, %v5057_v28  ;;  %v4845_v33 = vpop.f32.mrb[143].mxu0  ;;  %v15448_v34 = vpop.f32.mrb[143].mxu1 }
 0x655   : > { %v5312_v18 = vmul.f32 2.0, %v12399_v21  ;;  %v12402_v35 = vadd.f32 -0.5, %v4845_v33 }
 0x656   : > { %v14198_v24 = vpack.c.bf16 %v5313_v30, %v5313_v30  ;;  %v5314_v36 = vmul.f32 2.0, %v12401_v31  ;;  %v5316_v37 = vmul.f32 2.0, %v12403_v32  ;;  %15556 = vmatmul.mubr.msk.bf16.gmra.mrb[248].mxu0 %vm335_vm1, %v16237_v38  ;;  %v16239_v30 = vld [vmem:[%s19145_s0 + $0x70] sm:$0xff]  }
 0x657   : > { %v14197_v39 = vpack.c.bf16 %v5312_v18, %v5311_v29  ;;  %v5315_v40 = vmul.f32 2.0, %v12402_v35  ;;  %15559 = vmatprep.mubr.msk.bf16.mxu0 %vm16353_vm0, %v16352_v0 }
 0x658   : > { %12581 = vst.msk [vmem:[%s16753_s27 + $0x5c0] sm:$0xf] %vm1687_vm2, %v14198_v24  ;;  %v14200_v4 = vpack.c.bf16 %v5316_v37, %v5316_v37 }
 0x659   : > { %12580 = vst [vmem:[%s16753_s27 + $0x5b8] sm:$0xff] %v14197_v39  ;;  %v14199_v13 = vpack.c.bf16 %v5315_v40, %v5314_v36  ;;  %v4849_v5 = vpop.f32.mrb[144].mxu0  ;;  %v5062_v6 = vpop.f32.mrb[144].mxu1 }
 0x65a   : > { %12583 = vst.msk [vmem:[%s16753_s27 + $0x5cc] sm:$0xf] %vm1687_vm2, %v14200_v4  ;;  %v12404_v7 = vadd.f32 -0.5, %v4849_v5  ;;  %v12406_v8 = vadd.f32 -0.5, %v5062_v6  ;;  %v4851_v9 = vpop.f32.mrb[145].mxu0  ;;  %v15451_v22 = vpop.f32.mrb[145].mxu1 }
 0x65b   : > { %12582 = vst [vmem:[%s16753_s27 + $0x5c4] sm:$0xff] %v14199_v13  ;;  %v12405_v15 = vadd.f32 -0.5, %v4851_v9  ;;  %v4853_v17 = vpop.f32.mrb[146].mxu0  ;;  %v5065_v41 = vpop.f32.mrb[146].mxu1 }
 0x65c   : > { %v5317_v10 = vmul.f32 2.0, %v12404_v7  ;;  %v5319_v42 = vmul.f32 2.0, %v12406_v8  ;;  %v12407_v43 = vadd.f32 -0.5, %v4853_v17  ;;  %v12409_v44 = vadd.f32 -0.5, %v5065_v41  ;;  %v4855_v45 = vpop.f32.mrb[147].mxu0  ;;  %v15452_v46 = vpop.f32.mrb[147].mxu1 }
 0x65d   : > { %v5318_v11 = vmul.f32 2.0, %v12405_v15  ;;  %v12408_v25 = vadd.f32 -0.5, %v4855_v45 }
 0x65e   : > { %v14202_v20 = vpack.c.bf16 %v5319_v42, %v5319_v42  ;;  %v5320_v47 = vmul.f32 2.0, %v12407_v43  ;;  %v5322_v48 = vmul.f32 2.0, %v12409_v44  ;;  %15560 = vmatmul.mubr.msk.bf16.gmra.mrb[252].mxu0 %vm335_vm1, %v16238_v49  ;;  %v16240_v42 = vld [vmem:[%s19145_s0 + $0x78] sm:$0xff]  }
 0x65f   : > { %v14201_v50 = vpack.c.bf16 %v5318_v11, %v5317_v10  ;;  %v5321_v51 = vmul.f32 2.0, %v12408_v25  ;;  %15563 = vmatprep.mubr.msk.bf16.mxu0 %vm16353_vm0, %v16352_v0 }
 0x660   : > { %12585 = vst.msk [vmem:[%s16753_s27 + $0x5d8] sm:$0xf] %vm1687_vm2, %v14202_v20  ;;  %v14204_v52 = vpack.c.bf16 %v5322_v48, %v5322_v48 }
 0x661   : > { %12584 = vst [vmem:[%s16753_s27 + $0x5d0] sm:$0xff] %v14201_v50  ;;  %v14203_v53 = vpack.c.bf16 %v5321_v51, %v5320_v47  ;;  %v4859_v54 = vpop.f32.mrb[148].mxu0  ;;  %v5070_v14 = vpop.f32.mrb[148].mxu1 }
 0x662   : > { %12587 = vst.msk [vmem:[%s16753_s27 + $0x5e4] sm:$0xf] %vm1687_vm2, %v14204_v52  ;;  %v12410_v55 = vadd.f32 -0.5, %v4859_v54  ;;  %v12412_v56 = vadd.f32 -0.5, %v5070_v14  ;;  %v4861_v57 = vpop.f32.mrb[149].mxu0  ;;  %v15455_v23 = vpop.f32.mrb[149].mxu1 }
 0x663   : > { %12586 = vst [vmem:[%s16753_s27 + $0x5dc] sm:$0xff] %v14203_v53  ;;  %v12411_v58 = vadd.f32 -0.5, %v4861_v57  ;;  %v4863_v59 = vpop.f32.mrb[150].mxu0  ;;  %v5073_v60 = vpop.f32.mrb[150].mxu1 }
 0x664   : > { %v5323_v12 = vmul.f32 2.0, %v12410_v55  ;;  %v5325_v61 = vmul.f32 2.0, %v12412_v56  ;;  %v12413_v62 = vadd.f32 -0.5, %v4863_v59  ;;  %v12415_v63 = vadd.f32 -0.5, %v5073_v60  ;;  %v4865_v1 = vpop.f32.mrb[151].mxu0  ;;  %v15456_v3 = vpop.f32.mrb[151].mxu1 }
 0x665   : > { %v5324_v16 = vmul.f32 2.0, %v12411_v58  ;;  %v12414_v21 = vadd.f32 -0.5, %v4865_v1 }
 0x666   : > { %v14206_v26 = vpack.c.bf16 %v5325_v61, %v5325_v61  ;;  %v5326_v28 = vmul.f32 2.0, %v12413_v62  ;;  %v5328_v29 = vmul.f32 2.0, %v12415_v63  ;;  %15564 = vmatmul.mubr.msk.bf16.gmra.mrb[0].mxu0 %vm335_vm1, %v16239_v30  ;;  %v16241_v61 = vld [vmem:[%s19145_s0 + $0x80] sm:$0xff]  }
 0x667   : > { %v14205_v31 = vpack.c.bf16 %v5324_v16, %v5323_v12  ;;  %v5327_v32 = vmul.f32 2.0, %v12414_v21  ;;  %15567 = vmatprep.mubr.msk.bf16.mxu0 %vm16353_vm0, %v16352_v0 }
 0x668   : > { %12589 = vst.msk [vmem:[%s16753_s27 + $0x5f0] sm:$0xf] %vm1687_vm2, %v14206_v26  ;;  %v14208_v33 = vpack.c.bf16 %v5328_v29, %v5328_v29 }
 0x669   : > { %12588 = vst [vmem:[%s16753_s27 + $0x5e8] sm:$0xff] %v14205_v31  ;;  %v14207_v34 = vpack.c.bf16 %v5327_v32, %v5326_v28  ;;  %v4869_v18 = vpop.f32.mrb[152].mxu0  ;;  %v5078_v35 = vpop.f32.mrb[152].mxu1 }
 0x66a   : > { %12591 = vst.msk [vmem:[%s16753_s27 + $0x5fc] sm:$0xf] %vm1687_vm2, %v14208_v33  ;;  %v12416_v24 = vadd.f32 -0.5, %v4869_v18  ;;  %v12418_v36 = vadd.f32 -0.5, %v5078_v35  ;;  %v4871_v37 = vpop.f32.mrb[153].mxu0  ;;  %v15459_v38 = vpop.f32.mrb[153].mxu1 }
 0x66b   : > { %12590 = vst [vmem:[%s16753_s27 + $0x5f4] sm:$0xff] %v14207_v34  ;;  %v12417_v39 = vadd.f32 -0.5, %v4871_v37  ;;  %v4873_v40 = vpop.f32.mrb[154].mxu0  ;;  %v5081_v4 = vpop.f32.mrb[154].mxu1 }
 0x66c   : > { %v5329_v13 = vmul.f32 2.0, %v12416_v24  ;;  %v5331_v5 = vmul.f32 2.0, %v12418_v36  ;;  %v12419_v6 = vadd.f32 -0.5, %v4873_v40  ;;  %v12421_v7 = vadd.f32 -0.5, %v5081_v4  ;;  %v4875_v8 = vpop.f32.mrb[155].mxu0  ;;  %v15460_v9 = vpop.f32.mrb[155].mxu1 }
 0x66d   : > { %v5330_v22 = vmul.f32 2.0, %v12417_v39  ;;  %v12420_v15 = vadd.f32 -0.5, %v4875_v8 }
 0x66e   : > { %v14210_v17 = vpack.c.bf16 %v5331_v5, %v5331_v5  ;;  %v5332_v41 = vmul.f32 2.0, %v12419_v6  ;;  %v5334_v10 = vmul.f32 2.0, %v12421_v7  ;;  %15568 = vmatmul.mubr.msk.bf16.gmra.mrb[4].mxu0 %vm335_vm1, %v16240_v42  ;;  %v16242_v5 = vld [vmem:[%s19145_s0 + $0x88] sm:$0xff]  }
 0x66f   : > { %v14209_v43 = vpack.c.bf16 %v5330_v22, %v5329_v13  ;;  %v5333_v44 = vmul.f32 2.0, %v12420_v15  ;;  %15571 = vmatprep.mubr.msk.bf16.mxu0 %vm16353_vm0, %v16352_v0 }
 0x670   : > { %12593 = vst.msk [vmem:[%s16753_s27 + $0x608] sm:$0xf] %vm1687_vm2, %v14210_v17  ;;  %v14212_v45 = vpack.c.bf16 %v5334_v10, %v5334_v10 }
 0x671   : > { %12592 = vst [vmem:[%s16753_s27 + $0x600] sm:$0xff] %v14209_v43  ;;  %v14211_v46 = vpack.c.bf16 %v5333_v44, %v5332_v41  ;;  %v4879_v11 = vpop.f32.mrb[156].mxu0  ;;  %v5086_v25 = vpop.f32.mrb[156].mxu1 }
 0x672   : > { %12595 = vst.msk [vmem:[%s16753_s27 + $0x614] sm:$0xf] %vm1687_vm2, %v14212_v45  ;;  %v12422_v20 = vadd.f32 -0.5, %v4879_v11  ;;  %v12424_v47 = vadd.f32 -0.5, %v5086_v25  ;;  %v4881_v48 = vpop.f32.mrb[157].mxu0  ;;  %v15463_v49 = vpop.f32.mrb[157].mxu1 }
 0x673   : > { %12594 = vst [vmem:[%s16753_s27 + $0x60c] sm:$0xff] %v14211_v46  ;;  %v12423_v50 = vadd.f32 -0.5, %v4881_v48  ;;  %v4883_v51 = vpop.f32.mrb[158].mxu0  ;;  %v5089_v52 = vpop.f32.mrb[158].mxu1 }
 0x674   : > { %v5335_v53 = vmul.f32 2.0, %v12422_v20  ;;  %v5337_v54 = vmul.f32 2.0, %v12424_v47  ;;  %v12425_v14 = vadd.f32 -0.5, %v4883_v51  ;;  %v12427_v55 = vadd.f32 -0.5, %v5089_v52  ;;  %v4885_v56 = vpop.f32.mrb[159].mxu0  ;;  %v15464_v57 = vpop.f32.mrb[159].mxu1 }
 0x675   : > { %v5336_v23 = vmul.f32 2.0, %v12423_v50  ;;  %v12426_v58 = vadd.f32 -0.5, %v4885_v56 }
 0x676   : > { %v14214_v59 = vpack.c.bf16 %v5337_v54, %v5337_v54  ;;  %v5338_v60 = vmul.f32 2.0, %v12425_v14  ;;  %v5340_v12 = vmul.f32 2.0, %v12427_v55  ;;  %15572 = vmatmul.mubr.msk.bf16.gmra.mrb[8].mxu0 %vm335_vm1, %v16241_v61  ;;  %v16243_v54 = vld [vmem:[%s19145_s0 + $0x90] sm:$0x3f]  }
 0x677   : > { %v14213_v62 = vpack.c.bf16 %v5336_v23, %v5335_v53  ;;  %v5339_v63 = vmul.f32 2.0, %v12426_v58  ;;  %15575 = vmatprep.mubr.msk.bf16.mxu0 %vm16353_vm0, %v16352_v0 }
 0x678   : > { %12597 = vst.msk [vmem:[%s16753_s27 + $0x620] sm:$0xf] %vm1687_vm2, %v14214_v59  ;;  %v14216_v1 = vpack.c.bf16 %v5340_v12, %v5340_v12 }
 0x679   : > { %12596 = vst [vmem:[%s16753_s27 + $0x618] sm:$0xff] %v14213_v62  ;;  %v14215_v3 = vpack.c.bf16 %v5339_v63, %v5338_v60  ;;  %v4889_v16 = vpop.f32.mrb[160].mxu0  ;;  %v5094_v21 = vpop.f32.mrb[160].mxu1 }
 0x67a   : > { %12599 = vst.msk [vmem:[%s16753_s27 + $0x62c] sm:$0xf] %vm1687_vm2, %v14216_v1  ;;  %v12428_v26 = vadd.f32 -0.5, %v4889_v16  ;;  %v12430_v28 = vadd.f32 -0.5, %v5094_v21  ;;  %v4891_v29 = vpop.f32.mrb[161].mxu0  ;;  %v15467_v30 = vpop.f32.mrb[161].mxu1 }
 0x67b   : > { %12598 = vst [vmem:[%s16753_s27 + $0x624] sm:$0xff] %v14215_v3  ;;  %v12429_v31 = vadd.f32 -0.5, %v4891_v29  ;;  %v4893_v32 = vpop.f32.mrb[162].mxu0  ;;  %v5097_v33 = vpop.f32.mrb[162].mxu1 }
 0x67c   : > { %v5341_v34 = vmul.f32 2.0, %v12428_v26  ;;  %v5343_v18 = vmul.f32 2.0, %v12430_v28  ;;  %v12431_v35 = vadd.f32 -0.5, %v4893_v32  ;;  %v12433_v24 = vadd.f32 -0.5, %v5097_v33  ;;  %v4895_v36 = vpop.f32.mrb[163].mxu0  ;;  %v15468_v37 = vpop.f32.mrb[163].mxu1 }
 0x67d   : > { %v5342_v38 = vmul.f32 2.0, %v12429_v31  ;;  %v12432_v39 = vadd.f32 -0.5, %v4895_v36 }
 0x67e   : > { %v14218_v40 = vpack.c.bf16 %v5343_v18, %v5343_v18  ;;  %v5344_v4 = vmul.f32 2.0, %v12431_v35  ;;  %v5346_v13 = vmul.f32 2.0, %v12433_v24  ;;  %15576 = vmatmul.mubr.msk.bf16.gmra.mrb[12].mxu0 %vm335_vm1, %v16242_v5 }
 0x67f   : > { %v14217_v6 = vpack.c.bf16 %v5342_v38, %v5341_v34  ;;  %v5345_v7 = vmul.f32 2.0, %v12432_v39  ;;  %15579 = vmatprep.mubr.msk.bf16.mxu0 %vm16353_vm0, %v16352_v0 }
 0x680   : > { %12601 = vst.msk [vmem:[%s16753_s27 + $0x638] sm:$0xf] %vm1687_vm2, %v14218_v40  ;;  %v14220_v8 = vpack.c.bf16 %v5346_v13, %v5346_v13 }
 0x681   : > { %12600 = vst [vmem:[%s16753_s27 + $0x630] sm:$0xff] %v14217_v6  ;;  %v14219_v9 = vpack.c.bf16 %v5345_v7, %v5344_v4  ;;  %v4899_v22 = vpop.f32.mrb[164].mxu0  ;;  %v5102_v15 = vpop.f32.mrb[164].mxu1 }
 0x682   : > { %12603 = vst.msk [vmem:[%s16753_s27 + $0x644] sm:$0xf] %vm1687_vm2, %v14220_v8  ;;  %v12434_v17 = vadd.f32 -0.5, %v4899_v22  ;;  %v12436_v41 = vadd.f32 -0.5, %v5102_v15  ;;  %v4901_v10 = vpop.f32.mrb[165].mxu0  ;;  %v15471_v42 = vpop.f32.mrb[165].mxu1 }
 0x683   : > { %12602 = vst [vmem:[%s16753_s27 + $0x63c] sm:$0xff] %v14219_v9  ;;  %v12435_v43 = vadd.f32 -0.5, %v4901_v10  ;;  %v4903_v44 = vpop.f32.mrb[166].mxu0  ;;  %v5105_v45 = vpop.f32.mrb[166].mxu1 }
 0x684   : > { %v5347_v46 = vmul.f32 2.0, %v12434_v17  ;;  %v5349_v11 = vmul.f32 2.0, %v12436_v41  ;;  %v12437_v25 = vadd.f32 -0.5, %v4903_v44  ;;  %v12439_v20 = vadd.f32 -0.5, %v5105_v45  ;;  %v4905_v47 = vpop.f32.mrb[167].mxu0  ;;  %v15472_v48 = vpop.f32.mrb[167].mxu1 }
 0x685   : > { %v5348_v49 = vmul.f32 2.0, %v12435_v43  ;;  %v12438_v50 = vadd.f32 -0.5, %v4905_v47 }
 0x686   : > { %v14222_v51 = vpack.c.bf16 %v5349_v11, %v5349_v11  ;;  %v5350_v52 = vmul.f32 2.0, %v12437_v25  ;;  %v5352_v53 = vmul.f32 2.0, %v12439_v20  ;;  %15580 = vmatmul.mubr.msk.bf16.gmra.mrb[16].mxu0 %vm335_vm1, %v16243_v54 }
 0x687   : > { %v14221_v14 = vpack.c.bf16 %v5348_v49, %v5347_v46  ;;  %v5351_v55 = vmul.f32 2.0, %v12438_v50  ;;  %15585 = vmatprep.mubr.msk.bf16.mxu0 %vm16353_vm0, %v16352_v0 }
 0x688   : > { %12605 = vst.msk [vmem:[%s16753_s27 + $0x650] sm:$0xf] %vm1687_vm2, %v14222_v51  ;;  %v14224_v56 = vpack.c.bf16 %v5352_v53, %v5352_v53 }
 0x689   : > { %12604 = vst [vmem:[%s16753_s27 + $0x648] sm:$0xff] %v14221_v14  ;;  %v14223_v57 = vpack.c.bf16 %v5351_v55, %v5350_v52  ;;  %v4909_v23 = vpop.f32.mrb[168].mxu0  ;;  %v5110_v58 = vpop.f32.mrb[168].mxu1 }
 0x68a   : > { %12607 = vst.msk [vmem:[%s16753_s27 + $0x65c] sm:$0xf] %vm1687_vm2, %v14224_v56  ;;  %v12440_v59 = vadd.f32 -0.5, %v4909_v23  ;;  %v12442_v60 = vadd.f32 -0.5, %v5110_v58  ;;  %v4911_v12 = vpop.f32.mrb[169].mxu0  ;;  %v15475_v61 = vpop.f32.mrb[169].mxu1 }
 0x68b   : > { %12606 = vst [vmem:[%s16753_s27 + $0x654] sm:$0xff] %v14223_v57  ;;  %v12441_v62 = vadd.f32 -0.5, %v4911_v12  ;;  %v4913_v63 = vpop.f32.mrb[170].mxu0  ;;  %v5113_v1 = vpop.f32.mrb[170].mxu1 }
 0x68c   : > { %v5353_v3 = vmul.f32 2.0, %v12440_v59  ;;  %v5355_v16 = vmul.f32 2.0, %v12442_v60  ;;  %v12443_v21 = vadd.f32 -0.5, %v4913_v63  ;;  %v12445_v26 = vadd.f32 -0.5, %v5113_v1  ;;  %v4915_v28 = vpop.f32.mrb[171].mxu0  ;;  %v15476_v29 = vpop.f32.mrb[171].mxu1 }
 0x68d   : > { %v5354_v30 = vmul.f32 2.0, %v12441_v62  ;;  %v12444_v31 = vadd.f32 -0.5, %v4915_v28 }
 0x68e   : > { %v14226_v32 = vpack.c.bf16 %v5355_v16, %v5355_v16  ;;  %v5356_v33 = vmul.f32 2.0, %v12443_v21  ;;  %v5358_v34 = vmul.f32 2.0, %v12445_v26 }
 0x68f   : > { %v14225_v18 = vpack.c.bf16 %v5354_v30, %v5353_v3  ;;  %v5357_v35 = vmul.f32 2.0, %v12444_v31 }
 0x690   : > { %12609 = vst.msk [vmem:[%s16753_s27 + $0x668] sm:$0xf] %vm1687_vm2, %v14226_v32  ;;  %v14228_v24 = vpack.c.bf16 %v5358_v34, %v5358_v34 }
 0x691   : > { %12608 = vst [vmem:[%s16753_s27 + $0x660] sm:$0xff] %v14225_v18  ;;  %v14227_v36 = vpack.c.bf16 %v5357_v35, %v5356_v33  ;;  %v4919_v37 = vpop.f32.mrb[172].mxu0  ;;  %v5118_v38 = vpop.f32.mrb[172].mxu1 }
 0x692   : > { %12611 = vst.msk [vmem:[%s16753_s27 + $0x674] sm:$0xf] %vm1687_vm2, %v14228_v24  ;;  %v12446_v39 = vadd.f32 -0.5, %v4919_v37  ;;  %v12448_v40 = vadd.f32 -0.5, %v5118_v38  ;;  %v4921_v4 = vpop.f32.mrb[173].mxu0  ;;  %v15479_v13 = vpop.f32.mrb[173].mxu1 }
 0x693   : > { %12610 = vst [vmem:[%s16753_s27 + $0x66c] sm:$0xff] %v14227_v36  ;;  %v12447_v5 = vadd.f32 -0.5, %v4921_v4  ;;  %v4923_v6 = vpop.f32.mrb[174].mxu0  ;;  %v5121_v7 = vpop.f32.mrb[174].mxu1 }
 0x694   : > { %v5359_v8 = vmul.f32 2.0, %v12446_v39  ;;  %v5361_v9 = vmul.f32 2.0, %v12448_v40  ;;  %v12449_v22 = vadd.f32 -0.5, %v4923_v6  ;;  %v12451_v15 = vadd.f32 -0.5, %v5121_v7  ;;  %v4925_v17 = vpop.f32.mrb[175].mxu0  ;;  %v15480_v41 = vpop.f32.mrb[175].mxu1 }
 0x695   : > { %v5360_v10 = vmul.f32 2.0, %v12447_v5  ;;  %v12450_v42 = vadd.f32 -0.5, %v4925_v17 }
 0x696   : > { %v14230_v43 = vpack.c.bf16 %v5361_v9, %v5361_v9  ;;  %v5362_v44 = vmul.f32 2.0, %v12449_v22  ;;  %v5364_v45 = vmul.f32 2.0, %v12451_v15 }
 0x697   : > { %v14229_v46 = vpack.c.bf16 %v5360_v10, %v5359_v8  ;;  %v5363_v11 = vmul.f32 2.0, %v12450_v42 }
 0x698   : > { %12613 = vst.msk [vmem:[%s16753_s27 + $0x680] sm:$0xf] %vm1687_vm2, %v14230_v43  ;;  %v14232_v25 = vpack.c.bf16 %v5364_v45, %v5364_v45 }
 0x699   : > { %12612 = vst [vmem:[%s16753_s27 + $0x678] sm:$0xff] %v14229_v46  ;;  %v14231_v20 = vpack.c.bf16 %v5363_v11, %v5362_v44  ;;  %v4929_v47 = vpop.f32.mrb[176].mxu0  ;;  %v5126_v48 = vpop.f32.mrb[176].mxu1 }
 0x69a   : > { %12615 = vst.msk [vmem:[%s16753_s27 + $0x68c] sm:$0xf] %vm1687_vm2, %v14232_v25  ;;  %v12452_v49 = vadd.f32 -0.5, %v4929_v47  ;;  %v12454_v50 = vadd.f32 -0.5, %v5126_v48  ;;  %v4931_v51 = vpop.f32.mrb[177].mxu0  ;;  %v15483_v52 = vpop.f32.mrb[177].mxu1 }
 0x69b   : > { %12614 = vst [vmem:[%s16753_s27 + $0x684] sm:$0xff] %v14231_v20  ;;  %v12453_v53 = vadd.f32 -0.5, %v4931_v51  ;;  %v4933_v54 = vpop.f32.mrb[178].mxu0  ;;  %v5129_v14 = vpop.f32.mrb[178].mxu1 }
 0x69c   : > { %v5365_v55 = vmul.f32 2.0, %v12452_v49  ;;  %v5367_v56 = vmul.f32 2.0, %v12454_v50  ;;  %v12455_v57 = vadd.f32 -0.5, %v4933_v54  ;;  %v12457_v23 = vadd.f32 -0.5, %v5129_v14  ;;  %v4935_v58 = vpop.f32.mrb[179].mxu0  ;;  %v15484_v59 = vpop.f32.mrb[179].mxu1 }
 0x69d   : > { %v5366_v60 = vmul.f32 2.0, %v12453_v53  ;;  %v12456_v12 = vadd.f32 -0.5, %v4935_v58 }
 0x69e   : > { %v14234_v61 = vpack.c.bf16 %v5367_v56, %v5367_v56  ;;  %v5368_v62 = vmul.f32 2.0, %v12455_v57  ;;  %v5370_v63 = vmul.f32 2.0, %v12457_v23 }
 0x69f   : > { %v14233_v1 = vpack.c.bf16 %v5366_v60, %v5365_v55  ;;  %v5369_v3 = vmul.f32 2.0, %v12456_v12 }
 0x6a0   : > { %12617 = vst.msk [vmem:[%s16753_s27 + $0x698] sm:$0xf] %vm1687_vm2, %v14234_v61  ;;  %v14236_v16 = vpack.c.bf16 %v5370_v63, %v5370_v63 }
 0x6a1   : > { %12616 = vst [vmem:[%s16753_s27 + $0x690] sm:$0xff] %v14233_v1  ;;  %v14235_v21 = vpack.c.bf16 %v5369_v3, %v5368_v62  ;;  %v4939_v26 = vpop.f32.mrb[180].mxu0  ;;  %v5134_v28 = vpop.f32.mrb[180].mxu1 }
 0x6a2   : > { %12619 = vst.msk [vmem:[%s16753_s27 + $0x6a4] sm:$0xf] %vm1687_vm2, %v14236_v16  ;;  %v12458_v29 = vadd.f32 -0.5, %v4939_v26  ;;  %v12460_v30 = vadd.f32 -0.5, %v5134_v28  ;;  %v4941_v31 = vpop.f32.mrb[181].mxu0  ;;  %v15487_v32 = vpop.f32.mrb[181].mxu1 }
 0x6a3   : > { %12618 = vst [vmem:[%s16753_s27 + $0x69c] sm:$0xff] %v14235_v21  ;;  %v12459_v33 = vadd.f32 -0.5, %v4941_v31  ;;  %v4943_v34 = vpop.f32.mrb[182].mxu0  ;;  %v5137_v18 = vpop.f32.mrb[182].mxu1 }
 0x6a4   : > { %v5371_v35 = vmul.f32 2.0, %v12458_v29  ;;  %v5373_v24 = vmul.f32 2.0, %v12460_v30  ;;  %v12461_v36 = vadd.f32 -0.5, %v4943_v34  ;;  %v12463_v37 = vadd.f32 -0.5, %v5137_v18  ;;  %v4945_v38 = vpop.f32.mrb[183].mxu0  ;;  %v15488_v39 = vpop.f32.mrb[183].mxu1 }
 0x6a5   : > { %v5372_v40 = vmul.f32 2.0, %v12459_v33  ;;  %v12462_v4 = vadd.f32 -0.5, %v4945_v38 }
 0x6a6   : > { %v14238_v13 = vpack.c.bf16 %v5373_v24, %v5373_v24  ;;  %v5374_v5 = vmul.f32 2.0, %v12461_v36  ;;  %v5376_v6 = vmul.f32 2.0, %v12463_v37 }
 0x6a7   : > { %v14237_v7 = vpack.c.bf16 %v5372_v40, %v5371_v35  ;;  %v5375_v8 = vmul.f32 2.0, %v12462_v4 }
 0x6a8   : > { %12621 = vst.msk [vmem:[%s16753_s27 + $0x6b0] sm:$0xf] %vm1687_vm2, %v14238_v13  ;;  %v14240_v9 = vpack.c.bf16 %v5376_v6, %v5376_v6 }
 0x6a9   : > { %12620 = vst [vmem:[%s16753_s27 + $0x6a8] sm:$0xff] %v14237_v7  ;;  %v14239_v22 = vpack.c.bf16 %v5375_v8, %v5374_v5  ;;  %v4949_v15 = vpop.f32.mrb[184].mxu0  ;;  %v5142_v17 = vpop.f32.mrb[184].mxu1 }
 0x6aa   : > { %12623 = vst.msk [vmem:[%s16753_s27 + $0x6bc] sm:$0xf] %vm1687_vm2, %v14240_v9  ;;  %v12464_v41 = vadd.f32 -0.5, %v4949_v15  ;;  %v12466_v10 = vadd.f32 -0.5, %v5142_v17  ;;  %v4951_v42 = vpop.f32.mrb[185].mxu0  ;;  %v15491_v43 = vpop.f32.mrb[185].mxu1 }
 0x6ab   : > { %12622 = vst [vmem:[%s16753_s27 + $0x6b4] sm:$0xff] %v14239_v22  ;;  %v12465_v44 = vadd.f32 -0.5, %v4951_v42  ;;  %v4953_v45 = vpop.f32.mrb[186].mxu0  ;;  %v5145_v46 = vpop.f32.mrb[186].mxu1 }
 0x6ac   : > { %v5377_v11 = vmul.f32 2.0, %v12464_v41  ;;  %v5379_v25 = vmul.f32 2.0, %v12466_v10  ;;  %v12467_v20 = vadd.f32 -0.5, %v4953_v45  ;;  %v12469_v47 = vadd.f32 -0.5, %v5145_v46  ;;  %v4955_v48 = vpop.f32.mrb[187].mxu0  ;;  %v15492_v49 = vpop.f32.mrb[187].mxu1 }
 0x6ad   : > { %v5378_v50 = vmul.f32 2.0, %v12465_v44  ;;  %v12468_v51 = vadd.f32 -0.5, %v4955_v48 }
 0x6ae   : > { %v14242_v52 = vpack.c.bf16 %v5379_v25, %v5379_v25  ;;  %v5380_v53 = vmul.f32 2.0, %v12467_v20  ;;  %v5382_v54 = vmul.f32 2.0, %v12469_v47 }
 0x6af   : > { %v14241_v14 = vpack.c.bf16 %v5378_v50, %v5377_v11  ;;  %v5381_v55 = vmul.f32 2.0, %v12468_v51 }
 0x6b0   : > { %12625 = vst.msk [vmem:[%s16753_s27 + $0x6c8] sm:$0xf] %vm1687_vm2, %v14242_v52  ;;  %v14244_v56 = vpack.c.bf16 %v5382_v54, %v5382_v54 }
 0x6b1   : > { %12624 = vst [vmem:[%s16753_s27 + $0x6c0] sm:$0xff] %v14241_v14  ;;  %v14243_v57 = vpack.c.bf16 %v5381_v55, %v5380_v53  ;;  %v4959_v23 = vpop.f32.mrb[188].mxu0  ;;  %v5150_v58 = vpop.f32.mrb[188].mxu1 }
 0x6b2   : > { %12627 = vst.msk [vmem:[%s16753_s27 + $0x6d4] sm:$0xf] %vm1687_vm2, %v14244_v56  ;;  %v12470_v59 = vadd.f32 -0.5, %v4959_v23  ;;  %v12472_v60 = vadd.f32 -0.5, %v5150_v58  ;;  %v4961_v12 = vpop.f32.mrb[189].mxu0  ;;  %v15495_v61 = vpop.f32.mrb[189].mxu1 }
 0x6b3   : > { %12626 = vst [vmem:[%s16753_s27 + $0x6cc] sm:$0xff] %v14243_v57  ;;  %v12471_v62 = vadd.f32 -0.5, %v4961_v12  ;;  %v4963_v63 = vpop.f32.mrb[190].mxu0  ;;  %v5153_v1 = vpop.f32.mrb[190].mxu1 }
 0x6b4   : > { %v5383_v3 = vmul.f32 2.0, %v12470_v59  ;;  %v5385_v16 = vmul.f32 2.0, %v12472_v60  ;;  %v12473_v21 = vadd.f32 -0.5, %v4963_v63  ;;  %v12475_v26 = vadd.f32 -0.5, %v5153_v1  ;;  %v4965_v28 = vpop.f32.mrb[191].mxu0  ;;  %v15496_v29 = vpop.f32.mrb[191].mxu1 }
 0x6b5   : > { %v5384_v30 = vmul.f32 2.0, %v12471_v62  ;;  %v12474_v31 = vadd.f32 -0.5, %v4965_v28  ;;  %v12969_v28 = vld [vmem:[%s16434_s8 + $0x50] sm:$0xff]  ;;  %v12970_v29 = vld [vmem:[%s16434_s8 + $0x58] sm:$0xff] }
 0x6b6   : > { %v14246_v32 = vpack.c.bf16 %v5385_v16, %v5385_v16  ;;  %v5386_v33 = vmul.f32 2.0, %v12473_v21  ;;  %v5388_v34 = vmul.f32 2.0, %v12475_v26  ;;  %v12638_v26 = vld [vmem:[%s16753_s27 + $0x714] sm:$0x33] }
 0x6b7   : > { %v14245_v18 = vpack.c.bf16 %v5384_v30, %v5383_v3  ;;  %v5387_v35 = vmul.f32 2.0, %v12474_v31  ;;  %v12640_v3 = vld [vmem:[%s16753_s27 + $0x71c] sm:$0x3] }
 0x6b8   : > { %12629 = vst.msk [vmem:[%s16753_s27 + $0x6e0] sm:$0xf] %vm1687_vm2, %v14246_v32  ;;  %v14248_v24 = vpack.c.bf16 %v5388_v34, %v5388_v34 }
 0x6b9   : > { %12628 = vst [vmem:[%s16753_s27 + $0x6d8] sm:$0xff] %v14245_v18  ;;  %v14247_v36 = vpack.c.bf16 %v5387_v35, %v5386_v33  ;;  %v4969_v37 = vpop.f32.mrb[192].mxu0  ;;  %v5158_v38 = vpop.f32.mrb[192].mxu1  ;;  %v7227_v35 = vpack.c.bf16 %v12970_v29, %v12969_v28 }
 0x6ba   : > { %12631 = vst.msk [vmem:[%s16753_s27 + $0x6ec] sm:$0xf] %vm1687_vm2, %v14248_v24  ;;  %v12476_v39 = vadd.f32 -0.5, %v4969_v37  ;;  %v12478_v40 = vadd.f32 -0.5, %v5158_v38  ;;  %v4971_v4 = vpop.f32.mrb[193].mxu0  ;;  %v15499_v13 = vpop.f32.mrb[193].mxu1 }
 0x6bb   : > { %12630 = vst [vmem:[%s16753_s27 + $0x6e4] sm:$0xff] %v14247_v36  ;;  %v12477_v5 = vadd.f32 -0.5, %v4971_v4  ;;  %v4973_v6 = vpop.f32.mrb[194].mxu0  ;;  %v5161_v7 = vpop.f32.mrb[194].mxu1  ;;  %v16244_v37 = vld [vmem:[#allocation2] ss:$12 sps:$4 sm:$0xff]  }
 0x6bc   : > { %v5389_v8 = vmul.f32 2.0, %v12476_v39  ;;  %v5391_v9 = vmul.f32 2.0, %v12478_v40  ;;  %v12479_v22 = vadd.f32 -0.5, %v4973_v6  ;;  %v12481_v15 = vadd.f32 -0.5, %v5161_v7  ;;  %v4975_v17 = vpop.f32.mrb[195].mxu0  ;;  %v15500_v41 = vpop.f32.mrb[195].mxu1 }
 0x6bd   : > { %v5390_v10 = vmul.f32 2.0, %v12477_v5  ;;  %v12480_v42 = vadd.f32 -0.5, %v4975_v17 }
 0x6be   : > { %v14250_v43 = vpack.c.bf16 %v5391_v9, %v5391_v9  ;;  %v5392_v44 = vmul.f32 2.0, %v12479_v22  ;;  %v5394_v45 = vmul.f32 2.0, %v12481_v15 }
 0x6bf   : > { %v14249_v46 = vpack.c.bf16 %v5390_v10, %v5389_v8  ;;  %v5393_v11 = vmul.f32 2.0, %v12480_v42 }
 0x6c0   : > { %12633 = vst.msk [vmem:[%s16753_s27 + $0x6f8] sm:$0xf] %vm1687_vm2, %v14250_v43  ;;  %v14252_v25 = vpack.c.bf16 %v5394_v45, %v5394_v45 }
 0x6c1   : > { %12632 = vst [vmem:[%s16753_s27 + $0x6f0] sm:$0xff] %v14249_v46  ;;  %v14251_v20 = vpack.c.bf16 %v5393_v11, %v5392_v44  ;;  %v4979_v47 = vpop.f32.mrb[196].mxu0  ;;  %v5166_v48 = vpop.f32.mrb[196].mxu1 }
 0x6c2   : > { %12635 = vst.msk [vmem:[%s16753_s27 + $0x704] sm:$0xf] %vm1687_vm2, %v14252_v25  ;;  %v12482_v49 = vadd.f32 -0.5, %v4979_v47  ;;  %v12484_v50 = vadd.f32 -0.5, %v5166_v48  ;;  %v4981_v51 = vpop.f32.mrb[197].mxu0  ;;  %v15503_v52 = vpop.f32.mrb[197].mxu1 }
 0x6c3   : > { %12634 = vst [vmem:[%s16753_s27 + $0x6fc] sm:$0xff] %v14251_v20  ;;  %v12483_v53 = vadd.f32 -0.5, %v4981_v51  ;;  %v4983_v54 = vpop.f32.mrb[198].mxu0  ;;  %v5169_v14 = vpop.f32.mrb[198].mxu1 }
 0x6c4   : > { %v5395_v55 = vmul.f32 2.0, %v12482_v49  ;;  %v5397_v56 = vmul.f32 2.0, %v12484_v50  ;;  %v12485_v57 = vadd.f32 -0.5, %v4983_v54  ;;  %v12487_v23 = vadd.f32 -0.5, %v5169_v14  ;;  %v4985_v58 = vpop.f32.mrb[199].mxu0  ;;  %v15504_v59 = vpop.f32.mrb[199].mxu1 }
 0x6c5   : > { %v5396_v60 = vmul.f32 2.0, %v12483_v53  ;;  %v12486_v12 = vadd.f32 -0.5, %v4985_v58 }
 0x6c6   : > { %v14254_v61 = vpack.c.bf16 %v5397_v56, %v5397_v56  ;;  %v5398_v62 = vmul.f32 2.0, %v12485_v57  ;;  %v5400_v63 = vmul.f32 2.0, %v12487_v23 }
 0x6c7   : > { %v14253_v1 = vpack.c.bf16 %v5396_v60, %v5395_v55  ;;  %v5399_v16 = vmul.f32 2.0, %v12486_v12 }
 0x6c8   : > { %12637 = vst.msk [vmem:[%s16753_s27 + $0x710] sm:$0xf] %vm1687_vm2, %v14254_v61  ;;  %v14256_v21 = vpack.c.bf16 %v5400_v63, %v5400_v63 }
 0x6c9   : > { %12636 = vst [vmem:[%s16753_s27 + $0x708] sm:$0xff] %v14253_v1  ;;  %v14255_v30 = vpack.c.bf16 %v5399_v16, %v5398_v62  ;;  %v5900_v31 = vpop.f32.mrb[200].mxu0 }
 0x6ca   : > { %v5860_v32 = vsel %vm16919_vm10, %v14256_v21, %v12640_v3  ;;  %v15509_v33 = vpop.f32.mrb[201].mxu0 }
 0x6cb   : > { %12641 = vst [vmem:[%s16753_s27 + $0x71c] sm:$0x3] %v5860_v32  ;;  %v5857_v34 = vsel %vm16929_vm11, %v14255_v30, %v12638_v26  ;;  %v5903_v18 = vpop.f32.mrb[202].mxu0 }
 0x6cc   : > { %12639 = vst [vmem:[%s16753_s27 + $0x714] sm:$0x33] %v5857_v34  ;;  %v6051_v24 = vpack.c.bf16 %v5903_v18, %v5900_v31  ;;  %v15510_v36 = vpop.f32.mrb[203].mxu0 }
 0x6ce   : > { %12663 = vmatmul.mubr.msk.bf16.vlgmr.msra.gmra.mrb[200].mxu1 %vm335_vm1, %v6051_v24  ;;  %15586 = vmatmul.mubr.msk.bf16.vlgmr.msra.gmra.mrb[20].mxu0 %vm335_vm1, %v6051_v24 }
 0x6cf   : > { %15662 = vmatpush3.bf16.msra.mxu1 %v7227_v35  ;;  %6169 = vmatprep.mubr.bf16.mxu1 %v16354_v19 }
 0x6d0   : > { %15589 = vmatprep.mubr.msk.bf16.mxu0 %vm16353_vm0, %v16352_v0  ;;  %7490 = vmatpush1.bf16.msra.mxu0 %v16244_v37 }
 0x6d1   : > { %v5908_v38 = vpop.f32.mrb[204].mxu0  ;;  %15739 = vmatprep.subr.bf16.mxu1 %v16352_v0  ;;  %15817 = vmatprep.subr.bf16.mxu0 %v16352_v0 }
 0x6d2   : > { %v15513_v39 = vpop.f32.mrb[205].mxu0 }
 0x6d3   : > { %v5911_v40 = vpop.f32.mrb[206].mxu0 }
 0x6d4   : > { %v6052_v4 = vpack.c.bf16 %v5911_v40, %v5908_v38  ;;  %v15514_v13 = vpop.f32.mrb[207].mxu0 }
 0x6d6   : > { %12664 = vmatmul.mubr.msk.bf16.gmra.mrb[204].mxu1 %vm335_vm1, %v6052_v4  ;;  %15590 = vmatmul.mubr.msk.bf16.gmra.mrb[24].mxu0 %vm335_vm1, %v6052_v4 }
 0x6d7   : > { %6179 = vmatprep.mubr.bf16.mxu1 %v16354_v19  ;;  %15593 = vmatprep.mubr.msk.bf16.mxu0 %vm16353_vm0, %v16352_v0 }
 0x6d9   : > { %v5916_v5 = vpop.f32.mrb[208].mxu0 }
 0x6da   : > { %v15517_v6 = vpop.f32.mrb[209].mxu0 }
 0x6db   : > { %v5919_v7 = vpop.f32.mrb[210].mxu0 }
 0x6dc   : > { %v6053_v8 = vpack.c.bf16 %v5919_v7, %v5916_v5  ;;  %v15518_v9 = vpop.f32.mrb[211].mxu0 }
 0x6de   : > { %12665 = vmatmul.mubr.msk.bf16.gmra.mrb[208].mxu1 %vm335_vm1, %v6053_v8  ;;  %15594 = vmatmul.mubr.msk.bf16.gmra.mrb[28].mxu0 %vm335_vm1, %v6053_v8 }
 0x6df   : > { %6189 = vmatprep.mubr.bf16.mxu1 %v16354_v19  ;;  %15597 = vmatprep.mubr.msk.bf16.mxu0 %vm16353_vm0, %v16352_v0 }
 0x6e1   : > { %v5924_v22 = vpop.f32.mrb[212].mxu0 }
 0x6e2   : > { %v15521_v15 = vpop.f32.mrb[213].mxu0 }
 0x6e3   : > { %v5927_v17 = vpop.f32.mrb[214].mxu0 }
 0x6e4   : > { %v6054_v41 = vpack.c.bf16 %v5927_v17, %v5924_v22  ;;  %v15522_v10 = vpop.f32.mrb[215].mxu0 }
 0x6e6   : > { %12666 = vmatmul.mubr.msk.bf16.gmra.mrb[212].mxu1 %vm335_vm1, %v6054_v41  ;;  %15598 = vmatmul.mubr.msk.bf16.gmra.mrb[32].mxu0 %vm335_vm1, %v6054_v41 }
 0x6e7   : > { %6199 = vmatprep.mubr.bf16.mxu1 %v16354_v19  ;;  %15601 = vmatprep.mubr.msk.bf16.mxu0 %vm16353_vm0, %v16352_v0 }
 0x6e9   : > { %v5932_v42 = vpop.f32.mrb[216].mxu0 }
 0x6ea   : > { %v15525_v43 = vpop.f32.mrb[217].mxu0 }
 0x6eb   : > { %v5935_v44 = vpop.f32.mrb[218].mxu0 }
 0x6ec   : > { %v6055_v45 = vpack.c.bf16 %v5935_v44, %v5932_v42  ;;  %v15526_v46 = vpop.f32.mrb[219].mxu0 }
 0x6ee   : > { %12667 = vmatmul.mubr.msk.bf16.gmra.mrb[216].mxu1 %vm335_vm1, %v6055_v45  ;;  %15602 = vmatmul.mubr.msk.bf16.gmra.mrb[36].mxu0 %vm335_vm1, %v6055_v45 }
 0x6ef   : > { %6209 = vmatprep.mubr.bf16.mxu1 %v16354_v19  ;;  %15605 = vmatprep.mubr.msk.bf16.mxu0 %vm16353_vm0, %v16352_v0 }
 0x6f1   : > { %v5940_v11 = vpop.f32.mrb[220].mxu0 }
 0x6f2   : > { %v15529_v25 = vpop.f32.mrb[221].mxu0 }
 0x6f3   : > { %v5943_v20 = vpop.f32.mrb[222].mxu0 }
 0x6f4   : > { %v6056_v47 = vpack.c.bf16 %v5943_v20, %v5940_v11  ;;  %v15530_v48 = vpop.f32.mrb[223].mxu0 }
 0x6f6   : > { %12668 = vmatmul.mubr.msk.bf16.gmra.mrb[220].mxu1 %vm335_vm1, %v6056_v47  ;;  %15606 = vmatmul.mubr.msk.bf16.gmra.mrb[40].mxu0 %vm335_vm1, %v6056_v47 }
 0x6f7   : > { %6219 = vmatprep.mubr.bf16.mxu1 %v16354_v19  ;;  %15609 = vmatprep.mubr.msk.bf16.mxu0 %vm16353_vm0, %v16352_v0 }
 0x6f9   : > { %v5948_v49 = vpop.f32.mrb[224].mxu0 }
 0x6fa   : > { %v15533_v50 = vpop.f32.mrb[225].mxu0 }
 0x6fb   : > { %v5951_v51 = vpop.f32.mrb[226].mxu0 }
 0x6fc   : > { %v6057_v52 = vpack.c.bf16 %v5951_v51, %v5948_v49  ;;  %v15534_v53 = vpop.f32.mrb[227].mxu0 }
 0x6fe   : > { %12669 = vmatmul.mubr.msk.bf16.gmra.mrb[224].mxu1 %vm335_vm1, %v6057_v52  ;;  %15610 = vmatmul.mubr.msk.bf16.gmra.mrb[44].mxu0 %vm335_vm1, %v6057_v52 }
 0x6ff   : > { %6229 = vmatprep.mubr.bf16.mxu1 %v16354_v19  ;;  %15613 = vmatprep.mubr.msk.bf16.mxu0 %vm16353_vm0, %v16352_v0 }
 0x701   : > { %v5956_v54 = vpop.f32.mrb[228].mxu0 }
 0x702   : > { %v15537_v14 = vpop.f32.mrb[229].mxu0 }
 0x703   : > { %v5959_v55 = vpop.f32.mrb[230].mxu0  ;;  %v16246_v14 = vld [vmem:[#allocation2 + $0x8] ss:$12 sps:$4 sm:$0xff]  }
 0x704   : > { %v6058_v56 = vpack.c.bf16 %v5959_v55, %v5956_v54  ;;  %v15538_v57 = vpop.f32.mrb[231].mxu0  ;;  %v16245_v54 = vld [vmem:[%s19145_s0] sm:$0xff]  }
 0x705   : > { %v16247_v55 = vld [vmem:[#allocation2 + $0x4] ss:$12 sps:$4 sm:$0xff]  }
 0x706   : > { %12670 = vmatmul.mubr.msk.bf16.gmra.mrb[228].mxu1 %vm335_vm1, %v6058_v56  ;;  %15614 = vmatmul.mubr.msk.bf16.gmra.mrb[48].mxu0 %vm335_vm1, %v6058_v56  ;;  %v16248_v56 = vld [vmem:[%s19145_s0 + $0x8] sm:$0xff]   ;;  %v16249_v57 = vld [vmem:[%s19145_s0 + $0x10] sm:$0xff]  }
 0x707   : > { %6239 = vmatprep.mubr.bf16.mxu1 %v16354_v19  ;;  %15617 = vmatprep.mubr.msk.bf16.mxu0 %vm16353_vm0, %v16352_v0 }
 0x709   : > { %v5964_v23 = vpop.f32.mrb[232].mxu0 }
 0x70a   : > { %v15541_v58 = vpop.f32.mrb[233].mxu0 }
 0x70b   : > { %v5967_v59 = vpop.f32.mrb[234].mxu0  ;;  %v16251_v58 = vld [vmem:[%s19145_s0 + $0x20] sm:$0xff]  }
 0x70c   : > { %v6059_v60 = vpack.c.bf16 %v5967_v59, %v5964_v23  ;;  %v15542_v12 = vpop.f32.mrb[235].mxu0  ;;  %v16250_v23 = vld [vmem:[%s19145_s0 + $0x18] sm:$0xff]   ;;  %v16252_v59 = vld [vmem:[%s19145_s0 + $0x28] sm:$0xff]  }
 0x70d   : > { %v16254_v12 = vld [vmem:[%s19145_s0 + $0x38] sm:$0xff]  }
 0x70e   : > { %12671 = vmatmul.mubr.msk.bf16.gmra.mrb[232].mxu1 %vm335_vm1, %v6059_v60  ;;  %15618 = vmatmul.mubr.msk.bf16.gmra.mrb[52].mxu0 %vm335_vm1, %v6059_v60  ;;  %v16253_v60 = vld [vmem:[%s19145_s0 + $0x30] sm:$0xff]  }
 0x70f   : > { %6249 = vmatprep.mubr.bf16.mxu1 %v16354_v19  ;;  %15621 = vmatprep.mubr.msk.bf16.mxu0 %vm16353_vm0, %v16352_v0 }
 0x711   : > { %v5972_v61 = vpop.f32.mrb[236].mxu0 }
 0x712   : > { %v15545_v62 = vpop.f32.mrb[237].mxu0 }
 0x713   : > { %v5975_v63 = vpop.f32.mrb[238].mxu0 }
 0x714   : > { %v6060_v1 = vpack.c.bf16 %v5975_v63, %v5972_v61  ;;  %v15546_v3 = vpop.f32.mrb[239].mxu0 }
 0x716   : > { %12672 = vmatmul.mubr.msk.bf16.gmra.mrb[236].mxu1 %vm335_vm1, %v6060_v1  ;;  %15622 = vmatmul.mubr.msk.bf16.gmra.mrb[56].mxu0 %vm335_vm1, %v6060_v1 }
 0x717   : > { %6259 = vmatprep.mubr.bf16.mxu1 %v16354_v19  ;;  %15625 = vmatprep.mubr.msk.bf16.mxu0 %vm16353_vm0, %v16352_v0 }
 0x719   : > { %v5980_v16 = vpop.f32.mrb[240].mxu0 }
 0x71a   : > { %v15549_v21 = vpop.f32.mrb[241].mxu0 }
 0x71b   : > { %v5983_v26 = vpop.f32.mrb[242].mxu0 }
 0x71c   : > { %v6061_v28 = vpack.c.bf16 %v5983_v26, %v5980_v16  ;;  %v15550_v29 = vpop.f32.mrb[243].mxu0 }
 0x71e   : > { %12673 = vmatmul.mubr.msk.bf16.gmra.mrb[240].mxu1 %vm335_vm1, %v6061_v28  ;;  %15626 = vmatmul.mubr.msk.bf16.gmra.mrb[60].mxu0 %vm335_vm1, %v6061_v28 }
 0x71f   : > { %6269 = vmatprep.mubr.bf16.mxu1 %v16354_v19  ;;  %15629 = vmatprep.mubr.msk.bf16.mxu0 %vm16353_vm0, %v16352_v0 }
 0x721   : > { %v5988_v30 = vpop.f32.mrb[244].mxu0 }
 0x722   : > { %v15553_v31 = vpop.f32.mrb[245].mxu0 }
 0x723   : > { %v5991_v32 = vpop.f32.mrb[246].mxu0 }
 0x724   : > { %v6062_v33 = vpack.c.bf16 %v5991_v32, %v5988_v30  ;;  %v15554_v34 = vpop.f32.mrb[247].mxu0 }
 0x726   : > { %12674 = vmatmul.mubr.msk.bf16.gmra.mrb[244].mxu1 %vm335_vm1, %v6062_v33  ;;  %15630 = vmatmul.mubr.msk.bf16.gmra.mrb[64].mxu0 %vm335_vm1, %v6062_v33 }
 0x727   : > { %6279 = vmatprep.mubr.bf16.mxu1 %v16354_v19  ;;  %15633 = vmatprep.mubr.msk.bf16.mxu0 %vm16353_vm0, %v16352_v0 }
 0x729   : > { %v5996_v18 = vpop.f32.mrb[248].mxu0 }
 0x72a   : > { %v15557_v35 = vpop.f32.mrb[249].mxu0 }
 0x72b   : > { %v5999_v24 = vpop.f32.mrb[250].mxu0 }
 0x72c   : > { %v6063_v36 = vpack.c.bf16 %v5999_v24, %v5996_v18  ;;  %v15558_v37 = vpop.f32.mrb[251].mxu0 }
 0x72e   : > { %12675 = vmatmul.mubr.msk.bf16.gmra.mrb[248].mxu1 %vm335_vm1, %v6063_v36  ;;  %15634 = vmatmul.mubr.msk.bf16.gmra.mrb[68].mxu0 %vm335_vm1, %v6063_v36 }
 0x72f   : > { %6289 = vmatprep.mubr.bf16.mxu1 %v16354_v19  ;;  %15637 = vmatprep.mubr.msk.bf16.mxu0 %vm16353_vm0, %v16352_v0 }
 0x731   : > { %v6004_v38 = vpop.f32.mrb[252].mxu0 }
 0x732   : > { %v15561_v39 = vpop.f32.mrb[253].mxu0 }
 0x733   : > { %v6007_v40 = vpop.f32.mrb[254].mxu0 }
 0x734   : > { %v6064_v4 = vpack.c.bf16 %v6007_v40, %v6004_v38  ;;  %v15562_v13 = vpop.f32.mrb[255].mxu0  ;;  %v16255_v38 = vld [vmem:[%s19145_s0 + $0x40] sm:$0xff]  }
 0x736   : > { %12676 = vmatmul.mubr.msk.bf16.gmra.mrb[252].mxu1 %vm335_vm1, %v6064_v4  ;;  %15638 = vmatmul.mubr.msk.bf16.gmra.mrb[72].mxu0 %vm335_vm1, %v6064_v4 }
 0x737   : > { %6299 = vmatprep.mubr.bf16.mxu1 %v16354_v19  ;;  %15641 = vmatprep.mubr.msk.bf16.mxu0 %vm16353_vm0, %v16352_v0 }
 0x739   : > { %v6012_v5 = vpop.f32.mrb[0].mxu0 }
 0x73a   : > { %v15565_v6 = vpop.f32.mrb[1].mxu0 }
 0x73b   : > { %v6015_v7 = vpop.f32.mrb[2].mxu0 }
 0x73c   : > { %v6065_v8 = vpack.c.bf16 %v6015_v7, %v6012_v5  ;;  %v15566_v9 = vpop.f32.mrb[3].mxu0 }
 0x73e   : > { %12677 = vmatmul.mubr.msk.bf16.gmra.mrb[0].mxu1 %vm335_vm1, %v6065_v8  ;;  %15642 = vmatmul.mubr.msk.bf16.gmra.mrb[76].mxu0 %vm335_vm1, %v6065_v8 }
 0x73f   : > { %6309 = vmatprep.mubr.bf16.mxu1 %v16354_v19  ;;  %15645 = vmatprep.mubr.msk.bf16.mxu0 %vm16353_vm0, %v16352_v0 }
 0x741   : > { %v6020_v22 = vpop.f32.mrb[4].mxu0 }
 0x742   : > { %v15569_v15 = vpop.f32.mrb[5].mxu0 }
 0x743   : > { %v6023_v17 = vpop.f32.mrb[6].mxu0 }
 0x744   : > { %v6066_v41 = vpack.c.bf16 %v6023_v17, %v6020_v22  ;;  %v15570_v10 = vpop.f32.mrb[7].mxu0 }
 0x746   : > { %12678 = vmatmul.mubr.msk.bf16.gmra.mrb[4].mxu1 %vm335_vm1, %v6066_v41  ;;  %15646 = vmatmul.mubr.msk.bf16.gmra.mrb[80].mxu0 %vm335_vm1, %v6066_v41 }
 0x747   : > { %6319 = vmatprep.mubr.bf16.mxu1 %v16354_v19  ;;  %15649 = vmatprep.mubr.msk.bf16.mxu0 %vm16353_vm0, %v16352_v0 }
 0x749   : > { %v6028_v42 = vpop.f32.mrb[8].mxu0 }
 0x74a   : > { %v15573_v43 = vpop.f32.mrb[9].mxu0 }
 0x74b   : > { %v6031_v44 = vpop.f32.mrb[10].mxu0 }
 0x74c   : > { %v6067_v45 = vpack.c.bf16 %v6031_v44, %v6028_v42  ;;  %v15574_v46 = vpop.f32.mrb[11].mxu0 }
 0x74e   : > { %12679 = vmatmul.mubr.msk.bf16.gmra.mrb[8].mxu1 %vm335_vm1, %v6067_v45  ;;  %15650 = vmatmul.mubr.msk.bf16.gmra.mrb[84].mxu0 %vm335_vm1, %v6067_v45 }
 0x74f   : > { %6329 = vmatprep.mubr.bf16.mxu1 %v16354_v19  ;;  %15653 = vmatprep.mubr.msk.bf16.mxu0 %vm16353_vm0, %v16352_v0 }
 0x751   : > { %v6036_v11 = vpop.f32.mrb[12].mxu0 }
 0x752   : > { %v15577_v25 = vpop.f32.mrb[13].mxu0 }
 0x753   : > { %v6039_v20 = vpop.f32.mrb[14].mxu0 }
 0x754   : > { %v6068_v47 = vpack.c.bf16 %v6039_v20, %v6036_v11  ;;  %v15578_v48 = vpop.f32.mrb[15].mxu0 }
 0x756   : > { %12680 = vmatmul.mubr.msk.bf16.gmra.mrb[12].mxu1 %vm335_vm1, %v6068_v47  ;;  %15654 = vmatmul.mubr.msk.bf16.gmra.mrb[88].mxu0 %vm335_vm1, %v6068_v47 }
 0x757   : > { %6339 = vmatprep.mubr.bf16.mxu1 %v16354_v19  ;;  %15657 = vmatprep.mubr.msk.bf16.mxu0 %vm16353_vm0, %v16352_v0 }
 0x759   : > { %v6044_v49 = vpop.f32.mrb[16].mxu0 }
 0x75a   : > { %v15581_v50 = vpop.f32.mrb[17].mxu0 }
 0x75b   : > { %v6047_v51 = vpop.f32.mrb[18].mxu0 }
 0x75c   : > { %v6069_v52 = vpack.c.bf16 %v6047_v51, %v6044_v49  ;;  %v15582_v53 = vpop.f32.mrb[19].mxu0  ;;  %v16256_v49 = vld [vmem:[%s19145_s0 + $0x48] sm:$0xff]  }
 0x75e   : > { %12681 = vmatmul.mubr.msk.bf16.gmra.mrb[16].mxu1 %vm335_vm1, %v6069_v52  ;;  %15658 = vmatmul.mubr.msk.bf16.gmra.mrb[92].mxu0 %vm335_vm1, %v6069_v52 }
 0x75f   : > { %15663 = vmatprep.mubr.msk.bf16.mxu1 %vm16353_vm0, %v16352_v0  ;;  %7521 = vmatprep.mubr.bf16.mxu0 %v16354_v19 }
 0x766   : > { %15664 = vmatmul.mubr.msk.bf16.vlgmr.msra.gmra.mrb[20].mxu1 %vm335_vm1, %v16245_v54 }
 0x767   : > { %15667 = vmatprep.mubr.msk.bf16.mxu1 %vm16353_vm0, %v16352_v0  ;;  %15740 = vmatpush3.bf16.msra.mxu1 %v16246_v14 }
 0x768   : > { %8851 = vmatprep.subr.bf16.mxu1 %v16247_v55 }
 0x76e   : > { %15668 = vmatmul.mubr.msk.bf16.gmra.mrb[24].mxu1 %vm335_vm1, %v16248_v56 }
 0x76f   : > { %15671 = vmatprep.mubr.msk.bf16.mxu1 %vm16353_vm0, %v16352_v0 }
 0x776   : > { %15672 = vmatmul.mubr.msk.bf16.gmra.mrb[28].mxu1 %vm335_vm1, %v16249_v57 }
 0x777   : > { %15675 = vmatprep.mubr.msk.bf16.mxu1 %vm16353_vm0, %v16352_v0 }
 0x77e   : > { %15676 = vmatmul.mubr.msk.bf16.gmra.mrb[32].mxu1 %vm335_vm1, %v16250_v23 }
 0x77f   : > { %15679 = vmatprep.mubr.msk.bf16.mxu1 %vm16353_vm0, %v16352_v0 }
 0x786   : > { %15680 = vmatmul.mubr.msk.bf16.gmra.mrb[36].mxu1 %vm335_vm1, %v16251_v58 }
 0x787   : > { %15683 = vmatprep.mubr.msk.bf16.mxu1 %vm16353_vm0, %v16352_v0 }
 0x78e   : > { %15684 = vmatmul.mubr.msk.bf16.gmra.mrb[40].mxu1 %vm335_vm1, %v16252_v59 }
 0x78f   : > { %15687 = vmatprep.mubr.msk.bf16.mxu1 %vm16353_vm0, %v16352_v0 }
 0x796   : > { %15688 = vmatmul.mubr.msk.bf16.gmra.mrb[44].mxu1 %vm335_vm1, %v16253_v60 }
 0x797   : > { %15691 = vmatprep.mubr.msk.bf16.mxu1 %vm16353_vm0, %v16352_v0 }
 0x79e   : > { %15692 = vmatmul.mubr.msk.bf16.gmra.mrb[48].mxu1 %vm335_vm1, %v16254_v12 }
 0x79f   : > { %15695 = vmatprep.mubr.msk.bf16.mxu1 %vm16353_vm0, %v16352_v0 }
 0x7a1   : > { %v6161_v61 = vpop.f32.mrb[200].mxu1  ;;  %v6384_v62 = vpop.f32.mrb[20].mxu0 }
 0x7a2   : > { %v12701_v63 = vadd.f32 -0.5, %v6161_v61  ;;  %v12703_v1 = vadd.f32 -0.5, %v6384_v62  ;;  %v6163_v3 = vpop.f32.mrb[201].mxu1  ;;  %v15587_v16 = vpop.f32.mrb[21].mxu0 }
 0x7a3   : > { %v12702_v21 = vadd.f32 -0.5, %v6163_v3  ;;  %v6165_v26 = vpop.f32.mrb[202].mxu1  ;;  %v6387_v28 = vpop.f32.mrb[22].mxu0 }
 0x7a4   : > { %v6649_v29 = vmul.f32 2.0, %v12701_v63  ;;  %v6651_v30 = vmul.f32 2.0, %v12703_v1  ;;  %v12704_v31 = vadd.f32 -0.5, %v6165_v26  ;;  %v12706_v32 = vadd.f32 -0.5, %v6387_v28  ;;  %v6167_v33 = vpop.f32.mrb[203].mxu1  ;;  %v15588_v34 = vpop.f32.mrb[23].mxu0 }
 0x7a5   : > { %v6650_v18 = vmul.f32 2.0, %v12702_v21  ;;  %v12705_v35 = vadd.f32 -0.5, %v6167_v33 }
 0x7a6   : > { %v14258_v24 = vpack.c.bf16 %v6651_v30, %v6651_v30  ;;  %v6652_v36 = vmul.f32 2.0, %v12704_v31  ;;  %v6654_v37 = vmul.f32 2.0, %v12706_v32  ;;  %15696 = vmatmul.mubr.msk.bf16.gmra.mrb[52].mxu1 %vm335_vm1, %v16255_v38  ;;  %v16257_v30 = vld [vmem:[%s19145_s0 + $0x50] sm:$0xff]  }
 0x7a7   : > { %v14257_v39 = vpack.c.bf16 %v6650_v18, %v6649_v29  ;;  %v6653_v40 = vmul.f32 2.0, %v12705_v35  ;;  %15699 = vmatprep.mubr.msk.bf16.mxu1 %vm16353_vm0, %v16352_v0 }
 0x7a8   : > { %12892 = vst.msk [vmem:[%s16753_s27 + $0x728] sm:$0xf] %vm1687_vm2, %v14258_v24  ;;  %v14260_v4 = vpack.c.bf16 %v6654_v37, %v6654_v37 }
 0x7a9   : > { %12891 = vst [vmem:[%s16753_s27 + $0x720] sm:$0xff] %v14257_v39  ;;  %v14259_v13 = vpack.c.bf16 %v6653_v40, %v6652_v36  ;;  %v6171_v5 = vpop.f32.mrb[204].mxu1  ;;  %v6392_v6 = vpop.f32.mrb[24].mxu0 }
 0x7aa   : > { %12894 = vst.msk [vmem:[%s16753_s27 + $0x734] sm:$0xf] %vm1687_vm2, %v14260_v4  ;;  %v12707_v7 = vadd.f32 -0.5, %v6171_v5  ;;  %v12709_v8 = vadd.f32 -0.5, %v6392_v6  ;;  %v6173_v9 = vpop.f32.mrb[205].mxu1  ;;  %v15591_v22 = vpop.f32.mrb[25].mxu0 }
 0x7ab   : > { %12893 = vst [vmem:[%s16753_s27 + $0x72c] sm:$0xff] %v14259_v13  ;;  %v12708_v15 = vadd.f32 -0.5, %v6173_v9  ;;  %v6175_v17 = vpop.f32.mrb[206].mxu1  ;;  %v6395_v41 = vpop.f32.mrb[26].mxu0 }
 0x7ac   : > { %v6655_v10 = vmul.f32 2.0, %v12707_v7  ;;  %v6657_v42 = vmul.f32 2.0, %v12709_v8  ;;  %v12710_v43 = vadd.f32 -0.5, %v6175_v17  ;;  %v12712_v44 = vadd.f32 -0.5, %v6395_v41  ;;  %v6177_v45 = vpop.f32.mrb[207].mxu1  ;;  %v15592_v46 = vpop.f32.mrb[27].mxu0 }
 0x7ad   : > { %v6656_v11 = vmul.f32 2.0, %v12708_v15  ;;  %v12711_v25 = vadd.f32 -0.5, %v6177_v45 }
 0x7ae   : > { %v14262_v20 = vpack.c.bf16 %v6657_v42, %v6657_v42  ;;  %v6658_v47 = vmul.f32 2.0, %v12710_v43  ;;  %v6660_v48 = vmul.f32 2.0, %v12712_v44  ;;  %15700 = vmatmul.mubr.msk.bf16.gmra.mrb[56].mxu1 %vm335_vm1, %v16256_v49  ;;  %v16258_v42 = vld [vmem:[%s19145_s0 + $0x58] sm:$0xff]  }
 0x7af   : > { %v14261_v50 = vpack.c.bf16 %v6656_v11, %v6655_v10  ;;  %v6659_v51 = vmul.f32 2.0, %v12711_v25  ;;  %15703 = vmatprep.mubr.msk.bf16.mxu1 %vm16353_vm0, %v16352_v0 }
 0x7b0   : > { %12896 = vst.msk [vmem:[%s16753_s27 + $0x740] sm:$0xf] %vm1687_vm2, %v14262_v20  ;;  %v14264_v52 = vpack.c.bf16 %v6660_v48, %v6660_v48 }
 0x7b1   : > { %12895 = vst [vmem:[%s16753_s27 + $0x738] sm:$0xff] %v14261_v50  ;;  %v14263_v53 = vpack.c.bf16 %v6659_v51, %v6658_v47  ;;  %v6181_v54 = vpop.f32.mrb[208].mxu1  ;;  %v6400_v14 = vpop.f32.mrb[28].mxu0 }
 0x7b2   : > { %12898 = vst.msk [vmem:[%s16753_s27 + $0x74c] sm:$0xf] %vm1687_vm2, %v14264_v52  ;;  %v12713_v55 = vadd.f32 -0.5, %v6181_v54  ;;  %v12715_v56 = vadd.f32 -0.5, %v6400_v14  ;;  %v6183_v57 = vpop.f32.mrb[209].mxu1  ;;  %v15595_v23 = vpop.f32.mrb[29].mxu0 }
 0x7b3   : > { %12897 = vst [vmem:[%s16753_s27 + $0x744] sm:$0xff] %v14263_v53  ;;  %v12714_v58 = vadd.f32 -0.5, %v6183_v57  ;;  %v6185_v59 = vpop.f32.mrb[210].mxu1  ;;  %v6403_v60 = vpop.f32.mrb[30].mxu0 }
 0x7b4   : > { %v6661_v12 = vmul.f32 2.0, %v12713_v55  ;;  %v6663_v61 = vmul.f32 2.0, %v12715_v56  ;;  %v12716_v62 = vadd.f32 -0.5, %v6185_v59  ;;  %v12718_v63 = vadd.f32 -0.5, %v6403_v60  ;;  %v6187_v1 = vpop.f32.mrb[211].mxu1  ;;  %v15596_v3 = vpop.f32.mrb[31].mxu0 }
 0x7b5   : > { %v6662_v16 = vmul.f32 2.0, %v12714_v58  ;;  %v12717_v21 = vadd.f32 -0.5, %v6187_v1 }
 0x7b6   : > { %v14266_v26 = vpack.c.bf16 %v6663_v61, %v6663_v61  ;;  %v6664_v28 = vmul.f32 2.0, %v12716_v62  ;;  %v6666_v29 = vmul.f32 2.0, %v12718_v63  ;;  %15704 = vmatmul.mubr.msk.bf16.gmra.mrb[60].mxu1 %vm335_vm1, %v16257_v30  ;;  %v16259_v61 = vld [vmem:[%s19145_s0 + $0x60] sm:$0xff]  }
 0x7b7   : > { %v14265_v31 = vpack.c.bf16 %v6662_v16, %v6661_v12  ;;  %v6665_v32 = vmul.f32 2.0, %v12717_v21  ;;  %15707 = vmatprep.mubr.msk.bf16.mxu1 %vm16353_vm0, %v16352_v0 }
 0x7b8   : > { %12900 = vst.msk [vmem:[%s16753_s27 + $0x758] sm:$0xf] %vm1687_vm2, %v14266_v26  ;;  %v14268_v33 = vpack.c.bf16 %v6666_v29, %v6666_v29 }
 0x7b9   : > { %12899 = vst [vmem:[%s16753_s27 + $0x750] sm:$0xff] %v14265_v31  ;;  %v14267_v34 = vpack.c.bf16 %v6665_v32, %v6664_v28  ;;  %v6191_v18 = vpop.f32.mrb[212].mxu1  ;;  %v6408_v35 = vpop.f32.mrb[32].mxu0 }
 0x7ba   : > { %12902 = vst.msk [vmem:[%s16753_s27 + $0x764] sm:$0xf] %vm1687_vm2, %v14268_v33  ;;  %v12719_v24 = vadd.f32 -0.5, %v6191_v18  ;;  %v12721_v36 = vadd.f32 -0.5, %v6408_v35  ;;  %v6193_v37 = vpop.f32.mrb[213].mxu1  ;;  %v15599_v38 = vpop.f32.mrb[33].mxu0 }
 0x7bb   : > { %12901 = vst [vmem:[%s16753_s27 + $0x75c] sm:$0xff] %v14267_v34  ;;  %v12720_v39 = vadd.f32 -0.5, %v6193_v37  ;;  %v6195_v40 = vpop.f32.mrb[214].mxu1  ;;  %v6411_v4 = vpop.f32.mrb[34].mxu0 }
 0x7bc   : > { %v6667_v13 = vmul.f32 2.0, %v12719_v24  ;;  %v6669_v5 = vmul.f32 2.0, %v12721_v36  ;;  %v12722_v6 = vadd.f32 -0.5, %v6195_v40  ;;  %v12724_v7 = vadd.f32 -0.5, %v6411_v4  ;;  %v6197_v8 = vpop.f32.mrb[215].mxu1  ;;  %v15600_v9 = vpop.f32.mrb[35].mxu0 }
 0x7bd   : > { %v6668_v22 = vmul.f32 2.0, %v12720_v39  ;;  %v12723_v15 = vadd.f32 -0.5, %v6197_v8 }
 0x7be   : > { %v14270_v17 = vpack.c.bf16 %v6669_v5, %v6669_v5  ;;  %v6670_v41 = vmul.f32 2.0, %v12722_v6  ;;  %v6672_v10 = vmul.f32 2.0, %v12724_v7  ;;  %15708 = vmatmul.mubr.msk.bf16.gmra.mrb[64].mxu1 %vm335_vm1, %v16258_v42  ;;  %v16260_v5 = vld [vmem:[%s19145_s0 + $0x68] sm:$0xff]  }
 0x7bf   : > { %v14269_v43 = vpack.c.bf16 %v6668_v22, %v6667_v13  ;;  %v6671_v44 = vmul.f32 2.0, %v12723_v15  ;;  %15711 = vmatprep.mubr.msk.bf16.mxu1 %vm16353_vm0, %v16352_v0 }
 0x7c0   : > { %12904 = vst.msk [vmem:[%s16753_s27 + $0x770] sm:$0xf] %vm1687_vm2, %v14270_v17  ;;  %v14272_v45 = vpack.c.bf16 %v6672_v10, %v6672_v10 }
 0x7c1   : > { %12903 = vst [vmem:[%s16753_s27 + $0x768] sm:$0xff] %v14269_v43  ;;  %v14271_v46 = vpack.c.bf16 %v6671_v44, %v6670_v41  ;;  %v6201_v11 = vpop.f32.mrb[216].mxu1  ;;  %v6416_v25 = vpop.f32.mrb[36].mxu0 }
 0x7c2   : > { %12906 = vst.msk [vmem:[%s16753_s27 + $0x77c] sm:$0xf] %vm1687_vm2, %v14272_v45  ;;  %v12725_v20 = vadd.f32 -0.5, %v6201_v11  ;;  %v12727_v47 = vadd.f32 -0.5, %v6416_v25  ;;  %v6203_v48 = vpop.f32.mrb[217].mxu1  ;;  %v15603_v49 = vpop.f32.mrb[37].mxu0 }
 0x7c3   : > { %12905 = vst [vmem:[%s16753_s27 + $0x774] sm:$0xff] %v14271_v46  ;;  %v12726_v50 = vadd.f32 -0.5, %v6203_v48  ;;  %v6205_v51 = vpop.f32.mrb[218].mxu1  ;;  %v6419_v52 = vpop.f32.mrb[38].mxu0 }
 0x7c4   : > { %v6673_v53 = vmul.f32 2.0, %v12725_v20  ;;  %v6675_v54 = vmul.f32 2.0, %v12727_v47  ;;  %v12728_v14 = vadd.f32 -0.5, %v6205_v51  ;;  %v12730_v55 = vadd.f32 -0.5, %v6419_v52  ;;  %v6207_v56 = vpop.f32.mrb[219].mxu1  ;;  %v15604_v57 = vpop.f32.mrb[39].mxu0 }
 0x7c5   : > { %v6674_v23 = vmul.f32 2.0, %v12726_v50  ;;  %v12729_v58 = vadd.f32 -0.5, %v6207_v56 }
 0x7c6   : > { %v14274_v59 = vpack.c.bf16 %v6675_v54, %v6675_v54  ;;  %v6676_v60 = vmul.f32 2.0, %v12728_v14  ;;  %v6678_v12 = vmul.f32 2.0, %v12730_v55  ;;  %15712 = vmatmul.mubr.msk.bf16.gmra.mrb[68].mxu1 %vm335_vm1, %v16259_v61  ;;  %v16261_v54 = vld [vmem:[%s19145_s0 + $0x70] sm:$0xff]  }
 0x7c7   : > { %v14273_v62 = vpack.c.bf16 %v6674_v23, %v6673_v53  ;;  %v6677_v63 = vmul.f32 2.0, %v12729_v58  ;;  %15715 = vmatprep.mubr.msk.bf16.mxu1 %vm16353_vm0, %v16352_v0 }
 0x7c8   : > { %12908 = vst.msk [vmem:[%s16753_s27 + $0x788] sm:$0xf] %vm1687_vm2, %v14274_v59  ;;  %v14276_v1 = vpack.c.bf16 %v6678_v12, %v6678_v12 }
 0x7c9   : > { %12907 = vst [vmem:[%s16753_s27 + $0x780] sm:$0xff] %v14273_v62  ;;  %v14275_v3 = vpack.c.bf16 %v6677_v63, %v6676_v60  ;;  %v6211_v16 = vpop.f32.mrb[220].mxu1  ;;  %v6424_v21 = vpop.f32.mrb[40].mxu0 }
 0x7ca   : > { %12910 = vst.msk [vmem:[%s16753_s27 + $0x794] sm:$0xf] %vm1687_vm2, %v14276_v1  ;;  %v12731_v26 = vadd.f32 -0.5, %v6211_v16  ;;  %v12733_v28 = vadd.f32 -0.5, %v6424_v21  ;;  %v6213_v29 = vpop.f32.mrb[221].mxu1  ;;  %v15607_v30 = vpop.f32.mrb[41].mxu0 }
 0x7cb   : > { %12909 = vst [vmem:[%s16753_s27 + $0x78c] sm:$0xff] %v14275_v3  ;;  %v12732_v31 = vadd.f32 -0.5, %v6213_v29  ;;  %v6215_v32 = vpop.f32.mrb[222].mxu1  ;;  %v6427_v33 = vpop.f32.mrb[42].mxu0 }
 0x7cc   : > { %v6679_v34 = vmul.f32 2.0, %v12731_v26  ;;  %v6681_v18 = vmul.f32 2.0, %v12733_v28  ;;  %v12734_v35 = vadd.f32 -0.5, %v6215_v32  ;;  %v12736_v24 = vadd.f32 -0.5, %v6427_v33  ;;  %v6217_v36 = vpop.f32.mrb[223].mxu1  ;;  %v15608_v37 = vpop.f32.mrb[43].mxu0 }
 0x7cd   : > { %v6680_v38 = vmul.f32 2.0, %v12732_v31  ;;  %v12735_v39 = vadd.f32 -0.5, %v6217_v36 }
 0x7ce   : > { %v14278_v40 = vpack.c.bf16 %v6681_v18, %v6681_v18  ;;  %v6682_v4 = vmul.f32 2.0, %v12734_v35  ;;  %v6684_v13 = vmul.f32 2.0, %v12736_v24  ;;  %15716 = vmatmul.mubr.msk.bf16.gmra.mrb[72].mxu1 %vm335_vm1, %v16260_v5  ;;  %v16262_v18 = vld [vmem:[%s19145_s0 + $0x78] sm:$0xff]  }
 0x7cf   : > { %v14277_v6 = vpack.c.bf16 %v6680_v38, %v6679_v34  ;;  %v6683_v7 = vmul.f32 2.0, %v12735_v39  ;;  %15719 = vmatprep.mubr.msk.bf16.mxu1 %vm16353_vm0, %v16352_v0 }
 0x7d0   : > { %12912 = vst.msk [vmem:[%s16753_s27 + $0x7a0] sm:$0xf] %vm1687_vm2, %v14278_v40  ;;  %v14280_v8 = vpack.c.bf16 %v6684_v13, %v6684_v13 }
 0x7d1   : > { %12911 = vst [vmem:[%s16753_s27 + $0x798] sm:$0xff] %v14277_v6  ;;  %v14279_v9 = vpack.c.bf16 %v6683_v7, %v6682_v4  ;;  %v6221_v22 = vpop.f32.mrb[224].mxu1  ;;  %v6432_v15 = vpop.f32.mrb[44].mxu0 }
 0x7d2   : > { %12914 = vst.msk [vmem:[%s16753_s27 + $0x7ac] sm:$0xf] %vm1687_vm2, %v14280_v8  ;;  %v12737_v17 = vadd.f32 -0.5, %v6221_v22  ;;  %v12739_v41 = vadd.f32 -0.5, %v6432_v15  ;;  %v6223_v10 = vpop.f32.mrb[225].mxu1  ;;  %v15611_v42 = vpop.f32.mrb[45].mxu0 }
 0x7d3   : > { %12913 = vst [vmem:[%s16753_s27 + $0x7a4] sm:$0xff] %v14279_v9  ;;  %v12738_v43 = vadd.f32 -0.5, %v6223_v10  ;;  %v6225_v44 = vpop.f32.mrb[226].mxu1  ;;  %v6435_v45 = vpop.f32.mrb[46].mxu0 }
 0x7d4   : > { %v6685_v46 = vmul.f32 2.0, %v12737_v17  ;;  %v6687_v11 = vmul.f32 2.0, %v12739_v41  ;;  %v12740_v25 = vadd.f32 -0.5, %v6225_v44  ;;  %v12742_v20 = vadd.f32 -0.5, %v6435_v45  ;;  %v6227_v47 = vpop.f32.mrb[227].mxu1  ;;  %v15612_v48 = vpop.f32.mrb[47].mxu0 }
 0x7d5   : > { %v6686_v49 = vmul.f32 2.0, %v12738_v43  ;;  %v12741_v50 = vadd.f32 -0.5, %v6227_v47 }
 0x7d6   : > { %v14282_v51 = vpack.c.bf16 %v6687_v11, %v6687_v11  ;;  %v6688_v52 = vmul.f32 2.0, %v12740_v25  ;;  %v6690_v53 = vmul.f32 2.0, %v12742_v20  ;;  %15720 = vmatmul.mubr.msk.bf16.gmra.mrb[76].mxu1 %vm335_vm1, %v16261_v54  ;;  %v16263_v11 = vld [vmem:[%s19145_s0 + $0x80] sm:$0xff]  }
 0x7d7   : > { %v14281_v14 = vpack.c.bf16 %v6686_v49, %v6685_v46  ;;  %v6689_v55 = vmul.f32 2.0, %v12741_v50  ;;  %15723 = vmatprep.mubr.msk.bf16.mxu1 %vm16353_vm0, %v16352_v0 }
 0x7d8   : > { %12916 = vst.msk [vmem:[%s16753_s27 + $0x7b8] sm:$0xf] %vm1687_vm2, %v14282_v51  ;;  %v14284_v56 = vpack.c.bf16 %v6690_v53, %v6690_v53 }
 0x7d9   : > { %12915 = vst [vmem:[%s16753_s27 + $0x7b0] sm:$0xff] %v14281_v14  ;;  %v14283_v57 = vpack.c.bf16 %v6689_v55, %v6688_v52  ;;  %v6231_v23 = vpop.f32.mrb[228].mxu1  ;;  %v6440_v58 = vpop.f32.mrb[48].mxu0 }
 0x7da   : > { %12918 = vst.msk [vmem:[%s16753_s27 + $0x7c4] sm:$0xf] %vm1687_vm2, %v14284_v56  ;;  %v12743_v59 = vadd.f32 -0.5, %v6231_v23  ;;  %v12745_v60 = vadd.f32 -0.5, %v6440_v58  ;;  %v6233_v12 = vpop.f32.mrb[229].mxu1  ;;  %v15615_v61 = vpop.f32.mrb[49].mxu0 }
 0x7db   : > { %12917 = vst [vmem:[%s16753_s27 + $0x7bc] sm:$0xff] %v14283_v57  ;;  %v12744_v62 = vadd.f32 -0.5, %v6233_v12  ;;  %v6235_v63 = vpop.f32.mrb[230].mxu1  ;;  %v6443_v1 = vpop.f32.mrb[50].mxu0 }
 0x7dc   : > { %v6691_v3 = vmul.f32 2.0, %v12743_v59  ;;  %v6693_v16 = vmul.f32 2.0, %v12745_v60  ;;  %v12746_v21 = vadd.f32 -0.5, %v6235_v63  ;;  %v12748_v26 = vadd.f32 -0.5, %v6443_v1  ;;  %v6237_v28 = vpop.f32.mrb[231].mxu1  ;;  %v15616_v29 = vpop.f32.mrb[51].mxu0 }
 0x7dd   : > { %v6692_v30 = vmul.f32 2.0, %v12744_v62  ;;  %v12747_v31 = vadd.f32 -0.5, %v6237_v28 }
 0x7de   : > { %v14286_v32 = vpack.c.bf16 %v6693_v16, %v6693_v16  ;;  %v6694_v33 = vmul.f32 2.0, %v12746_v21  ;;  %v6696_v34 = vmul.f32 2.0, %v12748_v26  ;;  %15724 = vmatmul.mubr.msk.bf16.gmra.mrb[80].mxu1 %vm335_vm1, %v16262_v18  ;;  %v16264_v16 = vld [vmem:[%s19145_s0 + $0x88] sm:$0xff]  }
 0x7df   : > { %v14285_v35 = vpack.c.bf16 %v6692_v30, %v6691_v3  ;;  %v6695_v24 = vmul.f32 2.0, %v12747_v31  ;;  %15727 = vmatprep.mubr.msk.bf16.mxu1 %vm16353_vm0, %v16352_v0 }
 0x7e0   : > { %12920 = vst.msk [vmem:[%s16753_s27 + $0x7d0] sm:$0xf] %vm1687_vm2, %v14286_v32  ;;  %v14288_v36 = vpack.c.bf16 %v6696_v34, %v6696_v34 }
 0x7e1   : > { %12919 = vst [vmem:[%s16753_s27 + $0x7c8] sm:$0xff] %v14285_v35  ;;  %v14287_v37 = vpack.c.bf16 %v6695_v24, %v6694_v33  ;;  %v6241_v38 = vpop.f32.mrb[232].mxu1  ;;  %v6448_v39 = vpop.f32.mrb[52].mxu0 }
 0x7e2   : > { %12922 = vst.msk [vmem:[%s16753_s27 + $0x7dc] sm:$0xf] %vm1687_vm2, %v14288_v36  ;;  %v12749_v40 = vadd.f32 -0.5, %v6241_v38  ;;  %v12751_v4 = vadd.f32 -0.5, %v6448_v39  ;;  %v6243_v13 = vpop.f32.mrb[233].mxu1  ;;  %v15619_v5 = vpop.f32.mrb[53].mxu0 }
 0x7e3   : > { %12921 = vst [vmem:[%s16753_s27 + $0x7d4] sm:$0xff] %v14287_v37  ;;  %v12750_v6 = vadd.f32 -0.5, %v6243_v13  ;;  %v6245_v7 = vpop.f32.mrb[234].mxu1  ;;  %v6451_v8 = vpop.f32.mrb[54].mxu0 }
 0x7e4   : > { %v6697_v9 = vmul.f32 2.0, %v12749_v40  ;;  %v6699_v22 = vmul.f32 2.0, %v12751_v4  ;;  %v12752_v15 = vadd.f32 -0.5, %v6245_v7  ;;  %v12754_v17 = vadd.f32 -0.5, %v6451_v8  ;;  %v6247_v41 = vpop.f32.mrb[235].mxu1  ;;  %v15620_v10 = vpop.f32.mrb[55].mxu0 }
 0x7e5   : > { %v6698_v42 = vmul.f32 2.0, %v12750_v6  ;;  %v12753_v43 = vadd.f32 -0.5, %v6247_v41 }
 0x7e6   : > { %v14290_v44 = vpack.c.bf16 %v6699_v22, %v6699_v22  ;;  %v6700_v45 = vmul.f32 2.0, %v12752_v15  ;;  %v6702_v46 = vmul.f32 2.0, %v12754_v17  ;;  %15728 = vmatmul.mubr.msk.bf16.gmra.mrb[84].mxu1 %vm335_vm1, %v16263_v11  ;;  %v16265_v22 = vld [vmem:[%s19145_s0 + $0x90] sm:$0x3f]  }
 0x7e7   : > { %v14289_v25 = vpack.c.bf16 %v6698_v42, %v6697_v9  ;;  %v6701_v20 = vmul.f32 2.0, %v12753_v43  ;;  %15731 = vmatprep.mubr.msk.bf16.mxu1 %vm16353_vm0, %v16352_v0 }
 0x7e8   : > { %12924 = vst.msk [vmem:[%s16753_s27 + $0x7e8] sm:$0xf] %vm1687_vm2, %v14290_v44  ;;  %v14292_v47 = vpack.c.bf16 %v6702_v46, %v6702_v46 }
 0x7e9   : > { %12923 = vst [vmem:[%s16753_s27 + $0x7e0] sm:$0xff] %v14289_v25  ;;  %v14291_v48 = vpack.c.bf16 %v6701_v20, %v6700_v45  ;;  %v6251_v49 = vpop.f32.mrb[236].mxu1  ;;  %v6456_v50 = vpop.f32.mrb[56].mxu0 }
 0x7ea   : > { %12926 = vst.msk [vmem:[%s16753_s27 + $0x7f4] sm:$0xf] %vm1687_vm2, %v14292_v47  ;;  %v12755_v51 = vadd.f32 -0.5, %v6251_v49  ;;  %v12757_v52 = vadd.f32 -0.5, %v6456_v50  ;;  %v6253_v53 = vpop.f32.mrb[237].mxu1  ;;  %v15623_v54 = vpop.f32.mrb[57].mxu0 }
 0x7eb   : > { %12925 = vst [vmem:[%s16753_s27 + $0x7ec] sm:$0xff] %v14291_v48  ;;  %v12756_v14 = vadd.f32 -0.5, %v6253_v53  ;;  %v6255_v55 = vpop.f32.mrb[238].mxu1  ;;  %v6459_v56 = vpop.f32.mrb[58].mxu0 }
 0x7ec   : > { %v6703_v57 = vmul.f32 2.0, %v12755_v51  ;;  %v6705_v23 = vmul.f32 2.0, %v12757_v52  ;;  %v12758_v58 = vadd.f32 -0.5, %v6255_v55  ;;  %v12760_v59 = vadd.f32 -0.5, %v6459_v56  ;;  %v6257_v60 = vpop.f32.mrb[239].mxu1  ;;  %v15624_v12 = vpop.f32.mrb[59].mxu0 }
 0x7ed   : > { %v6704_v61 = vmul.f32 2.0, %v12756_v14  ;;  %v12759_v62 = vadd.f32 -0.5, %v6257_v60 }
 0x7ee   : > { %v14294_v63 = vpack.c.bf16 %v6705_v23, %v6705_v23  ;;  %v6706_v1 = vmul.f32 2.0, %v12758_v58  ;;  %v6708_v3 = vmul.f32 2.0, %v12760_v59  ;;  %15732 = vmatmul.mubr.msk.bf16.gmra.mrb[88].mxu1 %vm335_vm1, %v16264_v16 }
 0x7ef   : > { %v14293_v21 = vpack.c.bf16 %v6704_v61, %v6703_v57  ;;  %v6707_v26 = vmul.f32 2.0, %v12759_v62  ;;  %15735 = vmatprep.mubr.msk.bf16.mxu1 %vm16353_vm0, %v16352_v0 }
 0x7f0   : > { %12928 = vst.msk [vmem:[%s16753_s27 + $0x800] sm:$0xf] %vm1687_vm2, %v14294_v63  ;;  %v14296_v28 = vpack.c.bf16 %v6708_v3, %v6708_v3 }
 0x7f1   : > { %12927 = vst [vmem:[%s16753_s27 + $0x7f8] sm:$0xff] %v14293_v21  ;;  %v14295_v29 = vpack.c.bf16 %v6707_v26, %v6706_v1  ;;  %v6261_v30 = vpop.f32.mrb[240].mxu1  ;;  %v6464_v31 = vpop.f32.mrb[60].mxu0 }
 0x7f2   : > { %12930 = vst.msk [vmem:[%s16753_s27 + $0x80c] sm:$0xf] %vm1687_vm2, %v14296_v28  ;;  %v12761_v32 = vadd.f32 -0.5, %v6261_v30  ;;  %v12763_v33 = vadd.f32 -0.5, %v6464_v31  ;;  %v6263_v34 = vpop.f32.mrb[241].mxu1  ;;  %v15627_v18 = vpop.f32.mrb[61].mxu0 }
 0x7f3   : > { %12929 = vst [vmem:[%s16753_s27 + $0x804] sm:$0xff] %v14295_v29  ;;  %v12762_v35 = vadd.f32 -0.5, %v6263_v34  ;;  %v6265_v24 = vpop.f32.mrb[242].mxu1  ;;  %v6467_v36 = vpop.f32.mrb[62].mxu0 }
 0x7f4   : > { %v6709_v37 = vmul.f32 2.0, %v12761_v32  ;;  %v6711_v38 = vmul.f32 2.0, %v12763_v33  ;;  %v12764_v39 = vadd.f32 -0.5, %v6265_v24  ;;  %v12766_v40 = vadd.f32 -0.5, %v6467_v36  ;;  %v6267_v4 = vpop.f32.mrb[243].mxu1  ;;  %v15628_v13 = vpop.f32.mrb[63].mxu0 }
 0x7f5   : > { %v6710_v5 = vmul.f32 2.0, %v12762_v35  ;;  %v12765_v6 = vadd.f32 -0.5, %v6267_v4 }
 0x7f6   : > { %v14298_v7 = vpack.c.bf16 %v6711_v38, %v6711_v38  ;;  %v6712_v8 = vmul.f32 2.0, %v12764_v39  ;;  %v6714_v9 = vmul.f32 2.0, %v12766_v40  ;;  %15736 = vmatmul.mubr.msk.bf16.gmra.mrb[92].mxu1 %vm335_vm1, %v16265_v22 }
 0x7f7   : > { %v14297_v15 = vpack.c.bf16 %v6710_v5, %v6709_v37  ;;  %v6713_v17 = vmul.f32 2.0, %v12765_v6  ;;  %15741 = vmatprep.mubr.msk.bf16.mxu1 %vm16353_vm0, %v16352_v0 }
 0x7f8   : > { %12932 = vst.msk [vmem:[%s16753_s27 + $0x818] sm:$0xf] %vm1687_vm2, %v14298_v7  ;;  %v14300_v41 = vpack.c.bf16 %v6714_v9, %v6714_v9 }
 0x7f9   : > { %12931 = vst [vmem:[%s16753_s27 + $0x810] sm:$0xff] %v14297_v15  ;;  %v14299_v10 = vpack.c.bf16 %v6713_v17, %v6712_v8  ;;  %v6271_v42 = vpop.f32.mrb[244].mxu1  ;;  %v6472_v43 = vpop.f32.mrb[64].mxu0 }
 0x7fa   : > { %12934 = vst.msk [vmem:[%s16753_s27 + $0x824] sm:$0xf] %vm1687_vm2, %v14300_v41  ;;  %v12767_v44 = vadd.f32 -0.5, %v6271_v42  ;;  %v12769_v45 = vadd.f32 -0.5, %v6472_v43  ;;  %v6273_v46 = vpop.f32.mrb[245].mxu1  ;;  %v15631_v11 = vpop.f32.mrb[65].mxu0 }
 0x7fb   : > { %12933 = vst [vmem:[%s16753_s27 + $0x81c] sm:$0xff] %v14299_v10  ;;  %v12768_v25 = vadd.f32 -0.5, %v6273_v46  ;;  %v6275_v20 = vpop.f32.mrb[246].mxu1  ;;  %v6475_v47 = vpop.f32.mrb[66].mxu0 }
 0x7fc   : > { %v6715_v48 = vmul.f32 2.0, %v12767_v44  ;;  %v6717_v49 = vmul.f32 2.0, %v12769_v45  ;;  %v12770_v50 = vadd.f32 -0.5, %v6275_v20  ;;  %v12772_v51 = vadd.f32 -0.5, %v6475_v47  ;;  %v6277_v52 = vpop.f32.mrb[247].mxu1  ;;  %v15632_v53 = vpop.f32.mrb[67].mxu0 }
 0x7fd   : > { %v6716_v54 = vmul.f32 2.0, %v12768_v25  ;;  %v12771_v14 = vadd.f32 -0.5, %v6277_v52 }
 0x7fe   : > { %v14302_v55 = vpack.c.bf16 %v6717_v49, %v6717_v49  ;;  %v6718_v56 = vmul.f32 2.0, %v12770_v50  ;;  %v6720_v57 = vmul.f32 2.0, %v12772_v51 }
 0x7ff   : > { %v14301_v23 = vpack.c.bf16 %v6716_v54, %v6715_v48  ;;  %v6719_v58 = vmul.f32 2.0, %v12771_v14 }
 0x800   : > { %12936 = vst.msk [vmem:[%s16753_s27 + $0x830] sm:$0xf] %vm1687_vm2, %v14302_v55  ;;  %v14304_v59 = vpack.c.bf16 %v6720_v57, %v6720_v57 }
 0x801   : > { %12935 = vst [vmem:[%s16753_s27 + $0x828] sm:$0xff] %v14301_v23  ;;  %v14303_v60 = vpack.c.bf16 %v6719_v58, %v6718_v56  ;;  %v6281_v12 = vpop.f32.mrb[248].mxu1  ;;  %v6480_v61 = vpop.f32.mrb[68].mxu0 }
 0x802   : > { %12938 = vst.msk [vmem:[%s16753_s27 + $0x83c] sm:$0xf] %vm1687_vm2, %v14304_v59  ;;  %v12773_v62 = vadd.f32 -0.5, %v6281_v12  ;;  %v12775_v63 = vadd.f32 -0.5, %v6480_v61  ;;  %v6283_v1 = vpop.f32.mrb[249].mxu1  ;;  %v15635_v3 = vpop.f32.mrb[69].mxu0 }
 0x803   : > { %12937 = vst [vmem:[%s16753_s27 + $0x834] sm:$0xff] %v14303_v60  ;;  %v12774_v16 = vadd.f32 -0.5, %v6283_v1  ;;  %v6285_v21 = vpop.f32.mrb[250].mxu1  ;;  %v6483_v26 = vpop.f32.mrb[70].mxu0 }
 0x804   : > { %v6721_v28 = vmul.f32 2.0, %v12773_v62  ;;  %v6723_v29 = vmul.f32 2.0, %v12775_v63  ;;  %v12776_v30 = vadd.f32 -0.5, %v6285_v21  ;;  %v12778_v31 = vadd.f32 -0.5, %v6483_v26  ;;  %v6287_v32 = vpop.f32.mrb[251].mxu1  ;;  %v15636_v33 = vpop.f32.mrb[71].mxu0 }
 0x805   : > { %v6722_v34 = vmul.f32 2.0, %v12774_v16  ;;  %v12777_v18 = vadd.f32 -0.5, %v6287_v32 }
 0x806   : > { %v14306_v35 = vpack.c.bf16 %v6723_v29, %v6723_v29  ;;  %v6724_v24 = vmul.f32 2.0, %v12776_v30  ;;  %v6726_v36 = vmul.f32 2.0, %v12778_v31 }
 0x807   : > { %v14305_v37 = vpack.c.bf16 %v6722_v34, %v6721_v28  ;;  %v6725_v38 = vmul.f32 2.0, %v12777_v18 }
 0x808   : > { %12940 = vst.msk [vmem:[%s16753_s27 + $0x848] sm:$0xf] %vm1687_vm2, %v14306_v35  ;;  %v14308_v39 = vpack.c.bf16 %v6726_v36, %v6726_v36 }
 0x809   : > { %12939 = vst [vmem:[%s16753_s27 + $0x840] sm:$0xff] %v14305_v37  ;;  %v14307_v40 = vpack.c.bf16 %v6725_v38, %v6724_v24  ;;  %v6291_v4 = vpop.f32.mrb[252].mxu1  ;;  %v6488_v13 = vpop.f32.mrb[72].mxu0 }
 0x80a   : > { %12942 = vst.msk [vmem:[%s16753_s27 + $0x854] sm:$0xf] %vm1687_vm2, %v14308_v39  ;;  %v12779_v5 = vadd.f32 -0.5, %v6291_v4  ;;  %v12781_v6 = vadd.f32 -0.5, %v6488_v13  ;;  %v6293_v7 = vpop.f32.mrb[253].mxu1  ;;  %v15639_v8 = vpop.f32.mrb[73].mxu0 }
 0x80b   : > { %12941 = vst [vmem:[%s16753_s27 + $0x84c] sm:$0xff] %v14307_v40  ;;  %v12780_v9 = vadd.f32 -0.5, %v6293_v7  ;;  %v6295_v22 = vpop.f32.mrb[254].mxu1  ;;  %v6491_v15 = vpop.f32.mrb[74].mxu0 }
 0x80c   : > { %v6727_v17 = vmul.f32 2.0, %v12779_v5  ;;  %v6729_v41 = vmul.f32 2.0, %v12781_v6  ;;  %v12782_v10 = vadd.f32 -0.5, %v6295_v22  ;;  %v12784_v42 = vadd.f32 -0.5, %v6491_v15  ;;  %v6297_v43 = vpop.f32.mrb[255].mxu1  ;;  %v15640_v44 = vpop.f32.mrb[75].mxu0 }
 0x80d   : > { %v6728_v45 = vmul.f32 2.0, %v12780_v9  ;;  %v12783_v46 = vadd.f32 -0.5, %v6297_v43 }
 0x80e   : > { %v14310_v11 = vpack.c.bf16 %v6729_v41, %v6729_v41  ;;  %v6730_v25 = vmul.f32 2.0, %v12782_v10  ;;  %v6732_v20 = vmul.f32 2.0, %v12784_v42 }
 0x80f   : > { %v14309_v47 = vpack.c.bf16 %v6728_v45, %v6727_v17  ;;  %v6731_v48 = vmul.f32 2.0, %v12783_v46 }
 0x810   : > { %12944 = vst.msk [vmem:[%s16753_s27 + $0x860] sm:$0xf] %vm1687_vm2, %v14310_v11  ;;  %v14312_v49 = vpack.c.bf16 %v6732_v20, %v6732_v20 }
 0x811   : > { %12943 = vst [vmem:[%s16753_s27 + $0x858] sm:$0xff] %v14309_v47  ;;  %v14311_v50 = vpack.c.bf16 %v6731_v48, %v6730_v25  ;;  %v6301_v51 = vpop.f32.mrb[0].mxu1  ;;  %v6496_v52 = vpop.f32.mrb[76].mxu0 }
 0x812   : > { %12946 = vst.msk [vmem:[%s16753_s27 + $0x86c] sm:$0xf] %vm1687_vm2, %v14312_v49  ;;  %v12785_v53 = vadd.f32 -0.5, %v6301_v51  ;;  %v12787_v54 = vadd.f32 -0.5, %v6496_v52  ;;  %v6303_v14 = vpop.f32.mrb[1].mxu1  ;;  %v15643_v55 = vpop.f32.mrb[77].mxu0 }
 0x813   : > { %12945 = vst [vmem:[%s16753_s27 + $0x864] sm:$0xff] %v14311_v50  ;;  %v12786_v56 = vadd.f32 -0.5, %v6303_v14  ;;  %v6305_v57 = vpop.f32.mrb[2].mxu1  ;;  %v6499_v23 = vpop.f32.mrb[78].mxu0 }
 0x814   : > { %v6733_v58 = vmul.f32 2.0, %v12785_v53  ;;  %v6735_v59 = vmul.f32 2.0, %v12787_v54  ;;  %v12788_v60 = vadd.f32 -0.5, %v6305_v57  ;;  %v12790_v12 = vadd.f32 -0.5, %v6499_v23  ;;  %v6307_v61 = vpop.f32.mrb[3].mxu1  ;;  %v15644_v62 = vpop.f32.mrb[79].mxu0 }
 0x815   : > { %v6734_v63 = vmul.f32 2.0, %v12786_v56  ;;  %v12789_v1 = vadd.f32 -0.5, %v6307_v61 }
 0x816   : > { %v14314_v3 = vpack.c.bf16 %v6735_v59, %v6735_v59  ;;  %v6736_v16 = vmul.f32 2.0, %v12788_v60  ;;  %v6738_v21 = vmul.f32 2.0, %v12790_v12 }
 0x817   : > { %v14313_v26 = vpack.c.bf16 %v6734_v63, %v6733_v58  ;;  %v6737_v28 = vmul.f32 2.0, %v12789_v1 }
 0x818   : > { %12948 = vst.msk [vmem:[%s16753_s27 + $0x878] sm:$0xf] %vm1687_vm2, %v14314_v3  ;;  %v14316_v29 = vpack.c.bf16 %v6738_v21, %v6738_v21 }
 0x819   : > { %12947 = vst [vmem:[%s16753_s27 + $0x870] sm:$0xff] %v14313_v26  ;;  %v14315_v30 = vpack.c.bf16 %v6737_v28, %v6736_v16  ;;  %v6311_v31 = vpop.f32.mrb[4].mxu1  ;;  %v6504_v32 = vpop.f32.mrb[80].mxu0 }
 0x81a   : > { %12950 = vst.msk [vmem:[%s16753_s27 + $0x884] sm:$0xf] %vm1687_vm2, %v14316_v29  ;;  %v12791_v33 = vadd.f32 -0.5, %v6311_v31  ;;  %v12793_v34 = vadd.f32 -0.5, %v6504_v32  ;;  %v6313_v18 = vpop.f32.mrb[5].mxu1  ;;  %v15647_v35 = vpop.f32.mrb[81].mxu0 }
 0x81b   : > { %12949 = vst [vmem:[%s16753_s27 + $0x87c] sm:$0xff] %v14315_v30  ;;  %v12792_v24 = vadd.f32 -0.5, %v6313_v18  ;;  %v6315_v36 = vpop.f32.mrb[6].mxu1  ;;  %v6507_v37 = vpop.f32.mrb[82].mxu0 }
 0x81c   : > { %v6739_v38 = vmul.f32 2.0, %v12791_v33  ;;  %v6741_v39 = vmul.f32 2.0, %v12793_v34  ;;  %v12794_v40 = vadd.f32 -0.5, %v6315_v36  ;;  %v12796_v4 = vadd.f32 -0.5, %v6507_v37  ;;  %v6317_v13 = vpop.f32.mrb[7].mxu1  ;;  %v15648_v5 = vpop.f32.mrb[83].mxu0 }
 0x81d   : > { %v6740_v6 = vmul.f32 2.0, %v12792_v24  ;;  %v12795_v7 = vadd.f32 -0.5, %v6317_v13 }
 0x81e   : > { %v14318_v8 = vpack.c.bf16 %v6741_v39, %v6741_v39  ;;  %v6742_v9 = vmul.f32 2.0, %v12794_v40  ;;  %v6744_v22 = vmul.f32 2.0, %v12796_v4 }
 0x81f   : > { %v14317_v15 = vpack.c.bf16 %v6740_v6, %v6739_v38  ;;  %v6743_v17 = vmul.f32 2.0, %v12795_v7 }
 0x820   : > { %12952 = vst.msk [vmem:[%s16753_s27 + $0x890] sm:$0xf] %vm1687_vm2, %v14318_v8  ;;  %v14320_v41 = vpack.c.bf16 %v6744_v22, %v6744_v22 }
 0x821   : > { %12951 = vst [vmem:[%s16753_s27 + $0x888] sm:$0xff] %v14317_v15  ;;  %v14319_v10 = vpack.c.bf16 %v6743_v17, %v6742_v9  ;;  %v6321_v42 = vpop.f32.mrb[8].mxu1  ;;  %v6512_v43 = vpop.f32.mrb[84].mxu0 }
 0x822   : > { %12954 = vst.msk [vmem:[%s16753_s27 + $0x89c] sm:$0xf] %vm1687_vm2, %v14320_v41  ;;  %v12797_v44 = vadd.f32 -0.5, %v6321_v42  ;;  %v12799_v45 = vadd.f32 -0.5, %v6512_v43  ;;  %v6323_v46 = vpop.f32.mrb[9].mxu1  ;;  %v15651_v11 = vpop.f32.mrb[85].mxu0 }
 0x823   : > { %12953 = vst [vmem:[%s16753_s27 + $0x894] sm:$0xff] %v14319_v10  ;;  %v12798_v25 = vadd.f32 -0.5, %v6323_v46  ;;  %v6325_v20 = vpop.f32.mrb[10].mxu1  ;;  %v6515_v47 = vpop.f32.mrb[86].mxu0 }
 0x824   : > { %v6745_v48 = vmul.f32 2.0, %v12797_v44  ;;  %v6747_v49 = vmul.f32 2.0, %v12799_v45  ;;  %v12800_v50 = vadd.f32 -0.5, %v6325_v20  ;;  %v12802_v51 = vadd.f32 -0.5, %v6515_v47  ;;  %v6327_v52 = vpop.f32.mrb[11].mxu1  ;;  %v15652_v53 = vpop.f32.mrb[87].mxu0 }
 0x825   : > { %v6746_v54 = vmul.f32 2.0, %v12798_v25  ;;  %v12801_v14 = vadd.f32 -0.5, %v6327_v52  ;;  %v13296_v52 = vld [vmem:[%s16434_s8 + $0x60] sm:$0xff]  ;;  %v13297_v53 = vld [vmem:[%s16434_s8 + $0x68] sm:$0xff] }
 0x826   : > { %v14322_v55 = vpack.c.bf16 %v6747_v49, %v6747_v49  ;;  %v6748_v56 = vmul.f32 2.0, %v12800_v50  ;;  %v6750_v57 = vmul.f32 2.0, %v12802_v51  ;;  %v12965_v51 = vld [vmem:[%s16753_s27 + $0x8dc] sm:$0x33] }
 0x827   : > { %v14321_v23 = vpack.c.bf16 %v6746_v54, %v6745_v48  ;;  %v6749_v58 = vmul.f32 2.0, %v12801_v14  ;;  %v12967_v48 = vld [vmem:[%s16753_s27 + $0x8e4] sm:$0x3] }
 0x828   : > { %12956 = vst.msk [vmem:[%s16753_s27 + $0x8a8] sm:$0xf] %vm1687_vm2, %v14322_v55  ;;  %v14324_v59 = vpack.c.bf16 %v6750_v57, %v6750_v57 }
 0x829   : > { %12955 = vst [vmem:[%s16753_s27 + $0x8a0] sm:$0xff] %v14321_v23  ;;  %v14323_v60 = vpack.c.bf16 %v6749_v58, %v6748_v56  ;;  %v6331_v12 = vpop.f32.mrb[12].mxu1  ;;  %v6520_v61 = vpop.f32.mrb[88].mxu0  ;;  %v8589_v58 = vpack.c.bf16 %v13297_v53, %v13296_v52 }
 0x82a   : > { %12958 = vst.msk [vmem:[%s16753_s27 + $0x8b4] sm:$0xf] %vm1687_vm2, %v14324_v59  ;;  %v12803_v62 = vadd.f32 -0.5, %v6331_v12  ;;  %v12805_v63 = vadd.f32 -0.5, %v6520_v61  ;;  %v6333_v1 = vpop.f32.mrb[13].mxu1  ;;  %v15655_v3 = vpop.f32.mrb[89].mxu0 }
 0x82b   : > { %12957 = vst [vmem:[%s16753_s27 + $0x8ac] sm:$0xff] %v14323_v60  ;;  %v12804_v16 = vadd.f32 -0.5, %v6333_v1  ;;  %v6335_v21 = vpop.f32.mrb[14].mxu1  ;;  %v6523_v26 = vpop.f32.mrb[90].mxu0  ;;  %v16266_v12 = vld [vmem:[#allocation2] ss:$12 sps:$4 sm:$0xff]  }
 0x82c   : > { %v6751_v28 = vmul.f32 2.0, %v12803_v62  ;;  %v6753_v29 = vmul.f32 2.0, %v12805_v63  ;;  %v12806_v30 = vadd.f32 -0.5, %v6335_v21  ;;  %v12808_v31 = vadd.f32 -0.5, %v6523_v26  ;;  %v6337_v32 = vpop.f32.mrb[15].mxu1  ;;  %v15656_v33 = vpop.f32.mrb[91].mxu0 }
 0x82d   : > { %v6752_v34 = vmul.f32 2.0, %v12804_v16  ;;  %v12807_v18 = vadd.f32 -0.5, %v6337_v32 }
 0x82e   : > { %v14326_v35 = vpack.c.bf16 %v6753_v29, %v6753_v29  ;;  %v6754_v24 = vmul.f32 2.0, %v12806_v30  ;;  %v6756_v36 = vmul.f32 2.0, %v12808_v31 }
 0x82f   : > { %v14325_v37 = vpack.c.bf16 %v6752_v34, %v6751_v28  ;;  %v6755_v38 = vmul.f32 2.0, %v12807_v18 }
 0x830   : > { %12960 = vst.msk [vmem:[%s16753_s27 + $0x8c0] sm:$0xf] %vm1687_vm2, %v14326_v35  ;;  %v14328_v39 = vpack.c.bf16 %v6756_v36, %v6756_v36 }
 0x831   : > { %12959 = vst [vmem:[%s16753_s27 + $0x8b8] sm:$0xff] %v14325_v37  ;;  %v14327_v40 = vpack.c.bf16 %v6755_v38, %v6754_v24  ;;  %v6341_v4 = vpop.f32.mrb[16].mxu1  ;;  %v6528_v13 = vpop.f32.mrb[92].mxu0 }
 0x832   : > { %12962 = vst.msk [vmem:[%s16753_s27 + $0x8cc] sm:$0xf] %vm1687_vm2, %v14328_v39  ;;  %v12809_v5 = vadd.f32 -0.5, %v6341_v4  ;;  %v12811_v6 = vadd.f32 -0.5, %v6528_v13  ;;  %v6343_v7 = vpop.f32.mrb[17].mxu1  ;;  %v15659_v8 = vpop.f32.mrb[93].mxu0 }
 0x833   : > { %12961 = vst [vmem:[%s16753_s27 + $0x8c4] sm:$0xff] %v14327_v40  ;;  %v12810_v9 = vadd.f32 -0.5, %v6343_v7  ;;  %v6345_v22 = vpop.f32.mrb[18].mxu1  ;;  %v6531_v15 = vpop.f32.mrb[94].mxu0 }
 0x834   : > { %v6757_v17 = vmul.f32 2.0, %v12809_v5  ;;  %v6759_v41 = vmul.f32 2.0, %v12811_v6  ;;  %v12812_v10 = vadd.f32 -0.5, %v6345_v22  ;;  %v12814_v42 = vadd.f32 -0.5, %v6531_v15  ;;  %v6347_v43 = vpop.f32.mrb[19].mxu1  ;;  %v15660_v44 = vpop.f32.mrb[95].mxu0 }
 0x835   : > { %v6758_v45 = vmul.f32 2.0, %v12810_v9  ;;  %v12813_v46 = vadd.f32 -0.5, %v6347_v43 }
 0x836   : > { %v14330_v11 = vpack.c.bf16 %v6759_v41, %v6759_v41  ;;  %v6760_v25 = vmul.f32 2.0, %v12812_v10  ;;  %v6762_v20 = vmul.f32 2.0, %v12814_v42 }
 0x837   : > { %v14329_v47 = vpack.c.bf16 %v6758_v45, %v6757_v17  ;;  %v6761_v49 = vmul.f32 2.0, %v12813_v46 }
 0x838   : > { %12964 = vst.msk [vmem:[%s16753_s27 + $0x8d8] sm:$0xf] %vm1687_vm2, %v14330_v11  ;;  %v14332_v50 = vpack.c.bf16 %v6762_v20, %v6762_v20 }
 0x839   : > { %12963 = vst [vmem:[%s16753_s27 + $0x8d0] sm:$0xff] %v14329_v47  ;;  %v14331_v54 = vpack.c.bf16 %v6761_v49, %v6760_v25  ;;  %v7262_v14 = vpop.f32.mrb[20].mxu1 }
 0x83a   : > { %v7222_v55 = vsel %vm16919_vm10, %v14332_v50, %v12967_v48  ;;  %v15665_v56 = vpop.f32.mrb[21].mxu1 }
 0x83b   : > { %12968 = vst [vmem:[%s16753_s27 + $0x8e4] sm:$0x3] %v7222_v55  ;;  %v7219_v57 = vsel %vm16929_vm11, %v14331_v54, %v12965_v51  ;;  %v7265_v23 = vpop.f32.mrb[22].mxu1 }
 0x83c   : > { %12966 = vst [vmem:[%s16753_s27 + $0x8dc] sm:$0x33] %v7219_v57  ;;  %v7413_v59 = vpack.c.bf16 %v7265_v23, %v7262_v14  ;;  %v15666_v60 = vpop.f32.mrb[23].mxu1 }
 0x83e   : > { %12990 = vmatmul.mubr.msk.bf16.vlgmr.msra.gmra.mrb[96].mxu0 %vm335_vm1, %v7413_v59  ;;  %15742 = vmatmul.mubr.msk.bf16.vlgmr.msra.gmra.mrb[96].mxu1 %vm335_vm1, %v7413_v59 }
 0x83f   : > { %15818 = vmatpush3.bf16.msra.mxu0 %v8589_v58  ;;  %7531 = vmatprep.mubr.bf16.mxu0 %v16354_v19 }
 0x840   : > { %15745 = vmatprep.mubr.msk.bf16.mxu1 %vm16353_vm0, %v16352_v0  ;;  %8852 = vmatpush1.bf16.msra.mxu1 %v16266_v12 }
 0x841   : > { %v7270_v61 = vpop.f32.mrb[24].mxu1  ;;  %15895 = vmatprep.subr.bf16.mxu0 %v16352_v0  ;;  %15973 = vmatprep.subr.bf16.mxu1 %v16352_v0 }
 0x842   : > { %v15669_v62 = vpop.f32.mrb[25].mxu1 }
 0x843   : > { %v7273_v63 = vpop.f32.mrb[26].mxu1 }
 0x844   : > { %v7414_v1 = vpack.c.bf16 %v7273_v63, %v7270_v61  ;;  %v15670_v3 = vpop.f32.mrb[27].mxu1 }
 0x846   : > { %12991 = vmatmul.mubr.msk.bf16.gmra.mrb[100].mxu0 %vm335_vm1, %v7414_v1  ;;  %15746 = vmatmul.mubr.msk.bf16.gmra.mrb[100].mxu1 %vm335_vm1, %v7414_v1 }
 0x847   : > { %7541 = vmatprep.mubr.bf16.mxu0 %v16354_v19  ;;  %15749 = vmatprep.mubr.msk.bf16.mxu1 %vm16353_vm0, %v16352_v0 }
 0x849   : > { %v7278_v16 = vpop.f32.mrb[28].mxu1 }
 0x84a   : > { %v15673_v21 = vpop.f32.mrb[29].mxu1 }
 0x84b   : > { %v7281_v26 = vpop.f32.mrb[30].mxu1 }
 0x84c   : > { %v7415_v28 = vpack.c.bf16 %v7281_v26, %v7278_v16  ;;  %v15674_v29 = vpop.f32.mrb[31].mxu1 }
 0x84e   : > { %12992 = vmatmul.mubr.msk.bf16.gmra.mrb[104].mxu0 %vm335_vm1, %v7415_v28  ;;  %15750 = vmatmul.mubr.msk.bf16.gmra.mrb[104].mxu1 %vm335_vm1, %v7415_v28 }
 0x84f   : > { %7551 = vmatprep.mubr.bf16.mxu0 %v16354_v19  ;;  %15753 = vmatprep.mubr.msk.bf16.mxu1 %vm16353_vm0, %v16352_v0 }
 0x851   : > { %v7286_v30 = vpop.f32.mrb[32].mxu1 }
 0x852   : > { %v15677_v31 = vpop.f32.mrb[33].mxu1 }
 0x853   : > { %v7289_v32 = vpop.f32.mrb[34].mxu1 }
 0x854   : > { %v7416_v33 = vpack.c.bf16 %v7289_v32, %v7286_v30  ;;  %v15678_v34 = vpop.f32.mrb[35].mxu1 }
 0x856   : > { %12993 = vmatmul.mubr.msk.bf16.gmra.mrb[108].mxu0 %vm335_vm1, %v7416_v33  ;;  %15754 = vmatmul.mubr.msk.bf16.gmra.mrb[108].mxu1 %vm335_vm1, %v7416_v33 }
 0x857   : > { %7561 = vmatprep.mubr.bf16.mxu0 %v16354_v19  ;;  %15757 = vmatprep.mubr.msk.bf16.mxu1 %vm16353_vm0, %v16352_v0 }
 0x859   : > { %v7294_v18 = vpop.f32.mrb[36].mxu1 }
 0x85a   : > { %v15681_v35 = vpop.f32.mrb[37].mxu1 }
 0x85b   : > { %v7297_v24 = vpop.f32.mrb[38].mxu1 }
 0x85c   : > { %v7417_v36 = vpack.c.bf16 %v7297_v24, %v7294_v18  ;;  %v15682_v37 = vpop.f32.mrb[39].mxu1 }
 0x85e   : > { %12994 = vmatmul.mubr.msk.bf16.gmra.mrb[112].mxu0 %vm335_vm1, %v7417_v36  ;;  %15758 = vmatmul.mubr.msk.bf16.gmra.mrb[112].mxu1 %vm335_vm1, %v7417_v36 }
 0x85f   : > { %7571 = vmatprep.mubr.bf16.mxu0 %v16354_v19  ;;  %15761 = vmatprep.mubr.msk.bf16.mxu1 %vm16353_vm0, %v16352_v0 }
 0x861   : > { %v7302_v38 = vpop.f32.mrb[40].mxu1 }
 0x862   : > { %v15685_v39 = vpop.f32.mrb[41].mxu1 }
 0x863   : > { %v7305_v40 = vpop.f32.mrb[42].mxu1 }
 0x864   : > { %v7418_v4 = vpack.c.bf16 %v7305_v40, %v7302_v38  ;;  %v15686_v13 = vpop.f32.mrb[43].mxu1 }
 0x866   : > { %12995 = vmatmul.mubr.msk.bf16.gmra.mrb[116].mxu0 %vm335_vm1, %v7418_v4  ;;  %15762 = vmatmul.mubr.msk.bf16.gmra.mrb[116].mxu1 %vm335_vm1, %v7418_v4 }
 0x867   : > { %7581 = vmatprep.mubr.bf16.mxu0 %v16354_v19  ;;  %15765 = vmatprep.mubr.msk.bf16.mxu1 %vm16353_vm0, %v16352_v0 }
 0x869   : > { %v7310_v5 = vpop.f32.mrb[44].mxu1 }
 0x86a   : > { %v15689_v6 = vpop.f32.mrb[45].mxu1 }
 0x86b   : > { %v7313_v7 = vpop.f32.mrb[46].mxu1 }
 0x86c   : > { %v7419_v8 = vpack.c.bf16 %v7313_v7, %v7310_v5  ;;  %v15690_v9 = vpop.f32.mrb[47].mxu1 }
 0x86e   : > { %12996 = vmatmul.mubr.msk.bf16.gmra.mrb[120].mxu0 %vm335_vm1, %v7419_v8  ;;  %15766 = vmatmul.mubr.msk.bf16.gmra.mrb[120].mxu1 %vm335_vm1, %v7419_v8 }
 0x86f   : > { %7591 = vmatprep.mubr.bf16.mxu0 %v16354_v19  ;;  %15769 = vmatprep.mubr.msk.bf16.mxu1 %vm16353_vm0, %v16352_v0 }
 0x871   : > { %v7318_v22 = vpop.f32.mrb[48].mxu1 }
 0x872   : > { %v15693_v15 = vpop.f32.mrb[49].mxu1 }
 0x873   : > { %v7321_v17 = vpop.f32.mrb[50].mxu1  ;;  %v16268_v15 = vld [vmem:[#allocation2 + $0x8] ss:$12 sps:$4 sm:$0xff]  }
 0x874   : > { %v7420_v41 = vpack.c.bf16 %v7321_v17, %v7318_v22  ;;  %v15694_v10 = vpop.f32.mrb[51].mxu1  ;;  %v16267_v22 = vld [vmem:[%s19145_s0] sm:$0xff]  }
 0x875   : > { %v16269_v17 = vld [vmem:[#allocation2 + $0x4] ss:$12 sps:$4 sm:$0xff]  }
 0x876   : > { %12997 = vmatmul.mubr.msk.bf16.gmra.mrb[124].mxu0 %vm335_vm1, %v7420_v41  ;;  %15770 = vmatmul.mubr.msk.bf16.gmra.mrb[124].mxu1 %vm335_vm1, %v7420_v41  ;;  %v16270_v41 = vld [vmem:[%s19145_s0 + $0x8] sm:$0xff]   ;;  %v16271_v10 = vld [vmem:[%s19145_s0 + $0x10] sm:$0xff]  }
 0x877   : > { %7601 = vmatprep.mubr.bf16.mxu0 %v16354_v19  ;;  %15773 = vmatprep.mubr.msk.bf16.mxu1 %vm16353_vm0, %v16352_v0 }
 0x879   : > { %v7326_v42 = vpop.f32.mrb[52].mxu1 }
 0x87a   : > { %v15697_v43 = vpop.f32.mrb[53].mxu1 }
 0x87b   : > { %v7329_v44 = vpop.f32.mrb[54].mxu1  ;;  %v16273_v43 = vld [vmem:[%s19145_s0 + $0x20] sm:$0xff]  }
 0x87c   : > { %v7421_v45 = vpack.c.bf16 %v7329_v44, %v7326_v42  ;;  %v15698_v46 = vpop.f32.mrb[55].mxu1  ;;  %v16272_v42 = vld [vmem:[%s19145_s0 + $0x18] sm:$0xff]   ;;  %v16274_v44 = vld [vmem:[%s19145_s0 + $0x28] sm:$0xff]  }
 0x87d   : > { %v16276_v46 = vld [vmem:[%s19145_s0 + $0x38] sm:$0xff]  }
 0x87e   : > { %12998 = vmatmul.mubr.msk.bf16.gmra.mrb[128].mxu0 %vm335_vm1, %v7421_v45  ;;  %15774 = vmatmul.mubr.msk.bf16.gmra.mrb[128].mxu1 %vm335_vm1, %v7421_v45  ;;  %v16275_v45 = vld [vmem:[%s19145_s0 + $0x30] sm:$0xff]  }
 0x87f   : > { %7611 = vmatprep.mubr.bf16.mxu0 %v16354_v19  ;;  %15777 = vmatprep.mubr.msk.bf16.mxu1 %vm16353_vm0, %v16352_v0 }
 0x881   : > { %v7334_v11 = vpop.f32.mrb[56].mxu1 }
 0x882   : > { %v15701_v25 = vpop.f32.mrb[57].mxu1 }
 0x883   : > { %v7337_v20 = vpop.f32.mrb[58].mxu1 }
 0x884   : > { %v7422_v47 = vpack.c.bf16 %v7337_v20, %v7334_v11  ;;  %v15702_v48 = vpop.f32.mrb[59].mxu1 }
 0x886   : > { %12999 = vmatmul.mubr.msk.bf16.gmra.mrb[132].mxu0 %vm335_vm1, %v7422_v47  ;;  %15778 = vmatmul.mubr.msk.bf16.gmra.mrb[132].mxu1 %vm335_vm1, %v7422_v47 }
 0x887   : > { %7621 = vmatprep.mubr.bf16.mxu0 %v16354_v19  ;;  %15781 = vmatprep.mubr.msk.bf16.mxu1 %vm16353_vm0, %v16352_v0 }
 0x889   : > { %v7342_v49 = vpop.f32.mrb[60].mxu1 }
 0x88a   : > { %v15705_v50 = vpop.f32.mrb[61].mxu1 }
 0x88b   : > { %v7345_v51 = vpop.f32.mrb[62].mxu1 }
 0x88c   : > { %v7423_v52 = vpack.c.bf16 %v7345_v51, %v7342_v49  ;;  %v15706_v53 = vpop.f32.mrb[63].mxu1 }
 0x88e   : > { %13000 = vmatmul.mubr.msk.bf16.gmra.mrb[136].mxu0 %vm335_vm1, %v7423_v52  ;;  %15782 = vmatmul.mubr.msk.bf16.gmra.mrb[136].mxu1 %vm335_vm1, %v7423_v52 }
 0x88f   : > { %7631 = vmatprep.mubr.bf16.mxu0 %v16354_v19  ;;  %15785 = vmatprep.mubr.msk.bf16.mxu1 %vm16353_vm0, %v16352_v0 }
 0x891   : > { %v7350_v54 = vpop.f32.mrb[64].mxu1 }
 0x892   : > { %v15709_v14 = vpop.f32.mrb[65].mxu1 }
 0x893   : > { %v7353_v55 = vpop.f32.mrb[66].mxu1 }
 0x894   : > { %v7424_v56 = vpack.c.bf16 %v7353_v55, %v7350_v54  ;;  %v15710_v57 = vpop.f32.mrb[67].mxu1 }
 0x896   : > { %13001 = vmatmul.mubr.msk.bf16.gmra.mrb[140].mxu0 %vm335_vm1, %v7424_v56  ;;  %15786 = vmatmul.mubr.msk.bf16.gmra.mrb[140].mxu1 %vm335_vm1, %v7424_v56 }
 0x897   : > { %7641 = vmatprep.mubr.bf16.mxu0 %v16354_v19  ;;  %15789 = vmatprep.mubr.msk.bf16.mxu1 %vm16353_vm0, %v16352_v0 }
 0x899   : > { %v7358_v23 = vpop.f32.mrb[68].mxu1 }
 0x89a   : > { %v15713_v58 = vpop.f32.mrb[69].mxu1 }
 0x89b   : > { %v7361_v59 = vpop.f32.mrb[70].mxu1 }
 0x89c   : > { %v7425_v60 = vpack.c.bf16 %v7361_v59, %v7358_v23  ;;  %v15714_v12 = vpop.f32.mrb[71].mxu1 }
 0x89e   : > { %13002 = vmatmul.mubr.msk.bf16.gmra.mrb[144].mxu0 %vm335_vm1, %v7425_v60  ;;  %15790 = vmatmul.mubr.msk.bf16.gmra.mrb[144].mxu1 %vm335_vm1, %v7425_v60 }
 0x89f   : > { %7651 = vmatprep.mubr.bf16.mxu0 %v16354_v19  ;;  %15793 = vmatprep.mubr.msk.bf16.mxu1 %vm16353_vm0, %v16352_v0 }
 0x8a1   : > { %v7366_v61 = vpop.f32.mrb[72].mxu1 }
 0x8a2   : > { %v15717_v62 = vpop.f32.mrb[73].mxu1 }
 0x8a3   : > { %v7369_v63 = vpop.f32.mrb[74].mxu1 }
 0x8a4   : > { %v7426_v1 = vpack.c.bf16 %v7369_v63, %v7366_v61  ;;  %v15718_v3 = vpop.f32.mrb[75].mxu1  ;;  %v16277_v61 = vld [vmem:[%s19145_s0 + $0x40] sm:$0xff]  }
 0x8a6   : > { %13003 = vmatmul.mubr.msk.bf16.gmra.mrb[148].mxu0 %vm335_vm1, %v7426_v1  ;;  %15794 = vmatmul.mubr.msk.bf16.gmra.mrb[148].mxu1 %vm335_vm1, %v7426_v1 }
 0x8a7   : > { %7661 = vmatprep.mubr.bf16.mxu0 %v16354_v19  ;;  %15797 = vmatprep.mubr.msk.bf16.mxu1 %vm16353_vm0, %v16352_v0 }
 0x8a9   : > { %v7374_v16 = vpop.f32.mrb[76].mxu1 }
 0x8aa   : > { %v15721_v21 = vpop.f32.mrb[77].mxu1 }
 0x8ab   : > { %v7377_v26 = vpop.f32.mrb[78].mxu1 }
 0x8ac   : > { %v7427_v28 = vpack.c.bf16 %v7377_v26, %v7374_v16  ;;  %v15722_v29 = vpop.f32.mrb[79].mxu1 }
 0x8ae   : > { %13004 = vmatmul.mubr.msk.bf16.gmra.mrb[152].mxu0 %vm335_vm1, %v7427_v28  ;;  %15798 = vmatmul.mubr.msk.bf16.gmra.mrb[152].mxu1 %vm335_vm1, %v7427_v28 }
 0x8af   : > { %7671 = vmatprep.mubr.bf16.mxu0 %v16354_v19  ;;  %15801 = vmatprep.mubr.msk.bf16.mxu1 %vm16353_vm0, %v16352_v0 }
 0x8b1   : > { %v7382_v30 = vpop.f32.mrb[80].mxu1 }
 0x8b2   : > { %v15725_v31 = vpop.f32.mrb[81].mxu1 }
 0x8b3   : > { %v7385_v32 = vpop.f32.mrb[82].mxu1 }
 0x8b4   : > { %v7428_v33 = vpack.c.bf16 %v7385_v32, %v7382_v30  ;;  %v15726_v34 = vpop.f32.mrb[83].mxu1 }
 0x8b6   : > { %13005 = vmatmul.mubr.msk.bf16.gmra.mrb[156].mxu0 %vm335_vm1, %v7428_v33  ;;  %15802 = vmatmul.mubr.msk.bf16.gmra.mrb[156].mxu1 %vm335_vm1, %v7428_v33 }
 0x8b7   : > { %7681 = vmatprep.mubr.bf16.mxu0 %v16354_v19  ;;  %15805 = vmatprep.mubr.msk.bf16.mxu1 %vm16353_vm0, %v16352_v0 }
 0x8b9   : > { %v7390_v18 = vpop.f32.mrb[84].mxu1 }
 0x8ba   : > { %v15729_v35 = vpop.f32.mrb[85].mxu1 }
 0x8bb   : > { %v7393_v24 = vpop.f32.mrb[86].mxu1 }
 0x8bc   : > { %v7429_v36 = vpack.c.bf16 %v7393_v24, %v7390_v18  ;;  %v15730_v37 = vpop.f32.mrb[87].mxu1 }
 0x8be   : > { %13006 = vmatmul.mubr.msk.bf16.gmra.mrb[160].mxu0 %vm335_vm1, %v7429_v36  ;;  %15806 = vmatmul.mubr.msk.bf16.gmra.mrb[160].mxu1 %vm335_vm1, %v7429_v36 }
 0x8bf   : > { %7691 = vmatprep.mubr.bf16.mxu0 %v16354_v19  ;;  %15809 = vmatprep.mubr.msk.bf16.mxu1 %vm16353_vm0, %v16352_v0 }
 0x8c1   : > { %v7398_v38 = vpop.f32.mrb[88].mxu1 }
 0x8c2   : > { %v15733_v39 = vpop.f32.mrb[89].mxu1 }
 0x8c3   : > { %v7401_v40 = vpop.f32.mrb[90].mxu1 }
 0x8c4   : > { %v7430_v4 = vpack.c.bf16 %v7401_v40, %v7398_v38  ;;  %v15734_v13 = vpop.f32.mrb[91].mxu1 }
 0x8c6   : > { %13007 = vmatmul.mubr.msk.bf16.gmra.mrb[164].mxu0 %vm335_vm1, %v7430_v4  ;;  %15810 = vmatmul.mubr.msk.bf16.gmra.mrb[164].mxu1 %vm335_vm1, %v7430_v4 }
 0x8c7   : > { %7701 = vmatprep.mubr.bf16.mxu0 %v16354_v19  ;;  %15813 = vmatprep.mubr.msk.bf16.mxu1 %vm16353_vm0, %v16352_v0 }
 0x8c9   : > { %v7406_v5 = vpop.f32.mrb[92].mxu1 }
 0x8ca   : > { %v15737_v6 = vpop.f32.mrb[93].mxu1 }
 0x8cb   : > { %v7409_v7 = vpop.f32.mrb[94].mxu1 }
 0x8cc   : > { %v7431_v8 = vpack.c.bf16 %v7409_v7, %v7406_v5  ;;  %v15738_v9 = vpop.f32.mrb[95].mxu1  ;;  %v16278_v5 = vld [vmem:[%s19145_s0 + $0x48] sm:$0xff]  }
 0x8ce   : > { %13008 = vmatmul.mubr.msk.bf16.gmra.mrb[168].mxu0 %vm335_vm1, %v7431_v8  ;;  %15814 = vmatmul.mubr.msk.bf16.gmra.mrb[168].mxu1 %vm335_vm1, %v7431_v8 }
 0x8cf   : > { %15819 = vmatprep.mubr.msk.bf16.mxu0 %vm16353_vm0, %v16352_v0  ;;  %8883 = vmatprep.mubr.bf16.mxu1 %v16354_v19 }
 0x8d6   : > { %15820 = vmatmul.mubr.msk.bf16.vlgmr.msra.gmra.mrb[172].mxu0 %vm335_vm1, %v16267_v22 }
 0x8d7   : > { %15823 = vmatprep.mubr.msk.bf16.mxu0 %vm16353_vm0, %v16352_v0  ;;  %15896 = vmatpush3.bf16.msra.mxu0 %v16268_v15 }
 0x8d8   : > { %10213 = vmatprep.subr.bf16.mxu0 %v16269_v17 }
 0x8de   : > { %15824 = vmatmul.mubr.msk.bf16.gmra.mrb[176].mxu0 %vm335_vm1, %v16270_v41 }
 0x8df   : > { %15827 = vmatprep.mubr.msk.bf16.mxu0 %vm16353_vm0, %v16352_v0 }
 0x8e6   : > { %15828 = vmatmul.mubr.msk.bf16.gmra.mrb[180].mxu0 %vm335_vm1, %v16271_v10 }
 0x8e7   : > { %15831 = vmatprep.mubr.msk.bf16.mxu0 %vm16353_vm0, %v16352_v0 }
 0x8ee   : > { %15832 = vmatmul.mubr.msk.bf16.gmra.mrb[184].mxu0 %vm335_vm1, %v16272_v42 }
 0x8ef   : > { %15835 = vmatprep.mubr.msk.bf16.mxu0 %vm16353_vm0, %v16352_v0 }
 0x8f6   : > { %15836 = vmatmul.mubr.msk.bf16.gmra.mrb[188].mxu0 %vm335_vm1, %v16273_v43 }
 0x8f7   : > { %15839 = vmatprep.mubr.msk.bf16.mxu0 %vm16353_vm0, %v16352_v0 }
 0x8fe   : > { %15840 = vmatmul.mubr.msk.bf16.gmra.mrb[192].mxu0 %vm335_vm1, %v16274_v44 }
 0x8ff   : > { %15843 = vmatprep.mubr.msk.bf16.mxu0 %vm16353_vm0, %v16352_v0 }
 0x906   : > { %15844 = vmatmul.mubr.msk.bf16.gmra.mrb[196].mxu0 %vm335_vm1, %v16275_v45 }
 0x907   : > { %15847 = vmatprep.mubr.msk.bf16.mxu0 %vm16353_vm0, %v16352_v0 }
 0x90e   : > { %15848 = vmatmul.mubr.msk.bf16.gmra.mrb[200].mxu0 %vm335_vm1, %v16276_v46 }
 0x90f   : > { %15851 = vmatprep.mubr.msk.bf16.mxu0 %vm16353_vm0, %v16352_v0 }
 0x911   : > { %v7523_v11 = vpop.f32.mrb[96].mxu0  ;;  %v7746_v25 = vpop.f32.mrb[96].mxu1 }
 0x912   : > { %v13028_v20 = vadd.f32 -0.5, %v7523_v11  ;;  %v13030_v47 = vadd.f32 -0.5, %v7746_v25  ;;  %v7525_v48 = vpop.f32.mrb[97].mxu0  ;;  %v15743_v49 = vpop.f32.mrb[97].mxu1 }
 0x913   : > { %v13029_v50 = vadd.f32 -0.5, %v7525_v48  ;;  %v7527_v51 = vpop.f32.mrb[98].mxu0  ;;  %v7749_v52 = vpop.f32.mrb[98].mxu1 }
 0x914   : > { %v8011_v53 = vmul.f32 2.0, %v13028_v20  ;;  %v8013_v54 = vmul.f32 2.0, %v13030_v47  ;;  %v13031_v14 = vadd.f32 -0.5, %v7527_v51  ;;  %v13033_v55 = vadd.f32 -0.5, %v7749_v52  ;;  %v7529_v56 = vpop.f32.mrb[99].mxu0  ;;  %v15744_v57 = vpop.f32.mrb[99].mxu1 }
 0x915   : > { %v8012_v23 = vmul.f32 2.0, %v13029_v50  ;;  %v13032_v58 = vadd.f32 -0.5, %v7529_v56 }
 0x916   : > { %v14334_v59 = vpack.c.bf16 %v8013_v54, %v8013_v54  ;;  %v8014_v60 = vmul.f32 2.0, %v13031_v14  ;;  %v8016_v12 = vmul.f32 2.0, %v13033_v55  ;;  %15852 = vmatmul.mubr.msk.bf16.gmra.mrb[204].mxu0 %vm335_vm1, %v16277_v61  ;;  %v16279_v54 = vld [vmem:[%s19145_s0 + $0x50] sm:$0xff]  }
 0x917   : > { %v14333_v62 = vpack.c.bf16 %v8012_v23, %v8011_v53  ;;  %v8015_v63 = vmul.f32 2.0, %v13032_v58  ;;  %15855 = vmatprep.mubr.msk.bf16.mxu0 %vm16353_vm0, %v16352_v0 }
 0x918   : > { %13219 = vst.msk [vmem:[%s16753_s27 + $0x8f0] sm:$0xf] %vm1687_vm2, %v14334_v59  ;;  %v14336_v1 = vpack.c.bf16 %v8016_v12, %v8016_v12 }
 0x919   : > { %13218 = vst [vmem:[%s16753_s27 + $0x8e8] sm:$0xff] %v14333_v62  ;;  %v14335_v3 = vpack.c.bf16 %v8015_v63, %v8014_v60  ;;  %v7533_v16 = vpop.f32.mrb[100].mxu0  ;;  %v7754_v21 = vpop.f32.mrb[100].mxu1 }
 0x91a   : > { %13221 = vst.msk [vmem:[%s16753_s27 + $0x8fc] sm:$0xf] %vm1687_vm2, %v14336_v1  ;;  %v13034_v26 = vadd.f32 -0.5, %v7533_v16  ;;  %v13036_v28 = vadd.f32 -0.5, %v7754_v21  ;;  %v7535_v29 = vpop.f32.mrb[101].mxu0  ;;  %v15747_v30 = vpop.f32.mrb[101].mxu1 }
 0x91b   : > { %13220 = vst [vmem:[%s16753_s27 + $0x8f4] sm:$0xff] %v14335_v3  ;;  %v13035_v31 = vadd.f32 -0.5, %v7535_v29  ;;  %v7537_v32 = vpop.f32.mrb[102].mxu0  ;;  %v7757_v33 = vpop.f32.mrb[102].mxu1 }
 0x91c   : > { %v8017_v34 = vmul.f32 2.0, %v13034_v26  ;;  %v8019_v18 = vmul.f32 2.0, %v13036_v28  ;;  %v13037_v35 = vadd.f32 -0.5, %v7537_v32  ;;  %v13039_v24 = vadd.f32 -0.5, %v7757_v33  ;;  %v7539_v36 = vpop.f32.mrb[103].mxu0  ;;  %v15748_v37 = vpop.f32.mrb[103].mxu1 }
 0x91d   : > { %v8018_v38 = vmul.f32 2.0, %v13035_v31  ;;  %v13038_v39 = vadd.f32 -0.5, %v7539_v36 }
 0x91e   : > { %v14338_v40 = vpack.c.bf16 %v8019_v18, %v8019_v18  ;;  %v8020_v4 = vmul.f32 2.0, %v13037_v35  ;;  %v8022_v13 = vmul.f32 2.0, %v13039_v24  ;;  %15856 = vmatmul.mubr.msk.bf16.gmra.mrb[208].mxu0 %vm335_vm1, %v16278_v5  ;;  %v16280_v18 = vld [vmem:[%s19145_s0 + $0x58] sm:$0xff]  }
 0x91f   : > { %v14337_v6 = vpack.c.bf16 %v8018_v38, %v8017_v34  ;;  %v8021_v7 = vmul.f32 2.0, %v13038_v39  ;;  %15859 = vmatprep.mubr.msk.bf16.mxu0 %vm16353_vm0, %v16352_v0 }
 0x920   : > { %13223 = vst.msk [vmem:[%s16753_s27 + $0x908] sm:$0xf] %vm1687_vm2, %v14338_v40  ;;  %v14340_v8 = vpack.c.bf16 %v8022_v13, %v8022_v13 }
 0x921   : > { %13222 = vst [vmem:[%s16753_s27 + $0x900] sm:$0xff] %v14337_v6  ;;  %v14339_v9 = vpack.c.bf16 %v8021_v7, %v8020_v4  ;;  %v7543_v22 = vpop.f32.mrb[104].mxu0  ;;  %v7762_v15 = vpop.f32.mrb[104].mxu1 }
 0x922   : > { %13225 = vst.msk [vmem:[%s16753_s27 + $0x914] sm:$0xf] %vm1687_vm2, %v14340_v8  ;;  %v13040_v17 = vadd.f32 -0.5, %v7543_v22  ;;  %v13042_v41 = vadd.f32 -0.5, %v7762_v15  ;;  %v7545_v10 = vpop.f32.mrb[105].mxu0  ;;  %v15751_v42 = vpop.f32.mrb[105].mxu1 }
 0x923   : > { %13224 = vst [vmem:[%s16753_s27 + $0x90c] sm:$0xff] %v14339_v9  ;;  %v13041_v43 = vadd.f32 -0.5, %v7545_v10  ;;  %v7547_v44 = vpop.f32.mrb[106].mxu0  ;;  %v7765_v45 = vpop.f32.mrb[106].mxu1 }
 0x924   : > { %v8023_v46 = vmul.f32 2.0, %v13040_v17  ;;  %v8025_v11 = vmul.f32 2.0, %v13042_v41  ;;  %v13043_v25 = vadd.f32 -0.5, %v7547_v44  ;;  %v13045_v20 = vadd.f32 -0.5, %v7765_v45  ;;  %v7549_v47 = vpop.f32.mrb[107].mxu0  ;;  %v15752_v48 = vpop.f32.mrb[107].mxu1 }
 0x925   : > { %v8024_v49 = vmul.f32 2.0, %v13041_v43  ;;  %v13044_v50 = vadd.f32 -0.5, %v7549_v47 }
 0x926   : > { %v14342_v51 = vpack.c.bf16 %v8025_v11, %v8025_v11  ;;  %v8026_v52 = vmul.f32 2.0, %v13043_v25  ;;  %v8028_v53 = vmul.f32 2.0, %v13045_v20  ;;  %15860 = vmatmul.mubr.msk.bf16.gmra.mrb[212].mxu0 %vm335_vm1, %v16279_v54  ;;  %v16281_v11 = vld [vmem:[%s19145_s0 + $0x60] sm:$0xff]  }
 0x927   : > { %v14341_v14 = vpack.c.bf16 %v8024_v49, %v8023_v46  ;;  %v8027_v55 = vmul.f32 2.0, %v13044_v50  ;;  %15863 = vmatprep.mubr.msk.bf16.mxu0 %vm16353_vm0, %v16352_v0 }
 0x928   : > { %13227 = vst.msk [vmem:[%s16753_s27 + $0x920] sm:$0xf] %vm1687_vm2, %v14342_v51  ;;  %v14344_v56 = vpack.c.bf16 %v8028_v53, %v8028_v53 }
 0x929   : > { %13226 = vst [vmem:[%s16753_s27 + $0x918] sm:$0xff] %v14341_v14  ;;  %v14343_v57 = vpack.c.bf16 %v8027_v55, %v8026_v52  ;;  %v7553_v23 = vpop.f32.mrb[108].mxu0  ;;  %v7770_v58 = vpop.f32.mrb[108].mxu1 }
 0x92a   : > { %13229 = vst.msk [vmem:[%s16753_s27 + $0x92c] sm:$0xf] %vm1687_vm2, %v14344_v56  ;;  %v13046_v59 = vadd.f32 -0.5, %v7553_v23  ;;  %v13048_v60 = vadd.f32 -0.5, %v7770_v58  ;;  %v7555_v12 = vpop.f32.mrb[109].mxu0  ;;  %v15755_v61 = vpop.f32.mrb[109].mxu1 }
 0x92b   : > { %13228 = vst [vmem:[%s16753_s27 + $0x924] sm:$0xff] %v14343_v57  ;;  %v13047_v62 = vadd.f32 -0.5, %v7555_v12  ;;  %v7557_v63 = vpop.f32.mrb[110].mxu0  ;;  %v7773_v1 = vpop.f32.mrb[110].mxu1 }
 0x92c   : > { %v8029_v3 = vmul.f32 2.0, %v13046_v59  ;;  %v8031_v16 = vmul.f32 2.0, %v13048_v60  ;;  %v13049_v21 = vadd.f32 -0.5, %v7557_v63  ;;  %v13051_v26 = vadd.f32 -0.5, %v7773_v1  ;;  %v7559_v28 = vpop.f32.mrb[111].mxu0  ;;  %v15756_v29 = vpop.f32.mrb[111].mxu1 }
 0x92d   : > { %v8030_v30 = vmul.f32 2.0, %v13047_v62  ;;  %v13050_v31 = vadd.f32 -0.5, %v7559_v28 }
 0x92e   : > { %v14346_v32 = vpack.c.bf16 %v8031_v16, %v8031_v16  ;;  %v8032_v33 = vmul.f32 2.0, %v13049_v21  ;;  %v8034_v34 = vmul.f32 2.0, %v13051_v26  ;;  %15864 = vmatmul.mubr.msk.bf16.gmra.mrb[216].mxu0 %vm335_vm1, %v16280_v18  ;;  %v16282_v16 = vld [vmem:[%s19145_s0 + $0x68] sm:$0xff]  }
 0x92f   : > { %v14345_v35 = vpack.c.bf16 %v8030_v30, %v8029_v3  ;;  %v8033_v24 = vmul.f32 2.0, %v13050_v31  ;;  %15867 = vmatprep.mubr.msk.bf16.mxu0 %vm16353_vm0, %v16352_v0 }
 0x930   : > { %13231 = vst.msk [vmem:[%s16753_s27 + $0x938] sm:$0xf] %vm1687_vm2, %v14346_v32  ;;  %v14348_v36 = vpack.c.bf16 %v8034_v34, %v8034_v34 }
 0x931   : > { %13230 = vst [vmem:[%s16753_s27 + $0x930] sm:$0xff] %v14345_v35  ;;  %v14347_v37 = vpack.c.bf16 %v8033_v24, %v8032_v33  ;;  %v7563_v38 = vpop.f32.mrb[112].mxu0  ;;  %v7778_v39 = vpop.f32.mrb[112].mxu1 }
 0x932   : > { %13233 = vst.msk [vmem:[%s16753_s27 + $0x944] sm:$0xf] %vm1687_vm2, %v14348_v36  ;;  %v13052_v40 = vadd.f32 -0.5, %v7563_v38  ;;  %v13054_v4 = vadd.f32 -0.5, %v7778_v39  ;;  %v7565_v13 = vpop.f32.mrb[113].mxu0  ;;  %v15759_v5 = vpop.f32.mrb[113].mxu1 }
 0x933   : > { %13232 = vst [vmem:[%s16753_s27 + $0x93c] sm:$0xff] %v14347_v37  ;;  %v13053_v6 = vadd.f32 -0.5, %v7565_v13  ;;  %v7567_v7 = vpop.f32.mrb[114].mxu0  ;;  %v7781_v8 = vpop.f32.mrb[114].mxu1 }
 0x934   : > { %v8035_v9 = vmul.f32 2.0, %v13052_v40  ;;  %v8037_v22 = vmul.f32 2.0, %v13054_v4  ;;  %v13055_v15 = vadd.f32 -0.5, %v7567_v7  ;;  %v13057_v17 = vadd.f32 -0.5, %v7781_v8  ;;  %v7569_v41 = vpop.f32.mrb[115].mxu0  ;;  %v15760_v10 = vpop.f32.mrb[115].mxu1 }
 0x935   : > { %v8036_v42 = vmul.f32 2.0, %v13053_v6  ;;  %v13056_v43 = vadd.f32 -0.5, %v7569_v41 }
 0x936   : > { %v14350_v44 = vpack.c.bf16 %v8037_v22, %v8037_v22  ;;  %v8038_v45 = vmul.f32 2.0, %v13055_v15  ;;  %v8040_v46 = vmul.f32 2.0, %v13057_v17  ;;  %15868 = vmatmul.mubr.msk.bf16.gmra.mrb[220].mxu0 %vm335_vm1, %v16281_v11  ;;  %v16283_v22 = vld [vmem:[%s19145_s0 + $0x70] sm:$0xff]  }
 0x937   : > { %v14349_v25 = vpack.c.bf16 %v8036_v42, %v8035_v9  ;;  %v8039_v20 = vmul.f32 2.0, %v13056_v43  ;;  %15871 = vmatprep.mubr.msk.bf16.mxu0 %vm16353_vm0, %v16352_v0 }
 0x938   : > { %13235 = vst.msk [vmem:[%s16753_s27 + $0x950] sm:$0xf] %vm1687_vm2, %v14350_v44  ;;  %v14352_v47 = vpack.c.bf16 %v8040_v46, %v8040_v46 }
 0x939   : > { %13234 = vst [vmem:[%s16753_s27 + $0x948] sm:$0xff] %v14349_v25  ;;  %v14351_v48 = vpack.c.bf16 %v8039_v20, %v8038_v45  ;;  %v7573_v49 = vpop.f32.mrb[116].mxu0  ;;  %v7786_v50 = vpop.f32.mrb[116].mxu1 }
 0x93a   : > { %13237 = vst.msk [vmem:[%s16753_s27 + $0x95c] sm:$0xf] %vm1687_vm2, %v14352_v47  ;;  %v13058_v51 = vadd.f32 -0.5, %v7573_v49  ;;  %v13060_v52 = vadd.f32 -0.5, %v7786_v50  ;;  %v7575_v53 = vpop.f32.mrb[117].mxu0  ;;  %v15763_v54 = vpop.f32.mrb[117].mxu1 }
 0x93b   : > { %13236 = vst [vmem:[%s16753_s27 + $0x954] sm:$0xff] %v14351_v48  ;;  %v13059_v14 = vadd.f32 -0.5, %v7575_v53  ;;  %v7577_v55 = vpop.f32.mrb[118].mxu0  ;;  %v7789_v56 = vpop.f32.mrb[118].mxu1 }
 0x93c   : > { %v8041_v57 = vmul.f32 2.0, %v13058_v51  ;;  %v8043_v23 = vmul.f32 2.0, %v13060_v52  ;;  %v13061_v58 = vadd.f32 -0.5, %v7577_v55  ;;  %v13063_v59 = vadd.f32 -0.5, %v7789_v56  ;;  %v7579_v60 = vpop.f32.mrb[119].mxu0  ;;  %v15764_v12 = vpop.f32.mrb[119].mxu1 }
 0x93d   : > { %v8042_v61 = vmul.f32 2.0, %v13059_v14  ;;  %v13062_v62 = vadd.f32 -0.5, %v7579_v60 }
 0x93e   : > { %v14354_v63 = vpack.c.bf16 %v8043_v23, %v8043_v23  ;;  %v8044_v1 = vmul.f32 2.0, %v13061_v58  ;;  %v8046_v3 = vmul.f32 2.0, %v13063_v59  ;;  %15872 = vmatmul.mubr.msk.bf16.gmra.mrb[224].mxu0 %vm335_vm1, %v16282_v16  ;;  %v16284_v23 = vld [vmem:[%s19145_s0 + $0x78] sm:$0xff]  }
 0x93f   : > { %v14353_v21 = vpack.c.bf16 %v8042_v61, %v8041_v57  ;;  %v8045_v26 = vmul.f32 2.0, %v13062_v62  ;;  %15875 = vmatprep.mubr.msk.bf16.mxu0 %vm16353_vm0, %v16352_v0 }
 0x940   : > { %13239 = vst.msk [vmem:[%s16753_s27 + $0x968] sm:$0xf] %vm1687_vm2, %v14354_v63  ;;  %v14356_v28 = vpack.c.bf16 %v8046_v3, %v8046_v3 }
 0x941   : > { %13238 = vst [vmem:[%s16753_s27 + $0x960] sm:$0xff] %v14353_v21  ;;  %v14355_v29 = vpack.c.bf16 %v8045_v26, %v8044_v1  ;;  %v7583_v30 = vpop.f32.mrb[120].mxu0  ;;  %v7794_v31 = vpop.f32.mrb[120].mxu1 }
 0x942   : > { %13241 = vst.msk [vmem:[%s16753_s27 + $0x974] sm:$0xf] %vm1687_vm2, %v14356_v28  ;;  %v13064_v32 = vadd.f32 -0.5, %v7583_v30  ;;  %v13066_v33 = vadd.f32 -0.5, %v7794_v31  ;;  %v7585_v34 = vpop.f32.mrb[121].mxu0  ;;  %v15767_v18 = vpop.f32.mrb[121].mxu1 }
 0x943   : > { %13240 = vst [vmem:[%s16753_s27 + $0x96c] sm:$0xff] %v14355_v29  ;;  %v13065_v35 = vadd.f32 -0.5, %v7585_v34  ;;  %v7587_v24 = vpop.f32.mrb[122].mxu0  ;;  %v7797_v36 = vpop.f32.mrb[122].mxu1 }
 0x944   : > { %v8047_v37 = vmul.f32 2.0, %v13064_v32  ;;  %v8049_v38 = vmul.f32 2.0, %v13066_v33  ;;  %v13067_v39 = vadd.f32 -0.5, %v7587_v24  ;;  %v13069_v40 = vadd.f32 -0.5, %v7797_v36  ;;  %v7589_v4 = vpop.f32.mrb[123].mxu0  ;;  %v15768_v13 = vpop.f32.mrb[123].mxu1 }
 0x945   : > { %v8048_v5 = vmul.f32 2.0, %v13065_v35  ;;  %v13068_v6 = vadd.f32 -0.5, %v7589_v4 }
 0x946   : > { %v14358_v7 = vpack.c.bf16 %v8049_v38, %v8049_v38  ;;  %v8050_v8 = vmul.f32 2.0, %v13067_v39  ;;  %v8052_v9 = vmul.f32 2.0, %v13069_v40  ;;  %15876 = vmatmul.mubr.msk.bf16.gmra.mrb[228].mxu0 %vm335_vm1, %v16283_v22  ;;  %v16285_v38 = vld [vmem:[%s19145_s0 + $0x80] sm:$0xff]  }
 0x947   : > { %v14357_v15 = vpack.c.bf16 %v8048_v5, %v8047_v37  ;;  %v8051_v17 = vmul.f32 2.0, %v13068_v6  ;;  %15879 = vmatprep.mubr.msk.bf16.mxu0 %vm16353_vm0, %v16352_v0 }
 0x948   : > { %13243 = vst.msk [vmem:[%s16753_s27 + $0x980] sm:$0xf] %vm1687_vm2, %v14358_v7  ;;  %v14360_v41 = vpack.c.bf16 %v8052_v9, %v8052_v9 }
 0x949   : > { %13242 = vst [vmem:[%s16753_s27 + $0x978] sm:$0xff] %v14357_v15  ;;  %v14359_v10 = vpack.c.bf16 %v8051_v17, %v8050_v8  ;;  %v7593_v42 = vpop.f32.mrb[124].mxu0  ;;  %v7802_v43 = vpop.f32.mrb[124].mxu1 }
 0x94a   : > { %13245 = vst.msk [vmem:[%s16753_s27 + $0x98c] sm:$0xf] %vm1687_vm2, %v14360_v41  ;;  %v13070_v44 = vadd.f32 -0.5, %v7593_v42  ;;  %v13072_v45 = vadd.f32 -0.5, %v7802_v43  ;;  %v7595_v46 = vpop.f32.mrb[125].mxu0  ;;  %v15771_v11 = vpop.f32.mrb[125].mxu1 }
 0x94b   : > { %13244 = vst [vmem:[%s16753_s27 + $0x984] sm:$0xff] %v14359_v10  ;;  %v13071_v25 = vadd.f32 -0.5, %v7595_v46  ;;  %v7597_v20 = vpop.f32.mrb[126].mxu0  ;;  %v7805_v47 = vpop.f32.mrb[126].mxu1 }
 0x94c   : > { %v8053_v48 = vmul.f32 2.0, %v13070_v44  ;;  %v8055_v49 = vmul.f32 2.0, %v13072_v45  ;;  %v13073_v50 = vadd.f32 -0.5, %v7597_v20  ;;  %v13075_v51 = vadd.f32 -0.5, %v7805_v47  ;;  %v7599_v52 = vpop.f32.mrb[127].mxu0  ;;  %v15772_v53 = vpop.f32.mrb[127].mxu1 }
 0x94d   : > { %v8054_v54 = vmul.f32 2.0, %v13071_v25  ;;  %v13074_v14 = vadd.f32 -0.5, %v7599_v52 }
 0x94e   : > { %v14362_v55 = vpack.c.bf16 %v8055_v49, %v8055_v49  ;;  %v8056_v56 = vmul.f32 2.0, %v13073_v50  ;;  %v8058_v57 = vmul.f32 2.0, %v13075_v51  ;;  %15880 = vmatmul.mubr.msk.bf16.gmra.mrb[232].mxu0 %vm335_vm1, %v16284_v23  ;;  %v16286_v49 = vld [vmem:[%s19145_s0 + $0x88] sm:$0xff]  }
 0x94f   : > { %v14361_v58 = vpack.c.bf16 %v8054_v54, %v8053_v48  ;;  %v8057_v59 = vmul.f32 2.0, %v13074_v14  ;;  %15883 = vmatprep.mubr.msk.bf16.mxu0 %vm16353_vm0, %v16352_v0 }
 0x950   : > { %13247 = vst.msk [vmem:[%s16753_s27 + $0x998] sm:$0xf] %vm1687_vm2, %v14362_v55  ;;  %v14364_v60 = vpack.c.bf16 %v8058_v57, %v8058_v57 }
 0x951   : > { %13246 = vst [vmem:[%s16753_s27 + $0x990] sm:$0xff] %v14361_v58  ;;  %v14363_v12 = vpack.c.bf16 %v8057_v59, %v8056_v56  ;;  %v7603_v61 = vpop.f32.mrb[128].mxu0  ;;  %v7810_v62 = vpop.f32.mrb[128].mxu1 }
 0x952   : > { %13249 = vst.msk [vmem:[%s16753_s27 + $0x9a4] sm:$0xf] %vm1687_vm2, %v14364_v60  ;;  %v13076_v63 = vadd.f32 -0.5, %v7603_v61  ;;  %v13078_v1 = vadd.f32 -0.5, %v7810_v62  ;;  %v7605_v3 = vpop.f32.mrb[129].mxu0  ;;  %v15775_v16 = vpop.f32.mrb[129].mxu1 }
 0x953   : > { %13248 = vst [vmem:[%s16753_s27 + $0x99c] sm:$0xff] %v14363_v12  ;;  %v13077_v21 = vadd.f32 -0.5, %v7605_v3  ;;  %v7607_v26 = vpop.f32.mrb[130].mxu0  ;;  %v7813_v28 = vpop.f32.mrb[130].mxu1 }
 0x954   : > { %v8059_v29 = vmul.f32 2.0, %v13076_v63  ;;  %v8061_v30 = vmul.f32 2.0, %v13078_v1  ;;  %v13079_v31 = vadd.f32 -0.5, %v7607_v26  ;;  %v13081_v32 = vadd.f32 -0.5, %v7813_v28  ;;  %v7609_v33 = vpop.f32.mrb[131].mxu0  ;;  %v15776_v34 = vpop.f32.mrb[131].mxu1 }
 0x955   : > { %v8060_v18 = vmul.f32 2.0, %v13077_v21  ;;  %v13080_v35 = vadd.f32 -0.5, %v7609_v33 }
 0x956   : > { %v14366_v24 = vpack.c.bf16 %v8061_v30, %v8061_v30  ;;  %v8062_v36 = vmul.f32 2.0, %v13079_v31  ;;  %v8064_v37 = vmul.f32 2.0, %v13081_v32  ;;  %15884 = vmatmul.mubr.msk.bf16.gmra.mrb[236].mxu0 %vm335_vm1, %v16285_v38  ;;  %v16287_v30 = vld [vmem:[%s19145_s0 + $0x90] sm:$0x3f]  }
 0x957   : > { %v14365_v39 = vpack.c.bf16 %v8060_v18, %v8059_v29  ;;  %v8063_v40 = vmul.f32 2.0, %v13080_v35  ;;  %15887 = vmatprep.mubr.msk.bf16.mxu0 %vm16353_vm0, %v16352_v0 }
 0x958   : > { %13251 = vst.msk [vmem:[%s16753_s27 + $0x9b0] sm:$0xf] %vm1687_vm2, %v14366_v24  ;;  %v14368_v4 = vpack.c.bf16 %v8064_v37, %v8064_v37 }
 0x959   : > { %13250 = vst [vmem:[%s16753_s27 + $0x9a8] sm:$0xff] %v14365_v39  ;;  %v14367_v13 = vpack.c.bf16 %v8063_v40, %v8062_v36  ;;  %v7613_v5 = vpop.f32.mrb[132].mxu0  ;;  %v7818_v6 = vpop.f32.mrb[132].mxu1 }
 0x95a   : > { %13253 = vst.msk [vmem:[%s16753_s27 + $0x9bc] sm:$0xf] %vm1687_vm2, %v14368_v4  ;;  %v13082_v7 = vadd.f32 -0.5, %v7613_v5  ;;  %v13084_v8 = vadd.f32 -0.5, %v7818_v6  ;;  %v7615_v9 = vpop.f32.mrb[133].mxu0  ;;  %v15779_v22 = vpop.f32.mrb[133].mxu1 }
 0x95b   : > { %13252 = vst [vmem:[%s16753_s27 + $0x9b4] sm:$0xff] %v14367_v13  ;;  %v13083_v15 = vadd.f32 -0.5, %v7615_v9  ;;  %v7617_v17 = vpop.f32.mrb[134].mxu0  ;;  %v7821_v41 = vpop.f32.mrb[134].mxu1 }
 0x95c   : > { %v8065_v10 = vmul.f32 2.0, %v13082_v7  ;;  %v8067_v42 = vmul.f32 2.0, %v13084_v8  ;;  %v13085_v43 = vadd.f32 -0.5, %v7617_v17  ;;  %v13087_v44 = vadd.f32 -0.5, %v7821_v41  ;;  %v7619_v45 = vpop.f32.mrb[135].mxu0  ;;  %v15780_v46 = vpop.f32.mrb[135].mxu1 }
 0x95d   : > { %v8066_v11 = vmul.f32 2.0, %v13083_v15  ;;  %v13086_v25 = vadd.f32 -0.5, %v7619_v45 }
 0x95e   : > { %v14370_v20 = vpack.c.bf16 %v8067_v42, %v8067_v42  ;;  %v8068_v47 = vmul.f32 2.0, %v13085_v43  ;;  %v8070_v48 = vmul.f32 2.0, %v13087_v44  ;;  %15888 = vmatmul.mubr.msk.bf16.gmra.mrb[240].mxu0 %vm335_vm1, %v16286_v49 }
 0x95f   : > { %v14369_v50 = vpack.c.bf16 %v8066_v11, %v8065_v10  ;;  %v8069_v51 = vmul.f32 2.0, %v13086_v25  ;;  %15891 = vmatprep.mubr.msk.bf16.mxu0 %vm16353_vm0, %v16352_v0 }
 0x960   : > { %13255 = vst.msk [vmem:[%s16753_s27 + $0x9c8] sm:$0xf] %vm1687_vm2, %v14370_v20  ;;  %v14372_v52 = vpack.c.bf16 %v8070_v48, %v8070_v48 }
 0x961   : > { %13254 = vst [vmem:[%s16753_s27 + $0x9c0] sm:$0xff] %v14369_v50  ;;  %v14371_v53 = vpack.c.bf16 %v8069_v51, %v8068_v47  ;;  %v7623_v54 = vpop.f32.mrb[136].mxu0  ;;  %v7826_v14 = vpop.f32.mrb[136].mxu1 }
 0x962   : > { %13257 = vst.msk [vmem:[%s16753_s27 + $0x9d4] sm:$0xf] %vm1687_vm2, %v14372_v52  ;;  %v13088_v55 = vadd.f32 -0.5, %v7623_v54  ;;  %v13090_v56 = vadd.f32 -0.5, %v7826_v14  ;;  %v7625_v57 = vpop.f32.mrb[137].mxu0  ;;  %v15783_v23 = vpop.f32.mrb[137].mxu1 }
 0x963   : > { %13256 = vst [vmem:[%s16753_s27 + $0x9cc] sm:$0xff] %v14371_v53  ;;  %v13089_v58 = vadd.f32 -0.5, %v7625_v57  ;;  %v7627_v59 = vpop.f32.mrb[138].mxu0  ;;  %v7829_v60 = vpop.f32.mrb[138].mxu1 }
 0x964   : > { %v8071_v12 = vmul.f32 2.0, %v13088_v55  ;;  %v8073_v61 = vmul.f32 2.0, %v13090_v56  ;;  %v13091_v62 = vadd.f32 -0.5, %v7627_v59  ;;  %v13093_v63 = vadd.f32 -0.5, %v7829_v60  ;;  %v7629_v1 = vpop.f32.mrb[139].mxu0  ;;  %v15784_v3 = vpop.f32.mrb[139].mxu1 }
 0x965   : > { %v8072_v16 = vmul.f32 2.0, %v13089_v58  ;;  %v13092_v21 = vadd.f32 -0.5, %v7629_v1 }
 0x966   : > { %v14374_v26 = vpack.c.bf16 %v8073_v61, %v8073_v61  ;;  %v8074_v28 = vmul.f32 2.0, %v13091_v62  ;;  %v8076_v29 = vmul.f32 2.0, %v13093_v63  ;;  %15892 = vmatmul.mubr.msk.bf16.gmra.mrb[244].mxu0 %vm335_vm1, %v16287_v30 }
 0x967   : > { %v14373_v31 = vpack.c.bf16 %v8072_v16, %v8071_v12  ;;  %v8075_v32 = vmul.f32 2.0, %v13092_v21  ;;  %15897 = vmatprep.mubr.msk.bf16.mxu0 %vm16353_vm0, %v16352_v0 }
 0x968   : > { %13259 = vst.msk [vmem:[%s16753_s27 + $0x9e0] sm:$0xf] %vm1687_vm2, %v14374_v26  ;;  %v14376_v33 = vpack.c.bf16 %v8076_v29, %v8076_v29 }
 0x969   : > { %13258 = vst [vmem:[%s16753_s27 + $0x9d8] sm:$0xff] %v14373_v31  ;;  %v14375_v34 = vpack.c.bf16 %v8075_v32, %v8074_v28  ;;  %v7633_v18 = vpop.f32.mrb[140].mxu0  ;;  %v7834_v35 = vpop.f32.mrb[140].mxu1 }
 0x96a   : > { %13261 = vst.msk [vmem:[%s16753_s27 + $0x9ec] sm:$0xf] %vm1687_vm2, %v14376_v33  ;;  %v13094_v24 = vadd.f32 -0.5, %v7633_v18  ;;  %v13096_v36 = vadd.f32 -0.5, %v7834_v35  ;;  %v7635_v37 = vpop.f32.mrb[141].mxu0  ;;  %v15787_v38 = vpop.f32.mrb[141].mxu1 }
 0x96b   : > { %13260 = vst [vmem:[%s16753_s27 + $0x9e4] sm:$0xff] %v14375_v34  ;;  %v13095_v39 = vadd.f32 -0.5, %v7635_v37  ;;  %v7637_v40 = vpop.f32.mrb[142].mxu0  ;;  %v7837_v4 = vpop.f32.mrb[142].mxu1 }
 0x96c   : > { %v8077_v13 = vmul.f32 2.0, %v13094_v24  ;;  %v8079_v5 = vmul.f32 2.0, %v13096_v36  ;;  %v13097_v6 = vadd.f32 -0.5, %v7637_v40  ;;  %v13099_v7 = vadd.f32 -0.5, %v7837_v4  ;;  %v7639_v8 = vpop.f32.mrb[143].mxu0  ;;  %v15788_v9 = vpop.f32.mrb[143].mxu1 }
 0x96d   : > { %v8078_v22 = vmul.f32 2.0, %v13095_v39  ;;  %v13098_v15 = vadd.f32 -0.5, %v7639_v8 }
 0x96e   : > { %v14378_v17 = vpack.c.bf16 %v8079_v5, %v8079_v5  ;;  %v8080_v41 = vmul.f32 2.0, %v13097_v6  ;;  %v8082_v10 = vmul.f32 2.0, %v13099_v7 }
 0x96f   : > { %v14377_v42 = vpack.c.bf16 %v8078_v22, %v8077_v13  ;;  %v8081_v43 = vmul.f32 2.0, %v13098_v15 }
 0x970   : > { %13263 = vst.msk [vmem:[%s16753_s27 + $0x9f8] sm:$0xf] %vm1687_vm2, %v14378_v17  ;;  %v14380_v44 = vpack.c.bf16 %v8082_v10, %v8082_v10 }
 0x971   : > { %13262 = vst [vmem:[%s16753_s27 + $0x9f0] sm:$0xff] %v14377_v42  ;;  %v14379_v45 = vpack.c.bf16 %v8081_v43, %v8080_v41  ;;  %v7643_v46 = vpop.f32.mrb[144].mxu0  ;;  %v7842_v11 = vpop.f32.mrb[144].mxu1 }
 0x972   : > { %13265 = vst.msk [vmem:[%s16753_s27 + $0xa04] sm:$0xf] %vm1687_vm2, %v14380_v44  ;;  %v13100_v25 = vadd.f32 -0.5, %v7643_v46  ;;  %v13102_v20 = vadd.f32 -0.5, %v7842_v11  ;;  %v7645_v47 = vpop.f32.mrb[145].mxu0  ;;  %v15791_v48 = vpop.f32.mrb[145].mxu1 }
 0x973   : > { %13264 = vst [vmem:[%s16753_s27 + $0x9fc] sm:$0xff] %v14379_v45  ;;  %v13101_v49 = vadd.f32 -0.5, %v7645_v47  ;;  %v7647_v50 = vpop.f32.mrb[146].mxu0  ;;  %v7845_v51 = vpop.f32.mrb[146].mxu1 }
 0x974   : > { %v8083_v52 = vmul.f32 2.0, %v13100_v25  ;;  %v8085_v53 = vmul.f32 2.0, %v13102_v20  ;;  %v13103_v54 = vadd.f32 -0.5, %v7647_v50  ;;  %v13105_v14 = vadd.f32 -0.5, %v7845_v51  ;;  %v7649_v55 = vpop.f32.mrb[147].mxu0  ;;  %v15792_v56 = vpop.f32.mrb[147].mxu1 }
 0x975   : > { %v8084_v57 = vmul.f32 2.0, %v13101_v49  ;;  %v13104_v23 = vadd.f32 -0.5, %v7649_v55 }
 0x976   : > { %v14382_v58 = vpack.c.bf16 %v8085_v53, %v8085_v53  ;;  %v8086_v59 = vmul.f32 2.0, %v13103_v54  ;;  %v8088_v60 = vmul.f32 2.0, %v13105_v14 }
 0x977   : > { %v14381_v12 = vpack.c.bf16 %v8084_v57, %v8083_v52  ;;  %v8087_v61 = vmul.f32 2.0, %v13104_v23 }
 0x978   : > { %13267 = vst.msk [vmem:[%s16753_s27 + $0xa10] sm:$0xf] %vm1687_vm2, %v14382_v58  ;;  %v14384_v62 = vpack.c.bf16 %v8088_v60, %v8088_v60 }
 0x979   : > { %13266 = vst [vmem:[%s16753_s27 + $0xa08] sm:$0xff] %v14381_v12  ;;  %v14383_v63 = vpack.c.bf16 %v8087_v61, %v8086_v59  ;;  %v7653_v1 = vpop.f32.mrb[148].mxu0  ;;  %v7850_v3 = vpop.f32.mrb[148].mxu1 }
 0x97a   : > { %13269 = vst.msk [vmem:[%s16753_s27 + $0xa1c] sm:$0xf] %vm1687_vm2, %v14384_v62  ;;  %v13106_v16 = vadd.f32 -0.5, %v7653_v1  ;;  %v13108_v21 = vadd.f32 -0.5, %v7850_v3  ;;  %v7655_v26 = vpop.f32.mrb[149].mxu0  ;;  %v15795_v28 = vpop.f32.mrb[149].mxu1 }
 0x97b   : > { %13268 = vst [vmem:[%s16753_s27 + $0xa14] sm:$0xff] %v14383_v63  ;;  %v13107_v29 = vadd.f32 -0.5, %v7655_v26  ;;  %v7657_v30 = vpop.f32.mrb[150].mxu0  ;;  %v7853_v31 = vpop.f32.mrb[150].mxu1 }
 0x97c   : > { %v8089_v32 = vmul.f32 2.0, %v13106_v16  ;;  %v8091_v33 = vmul.f32 2.0, %v13108_v21  ;;  %v13109_v34 = vadd.f32 -0.5, %v7657_v30  ;;  %v13111_v18 = vadd.f32 -0.5, %v7853_v31  ;;  %v7659_v35 = vpop.f32.mrb[151].mxu0  ;;  %v15796_v24 = vpop.f32.mrb[151].mxu1 }
 0x97d   : > { %v8090_v36 = vmul.f32 2.0, %v13107_v29  ;;  %v13110_v37 = vadd.f32 -0.5, %v7659_v35 }
 0x97e   : > { %v14386_v38 = vpack.c.bf16 %v8091_v33, %v8091_v33  ;;  %v8092_v39 = vmul.f32 2.0, %v13109_v34  ;;  %v8094_v40 = vmul.f32 2.0, %v13111_v18 }
 0x97f   : > { %v14385_v4 = vpack.c.bf16 %v8090_v36, %v8089_v32  ;;  %v8093_v13 = vmul.f32 2.0, %v13110_v37 }
 0x980   : > { %13271 = vst.msk [vmem:[%s16753_s27 + $0xa28] sm:$0xf] %vm1687_vm2, %v14386_v38  ;;  %v14388_v5 = vpack.c.bf16 %v8094_v40, %v8094_v40 }
 0x981   : > { %13270 = vst [vmem:[%s16753_s27 + $0xa20] sm:$0xff] %v14385_v4  ;;  %v14387_v6 = vpack.c.bf16 %v8093_v13, %v8092_v39  ;;  %v7663_v7 = vpop.f32.mrb[152].mxu0  ;;  %v7858_v8 = vpop.f32.mrb[152].mxu1 }
 0x982   : > { %13273 = vst.msk [vmem:[%s16753_s27 + $0xa34] sm:$0xf] %vm1687_vm2, %v14388_v5  ;;  %v13112_v9 = vadd.f32 -0.5, %v7663_v7  ;;  %v13114_v22 = vadd.f32 -0.5, %v7858_v8  ;;  %v7665_v15 = vpop.f32.mrb[153].mxu0  ;;  %v15799_v17 = vpop.f32.mrb[153].mxu1 }
 0x983   : > { %13272 = vst [vmem:[%s16753_s27 + $0xa2c] sm:$0xff] %v14387_v6  ;;  %v13113_v41 = vadd.f32 -0.5, %v7665_v15  ;;  %v7667_v10 = vpop.f32.mrb[154].mxu0  ;;  %v7861_v42 = vpop.f32.mrb[154].mxu1 }
 0x984   : > { %v8095_v43 = vmul.f32 2.0, %v13112_v9  ;;  %v8097_v44 = vmul.f32 2.0, %v13114_v22  ;;  %v13115_v45 = vadd.f32 -0.5, %v7667_v10  ;;  %v13117_v46 = vadd.f32 -0.5, %v7861_v42  ;;  %v7669_v11 = vpop.f32.mrb[155].mxu0  ;;  %v15800_v25 = vpop.f32.mrb[155].mxu1 }
 0x985   : > { %v8096_v20 = vmul.f32 2.0, %v13113_v41  ;;  %v13116_v47 = vadd.f32 -0.5, %v7669_v11 }
 0x986   : > { %v14390_v48 = vpack.c.bf16 %v8097_v44, %v8097_v44  ;;  %v8098_v49 = vmul.f32 2.0, %v13115_v45  ;;  %v8100_v50 = vmul.f32 2.0, %v13117_v46 }
 0x987   : > { %v14389_v51 = vpack.c.bf16 %v8096_v20, %v8095_v43  ;;  %v8099_v52 = vmul.f32 2.0, %v13116_v47 }
 0x988   : > { %13275 = vst.msk [vmem:[%s16753_s27 + $0xa40] sm:$0xf] %vm1687_vm2, %v14390_v48  ;;  %v14392_v53 = vpack.c.bf16 %v8100_v50, %v8100_v50 }
 0x989   : > { %13274 = vst [vmem:[%s16753_s27 + $0xa38] sm:$0xff] %v14389_v51  ;;  %v14391_v54 = vpack.c.bf16 %v8099_v52, %v8098_v49  ;;  %v7673_v14 = vpop.f32.mrb[156].mxu0  ;;  %v7866_v55 = vpop.f32.mrb[156].mxu1 }
 0x98a   : > { %13277 = vst.msk [vmem:[%s16753_s27 + $0xa4c] sm:$0xf] %vm1687_vm2, %v14392_v53  ;;  %v13118_v56 = vadd.f32 -0.5, %v7673_v14  ;;  %v13120_v57 = vadd.f32 -0.5, %v7866_v55  ;;  %v7675_v23 = vpop.f32.mrb[157].mxu0  ;;  %v15803_v58 = vpop.f32.mrb[157].mxu1 }
 0x98b   : > { %13276 = vst [vmem:[%s16753_s27 + $0xa44] sm:$0xff] %v14391_v54  ;;  %v13119_v59 = vadd.f32 -0.5, %v7675_v23  ;;  %v7677_v60 = vpop.f32.mrb[158].mxu0  ;;  %v7869_v12 = vpop.f32.mrb[158].mxu1 }
 0x98c   : > { %v8101_v61 = vmul.f32 2.0, %v13118_v56  ;;  %v8103_v62 = vmul.f32 2.0, %v13120_v57  ;;  %v13121_v63 = vadd.f32 -0.5, %v7677_v60  ;;  %v13123_v1 = vadd.f32 -0.5, %v7869_v12  ;;  %v7679_v3 = vpop.f32.mrb[159].mxu0  ;;  %v15804_v16 = vpop.f32.mrb[159].mxu1 }
 0x98d   : > { %v8102_v21 = vmul.f32 2.0, %v13119_v59  ;;  %v13122_v26 = vadd.f32 -0.5, %v7679_v3 }
 0x98e   : > { %v14394_v28 = vpack.c.bf16 %v8103_v62, %v8103_v62  ;;  %v8104_v29 = vmul.f32 2.0, %v13121_v63  ;;  %v8106_v30 = vmul.f32 2.0, %v13123_v1 }
 0x98f   : > { %v14393_v31 = vpack.c.bf16 %v8102_v21, %v8101_v61  ;;  %v8105_v32 = vmul.f32 2.0, %v13122_v26 }
 0x990   : > { %13279 = vst.msk [vmem:[%s16753_s27 + $0xa58] sm:$0xf] %vm1687_vm2, %v14394_v28  ;;  %v14396_v33 = vpack.c.bf16 %v8106_v30, %v8106_v30 }
 0x991   : > { %13278 = vst [vmem:[%s16753_s27 + $0xa50] sm:$0xff] %v14393_v31  ;;  %v14395_v34 = vpack.c.bf16 %v8105_v32, %v8104_v29  ;;  %v7683_v18 = vpop.f32.mrb[160].mxu0  ;;  %v7874_v35 = vpop.f32.mrb[160].mxu1 }
 0x992   : > { %13281 = vst.msk [vmem:[%s16753_s27 + $0xa64] sm:$0xf] %vm1687_vm2, %v14396_v33  ;;  %v13124_v24 = vadd.f32 -0.5, %v7683_v18  ;;  %v13126_v36 = vadd.f32 -0.5, %v7874_v35  ;;  %v7685_v37 = vpop.f32.mrb[161].mxu0  ;;  %v15807_v38 = vpop.f32.mrb[161].mxu1 }
 0x993   : > { %13280 = vst [vmem:[%s16753_s27 + $0xa5c] sm:$0xff] %v14395_v34  ;;  %v13125_v39 = vadd.f32 -0.5, %v7685_v37  ;;  %v7687_v40 = vpop.f32.mrb[162].mxu0  ;;  %v7877_v4 = vpop.f32.mrb[162].mxu1 }
 0x994   : > { %v8107_v13 = vmul.f32 2.0, %v13124_v24  ;;  %v8109_v5 = vmul.f32 2.0, %v13126_v36  ;;  %v13127_v6 = vadd.f32 -0.5, %v7687_v40  ;;  %v13129_v7 = vadd.f32 -0.5, %v7877_v4  ;;  %v7689_v8 = vpop.f32.mrb[163].mxu0  ;;  %v15808_v9 = vpop.f32.mrb[163].mxu1 }
 0x995   : > { %v8108_v22 = vmul.f32 2.0, %v13125_v39  ;;  %v13128_v15 = vadd.f32 -0.5, %v7689_v8  ;;  %v13623_v8 = vld [vmem:[%s16434_s8 + $0x70] sm:$0xff]  ;;  %v13624_v9 = vld [vmem:[%s16434_s8 + $0x78] sm:$0xff] }
 0x996   : > { %v14398_v17 = vpack.c.bf16 %v8109_v5, %v8109_v5  ;;  %v8110_v41 = vmul.f32 2.0, %v13127_v6  ;;  %v8112_v10 = vmul.f32 2.0, %v13129_v7  ;;  %v13292_v7 = vld [vmem:[%s16753_s27 + $0xaa4] sm:$0x33] }
 0x997   : > { %v14397_v42 = vpack.c.bf16 %v8108_v22, %v8107_v13  ;;  %v8111_v43 = vmul.f32 2.0, %v13128_v15  ;;  %v13294_v13 = vld [vmem:[%s16753_s27 + $0xaac] sm:$0x3] }
 0x998   : > { %13283 = vst.msk [vmem:[%s16753_s27 + $0xa70] sm:$0xf] %vm1687_vm2, %v14398_v17  ;;  %v14400_v44 = vpack.c.bf16 %v8112_v10, %v8112_v10 }
 0x999   : > { %13282 = vst [vmem:[%s16753_s27 + $0xa68] sm:$0xff] %v14397_v42  ;;  %v14399_v45 = vpack.c.bf16 %v8111_v43, %v8110_v41  ;;  %v7693_v46 = vpop.f32.mrb[164].mxu0  ;;  %v7882_v11 = vpop.f32.mrb[164].mxu1  ;;  %v9951_v43 = vpack.c.bf16 %v13624_v9, %v13623_v8 }
 0x99a   : > { %13285 = vst.msk [vmem:[%s16753_s27 + $0xa7c] sm:$0xf] %vm1687_vm2, %v14400_v44  ;;  %v13130_v25 = vadd.f32 -0.5, %v7693_v46  ;;  %v13132_v20 = vadd.f32 -0.5, %v7882_v11  ;;  %v7695_v47 = vpop.f32.mrb[165].mxu0  ;;  %v15811_v48 = vpop.f32.mrb[165].mxu1 }
 0x99b   : > { %13284 = vst [vmem:[%s16753_s27 + $0xa74] sm:$0xff] %v14399_v45  ;;  %v13131_v49 = vadd.f32 -0.5, %v7695_v47  ;;  %v7697_v50 = vpop.f32.mrb[166].mxu0  ;;  %v7885_v51 = vpop.f32.mrb[166].mxu1  ;;  %v16288_v46 = vld [vmem:[#allocation2] ss:$12 sps:$4 sm:$0xff]  }
 0x99c   : > { %v8113_v52 = vmul.f32 2.0, %v13130_v25  ;;  %v8115_v53 = vmul.f32 2.0, %v13132_v20  ;;  %v13133_v54 = vadd.f32 -0.5, %v7697_v50  ;;  %v13135_v14 = vadd.f32 -0.5, %v7885_v51  ;;  %v7699_v55 = vpop.f32.mrb[167].mxu0  ;;  %v15812_v56 = vpop.f32.mrb[167].mxu1 }
 0x99d   : > { %v8114_v57 = vmul.f32 2.0, %v13131_v49  ;;  %v13134_v23 = vadd.f32 -0.5, %v7699_v55 }
 0x99e   : > { %v14402_v58 = vpack.c.bf16 %v8115_v53, %v8115_v53  ;;  %v8116_v59 = vmul.f32 2.0, %v13133_v54  ;;  %v8118_v60 = vmul.f32 2.0, %v13135_v14 }
 0x99f   : > { %v14401_v12 = vpack.c.bf16 %v8114_v57, %v8113_v52  ;;  %v8117_v61 = vmul.f32 2.0, %v13134_v23 }
 0x9a0   : > { %13287 = vst.msk [vmem:[%s16753_s27 + $0xa88] sm:$0xf] %vm1687_vm2, %v14402_v58  ;;  %v14404_v62 = vpack.c.bf16 %v8118_v60, %v8118_v60 }
 0x9a1   : > { %13286 = vst [vmem:[%s16753_s27 + $0xa80] sm:$0xff] %v14401_v12  ;;  %v14403_v63 = vpack.c.bf16 %v8117_v61, %v8116_v59  ;;  %v7703_v1 = vpop.f32.mrb[168].mxu0  ;;  %v7890_v3 = vpop.f32.mrb[168].mxu1 }
 0x9a2   : > { %13289 = vst.msk [vmem:[%s16753_s27 + $0xa94] sm:$0xf] %vm1687_vm2, %v14404_v62  ;;  %v13136_v16 = vadd.f32 -0.5, %v7703_v1  ;;  %v13138_v21 = vadd.f32 -0.5, %v7890_v3  ;;  %v7705_v26 = vpop.f32.mrb[169].mxu0  ;;  %v15815_v28 = vpop.f32.mrb[169].mxu1 }
 0x9a3   : > { %13288 = vst [vmem:[%s16753_s27 + $0xa8c] sm:$0xff] %v14403_v63  ;;  %v13137_v29 = vadd.f32 -0.5, %v7705_v26  ;;  %v7707_v30 = vpop.f32.mrb[170].mxu0  ;;  %v7893_v31 = vpop.f32.mrb[170].mxu1 }
 0x9a4   : > { %v8119_v32 = vmul.f32 2.0, %v13136_v16  ;;  %v8121_v33 = vmul.f32 2.0, %v13138_v21  ;;  %v13139_v34 = vadd.f32 -0.5, %v7707_v30  ;;  %v13141_v18 = vadd.f32 -0.5, %v7893_v31  ;;  %v7709_v35 = vpop.f32.mrb[171].mxu0  ;;  %v15816_v24 = vpop.f32.mrb[171].mxu1 }
 0x9a5   : > { %v8120_v36 = vmul.f32 2.0, %v13137_v29  ;;  %v13140_v37 = vadd.f32 -0.5, %v7709_v35 }
 0x9a6   : > { %v14406_v38 = vpack.c.bf16 %v8121_v33, %v8121_v33  ;;  %v8122_v39 = vmul.f32 2.0, %v13139_v34  ;;  %v8124_v40 = vmul.f32 2.0, %v13141_v18 }
 0x9a7   : > { %v14405_v4 = vpack.c.bf16 %v8120_v36, %v8119_v32  ;;  %v8123_v5 = vmul.f32 2.0, %v13140_v37 }
 0x9a8   : > { %13291 = vst.msk [vmem:[%s16753_s27 + $0xaa0] sm:$0xf] %vm1687_vm2, %v14406_v38  ;;  %v14408_v6 = vpack.c.bf16 %v8124_v40, %v8124_v40 }
 0x9a9   : > { %13290 = vst [vmem:[%s16753_s27 + $0xa98] sm:$0xff] %v14405_v4  ;;  %v14407_v22 = vpack.c.bf16 %v8123_v5, %v8122_v39  ;;  %v8624_v15 = vpop.f32.mrb[172].mxu0 }
 0x9aa   : > { %v8584_v17 = vsel %vm16919_vm10, %v14408_v6, %v13294_v13  ;;  %v15821_v41 = vpop.f32.mrb[173].mxu0 }
 0x9ab   : > { %13295 = vst [vmem:[%s16753_s27 + $0xaac] sm:$0x3] %v8584_v17  ;;  %v8581_v10 = vsel %vm16929_vm11, %v14407_v22, %v13292_v7  ;;  %v8627_v42 = vpop.f32.mrb[174].mxu0 }
 0x9ac   : > { %13293 = vst [vmem:[%s16753_s27 + $0xaa4] sm:$0x33] %v8581_v10  ;;  %v8775_v44 = vpack.c.bf16 %v8627_v42, %v8624_v15  ;;  %v15822_v45 = vpop.f32.mrb[175].mxu0 }
 0x9ae   : > { %13317 = vmatmul.mubr.msk.bf16.vlgmr.msra.gmra.mrb[172].mxu1 %vm335_vm1, %v8775_v44  ;;  %15898 = vmatmul.mubr.msk.bf16.vlgmr.msra.gmra.mrb[248].mxu0 %vm335_vm1, %v8775_v44 }
 0x9af   : > { %15974 = vmatpush3.bf16.msra.mxu1 %v9951_v43  ;;  %8893 = vmatprep.mubr.bf16.mxu1 %v16354_v19 }
 0x9b0   : > { %15901 = vmatprep.mubr.msk.bf16.mxu0 %vm16353_vm0, %v16352_v0  ;;  %10214 = vmatpush1.bf16.msra.mxu0 %v16288_v46 }
 0x9b1   : > { %v8632_v11 = vpop.f32.mrb[176].mxu0  ;;  %16051 = vmatprep.subr.bf16.mxu1 %v16352_v0 }
 0x9b2   : > { %v15825_v25 = vpop.f32.mrb[177].mxu0 }
 0x9b3   : > { %v8635_v20 = vpop.f32.mrb[178].mxu0 }
 0x9b4   : > { %v8776_v47 = vpack.c.bf16 %v8635_v20, %v8632_v11  ;;  %v15826_v48 = vpop.f32.mrb[179].mxu0 }
 0x9b6   : > { %13318 = vmatmul.mubr.msk.bf16.gmra.mrb[176].mxu1 %vm335_vm1, %v8776_v47  ;;  %15902 = vmatmul.mubr.msk.bf16.gmra.mrb[252].mxu0 %vm335_vm1, %v8776_v47 }
 0x9b7   : > { %8903 = vmatprep.mubr.bf16.mxu1 %v16354_v19  ;;  %15905 = vmatprep.mubr.msk.bf16.mxu0 %vm16353_vm0, %v16352_v0 }
 0x9b9   : > { %v8640_v49 = vpop.f32.mrb[180].mxu0 }
 0x9ba   : > { %v15829_v50 = vpop.f32.mrb[181].mxu0 }
 0x9bb   : > { %v8643_v51 = vpop.f32.mrb[182].mxu0 }
 0x9bc   : > { %v8777_v52 = vpack.c.bf16 %v8643_v51, %v8640_v49  ;;  %v15830_v53 = vpop.f32.mrb[183].mxu0 }
 0x9be   : > { %13319 = vmatmul.mubr.msk.bf16.gmra.mrb[180].mxu1 %vm335_vm1, %v8777_v52  ;;  %15906 = vmatmul.mubr.msk.bf16.gmra.mrb[0].mxu0 %vm335_vm1, %v8777_v52 }
 0x9bf   : > { %8913 = vmatprep.mubr.bf16.mxu1 %v16354_v19  ;;  %15909 = vmatprep.mubr.msk.bf16.mxu0 %vm16353_vm0, %v16352_v0 }
 0x9c1   : > { %v8648_v54 = vpop.f32.mrb[184].mxu0 }
 0x9c2   : > { %v15833_v14 = vpop.f32.mrb[185].mxu0 }
 0x9c3   : > { %v8651_v55 = vpop.f32.mrb[186].mxu0 }
 0x9c4   : > { %v8778_v56 = vpack.c.bf16 %v8651_v55, %v8648_v54  ;;  %v15834_v57 = vpop.f32.mrb[187].mxu0 }
 0x9c6   : > { %13320 = vmatmul.mubr.msk.bf16.gmra.mrb[184].mxu1 %vm335_vm1, %v8778_v56  ;;  %15910 = vmatmul.mubr.msk.bf16.gmra.mrb[4].mxu0 %vm335_vm1, %v8778_v56 }
 0x9c7   : > { %8923 = vmatprep.mubr.bf16.mxu1 %v16354_v19  ;;  %15913 = vmatprep.mubr.msk.bf16.mxu0 %vm16353_vm0, %v16352_v0 }
 0x9c9   : > { %v8656_v23 = vpop.f32.mrb[188].mxu0 }
 0x9ca   : > { %v15837_v58 = vpop.f32.mrb[189].mxu0 }
 0x9cb   : > { %v8659_v59 = vpop.f32.mrb[190].mxu0 }
 0x9cc   : > { %v8779_v60 = vpack.c.bf16 %v8659_v59, %v8656_v23  ;;  %v15838_v12 = vpop.f32.mrb[191].mxu0 }
 0x9ce   : > { %13321 = vmatmul.mubr.msk.bf16.gmra.mrb[188].mxu1 %vm335_vm1, %v8779_v60  ;;  %15914 = vmatmul.mubr.msk.bf16.gmra.mrb[8].mxu0 %vm335_vm1, %v8779_v60 }
 0x9cf   : > { %8933 = vmatprep.mubr.bf16.mxu1 %v16354_v19  ;;  %15917 = vmatprep.mubr.msk.bf16.mxu0 %vm16353_vm0, %v16352_v0 }
 0x9d1   : > { %v8664_v61 = vpop.f32.mrb[192].mxu0 }
 0x9d2   : > { %v15841_v62 = vpop.f32.mrb[193].mxu0 }
 0x9d3   : > { %v8667_v63 = vpop.f32.mrb[194].mxu0 }
 0x9d4   : > { %v8780_v1 = vpack.c.bf16 %v8667_v63, %v8664_v61  ;;  %v15842_v3 = vpop.f32.mrb[195].mxu0 }
 0x9d6   : > { %13322 = vmatmul.mubr.msk.bf16.gmra.mrb[192].mxu1 %vm335_vm1, %v8780_v1  ;;  %15918 = vmatmul.mubr.msk.bf16.gmra.mrb[12].mxu0 %vm335_vm1, %v8780_v1 }
 0x9d7   : > { %8943 = vmatprep.mubr.bf16.mxu1 %v16354_v19  ;;  %15921 = vmatprep.mubr.msk.bf16.mxu0 %vm16353_vm0, %v16352_v0 }
 0x9d9   : > { %v8672_v16 = vpop.f32.mrb[196].mxu0 }
 0x9da   : > { %v15845_v21 = vpop.f32.mrb[197].mxu0 }
 0x9db   : > { %v8675_v26 = vpop.f32.mrb[198].mxu0 }
 0x9dc   : > { %v8781_v28 = vpack.c.bf16 %v8675_v26, %v8672_v16  ;;  %v15846_v29 = vpop.f32.mrb[199].mxu0 }
 0x9de   : > { %13323 = vmatmul.mubr.msk.bf16.gmra.mrb[196].mxu1 %vm335_vm1, %v8781_v28  ;;  %15922 = vmatmul.mubr.msk.bf16.gmra.mrb[16].mxu0 %vm335_vm1, %v8781_v28 }
 0x9df   : > { %8953 = vmatprep.mubr.bf16.mxu1 %v16354_v19  ;;  %15925 = vmatprep.mubr.msk.bf16.mxu0 %vm16353_vm0, %v16352_v0 }
 0x9e1   : > { %v8680_v30 = vpop.f32.mrb[200].mxu0 }
 0x9e2   : > { %v15849_v31 = vpop.f32.mrb[201].mxu0 }
 0x9e3   : > { %v8683_v32 = vpop.f32.mrb[202].mxu0  ;;  %v16290_v31 = vld [vmem:[#allocation2 + $0x8] ss:$12 sps:$4 sm:$0xff]  }
 0x9e4   : > { %v8782_v33 = vpack.c.bf16 %v8683_v32, %v8680_v30  ;;  %v15850_v34 = vpop.f32.mrb[203].mxu0  ;;  %v16289_v30 = vld [vmem:[%s19145_s0] sm:$0xff]   ;;  %v16291_v32 = vld [vmem:[%s19145_s0 + $0x8] sm:$0xff]  }
 0x9e5   : > { %v16293_v34 = vld [vmem:[%s19145_s0 + $0x18] sm:$0xff]  }
 0x9e6   : > { %13324 = vmatmul.mubr.msk.bf16.gmra.mrb[200].mxu1 %vm335_vm1, %v8782_v33  ;;  %15926 = vmatmul.mubr.msk.bf16.gmra.mrb[20].mxu0 %vm335_vm1, %v8782_v33  ;;  %v16292_v33 = vld [vmem:[%s19145_s0 + $0x10] sm:$0xff]  }
 0x9e7   : > { %8963 = vmatprep.mubr.bf16.mxu1 %v16354_v19  ;;  %15929 = vmatprep.mubr.msk.bf16.mxu0 %vm16353_vm0, %v16352_v0 }
 0x9e9   : > { %v8688_v18 = vpop.f32.mrb[204].mxu0 }
 0x9ea   : > { %v15853_v35 = vpop.f32.mrb[205].mxu0 }
 0x9eb   : > { %v8691_v24 = vpop.f32.mrb[206].mxu0  ;;  %v16295_v35 = vld [vmem:[%s19145_s0 + $0x28] sm:$0xff]  }
 0x9ec   : > { %v8783_v36 = vpack.c.bf16 %v8691_v24, %v8688_v18  ;;  %v15854_v37 = vpop.f32.mrb[207].mxu0  ;;  %v16294_v18 = vld [vmem:[%s19145_s0 + $0x20] sm:$0xff]   ;;  %v16296_v24 = vld [vmem:[%s19145_s0 + $0x30] sm:$0xff]  }
 0x9ee   : > { %13325 = vmatmul.mubr.msk.bf16.gmra.mrb[204].mxu1 %vm335_vm1, %v8783_v36  ;;  %15930 = vmatmul.mubr.msk.bf16.gmra.mrb[24].mxu0 %vm335_vm1, %v8783_v36  ;;  %v16297_v36 = vld [vmem:[%s19145_s0 + $0x38] sm:$0xff]  }
 0x9ef   : > { %8973 = vmatprep.mubr.bf16.mxu1 %v16354_v19  ;;  %15933 = vmatprep.mubr.msk.bf16.mxu0 %vm16353_vm0, %v16352_v0 }
 0x9f1   : > { %v8696_v38 = vpop.f32.mrb[208].mxu0 }
 0x9f2   : > { %v15857_v39 = vpop.f32.mrb[209].mxu0 }
 0x9f3   : > { %v8699_v40 = vpop.f32.mrb[210].mxu0 }
 0x9f4   : > { %v8784_v4 = vpack.c.bf16 %v8699_v40, %v8696_v38  ;;  %v15858_v13 = vpop.f32.mrb[211].mxu0 }
 0x9f6   : > { %13326 = vmatmul.mubr.msk.bf16.gmra.mrb[208].mxu1 %vm335_vm1, %v8784_v4  ;;  %15934 = vmatmul.mubr.msk.bf16.gmra.mrb[28].mxu0 %vm335_vm1, %v8784_v4 }
 0x9f7   : > { %8983 = vmatprep.mubr.bf16.mxu1 %v16354_v19  ;;  %15937 = vmatprep.mubr.msk.bf16.mxu0 %vm16353_vm0, %v16352_v0 }
 0x9f9   : > { %v8704_v5 = vpop.f32.mrb[212].mxu0 }
 0x9fa   : > { %v15861_v6 = vpop.f32.mrb[213].mxu0 }
 0x9fb   : > { %v8707_v7 = vpop.f32.mrb[214].mxu0 }
 0x9fc   : > { %v8785_v8 = vpack.c.bf16 %v8707_v7, %v8704_v5  ;;  %v15862_v9 = vpop.f32.mrb[215].mxu0 }
 0x9fe   : > { %13327 = vmatmul.mubr.msk.bf16.gmra.mrb[212].mxu1 %vm335_vm1, %v8785_v8  ;;  %15938 = vmatmul.mubr.msk.bf16.gmra.mrb[32].mxu0 %vm335_vm1, %v8785_v8 }
 0x9ff   : > { %8993 = vmatprep.mubr.bf16.mxu1 %v16354_v19  ;;  %15941 = vmatprep.mubr.msk.bf16.mxu0 %vm16353_vm0, %v16352_v0 }
 0xa01   : > { %v8712_v22 = vpop.f32.mrb[216].mxu0 }
 0xa02   : > { %v15865_v15 = vpop.f32.mrb[217].mxu0 }
 0xa03   : > { %v8715_v17 = vpop.f32.mrb[218].mxu0 }
 0xa04   : > { %v8786_v41 = vpack.c.bf16 %v8715_v17, %v8712_v22  ;;  %v15866_v10 = vpop.f32.mrb[219].mxu0 }
 0xa06   : > { %13328 = vmatmul.mubr.msk.bf16.gmra.mrb[216].mxu1 %vm335_vm1, %v8786_v41  ;;  %15942 = vmatmul.mubr.msk.bf16.gmra.mrb[36].mxu0 %vm335_vm1, %v8786_v41 }
 0xa07   : > { %9003 = vmatprep.mubr.bf16.mxu1 %v16354_v19  ;;  %15945 = vmatprep.mubr.msk.bf16.mxu0 %vm16353_vm0, %v16352_v0 }
 0xa09   : > { %v8720_v42 = vpop.f32.mrb[220].mxu0 }
 0xa0a   : > { %v15869_v43 = vpop.f32.mrb[221].mxu0 }
 0xa0b   : > { %v8723_v44 = vpop.f32.mrb[222].mxu0 }
 0xa0c   : > { %v8787_v45 = vpack.c.bf16 %v8723_v44, %v8720_v42  ;;  %v15870_v46 = vpop.f32.mrb[223].mxu0 }
 0xa0d   : > { %v16298_v46 = vld [vmem:[%s19145_s0 + $0x40] sm:$0xff]  }
 0xa0e   : > { %13329 = vmatmul.mubr.msk.bf16.gmra.mrb[220].mxu1 %vm335_vm1, %v8787_v45  ;;  %15946 = vmatmul.mubr.msk.bf16.gmra.mrb[40].mxu0 %vm335_vm1, %v8787_v45 }
 0xa0f   : > { %9013 = vmatprep.mubr.bf16.mxu1 %v16354_v19  ;;  %15949 = vmatprep.mubr.msk.bf16.mxu0 %vm16353_vm0, %v16352_v0 }
 0xa11   : > { %v8728_v11 = vpop.f32.mrb[224].mxu0 }
 0xa12   : > { %v15873_v25 = vpop.f32.mrb[225].mxu0 }
 0xa13   : > { %v8731_v20 = vpop.f32.mrb[226].mxu0 }
 0xa14   : > { %v8788_v47 = vpack.c.bf16 %v8731_v20, %v8728_v11  ;;  %v15874_v48 = vpop.f32.mrb[227].mxu0 }
 0xa16   : > { %13330 = vmatmul.mubr.msk.bf16.gmra.mrb[224].mxu1 %vm335_vm1, %v8788_v47  ;;  %15950 = vmatmul.mubr.msk.bf16.gmra.mrb[44].mxu0 %vm335_vm1, %v8788_v47 }
 0xa17   : > { %9023 = vmatprep.mubr.bf16.mxu1 %v16354_v19  ;;  %15953 = vmatprep.mubr.msk.bf16.mxu0 %vm16353_vm0, %v16352_v0 }
 0xa19   : > { %v8736_v49 = vpop.f32.mrb[228].mxu0 }
 0xa1a   : > { %v15877_v50 = vpop.f32.mrb[229].mxu0 }
 0xa1b   : > { %v8739_v51 = vpop.f32.mrb[230].mxu0 }
 0xa1c   : > { %v8789_v52 = vpack.c.bf16 %v8739_v51, %v8736_v49  ;;  %v15878_v53 = vpop.f32.mrb[231].mxu0 }
 0xa1e   : > { %13331 = vmatmul.mubr.msk.bf16.gmra.mrb[228].mxu1 %vm335_vm1, %v8789_v52  ;;  %15954 = vmatmul.mubr.msk.bf16.gmra.mrb[48].mxu0 %vm335_vm1, %v8789_v52 }
 0xa1f   : > { %9033 = vmatprep.mubr.bf16.mxu1 %v16354_v19  ;;  %15957 = vmatprep.mubr.msk.bf16.mxu0 %vm16353_vm0, %v16352_v0 }
 0xa21   : > { %v8744_v54 = vpop.f32.mrb[232].mxu0 }
 0xa22   : > { %v15881_v14 = vpop.f32.mrb[233].mxu0 }
 0xa23   : > { %v8747_v55 = vpop.f32.mrb[234].mxu0 }
 0xa24   : > { %v8790_v56 = vpack.c.bf16 %v8747_v55, %v8744_v54  ;;  %v15882_v57 = vpop.f32.mrb[235].mxu0 }
 0xa26   : > { %13332 = vmatmul.mubr.msk.bf16.gmra.mrb[232].mxu1 %vm335_vm1, %v8790_v56  ;;  %15958 = vmatmul.mubr.msk.bf16.gmra.mrb[52].mxu0 %vm335_vm1, %v8790_v56 }
 0xa27   : > { %9043 = vmatprep.mubr.bf16.mxu1 %v16354_v19  ;;  %15961 = vmatprep.mubr.msk.bf16.mxu0 %vm16353_vm0, %v16352_v0 }
 0xa29   : > { %v8752_v23 = vpop.f32.mrb[236].mxu0 }
 0xa2a   : > { %v15885_v58 = vpop.f32.mrb[237].mxu0 }
 0xa2b   : > { %v8755_v59 = vpop.f32.mrb[238].mxu0 }
 0xa2c   : > { %v8791_v60 = vpack.c.bf16 %v8755_v59, %v8752_v23  ;;  %v15886_v12 = vpop.f32.mrb[239].mxu0 }
 0xa2e   : > { %13333 = vmatmul.mubr.msk.bf16.gmra.mrb[236].mxu1 %vm335_vm1, %v8791_v60  ;;  %15962 = vmatmul.mubr.msk.bf16.gmra.mrb[56].mxu0 %vm335_vm1, %v8791_v60 }
 0xa2f   : > { %9053 = vmatprep.mubr.bf16.mxu1 %v16354_v19  ;;  %15965 = vmatprep.mubr.msk.bf16.mxu0 %vm16353_vm0, %v16352_v0 }
 0xa31   : > { %v8760_v61 = vpop.f32.mrb[240].mxu0 }
 0xa32   : > { %v15889_v62 = vpop.f32.mrb[241].mxu0 }
 0xa33   : > { %v8763_v63 = vpop.f32.mrb[242].mxu0 }
 0xa34   : > { %v8792_v1 = vpack.c.bf16 %v8763_v63, %v8760_v61  ;;  %v15890_v3 = vpop.f32.mrb[243].mxu0 }
 0xa35   : > { %v16299_v3 = vld [vmem:[%s19145_s0 + $0x48] sm:$0xff]  }
 0xa36   : > { %13334 = vmatmul.mubr.msk.bf16.gmra.mrb[240].mxu1 %vm335_vm1, %v8792_v1  ;;  %15966 = vmatmul.mubr.msk.bf16.gmra.mrb[60].mxu0 %vm335_vm1, %v8792_v1 }
 0xa37   : > { %9063 = vmatprep.mubr.bf16.mxu1 %v16354_v19  ;;  %15969 = vmatprep.mubr.msk.bf16.mxu0 %vm16353_vm0, %v16352_v0 }
 0xa39   : > { %v8768_v16 = vpop.f32.mrb[244].mxu0 }
 0xa3a   : > { %v15893_v21 = vpop.f32.mrb[245].mxu0 }
 0xa3b   : > { %v8771_v26 = vpop.f32.mrb[246].mxu0 }
 0xa3c   : > { %v8793_v28 = vpack.c.bf16 %v8771_v26, %v8768_v16  ;;  %v15894_v29 = vpop.f32.mrb[247].mxu0 }
 0xa3e   : > { %13335 = vmatmul.mubr.msk.bf16.gmra.mrb[244].mxu1 %vm335_vm1, %v8793_v28  ;;  %15970 = vmatmul.mubr.msk.bf16.gmra.mrb[64].mxu0 %vm335_vm1, %v8793_v28 }
 0xa3f   : > { %15975 = vmatprep.mubr.msk.bf16.mxu1 %vm16353_vm0, %v16352_v0  ;;  %10245 = vmatprep.mubr.bf16.mxu0 %v16354_v19 }
 0xa46   : > { %15976 = vmatmul.mubr.msk.bf16.vlgmr.msra.gmra.mrb[248].mxu1 %vm335_vm1, %v16289_v30 }
 0xa47   : > { %15979 = vmatprep.mubr.msk.bf16.mxu1 %vm16353_vm0, %v16352_v0  ;;  %16052 = vmatpush3.bf16.msra.mxu1 %v16290_v31 }
 0xa4e   : > { %15980 = vmatmul.mubr.msk.bf16.gmra.mrb[252].mxu1 %vm335_vm1, %v16291_v32 }
 0xa4f   : > { %15983 = vmatprep.mubr.msk.bf16.mxu1 %vm16353_vm0, %v16352_v0 }
 0xa56   : > { %15984 = vmatmul.mubr.msk.bf16.gmra.mrb[0].mxu1 %vm335_vm1, %v16292_v33 }
 0xa57   : > { %15987 = vmatprep.mubr.msk.bf16.mxu1 %vm16353_vm0, %v16352_v0 }
 0xa5e   : > { %15988 = vmatmul.mubr.msk.bf16.gmra.mrb[4].mxu1 %vm335_vm1, %v16293_v34 }
 0xa5f   : > { %15991 = vmatprep.mubr.msk.bf16.mxu1 %vm16353_vm0, %v16352_v0 }
 0xa66   : > { %15992 = vmatmul.mubr.msk.bf16.gmra.mrb[8].mxu1 %vm335_vm1, %v16294_v18 }
 0xa67   : > { %15995 = vmatprep.mubr.msk.bf16.mxu1 %vm16353_vm0, %v16352_v0 }
 0xa6e   : > { %15996 = vmatmul.mubr.msk.bf16.gmra.mrb[12].mxu1 %vm335_vm1, %v16295_v35 }
 0xa6f   : > { %15999 = vmatprep.mubr.msk.bf16.mxu1 %vm16353_vm0, %v16352_v0 }
 0xa76   : > { %16000 = vmatmul.mubr.msk.bf16.gmra.mrb[16].mxu1 %vm335_vm1, %v16296_v24 }
 0xa77   : > { %16003 = vmatprep.mubr.msk.bf16.mxu1 %vm16353_vm0, %v16352_v0 }
 0xa7e   : > { %16004 = vmatmul.mubr.msk.bf16.gmra.mrb[20].mxu1 %vm335_vm1, %v16297_v36 }
 0xa7f   : > { %16007 = vmatprep.mubr.msk.bf16.mxu1 %vm16353_vm0, %v16352_v0 }
 0xa81   : > { %v8885_v37 = vpop.f32.mrb[172].mxu1  ;;  %v9108_v38 = vpop.f32.mrb[248].mxu0 }
 0xa82   : > { %v13355_v39 = vadd.f32 -0.5, %v8885_v37  ;;  %v13357_v40 = vadd.f32 -0.5, %v9108_v38  ;;  %v8887_v4 = vpop.f32.mrb[173].mxu1  ;;  %v15899_v13 = vpop.f32.mrb[249].mxu0 }
 0xa83   : > { %v13356_v5 = vadd.f32 -0.5, %v8887_v4  ;;  %v8889_v6 = vpop.f32.mrb[174].mxu1  ;;  %v9111_v7 = vpop.f32.mrb[250].mxu0 }
 0xa84   : > { %v9373_v8 = vmul.f32 2.0, %v13355_v39  ;;  %v9375_v9 = vmul.f32 2.0, %v13357_v40  ;;  %v13358_v22 = vadd.f32 -0.5, %v8889_v6  ;;  %v13360_v15 = vadd.f32 -0.5, %v9111_v7  ;;  %v8891_v17 = vpop.f32.mrb[175].mxu1  ;;  %v15900_v41 = vpop.f32.mrb[251].mxu0 }
 0xa85   : > { %v9374_v10 = vmul.f32 2.0, %v13356_v5  ;;  %v13359_v42 = vadd.f32 -0.5, %v8891_v17 }
 0xa86   : > { %v14410_v43 = vpack.c.bf16 %v9375_v9, %v9375_v9  ;;  %v9376_v44 = vmul.f32 2.0, %v13358_v22  ;;  %v9378_v45 = vmul.f32 2.0, %v13360_v15  ;;  %16008 = vmatmul.mubr.msk.bf16.gmra.mrb[24].mxu1 %vm335_vm1, %v16298_v46  ;;  %v16300_v9 = vld [vmem:[%s19145_s0 + $0x50] sm:$0xff]  }
 0xa87   : > { %v14409_v11 = vpack.c.bf16 %v9374_v10, %v9373_v8  ;;  %v9377_v25 = vmul.f32 2.0, %v13359_v42  ;;  %16011 = vmatprep.mubr.msk.bf16.mxu1 %vm16353_vm0, %v16352_v0 }
 0xa88   : > { %13546 = vst.msk [vmem:[%s16753_s27 + $0xab8] sm:$0xf] %vm1687_vm2, %v14410_v43  ;;  %v14412_v20 = vpack.c.bf16 %v9378_v45, %v9378_v45 }
 0xa89   : > { %13545 = vst [vmem:[%s16753_s27 + $0xab0] sm:$0xff] %v14409_v11  ;;  %v14411_v47 = vpack.c.bf16 %v9377_v25, %v9376_v44  ;;  %v8895_v48 = vpop.f32.mrb[176].mxu1  ;;  %v9116_v49 = vpop.f32.mrb[252].mxu0 }
 0xa8a   : > { %13548 = vst.msk [vmem:[%s16753_s27 + $0xac4] sm:$0xf] %vm1687_vm2, %v14412_v20  ;;  %v13361_v50 = vadd.f32 -0.5, %v8895_v48  ;;  %v13363_v51 = vadd.f32 -0.5, %v9116_v49  ;;  %v8897_v52 = vpop.f32.mrb[177].mxu1  ;;  %v15903_v53 = vpop.f32.mrb[253].mxu0 }
 0xa8b   : > { %13547 = vst [vmem:[%s16753_s27 + $0xabc] sm:$0xff] %v14411_v47  ;;  %v13362_v54 = vadd.f32 -0.5, %v8897_v52  ;;  %v8899_v14 = vpop.f32.mrb[178].mxu1  ;;  %v9119_v55 = vpop.f32.mrb[254].mxu0 }
 0xa8c   : > { %v9379_v56 = vmul.f32 2.0, %v13361_v50  ;;  %v9381_v57 = vmul.f32 2.0, %v13363_v51  ;;  %v13364_v23 = vadd.f32 -0.5, %v8899_v14  ;;  %v13366_v58 = vadd.f32 -0.5, %v9119_v55  ;;  %v8901_v59 = vpop.f32.mrb[179].mxu1  ;;  %v15904_v60 = vpop.f32.mrb[255].mxu0 }
 0xa8d   : > { %v9380_v12 = vmul.f32 2.0, %v13362_v54  ;;  %v13365_v61 = vadd.f32 -0.5, %v8901_v59 }
 0xa8e   : > { %v14414_v62 = vpack.c.bf16 %v9381_v57, %v9381_v57  ;;  %v9382_v63 = vmul.f32 2.0, %v13364_v23  ;;  %v9384_v1 = vmul.f32 2.0, %v13366_v58  ;;  %16012 = vmatmul.mubr.msk.bf16.gmra.mrb[28].mxu1 %vm335_vm1, %v16299_v3  ;;  %v16301_v57 = vld [vmem:[%s19145_s0 + $0x58] sm:$0xff]  }
 0xa8f   : > { %v14413_v16 = vpack.c.bf16 %v9380_v12, %v9379_v56  ;;  %v9383_v21 = vmul.f32 2.0, %v13365_v61  ;;  %16015 = vmatprep.mubr.msk.bf16.mxu1 %vm16353_vm0, %v16352_v0 }
 0xa90   : > { %13550 = vst.msk [vmem:[%s16753_s27 + $0xad0] sm:$0xf] %vm1687_vm2, %v14414_v62  ;;  %v14416_v26 = vpack.c.bf16 %v9384_v1, %v9384_v1 }
 0xa91   : > { %13549 = vst [vmem:[%s16753_s27 + $0xac8] sm:$0xff] %v14413_v16  ;;  %v14415_v28 = vpack.c.bf16 %v9383_v21, %v9382_v63  ;;  %v8905_v29 = vpop.f32.mrb[180].mxu1  ;;  %v9124_v30 = vpop.f32.mrb[0].mxu0 }
 0xa92   : > { %13552 = vst.msk [vmem:[%s16753_s27 + $0xadc] sm:$0xf] %vm1687_vm2, %v14416_v26  ;;  %v13367_v31 = vadd.f32 -0.5, %v8905_v29  ;;  %v13369_v32 = vadd.f32 -0.5, %v9124_v30  ;;  %v8907_v33 = vpop.f32.mrb[181].mxu1  ;;  %v15907_v34 = vpop.f32.mrb[1].mxu0 }
 0xa93   : > { %13551 = vst [vmem:[%s16753_s27 + $0xad4] sm:$0xff] %v14415_v28  ;;  %v13368_v18 = vadd.f32 -0.5, %v8907_v33  ;;  %v8909_v35 = vpop.f32.mrb[182].mxu1  ;;  %v9127_v24 = vpop.f32.mrb[2].mxu0 }
 0xa94   : > { %v9385_v36 = vmul.f32 2.0, %v13367_v31  ;;  %v9387_v37 = vmul.f32 2.0, %v13369_v32  ;;  %v13370_v38 = vadd.f32 -0.5, %v8909_v35  ;;  %v13372_v39 = vadd.f32 -0.5, %v9127_v24  ;;  %v8911_v40 = vpop.f32.mrb[183].mxu1  ;;  %v15908_v4 = vpop.f32.mrb[3].mxu0 }
 0xa95   : > { %v9386_v13 = vmul.f32 2.0, %v13368_v18  ;;  %v13371_v5 = vadd.f32 -0.5, %v8911_v40 }
 0xa96   : > { %v14418_v6 = vpack.c.bf16 %v9387_v37, %v9387_v37  ;;  %v9388_v7 = vmul.f32 2.0, %v13370_v38  ;;  %v9390_v8 = vmul.f32 2.0, %v13372_v39  ;;  %16016 = vmatmul.mubr.msk.bf16.gmra.mrb[32].mxu1 %vm335_vm1, %v16300_v9  ;;  %v16302_v37 = vld [vmem:[%s19145_s0 + $0x60] sm:$0xff]  }
 0xa97   : > { %v14417_v22 = vpack.c.bf16 %v9386_v13, %v9385_v36  ;;  %v9389_v15 = vmul.f32 2.0, %v13371_v5  ;;  %16019 = vmatprep.mubr.msk.bf16.mxu1 %vm16353_vm0, %v16352_v0 }
 0xa98   : > { %13554 = vst.msk [vmem:[%s16753_s27 + $0xae8] sm:$0xf] %vm1687_vm2, %v14418_v6  ;;  %v14420_v17 = vpack.c.bf16 %v9390_v8, %v9390_v8 }
 0xa99   : > { %13553 = vst [vmem:[%s16753_s27 + $0xae0] sm:$0xff] %v14417_v22  ;;  %v14419_v41 = vpack.c.bf16 %v9389_v15, %v9388_v7  ;;  %v8915_v10 = vpop.f32.mrb[184].mxu1  ;;  %v9132_v42 = vpop.f32.mrb[4].mxu0 }
 0xa9a   : > { %13556 = vst.msk [vmem:[%s16753_s27 + $0xaf4] sm:$0xf] %vm1687_vm2, %v14420_v17  ;;  %v13373_v43 = vadd.f32 -0.5, %v8915_v10  ;;  %v13375_v44 = vadd.f32 -0.5, %v9132_v42  ;;  %v8917_v45 = vpop.f32.mrb[185].mxu1  ;;  %v15911_v46 = vpop.f32.mrb[5].mxu0 }
 0xa9b   : > { %13555 = vst [vmem:[%s16753_s27 + $0xaec] sm:$0xff] %v14419_v41  ;;  %v13374_v11 = vadd.f32 -0.5, %v8917_v45  ;;  %v8919_v25 = vpop.f32.mrb[186].mxu1  ;;  %v9135_v20 = vpop.f32.mrb[6].mxu0 }
 0xa9c   : > { %v9391_v47 = vmul.f32 2.0, %v13373_v43  ;;  %v9393_v48 = vmul.f32 2.0, %v13375_v44  ;;  %v13376_v49 = vadd.f32 -0.5, %v8919_v25  ;;  %v13378_v50 = vadd.f32 -0.5, %v9135_v20  ;;  %v8921_v51 = vpop.f32.mrb[187].mxu1  ;;  %v15912_v52 = vpop.f32.mrb[7].mxu0 }
 0xa9d   : > { %v9392_v53 = vmul.f32 2.0, %v13374_v11  ;;  %v13377_v54 = vadd.f32 -0.5, %v8921_v51 }
 0xa9e   : > { %v14422_v14 = vpack.c.bf16 %v9393_v48, %v9393_v48  ;;  %v9394_v55 = vmul.f32 2.0, %v13376_v49  ;;  %v9396_v56 = vmul.f32 2.0, %v13378_v50  ;;  %16020 = vmatmul.mubr.msk.bf16.gmra.mrb[36].mxu1 %vm335_vm1, %v16301_v57  ;;  %v16303_v48 = vld [vmem:[%s19145_s0 + $0x68] sm:$0xff]  }
 0xa9f   : > { %v14421_v23 = vpack.c.bf16 %v9392_v53, %v9391_v47  ;;  %v9395_v58 = vmul.f32 2.0, %v13377_v54  ;;  %16023 = vmatprep.mubr.msk.bf16.mxu1 %vm16353_vm0, %v16352_v0 }
 0xaa0   : > { %13558 = vst.msk [vmem:[%s16753_s27 + $0xb00] sm:$0xf] %vm1687_vm2, %v14422_v14  ;;  %v14424_v59 = vpack.c.bf16 %v9396_v56, %v9396_v56 }
 0xaa1   : > { %13557 = vst [vmem:[%s16753_s27 + $0xaf8] sm:$0xff] %v14421_v23  ;;  %v14423_v60 = vpack.c.bf16 %v9395_v58, %v9394_v55  ;;  %v8925_v12 = vpop.f32.mrb[188].mxu1  ;;  %v9140_v61 = vpop.f32.mrb[8].mxu0 }
 0xaa2   : > { %13560 = vst.msk [vmem:[%s16753_s27 + $0xb0c] sm:$0xf] %vm1687_vm2, %v14424_v59  ;;  %v13379_v62 = vadd.f32 -0.5, %v8925_v12  ;;  %v13381_v63 = vadd.f32 -0.5, %v9140_v61  ;;  %v8927_v1 = vpop.f32.mrb[189].mxu1  ;;  %v15915_v3 = vpop.f32.mrb[9].mxu0 }
 0xaa3   : > { %13559 = vst [vmem:[%s16753_s27 + $0xb04] sm:$0xff] %v14423_v60  ;;  %v13380_v16 = vadd.f32 -0.5, %v8927_v1  ;;  %v8929_v21 = vpop.f32.mrb[190].mxu1  ;;  %v9143_v26 = vpop.f32.mrb[10].mxu0 }
 0xaa4   : > { %v9397_v28 = vmul.f32 2.0, %v13379_v62  ;;  %v9399_v29 = vmul.f32 2.0, %v13381_v63  ;;  %v13382_v30 = vadd.f32 -0.5, %v8929_v21  ;;  %v13384_v31 = vadd.f32 -0.5, %v9143_v26  ;;  %v8931_v32 = vpop.f32.mrb[191].mxu1  ;;  %v15916_v33 = vpop.f32.mrb[11].mxu0 }
 0xaa5   : > { %v9398_v34 = vmul.f32 2.0, %v13380_v16  ;;  %v13383_v18 = vadd.f32 -0.5, %v8931_v32 }
 0xaa6   : > { %v14426_v35 = vpack.c.bf16 %v9399_v29, %v9399_v29  ;;  %v9400_v24 = vmul.f32 2.0, %v13382_v30  ;;  %v9402_v36 = vmul.f32 2.0, %v13384_v31  ;;  %16024 = vmatmul.mubr.msk.bf16.gmra.mrb[40].mxu1 %vm335_vm1, %v16302_v37  ;;  %v16304_v29 = vld [vmem:[%s19145_s0 + $0x70] sm:$0xff]  }
 0xaa7   : > { %v14425_v38 = vpack.c.bf16 %v9398_v34, %v9397_v28  ;;  %v9401_v39 = vmul.f32 2.0, %v13383_v18  ;;  %16027 = vmatprep.mubr.msk.bf16.mxu1 %vm16353_vm0, %v16352_v0 }
 0xaa8   : > { %13562 = vst.msk [vmem:[%s16753_s27 + $0xb18] sm:$0xf] %vm1687_vm2, %v14426_v35  ;;  %v14428_v40 = vpack.c.bf16 %v9402_v36, %v9402_v36 }
 0xaa9   : > { %13561 = vst [vmem:[%s16753_s27 + $0xb10] sm:$0xff] %v14425_v38  ;;  %v14427_v4 = vpack.c.bf16 %v9401_v39, %v9400_v24  ;;  %v8935_v13 = vpop.f32.mrb[192].mxu1  ;;  %v9148_v5 = vpop.f32.mrb[12].mxu0 }
 0xaaa   : > { %13564 = vst.msk [vmem:[%s16753_s27 + $0xb24] sm:$0xf] %vm1687_vm2, %v14428_v40  ;;  %v13385_v6 = vadd.f32 -0.5, %v8935_v13  ;;  %v13387_v7 = vadd.f32 -0.5, %v9148_v5  ;;  %v8937_v8 = vpop.f32.mrb[193].mxu1  ;;  %v15919_v9 = vpop.f32.mrb[13].mxu0 }
 0xaab   : > { %13563 = vst [vmem:[%s16753_s27 + $0xb1c] sm:$0xff] %v14427_v4  ;;  %v13386_v22 = vadd.f32 -0.5, %v8937_v8  ;;  %v8939_v15 = vpop.f32.mrb[194].mxu1  ;;  %v9151_v17 = vpop.f32.mrb[14].mxu0 }
 0xaac   : > { %v9403_v41 = vmul.f32 2.0, %v13385_v6  ;;  %v9405_v10 = vmul.f32 2.0, %v13387_v7  ;;  %v13388_v42 = vadd.f32 -0.5, %v8939_v15  ;;  %v13390_v43 = vadd.f32 -0.5, %v9151_v17  ;;  %v8941_v44 = vpop.f32.mrb[195].mxu1  ;;  %v15920_v45 = vpop.f32.mrb[15].mxu0 }
 0xaad   : > { %v9404_v46 = vmul.f32 2.0, %v13386_v22  ;;  %v13389_v11 = vadd.f32 -0.5, %v8941_v44 }
 0xaae   : > { %v14430_v25 = vpack.c.bf16 %v9405_v10, %v9405_v10  ;;  %v9406_v20 = vmul.f32 2.0, %v13388_v42  ;;  %v9408_v47 = vmul.f32 2.0, %v13390_v43  ;;  %16028 = vmatmul.mubr.msk.bf16.gmra.mrb[44].mxu1 %vm335_vm1, %v16303_v48  ;;  %v16305_v10 = vld [vmem:[%s19145_s0 + $0x78] sm:$0xff]  }
 0xaaf   : > { %v14429_v49 = vpack.c.bf16 %v9404_v46, %v9403_v41  ;;  %v9407_v50 = vmul.f32 2.0, %v13389_v11  ;;  %16031 = vmatprep.mubr.msk.bf16.mxu1 %vm16353_vm0, %v16352_v0 }
 0xab0   : > { %13566 = vst.msk [vmem:[%s16753_s27 + $0xb30] sm:$0xf] %vm1687_vm2, %v14430_v25  ;;  %v14432_v51 = vpack.c.bf16 %v9408_v47, %v9408_v47 }
 0xab1   : > { %13565 = vst [vmem:[%s16753_s27 + $0xb28] sm:$0xff] %v14429_v49  ;;  %v14431_v52 = vpack.c.bf16 %v9407_v50, %v9406_v20  ;;  %v8945_v53 = vpop.f32.mrb[196].mxu1  ;;  %v9156_v54 = vpop.f32.mrb[16].mxu0 }
 0xab2   : > { %13568 = vst.msk [vmem:[%s16753_s27 + $0xb3c] sm:$0xf] %vm1687_vm2, %v14432_v51  ;;  %v13391_v14 = vadd.f32 -0.5, %v8945_v53  ;;  %v13393_v55 = vadd.f32 -0.5, %v9156_v54  ;;  %v8947_v56 = vpop.f32.mrb[197].mxu1  ;;  %v15923_v57 = vpop.f32.mrb[17].mxu0 }
 0xab3   : > { %13567 = vst [vmem:[%s16753_s27 + $0xb34] sm:$0xff] %v14431_v52  ;;  %v13392_v23 = vadd.f32 -0.5, %v8947_v56  ;;  %v8949_v58 = vpop.f32.mrb[198].mxu1  ;;  %v9159_v59 = vpop.f32.mrb[18].mxu0 }
 0xab4   : > { %v9409_v60 = vmul.f32 2.0, %v13391_v14  ;;  %v9411_v12 = vmul.f32 2.0, %v13393_v55  ;;  %v13394_v61 = vadd.f32 -0.5, %v8949_v58  ;;  %v13396_v62 = vadd.f32 -0.5, %v9159_v59  ;;  %v8951_v63 = vpop.f32.mrb[199].mxu1  ;;  %v15924_v1 = vpop.f32.mrb[19].mxu0 }
 0xab5   : > { %v9410_v3 = vmul.f32 2.0, %v13392_v23  ;;  %v13395_v16 = vadd.f32 -0.5, %v8951_v63 }
 0xab6   : > { %v14434_v21 = vpack.c.bf16 %v9411_v12, %v9411_v12  ;;  %v9412_v26 = vmul.f32 2.0, %v13394_v61  ;;  %v9414_v28 = vmul.f32 2.0, %v13396_v62  ;;  %16032 = vmatmul.mubr.msk.bf16.gmra.mrb[48].mxu1 %vm335_vm1, %v16304_v29  ;;  %v16306_v12 = vld [vmem:[%s19145_s0 + $0x80] sm:$0xff]  }
 0xab7   : > { %v14433_v30 = vpack.c.bf16 %v9410_v3, %v9409_v60  ;;  %v9413_v31 = vmul.f32 2.0, %v13395_v16  ;;  %16035 = vmatprep.mubr.msk.bf16.mxu1 %vm16353_vm0, %v16352_v0 }
 0xab8   : > { %13570 = vst.msk [vmem:[%s16753_s27 + $0xb48] sm:$0xf] %vm1687_vm2, %v14434_v21  ;;  %v14436_v32 = vpack.c.bf16 %v9414_v28, %v9414_v28 }
 0xab9   : > { %13569 = vst [vmem:[%s16753_s27 + $0xb40] sm:$0xff] %v14433_v30  ;;  %v14435_v33 = vpack.c.bf16 %v9413_v31, %v9412_v26  ;;  %v8955_v34 = vpop.f32.mrb[200].mxu1  ;;  %v9164_v18 = vpop.f32.mrb[20].mxu0 }
 0xaba   : > { %13572 = vst.msk [vmem:[%s16753_s27 + $0xb54] sm:$0xf] %vm1687_vm2, %v14436_v32  ;;  %v13397_v35 = vadd.f32 -0.5, %v8955_v34  ;;  %v13399_v24 = vadd.f32 -0.5, %v9164_v18  ;;  %v8957_v36 = vpop.f32.mrb[201].mxu1  ;;  %v15927_v37 = vpop.f32.mrb[21].mxu0 }
 0xabb   : > { %13571 = vst [vmem:[%s16753_s27 + $0xb4c] sm:$0xff] %v14435_v33  ;;  %v13398_v38 = vadd.f32 -0.5, %v8957_v36  ;;  %v8959_v39 = vpop.f32.mrb[202].mxu1  ;;  %v9167_v40 = vpop.f32.mrb[22].mxu0 }
 0xabc   : > { %v9415_v4 = vmul.f32 2.0, %v13397_v35  ;;  %v9417_v13 = vmul.f32 2.0, %v13399_v24  ;;  %v13400_v5 = vadd.f32 -0.5, %v8959_v39  ;;  %v13402_v6 = vadd.f32 -0.5, %v9167_v40  ;;  %v8961_v7 = vpop.f32.mrb[203].mxu1  ;;  %v15928_v8 = vpop.f32.mrb[23].mxu0 }
 0xabd   : > { %v9416_v9 = vmul.f32 2.0, %v13398_v38  ;;  %v13401_v22 = vadd.f32 -0.5, %v8961_v7 }
 0xabe   : > { %v14438_v15 = vpack.c.bf16 %v9417_v13, %v9417_v13  ;;  %v9418_v17 = vmul.f32 2.0, %v13400_v5  ;;  %v9420_v41 = vmul.f32 2.0, %v13402_v6  ;;  %16036 = vmatmul.mubr.msk.bf16.gmra.mrb[52].mxu1 %vm335_vm1, %v16305_v10  ;;  %v16307_v13 = vld [vmem:[%s19145_s0 + $0x88] sm:$0xff]  }
 0xabf   : > { %v14437_v42 = vpack.c.bf16 %v9416_v9, %v9415_v4  ;;  %v9419_v43 = vmul.f32 2.0, %v13401_v22  ;;  %16039 = vmatprep.mubr.msk.bf16.mxu1 %vm16353_vm0, %v16352_v0 }
 0xac0   : > { %13574 = vst.msk [vmem:[%s16753_s27 + $0xb60] sm:$0xf] %vm1687_vm2, %v14438_v15  ;;  %v14440_v44 = vpack.c.bf16 %v9420_v41, %v9420_v41 }
 0xac1   : > { %13573 = vst [vmem:[%s16753_s27 + $0xb58] sm:$0xff] %v14437_v42  ;;  %v14439_v45 = vpack.c.bf16 %v9419_v43, %v9418_v17  ;;  %v8965_v46 = vpop.f32.mrb[204].mxu1  ;;  %v9172_v11 = vpop.f32.mrb[24].mxu0 }
 0xac2   : > { %13576 = vst.msk [vmem:[%s16753_s27 + $0xb6c] sm:$0xf] %vm1687_vm2, %v14440_v44  ;;  %v13403_v25 = vadd.f32 -0.5, %v8965_v46  ;;  %v13405_v20 = vadd.f32 -0.5, %v9172_v11  ;;  %v8967_v47 = vpop.f32.mrb[205].mxu1  ;;  %v15931_v48 = vpop.f32.mrb[25].mxu0 }
 0xac3   : > { %13575 = vst [vmem:[%s16753_s27 + $0xb64] sm:$0xff] %v14439_v45  ;;  %v13404_v49 = vadd.f32 -0.5, %v8967_v47  ;;  %v8969_v50 = vpop.f32.mrb[206].mxu1  ;;  %v9175_v51 = vpop.f32.mrb[26].mxu0 }
 0xac4   : > { %v9421_v52 = vmul.f32 2.0, %v13403_v25  ;;  %v9423_v53 = vmul.f32 2.0, %v13405_v20  ;;  %v13406_v54 = vadd.f32 -0.5, %v8969_v50  ;;  %v13408_v14 = vadd.f32 -0.5, %v9175_v51  ;;  %v8971_v55 = vpop.f32.mrb[207].mxu1  ;;  %v15932_v56 = vpop.f32.mrb[27].mxu0 }
 0xac5   : > { %v9422_v57 = vmul.f32 2.0, %v13404_v49  ;;  %v13407_v23 = vadd.f32 -0.5, %v8971_v55 }
 0xac6   : > { %v14442_v58 = vpack.c.bf16 %v9423_v53, %v9423_v53  ;;  %v9424_v59 = vmul.f32 2.0, %v13406_v54  ;;  %v9426_v60 = vmul.f32 2.0, %v13408_v14  ;;  %16040 = vmatmul.mubr.msk.bf16.gmra.mrb[56].mxu1 %vm335_vm1, %v16306_v12  ;;  %v16308_v53 = vld [vmem:[%s19145_s0 + $0x90] sm:$0x3f]  }
 0xac7   : > { %v14441_v61 = vpack.c.bf16 %v9422_v57, %v9421_v52  ;;  %v9425_v62 = vmul.f32 2.0, %v13407_v23  ;;  %16043 = vmatprep.mubr.msk.bf16.mxu1 %vm16353_vm0, %v16352_v0 }
 0xac8   : > { %13578 = vst.msk [vmem:[%s16753_s27 + $0xb78] sm:$0xf] %vm1687_vm2, %v14442_v58  ;;  %v14444_v63 = vpack.c.bf16 %v9426_v60, %v9426_v60 }
 0xac9   : > { %13577 = vst [vmem:[%s16753_s27 + $0xb70] sm:$0xff] %v14441_v61  ;;  %v14443_v1 = vpack.c.bf16 %v9425_v62, %v9424_v59  ;;  %v8975_v3 = vpop.f32.mrb[208].mxu1  ;;  %v9180_v16 = vpop.f32.mrb[28].mxu0 }
 0xaca   : > { %13580 = vst.msk [vmem:[%s16753_s27 + $0xb84] sm:$0xf] %vm1687_vm2, %v14444_v63  ;;  %v13409_v21 = vadd.f32 -0.5, %v8975_v3  ;;  %v13411_v26 = vadd.f32 -0.5, %v9180_v16  ;;  %v8977_v28 = vpop.f32.mrb[209].mxu1  ;;  %v15935_v29 = vpop.f32.mrb[29].mxu0 }
 0xacb   : > { %13579 = vst [vmem:[%s16753_s27 + $0xb7c] sm:$0xff] %v14443_v1  ;;  %v13410_v30 = vadd.f32 -0.5, %v8977_v28  ;;  %v8979_v31 = vpop.f32.mrb[210].mxu1  ;;  %v9183_v32 = vpop.f32.mrb[30].mxu0 }
 0xacc   : > { %v9427_v33 = vmul.f32 2.0, %v13409_v21  ;;  %v9429_v34 = vmul.f32 2.0, %v13411_v26  ;;  %v13412_v18 = vadd.f32 -0.5, %v8979_v31  ;;  %v13414_v35 = vadd.f32 -0.5, %v9183_v32  ;;  %v8981_v24 = vpop.f32.mrb[211].mxu1  ;;  %v15936_v36 = vpop.f32.mrb[31].mxu0 }
 0xacd   : > { %v9428_v37 = vmul.f32 2.0, %v13410_v30  ;;  %v13413_v38 = vadd.f32 -0.5, %v8981_v24 }
 0xace   : > { %v14446_v39 = vpack.c.bf16 %v9429_v34, %v9429_v34  ;;  %v9430_v40 = vmul.f32 2.0, %v13412_v18  ;;  %v9432_v4 = vmul.f32 2.0, %v13414_v35  ;;  %16044 = vmatmul.mubr.msk.bf16.gmra.mrb[60].mxu1 %vm335_vm1, %v16307_v13 }
 0xacf   : > { %v14445_v5 = vpack.c.bf16 %v9428_v37, %v9427_v33  ;;  %v9431_v6 = vmul.f32 2.0, %v13413_v38  ;;  %16047 = vmatprep.mubr.msk.bf16.mxu1 %vm16353_vm0, %v16352_v0 }
 0xad0   : > { %13582 = vst.msk [vmem:[%s16753_s27 + $0xb90] sm:$0xf] %vm1687_vm2, %v14446_v39  ;;  %v14448_v7 = vpack.c.bf16 %v9432_v4, %v9432_v4 }
 0xad1   : > { %13581 = vst [vmem:[%s16753_s27 + $0xb88] sm:$0xff] %v14445_v5  ;;  %v14447_v8 = vpack.c.bf16 %v9431_v6, %v9430_v40  ;;  %v8985_v9 = vpop.f32.mrb[212].mxu1  ;;  %v9188_v22 = vpop.f32.mrb[32].mxu0 }
 0xad2   : > { %13584 = vst.msk [vmem:[%s16753_s27 + $0xb9c] sm:$0xf] %vm1687_vm2, %v14448_v7  ;;  %v13415_v15 = vadd.f32 -0.5, %v8985_v9  ;;  %v13417_v17 = vadd.f32 -0.5, %v9188_v22  ;;  %v8987_v41 = vpop.f32.mrb[213].mxu1  ;;  %v15939_v10 = vpop.f32.mrb[33].mxu0 }
 0xad3   : > { %13583 = vst [vmem:[%s16753_s27 + $0xb94] sm:$0xff] %v14447_v8  ;;  %v13416_v42 = vadd.f32 -0.5, %v8987_v41  ;;  %v8989_v43 = vpop.f32.mrb[214].mxu1  ;;  %v9191_v44 = vpop.f32.mrb[34].mxu0 }
 0xad4   : > { %v9433_v45 = vmul.f32 2.0, %v13415_v15  ;;  %v9435_v46 = vmul.f32 2.0, %v13417_v17  ;;  %v13418_v11 = vadd.f32 -0.5, %v8989_v43  ;;  %v13420_v25 = vadd.f32 -0.5, %v9191_v44  ;;  %v8991_v20 = vpop.f32.mrb[215].mxu1  ;;  %v15940_v47 = vpop.f32.mrb[35].mxu0 }
 0xad5   : > { %v9434_v48 = vmul.f32 2.0, %v13416_v42  ;;  %v13419_v49 = vadd.f32 -0.5, %v8991_v20 }
 0xad6   : > { %v14450_v50 = vpack.c.bf16 %v9435_v46, %v9435_v46  ;;  %v9436_v51 = vmul.f32 2.0, %v13418_v11  ;;  %v9438_v52 = vmul.f32 2.0, %v13420_v25  ;;  %16048 = vmatmul.mubr.msk.bf16.gmra.mrb[64].mxu1 %vm335_vm1, %v16308_v53 }
 0xad7   : > { %v14449_v54 = vpack.c.bf16 %v9434_v48, %v9433_v45  ;;  %v9437_v14 = vmul.f32 2.0, %v13419_v49  ;;  %16053 = vmatprep.mubr.msk.bf16.mxu1 %vm16353_vm0, %v16352_v0 }
 0xad8   : > { %13586 = vst.msk [vmem:[%s16753_s27 + $0xba8] sm:$0xf] %vm1687_vm2, %v14450_v50  ;;  %v14452_v55 = vpack.c.bf16 %v9438_v52, %v9438_v52 }
 0xad9   : > { %13585 = vst [vmem:[%s16753_s27 + $0xba0] sm:$0xff] %v14449_v54  ;;  %v14451_v56 = vpack.c.bf16 %v9437_v14, %v9436_v51  ;;  %v8995_v57 = vpop.f32.mrb[216].mxu1  ;;  %v9196_v23 = vpop.f32.mrb[36].mxu0 }
 0xada   : > { %13588 = vst.msk [vmem:[%s16753_s27 + $0xbb4] sm:$0xf] %vm1687_vm2, %v14452_v55  ;;  %v13421_v58 = vadd.f32 -0.5, %v8995_v57  ;;  %v13423_v59 = vadd.f32 -0.5, %v9196_v23  ;;  %v8997_v60 = vpop.f32.mrb[217].mxu1  ;;  %v15943_v12 = vpop.f32.mrb[37].mxu0 }
 0xadb   : > { %13587 = vst [vmem:[%s16753_s27 + $0xbac] sm:$0xff] %v14451_v56  ;;  %v13422_v61 = vadd.f32 -0.5, %v8997_v60  ;;  %v8999_v62 = vpop.f32.mrb[218].mxu1  ;;  %v9199_v63 = vpop.f32.mrb[38].mxu0 }
 0xadc   : > { %v9439_v1 = vmul.f32 2.0, %v13421_v58  ;;  %v9441_v3 = vmul.f32 2.0, %v13423_v59  ;;  %v13424_v16 = vadd.f32 -0.5, %v8999_v62  ;;  %v13426_v21 = vadd.f32 -0.5, %v9199_v63  ;;  %v9001_v26 = vpop.f32.mrb[219].mxu1  ;;  %v15944_v28 = vpop.f32.mrb[39].mxu0 }
 0xadd   : > { %v9440_v29 = vmul.f32 2.0, %v13422_v61  ;;  %v13425_v30 = vadd.f32 -0.5, %v9001_v26 }
 0xade   : > { %v14454_v31 = vpack.c.bf16 %v9441_v3, %v9441_v3  ;;  %v9442_v32 = vmul.f32 2.0, %v13424_v16  ;;  %v9444_v33 = vmul.f32 2.0, %v13426_v21 }
 0xadf   : > { %v14453_v34 = vpack.c.bf16 %v9440_v29, %v9439_v1  ;;  %v9443_v18 = vmul.f32 2.0, %v13425_v30 }
 0xae0   : > { %13590 = vst.msk [vmem:[%s16753_s27 + $0xbc0] sm:$0xf] %vm1687_vm2, %v14454_v31  ;;  %v14456_v35 = vpack.c.bf16 %v9444_v33, %v9444_v33 }
 0xae1   : > { %13589 = vst [vmem:[%s16753_s27 + $0xbb8] sm:$0xff] %v14453_v34  ;;  %v14455_v24 = vpack.c.bf16 %v9443_v18, %v9442_v32  ;;  %v9005_v36 = vpop.f32.mrb[220].mxu1  ;;  %v9204_v37 = vpop.f32.mrb[40].mxu0 }
 0xae2   : > { %13592 = vst.msk [vmem:[%s16753_s27 + $0xbcc] sm:$0xf] %vm1687_vm2, %v14456_v35  ;;  %v13427_v38 = vadd.f32 -0.5, %v9005_v36  ;;  %v13429_v39 = vadd.f32 -0.5, %v9204_v37  ;;  %v9007_v40 = vpop.f32.mrb[221].mxu1  ;;  %v15947_v4 = vpop.f32.mrb[41].mxu0 }
 0xae3   : > { %13591 = vst [vmem:[%s16753_s27 + $0xbc4] sm:$0xff] %v14455_v24  ;;  %v13428_v13 = vadd.f32 -0.5, %v9007_v40  ;;  %v9009_v5 = vpop.f32.mrb[222].mxu1  ;;  %v9207_v6 = vpop.f32.mrb[42].mxu0 }
 0xae4   : > { %v9445_v7 = vmul.f32 2.0, %v13427_v38  ;;  %v9447_v8 = vmul.f32 2.0, %v13429_v39  ;;  %v13430_v9 = vadd.f32 -0.5, %v9009_v5  ;;  %v13432_v22 = vadd.f32 -0.5, %v9207_v6  ;;  %v9011_v15 = vpop.f32.mrb[223].mxu1  ;;  %v15948_v17 = vpop.f32.mrb[43].mxu0 }
 0xae5   : > { %v9446_v41 = vmul.f32 2.0, %v13428_v13  ;;  %v13431_v10 = vadd.f32 -0.5, %v9011_v15 }
 0xae6   : > { %v14458_v42 = vpack.c.bf16 %v9447_v8, %v9447_v8  ;;  %v9448_v43 = vmul.f32 2.0, %v13430_v9  ;;  %v9450_v44 = vmul.f32 2.0, %v13432_v22 }
 0xae7   : > { %v14457_v45 = vpack.c.bf16 %v9446_v41, %v9445_v7  ;;  %v9449_v46 = vmul.f32 2.0, %v13431_v10 }
 0xae8   : > { %13594 = vst.msk [vmem:[%s16753_s27 + $0xbd8] sm:$0xf] %vm1687_vm2, %v14458_v42  ;;  %v14460_v11 = vpack.c.bf16 %v9450_v44, %v9450_v44 }
 0xae9   : > { %13593 = vst [vmem:[%s16753_s27 + $0xbd0] sm:$0xff] %v14457_v45  ;;  %v14459_v25 = vpack.c.bf16 %v9449_v46, %v9448_v43  ;;  %v9015_v20 = vpop.f32.mrb[224].mxu1  ;;  %v9212_v47 = vpop.f32.mrb[44].mxu0 }
 0xaea   : > { %13596 = vst.msk [vmem:[%s16753_s27 + $0xbe4] sm:$0xf] %vm1687_vm2, %v14460_v11  ;;  %v13433_v48 = vadd.f32 -0.5, %v9015_v20  ;;  %v13435_v49 = vadd.f32 -0.5, %v9212_v47  ;;  %v9017_v50 = vpop.f32.mrb[225].mxu1  ;;  %v15951_v51 = vpop.f32.mrb[45].mxu0 }
 0xaeb   : > { %13595 = vst [vmem:[%s16753_s27 + $0xbdc] sm:$0xff] %v14459_v25  ;;  %v13434_v52 = vadd.f32 -0.5, %v9017_v50  ;;  %v9019_v53 = vpop.f32.mrb[226].mxu1  ;;  %v9215_v54 = vpop.f32.mrb[46].mxu0 }
 0xaec   : > { %v9451_v14 = vmul.f32 2.0, %v13433_v48  ;;  %v9453_v55 = vmul.f32 2.0, %v13435_v49  ;;  %v13436_v56 = vadd.f32 -0.5, %v9019_v53  ;;  %v13438_v57 = vadd.f32 -0.5, %v9215_v54  ;;  %v9021_v23 = vpop.f32.mrb[227].mxu1  ;;  %v15952_v58 = vpop.f32.mrb[47].mxu0 }
 0xaed   : > { %v9452_v59 = vmul.f32 2.0, %v13434_v52  ;;  %v13437_v60 = vadd.f32 -0.5, %v9021_v23 }
 0xaee   : > { %v14462_v12 = vpack.c.bf16 %v9453_v55, %v9453_v55  ;;  %v9454_v61 = vmul.f32 2.0, %v13436_v56  ;;  %v9456_v62 = vmul.f32 2.0, %v13438_v57 }
 0xaef   : > { %v14461_v63 = vpack.c.bf16 %v9452_v59, %v9451_v14  ;;  %v9455_v1 = vmul.f32 2.0, %v13437_v60 }
 0xaf0   : > { %13598 = vst.msk [vmem:[%s16753_s27 + $0xbf0] sm:$0xf] %vm1687_vm2, %v14462_v12  ;;  %v14464_v3 = vpack.c.bf16 %v9456_v62, %v9456_v62 }
 0xaf1   : > { %13597 = vst [vmem:[%s16753_s27 + $0xbe8] sm:$0xff] %v14461_v63  ;;  %v14463_v16 = vpack.c.bf16 %v9455_v1, %v9454_v61  ;;  %v9025_v21 = vpop.f32.mrb[228].mxu1  ;;  %v9220_v26 = vpop.f32.mrb[48].mxu0 }
 0xaf2   : > { %13600 = vst.msk [vmem:[%s16753_s27 + $0xbfc] sm:$0xf] %vm1687_vm2, %v14464_v3  ;;  %v13439_v28 = vadd.f32 -0.5, %v9025_v21  ;;  %v13441_v29 = vadd.f32 -0.5, %v9220_v26  ;;  %v9027_v30 = vpop.f32.mrb[229].mxu1  ;;  %v15955_v31 = vpop.f32.mrb[49].mxu0 }
 0xaf3   : > { %13599 = vst [vmem:[%s16753_s27 + $0xbf4] sm:$0xff] %v14463_v16  ;;  %v13440_v32 = vadd.f32 -0.5, %v9027_v30  ;;  %v9029_v33 = vpop.f32.mrb[230].mxu1  ;;  %v9223_v34 = vpop.f32.mrb[50].mxu0 }
 0xaf4   : > { %v9457_v18 = vmul.f32 2.0, %v13439_v28  ;;  %v9459_v35 = vmul.f32 2.0, %v13441_v29  ;;  %v13442_v24 = vadd.f32 -0.5, %v9029_v33  ;;  %v13444_v36 = vadd.f32 -0.5, %v9223_v34  ;;  %v9031_v37 = vpop.f32.mrb[231].mxu1  ;;  %v15956_v38 = vpop.f32.mrb[51].mxu0 }
 0xaf5   : > { %v9458_v39 = vmul.f32 2.0, %v13440_v32  ;;  %v13443_v40 = vadd.f32 -0.5, %v9031_v37 }
 0xaf6   : > { %v14466_v4 = vpack.c.bf16 %v9459_v35, %v9459_v35  ;;  %v9460_v13 = vmul.f32 2.0, %v13442_v24  ;;  %v9462_v5 = vmul.f32 2.0, %v13444_v36 }
 0xaf7   : > { %v14465_v6 = vpack.c.bf16 %v9458_v39, %v9457_v18  ;;  %v9461_v7 = vmul.f32 2.0, %v13443_v40 }
 0xaf8   : > { %13602 = vst.msk [vmem:[%s16753_s27 + $0xc08] sm:$0xf] %vm1687_vm2, %v14466_v4  ;;  %v14468_v8 = vpack.c.bf16 %v9462_v5, %v9462_v5 }
 0xaf9   : > { %13601 = vst [vmem:[%s16753_s27 + $0xc00] sm:$0xff] %v14465_v6  ;;  %v14467_v9 = vpack.c.bf16 %v9461_v7, %v9460_v13  ;;  %v9035_v22 = vpop.f32.mrb[232].mxu1  ;;  %v9228_v15 = vpop.f32.mrb[52].mxu0 }
 0xafa   : > { %13604 = vst.msk [vmem:[%s16753_s27 + $0xc14] sm:$0xf] %vm1687_vm2, %v14468_v8  ;;  %v13445_v17 = vadd.f32 -0.5, %v9035_v22  ;;  %v13447_v41 = vadd.f32 -0.5, %v9228_v15  ;;  %v9037_v10 = vpop.f32.mrb[233].mxu1  ;;  %v15959_v42 = vpop.f32.mrb[53].mxu0 }
 0xafb   : > { %13603 = vst [vmem:[%s16753_s27 + $0xc0c] sm:$0xff] %v14467_v9  ;;  %v13446_v43 = vadd.f32 -0.5, %v9037_v10  ;;  %v9039_v44 = vpop.f32.mrb[234].mxu1  ;;  %v9231_v45 = vpop.f32.mrb[54].mxu0 }
 0xafc   : > { %v9463_v46 = vmul.f32 2.0, %v13445_v17  ;;  %v9465_v11 = vmul.f32 2.0, %v13447_v41  ;;  %v13448_v25 = vadd.f32 -0.5, %v9039_v44  ;;  %v13450_v20 = vadd.f32 -0.5, %v9231_v45  ;;  %v9041_v47 = vpop.f32.mrb[235].mxu1  ;;  %v15960_v48 = vpop.f32.mrb[55].mxu0 }
 0xafd   : > { %v9464_v49 = vmul.f32 2.0, %v13446_v43  ;;  %v13449_v50 = vadd.f32 -0.5, %v9041_v47 }
 0xafe   : > { %v14470_v51 = vpack.c.bf16 %v9465_v11, %v9465_v11  ;;  %v9466_v52 = vmul.f32 2.0, %v13448_v25  ;;  %v9468_v53 = vmul.f32 2.0, %v13450_v20 }
 0xaff   : > { %v14469_v54 = vpack.c.bf16 %v9464_v49, %v9463_v46  ;;  %v9467_v14 = vmul.f32 2.0, %v13449_v50 }
 0xb00   : > { %13606 = vst.msk [vmem:[%s16753_s27 + $0xc20] sm:$0xf] %vm1687_vm2, %v14470_v51  ;;  %v14472_v55 = vpack.c.bf16 %v9468_v53, %v9468_v53 }
 0xb01   : > { %13605 = vst [vmem:[%s16753_s27 + $0xc18] sm:$0xff] %v14469_v54  ;;  %v14471_v56 = vpack.c.bf16 %v9467_v14, %v9466_v52  ;;  %v9045_v57 = vpop.f32.mrb[236].mxu1  ;;  %v9236_v23 = vpop.f32.mrb[56].mxu0 }
 0xb02   : > { %13608 = vst.msk [vmem:[%s16753_s27 + $0xc2c] sm:$0xf] %vm1687_vm2, %v14472_v55  ;;  %v13451_v58 = vadd.f32 -0.5, %v9045_v57  ;;  %v13453_v59 = vadd.f32 -0.5, %v9236_v23  ;;  %v9047_v60 = vpop.f32.mrb[237].mxu1  ;;  %v15963_v12 = vpop.f32.mrb[57].mxu0 }
 0xb03   : > { %13607 = vst [vmem:[%s16753_s27 + $0xc24] sm:$0xff] %v14471_v56  ;;  %v13452_v61 = vadd.f32 -0.5, %v9047_v60  ;;  %v9049_v62 = vpop.f32.mrb[238].mxu1  ;;  %v9239_v63 = vpop.f32.mrb[58].mxu0 }
 0xb04   : > { %v9469_v1 = vmul.f32 2.0, %v13451_v58  ;;  %v9471_v3 = vmul.f32 2.0, %v13453_v59  ;;  %v13454_v16 = vadd.f32 -0.5, %v9049_v62  ;;  %v13456_v21 = vadd.f32 -0.5, %v9239_v63  ;;  %v9051_v26 = vpop.f32.mrb[239].mxu1  ;;  %v15964_v28 = vpop.f32.mrb[59].mxu0 }
 0xb05   : > { %v9470_v29 = vmul.f32 2.0, %v13452_v61  ;;  %v13455_v30 = vadd.f32 -0.5, %v9051_v26 }
 0xb06   : > { %v14474_v31 = vpack.c.bf16 %v9471_v3, %v9471_v3  ;;  %v9472_v32 = vmul.f32 2.0, %v13454_v16  ;;  %v9474_v33 = vmul.f32 2.0, %v13456_v21  ;;  %v13619_v21 = vld [vmem:[%s16753_s27 + $0xc6c] sm:$0x33] }
 0xb07   : > { %v14473_v34 = vpack.c.bf16 %v9470_v29, %v9469_v1  ;;  %v9473_v18 = vmul.f32 2.0, %v13455_v30  ;;  %v13621_v1 = vld [vmem:[%s16753_s27 + $0xc74] sm:$0x3] }
 0xb08   : > { %13610 = vst.msk [vmem:[%s16753_s27 + $0xc38] sm:$0xf] %vm1687_vm2, %v14474_v31  ;;  %v14476_v35 = vpack.c.bf16 %v9474_v33, %v9474_v33 }
 0xb09   : > { %13609 = vst [vmem:[%s16753_s27 + $0xc30] sm:$0xff] %v14473_v34  ;;  %v14475_v24 = vpack.c.bf16 %v9473_v18, %v9472_v32  ;;  %v9055_v36 = vpop.f32.mrb[240].mxu1  ;;  %v9244_v37 = vpop.f32.mrb[60].mxu0 }
 0xb0a   : > { %13612 = vst.msk [vmem:[%s16753_s27 + $0xc44] sm:$0xf] %vm1687_vm2, %v14476_v35  ;;  %v13457_v38 = vadd.f32 -0.5, %v9055_v36  ;;  %v13459_v39 = vadd.f32 -0.5, %v9244_v37  ;;  %v9057_v40 = vpop.f32.mrb[241].mxu1  ;;  %v15967_v4 = vpop.f32.mrb[61].mxu0 }
 0xb0b   : > { %13611 = vst [vmem:[%s16753_s27 + $0xc3c] sm:$0xff] %v14475_v24  ;;  %v13458_v13 = vadd.f32 -0.5, %v9057_v40  ;;  %v9059_v5 = vpop.f32.mrb[242].mxu1  ;;  %v9247_v6 = vpop.f32.mrb[62].mxu0 }
 0xb0c   : > { %v9475_v7 = vmul.f32 2.0, %v13457_v38  ;;  %v9477_v8 = vmul.f32 2.0, %v13459_v39  ;;  %v13460_v9 = vadd.f32 -0.5, %v9059_v5  ;;  %v13462_v22 = vadd.f32 -0.5, %v9247_v6  ;;  %v9061_v15 = vpop.f32.mrb[243].mxu1  ;;  %v15968_v17 = vpop.f32.mrb[63].mxu0 }
 0xb0d   : > { %v9476_v41 = vmul.f32 2.0, %v13458_v13  ;;  %v13461_v10 = vadd.f32 -0.5, %v9061_v15 }
 0xb0e   : > { %v14478_v42 = vpack.c.bf16 %v9477_v8, %v9477_v8  ;;  %v9478_v43 = vmul.f32 2.0, %v13460_v9  ;;  %v9480_v44 = vmul.f32 2.0, %v13462_v22 }
 0xb0f   : > { %v14477_v45 = vpack.c.bf16 %v9476_v41, %v9475_v7  ;;  %v9479_v46 = vmul.f32 2.0, %v13461_v10 }
 0xb10   : > { %13614 = vst.msk [vmem:[%s16753_s27 + $0xc50] sm:$0xf] %vm1687_vm2, %v14478_v42  ;;  %v14480_v11 = vpack.c.bf16 %v9480_v44, %v9480_v44 }
 0xb11   : > { %13613 = vst [vmem:[%s16753_s27 + $0xc48] sm:$0xff] %v14477_v45  ;;  %v14479_v25 = vpack.c.bf16 %v9479_v46, %v9478_v43  ;;  %v9065_v20 = vpop.f32.mrb[244].mxu1  ;;  %v9252_v47 = vpop.f32.mrb[64].mxu0 }
 0xb12   : > { %13616 = vst.msk [vmem:[%s16753_s27 + $0xc5c] sm:$0xf] %vm1687_vm2, %v14480_v11  ;;  %v13463_v48 = vadd.f32 -0.5, %v9065_v20  ;;  %v13465_v49 = vadd.f32 -0.5, %v9252_v47  ;;  %v9067_v50 = vpop.f32.mrb[245].mxu1  ;;  %v15971_v51 = vpop.f32.mrb[65].mxu0 }
 0xb13   : > { %13615 = vst [vmem:[%s16753_s27 + $0xc54] sm:$0xff] %v14479_v25  ;;  %v13464_v52 = vadd.f32 -0.5, %v9067_v50  ;;  %v9069_v53 = vpop.f32.mrb[246].mxu1  ;;  %v9255_v54 = vpop.f32.mrb[66].mxu0 }
 0xb14   : > { %v9481_v14 = vmul.f32 2.0, %v13463_v48  ;;  %v9483_v55 = vmul.f32 2.0, %v13465_v49  ;;  %v13466_v56 = vadd.f32 -0.5, %v9069_v53  ;;  %v13468_v57 = vadd.f32 -0.5, %v9255_v54  ;;  %v9071_v23 = vpop.f32.mrb[247].mxu1  ;;  %v15972_v58 = vpop.f32.mrb[67].mxu0 }
 0xb15   : > { %v9482_v59 = vmul.f32 2.0, %v13464_v52  ;;  %v13467_v60 = vadd.f32 -0.5, %v9071_v23 }
 0xb16   : > { %v14482_v12 = vpack.c.bf16 %v9483_v55, %v9483_v55  ;;  %v9484_v61 = vmul.f32 2.0, %v13466_v56  ;;  %v9486_v62 = vmul.f32 2.0, %v13468_v57 }
 0xb17   : > { %v14481_v63 = vpack.c.bf16 %v9482_v59, %v9481_v14  ;;  %v9485_v3 = vmul.f32 2.0, %v13467_v60 }
 0xb18   : > { %13618 = vst.msk [vmem:[%s16753_s27 + $0xc68] sm:$0xf] %vm1687_vm2, %v14482_v12  ;;  %v14484_v16 = vpack.c.bf16 %v9486_v62, %v9486_v62 }
 0xb19   : > { %13617 = vst [vmem:[%s16753_s27 + $0xc60] sm:$0xff] %v14481_v63  ;;  %v14483_v26 = vpack.c.bf16 %v9485_v3, %v9484_v61  ;;  %v9986_v28 = vpop.f32.mrb[248].mxu1 }
 0xb1a   : > { %v9946_v29 = vsel %vm16919_vm10, %v14484_v16, %v13621_v1  ;;  %v15977_v30 = vpop.f32.mrb[249].mxu1 }
 0xb1b   : > { %13622 = vst [vmem:[%s16753_s27 + $0xc74] sm:$0x3] %v9946_v29  ;;  %v9943_v31 = vsel %vm16929_vm11, %v14483_v26, %v13619_v21  ;;  %v9989_v32 = vpop.f32.mrb[250].mxu1 }
 0xb1c   : > { %13620 = vst [vmem:[%s16753_s27 + $0xc6c] sm:$0x33] %v9943_v31  ;;  %v10137_v33 = vpack.c.bf16 %v9989_v32, %v9986_v28  ;;  %v15978_v34 = vpop.f32.mrb[251].mxu1 }
 0xb1e   : > { %13644 = vmatmul.mubr.msk.bf16.vlgmr.msra.gmra.mrb[68].mxu0 %vm335_vm1, %v10137_v33  ;;  %16054 = vmatmul.mubr.msk.bf16.vlgmr.msra.gmra.mrb[68].mxu1 %vm335_vm1, %v10137_v33 }
 0xb1f   : > { %10255 = vmatprep.mubr.bf16.mxu0 %v16354_v19  ;;  %16057 = vmatprep.mubr.msk.bf16.mxu1 %vm16353_vm0, %v16352_v0 }
 0xb21   : > { %v9994_v18 = vpop.f32.mrb[252].mxu1 }
 0xb22   : > { %v15981_v35 = vpop.f32.mrb[253].mxu1 }
 0xb23   : > { %v9997_v24 = vpop.f32.mrb[254].mxu1 }
 0xb24   : > { %v10138_v36 = vpack.c.bf16 %v9997_v24, %v9994_v18  ;;  %v15982_v37 = vpop.f32.mrb[255].mxu1 }
 0xb26   : > { %13645 = vmatmul.mubr.msk.bf16.gmra.mrb[72].mxu0 %vm335_vm1, %v10138_v36  ;;  %16058 = vmatmul.mubr.msk.bf16.gmra.mrb[72].mxu1 %vm335_vm1, %v10138_v36 }
 0xb27   : > { %10265 = vmatprep.mubr.bf16.mxu0 %v16354_v19  ;;  %16061 = vmatprep.mubr.msk.bf16.mxu1 %vm16353_vm0, %v16352_v0 }
 0xb29   : > { %v10002_v38 = vpop.f32.mrb[0].mxu1 }
 0xb2a   : > { %v15985_v39 = vpop.f32.mrb[1].mxu1 }
 0xb2b   : > { %v10005_v40 = vpop.f32.mrb[2].mxu1 }
 0xb2c   : > { %v10139_v4 = vpack.c.bf16 %v10005_v40, %v10002_v38  ;;  %v15986_v13 = vpop.f32.mrb[3].mxu1 }
 0xb2e   : > { %13646 = vmatmul.mubr.msk.bf16.gmra.mrb[76].mxu0 %vm335_vm1, %v10139_v4  ;;  %16062 = vmatmul.mubr.msk.bf16.gmra.mrb[76].mxu1 %vm335_vm1, %v10139_v4 }
 0xb2f   : > { %10275 = vmatprep.mubr.bf16.mxu0 %v16354_v19  ;;  %16065 = vmatprep.mubr.msk.bf16.mxu1 %vm16353_vm0, %v16352_v0 }
 0xb31   : > { %v10010_v5 = vpop.f32.mrb[4].mxu1 }
 0xb32   : > { %v15989_v6 = vpop.f32.mrb[5].mxu1 }
 0xb33   : > { %v10013_v7 = vpop.f32.mrb[6].mxu1 }
 0xb34   : > { %v10140_v8 = vpack.c.bf16 %v10013_v7, %v10010_v5  ;;  %v15990_v9 = vpop.f32.mrb[7].mxu1 }
 0xb36   : > { %13647 = vmatmul.mubr.msk.bf16.gmra.mrb[80].mxu0 %vm335_vm1, %v10140_v8  ;;  %16066 = vmatmul.mubr.msk.bf16.gmra.mrb[80].mxu1 %vm335_vm1, %v10140_v8 }
 0xb37   : > { %10285 = vmatprep.mubr.bf16.mxu0 %v16354_v19  ;;  %16069 = vmatprep.mubr.msk.bf16.mxu1 %vm16353_vm0, %v16352_v0 }
 0xb39   : > { %v10018_v22 = vpop.f32.mrb[8].mxu1 }
 0xb3a   : > { %v15993_v15 = vpop.f32.mrb[9].mxu1 }
 0xb3b   : > { %v10021_v17 = vpop.f32.mrb[10].mxu1 }
 0xb3c   : > { %v10141_v41 = vpack.c.bf16 %v10021_v17, %v10018_v22  ;;  %v15994_v10 = vpop.f32.mrb[11].mxu1 }
 0xb3e   : > { %13648 = vmatmul.mubr.msk.bf16.gmra.mrb[84].mxu0 %vm335_vm1, %v10141_v41  ;;  %16070 = vmatmul.mubr.msk.bf16.gmra.mrb[84].mxu1 %vm335_vm1, %v10141_v41 }
 0xb3f   : > { %10295 = vmatprep.mubr.bf16.mxu0 %v16354_v19  ;;  %16073 = vmatprep.mubr.msk.bf16.mxu1 %vm16353_vm0, %v16352_v0 }
 0xb41   : > { %v10026_v42 = vpop.f32.mrb[12].mxu1 }
 0xb42   : > { %v15997_v43 = vpop.f32.mrb[13].mxu1 }
 0xb43   : > { %v10029_v44 = vpop.f32.mrb[14].mxu1 }
 0xb44   : > { %v10142_v45 = vpack.c.bf16 %v10029_v44, %v10026_v42  ;;  %v15998_v46 = vpop.f32.mrb[15].mxu1 }
 0xb46   : > { %13649 = vmatmul.mubr.msk.bf16.gmra.mrb[88].mxu0 %vm335_vm1, %v10142_v45  ;;  %16074 = vmatmul.mubr.msk.bf16.gmra.mrb[88].mxu1 %vm335_vm1, %v10142_v45 }
 0xb47   : > { %10305 = vmatprep.mubr.bf16.mxu0 %v16354_v19  ;;  %16077 = vmatprep.mubr.msk.bf16.mxu1 %vm16353_vm0, %v16352_v0 }
 0xb49   : > { %v10034_v11 = vpop.f32.mrb[16].mxu1 }
 0xb4a   : > { %v16001_v25 = vpop.f32.mrb[17].mxu1 }
 0xb4b   : > { %v10037_v20 = vpop.f32.mrb[18].mxu1 }
 0xb4c   : > { %v10143_v47 = vpack.c.bf16 %v10037_v20, %v10034_v11  ;;  %v16002_v48 = vpop.f32.mrb[19].mxu1 }
 0xb4e   : > { %13650 = vmatmul.mubr.msk.bf16.gmra.mrb[92].mxu0 %vm335_vm1, %v10143_v47  ;;  %16078 = vmatmul.mubr.msk.bf16.gmra.mrb[92].mxu1 %vm335_vm1, %v10143_v47 }
 0xb4f   : > { %10315 = vmatprep.mubr.bf16.mxu0 %v16354_v19  ;;  %16081 = vmatprep.mubr.msk.bf16.mxu1 %vm16353_vm0, %v16352_v0 }
 0xb51   : > { %v10042_v49 = vpop.f32.mrb[20].mxu1 }
 0xb52   : > { %v16005_v50 = vpop.f32.mrb[21].mxu1 }
 0xb53   : > { %v10045_v51 = vpop.f32.mrb[22].mxu1 }
 0xb54   : > { %v10144_v52 = vpack.c.bf16 %v10045_v51, %v10042_v49  ;;  %v16006_v53 = vpop.f32.mrb[23].mxu1 }
 0xb56   : > { %13651 = vmatmul.mubr.msk.bf16.gmra.mrb[96].mxu0 %vm335_vm1, %v10144_v52  ;;  %16082 = vmatmul.mubr.msk.bf16.gmra.mrb[96].mxu1 %vm335_vm1, %v10144_v52 }
 0xb57   : > { %10325 = vmatprep.mubr.bf16.mxu0 %v16354_v19  ;;  %16085 = vmatprep.mubr.msk.bf16.mxu1 %vm16353_vm0, %v16352_v0 }
 0xb59   : > { %v10050_v54 = vpop.f32.mrb[24].mxu1 }
 0xb5a   : > { %v16009_v14 = vpop.f32.mrb[25].mxu1 }
 0xb5b   : > { %v10053_v55 = vpop.f32.mrb[26].mxu1 }
 0xb5c   : > { %v10145_v56 = vpack.c.bf16 %v10053_v55, %v10050_v54  ;;  %v16010_v57 = vpop.f32.mrb[27].mxu1 }
 0xb5e   : > { %13652 = vmatmul.mubr.msk.bf16.gmra.mrb[100].mxu0 %vm335_vm1, %v10145_v56  ;;  %16086 = vmatmul.mubr.msk.bf16.gmra.mrb[100].mxu1 %vm335_vm1, %v10145_v56 }
 0xb5f   : > { %10335 = vmatprep.mubr.bf16.mxu0 %v16354_v19  ;;  %16089 = vmatprep.mubr.msk.bf16.mxu1 %vm16353_vm0, %v16352_v0 }
 0xb61   : > { %v10058_v23 = vpop.f32.mrb[28].mxu1 }
 0xb62   : > { %v16013_v58 = vpop.f32.mrb[29].mxu1 }
 0xb63   : > { %v10061_v59 = vpop.f32.mrb[30].mxu1 }
 0xb64   : > { %v10146_v60 = vpack.c.bf16 %v10061_v59, %v10058_v23  ;;  %v16014_v12 = vpop.f32.mrb[31].mxu1 }
 0xb66   : > { %13653 = vmatmul.mubr.msk.bf16.gmra.mrb[104].mxu0 %vm335_vm1, %v10146_v60  ;;  %16090 = vmatmul.mubr.msk.bf16.gmra.mrb[104].mxu1 %vm335_vm1, %v10146_v60 }
 0xb67   : > { %10345 = vmatprep.mubr.bf16.mxu0 %v16354_v19  ;;  %16093 = vmatprep.mubr.msk.bf16.mxu1 %vm16353_vm0, %v16352_v0 }
 0xb69   : > { %v10066_v61 = vpop.f32.mrb[32].mxu1 }
 0xb6a   : > { %v16017_v62 = vpop.f32.mrb[33].mxu1 }
 0xb6b   : > { %v10069_v63 = vpop.f32.mrb[34].mxu1 }
 0xb6c   : > { %v10147_v1 = vpack.c.bf16 %v10069_v63, %v10066_v61  ;;  %v16018_v3 = vpop.f32.mrb[35].mxu1 }
 0xb6e   : > { %13654 = vmatmul.mubr.msk.bf16.gmra.mrb[108].mxu0 %vm335_vm1, %v10147_v1  ;;  %16094 = vmatmul.mubr.msk.bf16.gmra.mrb[108].mxu1 %vm335_vm1, %v10147_v1 }
 0xb6f   : > { %10355 = vmatprep.mubr.bf16.mxu0 %v16354_v19  ;;  %16097 = vmatprep.mubr.msk.bf16.mxu1 %vm16353_vm0, %v16352_v0 }
 0xb71   : > { %v10074_v16 = vpop.f32.mrb[36].mxu1 }
 0xb72   : > { %v16021_v21 = vpop.f32.mrb[37].mxu1 }
 0xb73   : > { %v10077_v26 = vpop.f32.mrb[38].mxu1 }
 0xb74   : > { %v10148_v28 = vpack.c.bf16 %v10077_v26, %v10074_v16  ;;  %v16022_v29 = vpop.f32.mrb[39].mxu1 }
 0xb76   : > { %13655 = vmatmul.mubr.msk.bf16.gmra.mrb[112].mxu0 %vm335_vm1, %v10148_v28  ;;  %16098 = vmatmul.mubr.msk.bf16.gmra.mrb[112].mxu1 %vm335_vm1, %v10148_v28 }
 0xb77   : > { %10365 = vmatprep.mubr.bf16.mxu0 %v16354_v19  ;;  %16101 = vmatprep.mubr.msk.bf16.mxu1 %vm16353_vm0, %v16352_v0 }
 0xb79   : > { %v10082_v30 = vpop.f32.mrb[40].mxu1 }
 0xb7a   : > { %v16025_v31 = vpop.f32.mrb[41].mxu1 }
 0xb7b   : > { %v10085_v32 = vpop.f32.mrb[42].mxu1 }
 0xb7c   : > { %v10149_v33 = vpack.c.bf16 %v10085_v32, %v10082_v30  ;;  %v16026_v34 = vpop.f32.mrb[43].mxu1 }
 0xb7e   : > { %13656 = vmatmul.mubr.msk.bf16.gmra.mrb[116].mxu0 %vm335_vm1, %v10149_v33  ;;  %16102 = vmatmul.mubr.msk.bf16.gmra.mrb[116].mxu1 %vm335_vm1, %v10149_v33 }
 0xb7f   : > { %10375 = vmatprep.mubr.bf16.mxu0 %v16354_v19  ;;  %16105 = vmatprep.mubr.msk.bf16.mxu1 %vm16353_vm0, %v16352_v0 }
 0xb81   : > { %v10090_v18 = vpop.f32.mrb[44].mxu1 }
 0xb82   : > { %v16029_v35 = vpop.f32.mrb[45].mxu1 }
 0xb83   : > { %v10093_v24 = vpop.f32.mrb[46].mxu1 }
 0xb84   : > { %v10150_v36 = vpack.c.bf16 %v10093_v24, %v10090_v18  ;;  %v16030_v37 = vpop.f32.mrb[47].mxu1 }
 0xb86   : > { %13657 = vmatmul.mubr.msk.bf16.gmra.mrb[120].mxu0 %vm335_vm1, %v10150_v36  ;;  %16106 = vmatmul.mubr.msk.bf16.gmra.mrb[120].mxu1 %vm335_vm1, %v10150_v36 }
 0xb87   : > { %10385 = vmatprep.mubr.bf16.mxu0 %v16354_v19  ;;  %16109 = vmatprep.mubr.msk.bf16.mxu1 %vm16353_vm0, %v16352_v0 }
 0xb89   : > { %v10098_v38 = vpop.f32.mrb[48].mxu1 }
 0xb8a   : > { %v16033_v39 = vpop.f32.mrb[49].mxu1 }
 0xb8b   : > { %v10101_v40 = vpop.f32.mrb[50].mxu1 }
 0xb8c   : > { %v10151_v4 = vpack.c.bf16 %v10101_v40, %v10098_v38  ;;  %v16034_v13 = vpop.f32.mrb[51].mxu1 }
 0xb8e   : > { %13658 = vmatmul.mubr.msk.bf16.gmra.mrb[124].mxu0 %vm335_vm1, %v10151_v4  ;;  %16110 = vmatmul.mubr.msk.bf16.gmra.mrb[124].mxu1 %vm335_vm1, %v10151_v4 }
 0xb8f   : > { %10395 = vmatprep.mubr.bf16.mxu0 %v16354_v19  ;;  %16113 = vmatprep.mubr.msk.bf16.mxu1 %vm16353_vm0, %v16352_v0 }
 0xb91   : > { %v10106_v5 = vpop.f32.mrb[52].mxu1 }
 0xb92   : > { %v16037_v6 = vpop.f32.mrb[53].mxu1 }
 0xb93   : > { %v10109_v7 = vpop.f32.mrb[54].mxu1 }
 0xb94   : > { %v10152_v8 = vpack.c.bf16 %v10109_v7, %v10106_v5  ;;  %v16038_v9 = vpop.f32.mrb[55].mxu1 }
 0xb96   : > { %13659 = vmatmul.mubr.msk.bf16.gmra.mrb[128].mxu0 %vm335_vm1, %v10152_v8  ;;  %16114 = vmatmul.mubr.msk.bf16.gmra.mrb[128].mxu1 %vm335_vm1, %v10152_v8 }
 0xb97   : > { %10405 = vmatprep.mubr.bf16.mxu0 %v16354_v19  ;;  %16117 = vmatprep.mubr.msk.bf16.mxu1 %vm16353_vm0, %v16352_v0 }
 0xb99   : > { %v10114_v22 = vpop.f32.mrb[56].mxu1 }
 0xb9a   : > { %v16041_v15 = vpop.f32.mrb[57].mxu1 }
 0xb9b   : > { %v10117_v17 = vpop.f32.mrb[58].mxu1 }
 0xb9c   : > { %v10153_v41 = vpack.c.bf16 %v10117_v17, %v10114_v22  ;;  %v16042_v10 = vpop.f32.mrb[59].mxu1 }
 0xb9e   : > { %13660 = vmatmul.mubr.msk.bf16.gmra.mrb[132].mxu0 %vm335_vm1, %v10153_v41  ;;  %16118 = vmatmul.mubr.msk.bf16.gmra.mrb[132].mxu1 %vm335_vm1, %v10153_v41 }
 0xb9f   : > { %10415 = vmatprep.mubr.bf16.mxu0 %v16354_v19  ;;  %16121 = vmatprep.mubr.msk.bf16.mxu1 %vm16353_vm0, %v16352_v0 }
 0xba1   : > { %v10122_v42 = vpop.f32.mrb[60].mxu1 }
 0xba2   : > { %v16045_v43 = vpop.f32.mrb[61].mxu1 }
 0xba3   : > { %v10125_v44 = vpop.f32.mrb[62].mxu1 }
 0xba4   : > { %v10154_v45 = vpack.c.bf16 %v10125_v44, %v10122_v42  ;;  %v16046_v46 = vpop.f32.mrb[63].mxu1 }
 0xba6   : > { %13661 = vmatmul.mubr.msk.bf16.gmra.mrb[136].mxu0 %vm335_vm1, %v10154_v45  ;;  %16122 = vmatmul.mubr.msk.bf16.gmra.mrb[136].mxu1 %vm335_vm1, %v10154_v45 }
 0xba7   : > { %10425 = vmatprep.mubr.bf16.mxu0 %v16354_v19  ;;  %16125 = vmatprep.mubr.msk.bf16.mxu1 %vm16353_vm0, %v16352_v0 }
 0xba9   : > { %v10130_v11 = vpop.f32.mrb[64].mxu1 }
 0xbaa   : > { %v16049_v25 = vpop.f32.mrb[65].mxu1 }
 0xbab   : > { %v10133_v20 = vpop.f32.mrb[66].mxu1 }
 0xbac   : > { %v10155_v47 = vpack.c.bf16 %v10133_v20, %v10130_v11  ;;  %v16050_v48 = vpop.f32.mrb[67].mxu1 }
 0xbae   : > { %13662 = vmatmul.mubr.msk.bf16.gmra.mrb[140].mxu0 %vm335_vm1, %v10155_v47  ;;  %16126 = vmatmul.mubr.msk.bf16.gmra.mrb[140].mxu1 %vm335_vm1, %v10155_v47 }
 0xbf1   : > { %v10247_v49 = vpop.f32.mrb[68].mxu0  ;;  %v10470_v50 = vpop.f32.mrb[68].mxu1 }
 0xbf2   : > { %v13682_v51 = vadd.f32 -0.5, %v10247_v49  ;;  %v13684_v52 = vadd.f32 -0.5, %v10470_v50  ;;  %v10249_v53 = vpop.f32.mrb[69].mxu0  ;;  %v16055_v54 = vpop.f32.mrb[69].mxu1 }
 0xbf3   : > { %v13683_v14 = vadd.f32 -0.5, %v10249_v53  ;;  %v10251_v19 = vpop.f32.mrb[70].mxu0  ;;  %v10473_v55 = vpop.f32.mrb[70].mxu1 }
 0xbf4   : > { %v10735_v0 = vmul.f32 2.0, %v13682_v51  ;;  %v10737_v56 = vmul.f32 2.0, %v13684_v52  ;;  %v13685_v57 = vadd.f32 -0.5, %v10251_v19  ;;  %v13687_v23 = vadd.f32 -0.5, %v10473_v55  ;;  %v10253_v58 = vpop.f32.mrb[71].mxu0  ;;  %v16056_v59 = vpop.f32.mrb[71].mxu1 }
 0xbf5   : > { %v10736_v60 = vmul.f32 2.0, %v13683_v14  ;;  %v13686_v12 = vadd.f32 -0.5, %v10253_v58 }
 0xbf6   : > { %v14486_v61 = vpack.c.bf16 %v10737_v56, %v10737_v56  ;;  %v10738_v62 = vmul.f32 2.0, %v13685_v57  ;;  %v10740_v63 = vmul.f32 2.0, %v13687_v23 }
 0xbf7   : > { %v14485_v1 = vpack.c.bf16 %v10736_v60, %v10735_v0  ;;  %v10739_v3 = vmul.f32 2.0, %v13686_v12 }
 0xbf8   : > { %13873 = vst.msk [vmem:[%s16753_s27 + $0xc80] sm:$0xf] %vm1687_vm2, %v14486_v61  ;;  %v14488_v16 = vpack.c.bf16 %v10740_v63, %v10740_v63 }
 0xbf9   : > { %13872 = vst [vmem:[%s16753_s27 + $0xc78] sm:$0xff] %v14485_v1  ;;  %v14487_v21 = vpack.c.bf16 %v10739_v3, %v10738_v62  ;;  %v10257_v26 = vpop.f32.mrb[72].mxu0  ;;  %v10478_v28 = vpop.f32.mrb[72].mxu1 }
 0xbfa   : > { %13875 = vst.msk [vmem:[%s16753_s27 + $0xc8c] sm:$0xf] %vm1687_vm2, %v14488_v16  ;;  %v13688_v29 = vadd.f32 -0.5, %v10257_v26  ;;  %v13690_v30 = vadd.f32 -0.5, %v10478_v28  ;;  %v10259_v31 = vpop.f32.mrb[73].mxu0  ;;  %v16059_v32 = vpop.f32.mrb[73].mxu1 }
 0xbfb   : > { %13874 = vst [vmem:[%s16753_s27 + $0xc84] sm:$0xff] %v14487_v21  ;;  %v13689_v33 = vadd.f32 -0.5, %v10259_v31  ;;  %v10261_v34 = vpop.f32.mrb[74].mxu0  ;;  %v10481_v18 = vpop.f32.mrb[74].mxu1 }
 0xbfc   : > { %v10741_v35 = vmul.f32 2.0, %v13688_v29  ;;  %v10743_v24 = vmul.f32 2.0, %v13690_v30  ;;  %v13691_v36 = vadd.f32 -0.5, %v10261_v34  ;;  %v13693_v37 = vadd.f32 -0.5, %v10481_v18  ;;  %v10263_v38 = vpop.f32.mrb[75].mxu0  ;;  %v16060_v39 = vpop.f32.mrb[75].mxu1 }
 0xbfd   : > { %v10742_v40 = vmul.f32 2.0, %v13689_v33  ;;  %v13692_v4 = vadd.f32 -0.5, %v10263_v38 }
 0xbfe   : > { %v14490_v13 = vpack.c.bf16 %v10743_v24, %v10743_v24  ;;  %v10744_v5 = vmul.f32 2.0, %v13691_v36  ;;  %v10746_v6 = vmul.f32 2.0, %v13693_v37 }
 0xbff   : > { %v14489_v7 = vpack.c.bf16 %v10742_v40, %v10741_v35  ;;  %v10745_v8 = vmul.f32 2.0, %v13692_v4 }
 0xc00   : > { %13877 = vst.msk [vmem:[%s16753_s27 + $0xc98] sm:$0xf] %vm1687_vm2, %v14490_v13  ;;  %v14492_v9 = vpack.c.bf16 %v10746_v6, %v10746_v6 }
 0xc01   : > { %13876 = vst [vmem:[%s16753_s27 + $0xc90] sm:$0xff] %v14489_v7  ;;  %v14491_v22 = vpack.c.bf16 %v10745_v8, %v10744_v5  ;;  %v10267_v15 = vpop.f32.mrb[76].mxu0  ;;  %v10486_v17 = vpop.f32.mrb[76].mxu1 }
 0xc02   : > { %13879 = vst.msk [vmem:[%s16753_s27 + $0xca4] sm:$0xf] %vm1687_vm2, %v14492_v9  ;;  %v13694_v41 = vadd.f32 -0.5, %v10267_v15  ;;  %v13696_v10 = vadd.f32 -0.5, %v10486_v17  ;;  %v10269_v42 = vpop.f32.mrb[77].mxu0  ;;  %v16063_v43 = vpop.f32.mrb[77].mxu1 }
 0xc03   : > { %13878 = vst [vmem:[%s16753_s27 + $0xc9c] sm:$0xff] %v14491_v22  ;;  %v13695_v44 = vadd.f32 -0.5, %v10269_v42  ;;  %v10271_v45 = vpop.f32.mrb[78].mxu0  ;;  %v10489_v46 = vpop.f32.mrb[78].mxu1 }
 0xc04   : > { %v10747_v11 = vmul.f32 2.0, %v13694_v41  ;;  %v10749_v25 = vmul.f32 2.0, %v13696_v10  ;;  %v13697_v20 = vadd.f32 -0.5, %v10271_v45  ;;  %v13699_v47 = vadd.f32 -0.5, %v10489_v46  ;;  %v10273_v48 = vpop.f32.mrb[79].mxu0  ;;  %v16064_v49 = vpop.f32.mrb[79].mxu1 }
 0xc05   : > { %v10748_v50 = vmul.f32 2.0, %v13695_v44  ;;  %v13698_v51 = vadd.f32 -0.5, %v10273_v48 }
 0xc06   : > { %v14494_v52 = vpack.c.bf16 %v10749_v25, %v10749_v25  ;;  %v10750_v53 = vmul.f32 2.0, %v13697_v20  ;;  %v10752_v54 = vmul.f32 2.0, %v13699_v47 }
 0xc07   : > { %v14493_v14 = vpack.c.bf16 %v10748_v50, %v10747_v11  ;;  %v10751_v19 = vmul.f32 2.0, %v13698_v51 }
 0xc08   : > { %13881 = vst.msk [vmem:[%s16753_s27 + $0xcb0] sm:$0xf] %vm1687_vm2, %v14494_v52  ;;  %v14496_v55 = vpack.c.bf16 %v10752_v54, %v10752_v54 }
 0xc09   : > { %13880 = vst [vmem:[%s16753_s27 + $0xca8] sm:$0xff] %v14493_v14  ;;  %v14495_v0 = vpack.c.bf16 %v10751_v19, %v10750_v53  ;;  %v10277_v56 = vpop.f32.mrb[80].mxu0  ;;  %v10494_v57 = vpop.f32.mrb[80].mxu1 }
 0xc0a   : > { %13883 = vst.msk [vmem:[%s16753_s27 + $0xcbc] sm:$0xf] %vm1687_vm2, %v14496_v55  ;;  %v13700_v23 = vadd.f32 -0.5, %v10277_v56  ;;  %v13702_v58 = vadd.f32 -0.5, %v10494_v57  ;;  %v10279_v59 = vpop.f32.mrb[81].mxu0  ;;  %v16067_v60 = vpop.f32.mrb[81].mxu1 }
 0xc0b   : > { %13882 = vst [vmem:[%s16753_s27 + $0xcb4] sm:$0xff] %v14495_v0  ;;  %v13701_v12 = vadd.f32 -0.5, %v10279_v59  ;;  %v10281_v61 = vpop.f32.mrb[82].mxu0  ;;  %v10497_v62 = vpop.f32.mrb[82].mxu1 }
 0xc0c   : > { %v10753_v63 = vmul.f32 2.0, %v13700_v23  ;;  %v10755_v1 = vmul.f32 2.0, %v13702_v58  ;;  %v13703_v3 = vadd.f32 -0.5, %v10281_v61  ;;  %v13705_v16 = vadd.f32 -0.5, %v10497_v62  ;;  %v10283_v21 = vpop.f32.mrb[83].mxu0  ;;  %v16068_v26 = vpop.f32.mrb[83].mxu1 }
 0xc0d   : > { %v10754_v28 = vmul.f32 2.0, %v13701_v12  ;;  %v13704_v29 = vadd.f32 -0.5, %v10283_v21 }
 0xc0e   : > { %v14498_v30 = vpack.c.bf16 %v10755_v1, %v10755_v1  ;;  %v10756_v31 = vmul.f32 2.0, %v13703_v3  ;;  %v10758_v32 = vmul.f32 2.0, %v13705_v16 }
 0xc0f   : > { %v14497_v33 = vpack.c.bf16 %v10754_v28, %v10753_v63  ;;  %v10757_v34 = vmul.f32 2.0, %v13704_v29 }
 0xc10   : > { %13885 = vst.msk [vmem:[%s16753_s27 + $0xcc8] sm:$0xf] %vm1687_vm2, %v14498_v30  ;;  %v14500_v18 = vpack.c.bf16 %v10758_v32, %v10758_v32 }
 0xc11   : > { %13884 = vst [vmem:[%s16753_s27 + $0xcc0] sm:$0xff] %v14497_v33  ;;  %v14499_v35 = vpack.c.bf16 %v10757_v34, %v10756_v31  ;;  %v10287_v24 = vpop.f32.mrb[84].mxu0  ;;  %v10502_v36 = vpop.f32.mrb[84].mxu1 }
 0xc12   : > { %13887 = vst.msk [vmem:[%s16753_s27 + $0xcd4] sm:$0xf] %vm1687_vm2, %v14500_v18  ;;  %v13706_v37 = vadd.f32 -0.5, %v10287_v24  ;;  %v13708_v38 = vadd.f32 -0.5, %v10502_v36  ;;  %v10289_v39 = vpop.f32.mrb[85].mxu0  ;;  %v16071_v40 = vpop.f32.mrb[85].mxu1 }
 0xc13   : > { %13886 = vst [vmem:[%s16753_s27 + $0xccc] sm:$0xff] %v14499_v35  ;;  %v13707_v4 = vadd.f32 -0.5, %v10289_v39  ;;  %v10291_v13 = vpop.f32.mrb[86].mxu0  ;;  %v10505_v5 = vpop.f32.mrb[86].mxu1 }
 0xc14   : > { %v10759_v6 = vmul.f32 2.0, %v13706_v37  ;;  %v10761_v7 = vmul.f32 2.0, %v13708_v38  ;;  %v13709_v8 = vadd.f32 -0.5, %v10291_v13  ;;  %v13711_v9 = vadd.f32 -0.5, %v10505_v5  ;;  %v10293_v22 = vpop.f32.mrb[87].mxu0  ;;  %v16072_v15 = vpop.f32.mrb[87].mxu1 }
 0xc15   : > { %v10760_v17 = vmul.f32 2.0, %v13707_v4  ;;  %v13710_v41 = vadd.f32 -0.5, %v10293_v22 }
 0xc16   : > { %v14502_v10 = vpack.c.bf16 %v10761_v7, %v10761_v7  ;;  %v10762_v42 = vmul.f32 2.0, %v13709_v8  ;;  %v10764_v43 = vmul.f32 2.0, %v13711_v9 }
 0xc17   : > { %v14501_v44 = vpack.c.bf16 %v10760_v17, %v10759_v6  ;;  %v10763_v45 = vmul.f32 2.0, %v13710_v41 }
 0xc18   : > { %13889 = vst.msk [vmem:[%s16753_s27 + $0xce0] sm:$0xf] %vm1687_vm2, %v14502_v10  ;;  %v14504_v46 = vpack.c.bf16 %v10764_v43, %v10764_v43 }
 0xc19   : > { %13888 = vst [vmem:[%s16753_s27 + $0xcd8] sm:$0xff] %v14501_v44  ;;  %v14503_v11 = vpack.c.bf16 %v10763_v45, %v10762_v42  ;;  %v10297_v25 = vpop.f32.mrb[88].mxu0  ;;  %v10510_v20 = vpop.f32.mrb[88].mxu1 }
 0xc1a   : > { %13891 = vst.msk [vmem:[%s16753_s27 + $0xcec] sm:$0xf] %vm1687_vm2, %v14504_v46  ;;  %v13712_v47 = vadd.f32 -0.5, %v10297_v25  ;;  %v13714_v48 = vadd.f32 -0.5, %v10510_v20  ;;  %v10299_v49 = vpop.f32.mrb[89].mxu0  ;;  %v16075_v50 = vpop.f32.mrb[89].mxu1 }
 0xc1b   : > { %13890 = vst [vmem:[%s16753_s27 + $0xce4] sm:$0xff] %v14503_v11  ;;  %v13713_v51 = vadd.f32 -0.5, %v10299_v49  ;;  %v10301_v52 = vpop.f32.mrb[90].mxu0  ;;  %v10513_v53 = vpop.f32.mrb[90].mxu1 }
 0xc1c   : > { %v10765_v54 = vmul.f32 2.0, %v13712_v47  ;;  %v10767_v14 = vmul.f32 2.0, %v13714_v48  ;;  %v13715_v19 = vadd.f32 -0.5, %v10301_v52  ;;  %v13717_v55 = vadd.f32 -0.5, %v10513_v53  ;;  %v10303_v0 = vpop.f32.mrb[91].mxu0  ;;  %v16076_v56 = vpop.f32.mrb[91].mxu1 }
 0xc1d   : > { %v10766_v57 = vmul.f32 2.0, %v13713_v51  ;;  %v13716_v23 = vadd.f32 -0.5, %v10303_v0 }
 0xc1e   : > { %v14506_v58 = vpack.c.bf16 %v10767_v14, %v10767_v14  ;;  %v10768_v59 = vmul.f32 2.0, %v13715_v19  ;;  %v10770_v60 = vmul.f32 2.0, %v13717_v55 }
 0xc1f   : > { %v14505_v12 = vpack.c.bf16 %v10766_v57, %v10765_v54  ;;  %v10769_v61 = vmul.f32 2.0, %v13716_v23 }
 0xc20   : > { %13893 = vst.msk [vmem:[%s16753_s27 + $0xcf8] sm:$0xf] %vm1687_vm2, %v14506_v58  ;;  %v14508_v62 = vpack.c.bf16 %v10770_v60, %v10770_v60 }
 0xc21   : > { %13892 = vst [vmem:[%s16753_s27 + $0xcf0] sm:$0xff] %v14505_v12  ;;  %v14507_v63 = vpack.c.bf16 %v10769_v61, %v10768_v59  ;;  %v10307_v1 = vpop.f32.mrb[92].mxu0  ;;  %v10518_v3 = vpop.f32.mrb[92].mxu1 }
 0xc22   : > { %13895 = vst.msk [vmem:[%s16753_s27 + $0xd04] sm:$0xf] %vm1687_vm2, %v14508_v62  ;;  %v13718_v16 = vadd.f32 -0.5, %v10307_v1  ;;  %v13720_v21 = vadd.f32 -0.5, %v10518_v3  ;;  %v10309_v26 = vpop.f32.mrb[93].mxu0  ;;  %v16079_v28 = vpop.f32.mrb[93].mxu1 }
 0xc23   : > { %13894 = vst [vmem:[%s16753_s27 + $0xcfc] sm:$0xff] %v14507_v63  ;;  %v13719_v29 = vadd.f32 -0.5, %v10309_v26  ;;  %v10311_v30 = vpop.f32.mrb[94].mxu0  ;;  %v10521_v31 = vpop.f32.mrb[94].mxu1 }
 0xc24   : > { %v10771_v32 = vmul.f32 2.0, %v13718_v16  ;;  %v10773_v33 = vmul.f32 2.0, %v13720_v21  ;;  %v13721_v34 = vadd.f32 -0.5, %v10311_v30  ;;  %v13723_v18 = vadd.f32 -0.5, %v10521_v31  ;;  %v10313_v35 = vpop.f32.mrb[95].mxu0  ;;  %v16080_v24 = vpop.f32.mrb[95].mxu1 }
 0xc25   : > { %v10772_v36 = vmul.f32 2.0, %v13719_v29  ;;  %v13722_v37 = vadd.f32 -0.5, %v10313_v35 }
 0xc26   : > { %v14510_v38 = vpack.c.bf16 %v10773_v33, %v10773_v33  ;;  %v10774_v39 = vmul.f32 2.0, %v13721_v34  ;;  %v10776_v40 = vmul.f32 2.0, %v13723_v18 }
 0xc27   : > { %v14509_v4 = vpack.c.bf16 %v10772_v36, %v10771_v32  ;;  %v10775_v13 = vmul.f32 2.0, %v13722_v37 }
 0xc28   : > { %13897 = vst.msk [vmem:[%s16753_s27 + $0xd10] sm:$0xf] %vm1687_vm2, %v14510_v38  ;;  %v14512_v5 = vpack.c.bf16 %v10776_v40, %v10776_v40 }
 0xc29   : > { %13896 = vst [vmem:[%s16753_s27 + $0xd08] sm:$0xff] %v14509_v4  ;;  %v14511_v6 = vpack.c.bf16 %v10775_v13, %v10774_v39  ;;  %v10317_v7 = vpop.f32.mrb[96].mxu0  ;;  %v10526_v8 = vpop.f32.mrb[96].mxu1 }
 0xc2a   : > { %13899 = vst.msk [vmem:[%s16753_s27 + $0xd1c] sm:$0xf] %vm1687_vm2, %v14512_v5  ;;  %v13724_v9 = vadd.f32 -0.5, %v10317_v7  ;;  %v13726_v22 = vadd.f32 -0.5, %v10526_v8  ;;  %v10319_v15 = vpop.f32.mrb[97].mxu0  ;;  %v16083_v17 = vpop.f32.mrb[97].mxu1 }
 0xc2b   : > { %13898 = vst [vmem:[%s16753_s27 + $0xd14] sm:$0xff] %v14511_v6  ;;  %v13725_v41 = vadd.f32 -0.5, %v10319_v15  ;;  %v10321_v10 = vpop.f32.mrb[98].mxu0  ;;  %v10529_v42 = vpop.f32.mrb[98].mxu1 }
 0xc2c   : > { %v10777_v43 = vmul.f32 2.0, %v13724_v9  ;;  %v10779_v44 = vmul.f32 2.0, %v13726_v22  ;;  %v13727_v45 = vadd.f32 -0.5, %v10321_v10  ;;  %v13729_v46 = vadd.f32 -0.5, %v10529_v42  ;;  %v10323_v11 = vpop.f32.mrb[99].mxu0  ;;  %v16084_v25 = vpop.f32.mrb[99].mxu1 }
 0xc2d   : > { %v10778_v20 = vmul.f32 2.0, %v13725_v41  ;;  %v13728_v47 = vadd.f32 -0.5, %v10323_v11 }
 0xc2e   : > { %v14514_v48 = vpack.c.bf16 %v10779_v44, %v10779_v44  ;;  %v10780_v49 = vmul.f32 2.0, %v13727_v45  ;;  %v10782_v50 = vmul.f32 2.0, %v13729_v46 }
 0xc2f   : > { %v14513_v51 = vpack.c.bf16 %v10778_v20, %v10777_v43  ;;  %v10781_v52 = vmul.f32 2.0, %v13728_v47 }
 0xc30   : > { %13901 = vst.msk [vmem:[%s16753_s27 + $0xd28] sm:$0xf] %vm1687_vm2, %v14514_v48  ;;  %v14516_v53 = vpack.c.bf16 %v10782_v50, %v10782_v50 }
 0xc31   : > { %13900 = vst [vmem:[%s16753_s27 + $0xd20] sm:$0xff] %v14513_v51  ;;  %v14515_v54 = vpack.c.bf16 %v10781_v52, %v10780_v49  ;;  %v10327_v14 = vpop.f32.mrb[100].mxu0  ;;  %v10534_v19 = vpop.f32.mrb[100].mxu1 }
 0xc32   : > { %13903 = vst.msk [vmem:[%s16753_s27 + $0xd34] sm:$0xf] %vm1687_vm2, %v14516_v53  ;;  %v13730_v55 = vadd.f32 -0.5, %v10327_v14  ;;  %v13732_v0 = vadd.f32 -0.5, %v10534_v19  ;;  %v10329_v56 = vpop.f32.mrb[101].mxu0  ;;  %v16087_v57 = vpop.f32.mrb[101].mxu1 }
 0xc33   : > { %13902 = vst [vmem:[%s16753_s27 + $0xd2c] sm:$0xff] %v14515_v54  ;;  %v13731_v23 = vadd.f32 -0.5, %v10329_v56  ;;  %v10331_v58 = vpop.f32.mrb[102].mxu0  ;;  %v10537_v59 = vpop.f32.mrb[102].mxu1 }
 0xc34   : > { %v10783_v60 = vmul.f32 2.0, %v13730_v55  ;;  %v10785_v12 = vmul.f32 2.0, %v13732_v0  ;;  %v13733_v61 = vadd.f32 -0.5, %v10331_v58  ;;  %v13735_v62 = vadd.f32 -0.5, %v10537_v59  ;;  %v10333_v63 = vpop.f32.mrb[103].mxu0  ;;  %v16088_v1 = vpop.f32.mrb[103].mxu1 }
 0xc35   : > { %v10784_v3 = vmul.f32 2.0, %v13731_v23  ;;  %v13734_v16 = vadd.f32 -0.5, %v10333_v63 }
 0xc36   : > { %v14518_v21 = vpack.c.bf16 %v10785_v12, %v10785_v12  ;;  %v10786_v26 = vmul.f32 2.0, %v13733_v61  ;;  %v10788_v28 = vmul.f32 2.0, %v13735_v62 }
 0xc37   : > { %v14517_v29 = vpack.c.bf16 %v10784_v3, %v10783_v60  ;;  %v10787_v30 = vmul.f32 2.0, %v13734_v16 }
 0xc38   : > { %13905 = vst.msk [vmem:[%s16753_s27 + $0xd40] sm:$0xf] %vm1687_vm2, %v14518_v21  ;;  %v14520_v31 = vpack.c.bf16 %v10788_v28, %v10788_v28 }
 0xc39   : > { %13904 = vst [vmem:[%s16753_s27 + $0xd38] sm:$0xff] %v14517_v29  ;;  %v14519_v32 = vpack.c.bf16 %v10787_v30, %v10786_v26  ;;  %v10337_v33 = vpop.f32.mrb[104].mxu0  ;;  %v10542_v34 = vpop.f32.mrb[104].mxu1 }
 0xc3a   : > { %13907 = vst.msk [vmem:[%s16753_s27 + $0xd4c] sm:$0xf] %vm1687_vm2, %v14520_v31  ;;  %v13736_v18 = vadd.f32 -0.5, %v10337_v33  ;;  %v13738_v35 = vadd.f32 -0.5, %v10542_v34  ;;  %v10339_v24 = vpop.f32.mrb[105].mxu0  ;;  %v16091_v36 = vpop.f32.mrb[105].mxu1 }
 0xc3b   : > { %13906 = vst [vmem:[%s16753_s27 + $0xd44] sm:$0xff] %v14519_v32  ;;  %v13737_v37 = vadd.f32 -0.5, %v10339_v24  ;;  %v10341_v38 = vpop.f32.mrb[106].mxu0  ;;  %v10545_v39 = vpop.f32.mrb[106].mxu1 }
 0xc3c   : > { %v10789_v40 = vmul.f32 2.0, %v13736_v18  ;;  %v10791_v4 = vmul.f32 2.0, %v13738_v35  ;;  %v13739_v13 = vadd.f32 -0.5, %v10341_v38  ;;  %v13741_v5 = vadd.f32 -0.5, %v10545_v39  ;;  %v10343_v6 = vpop.f32.mrb[107].mxu0  ;;  %v16092_v7 = vpop.f32.mrb[107].mxu1 }
 0xc3d   : > { %v10790_v8 = vmul.f32 2.0, %v13737_v37  ;;  %v13740_v9 = vadd.f32 -0.5, %v10343_v6 }
 0xc3e   : > { %v14522_v22 = vpack.c.bf16 %v10791_v4, %v10791_v4  ;;  %v10792_v15 = vmul.f32 2.0, %v13739_v13  ;;  %v10794_v17 = vmul.f32 2.0, %v13741_v5 }
 0xc3f   : > { %v14521_v41 = vpack.c.bf16 %v10790_v8, %v10789_v40  ;;  %v10793_v10 = vmul.f32 2.0, %v13740_v9 }
 0xc40   : > { %13909 = vst.msk [vmem:[%s16753_s27 + $0xd58] sm:$0xf] %vm1687_vm2, %v14522_v22  ;;  %v14524_v42 = vpack.c.bf16 %v10794_v17, %v10794_v17 }
 0xc41   : > { %13908 = vst [vmem:[%s16753_s27 + $0xd50] sm:$0xff] %v14521_v41  ;;  %v14523_v43 = vpack.c.bf16 %v10793_v10, %v10792_v15  ;;  %v10347_v44 = vpop.f32.mrb[108].mxu0  ;;  %v10550_v45 = vpop.f32.mrb[108].mxu1 }
 0xc42   : > { %13911 = vst.msk [vmem:[%s16753_s27 + $0xd64] sm:$0xf] %vm1687_vm2, %v14524_v42  ;;  %v13742_v46 = vadd.f32 -0.5, %v10347_v44  ;;  %v13744_v11 = vadd.f32 -0.5, %v10550_v45  ;;  %v10349_v25 = vpop.f32.mrb[109].mxu0  ;;  %v16095_v20 = vpop.f32.mrb[109].mxu1 }
 0xc43   : > { %13910 = vst [vmem:[%s16753_s27 + $0xd5c] sm:$0xff] %v14523_v43  ;;  %v13743_v47 = vadd.f32 -0.5, %v10349_v25  ;;  %v10351_v48 = vpop.f32.mrb[110].mxu0  ;;  %v10553_v49 = vpop.f32.mrb[110].mxu1 }
 0xc44   : > { %v10795_v50 = vmul.f32 2.0, %v13742_v46  ;;  %v10797_v51 = vmul.f32 2.0, %v13744_v11  ;;  %v13745_v52 = vadd.f32 -0.5, %v10351_v48  ;;  %v13747_v53 = vadd.f32 -0.5, %v10553_v49  ;;  %v10353_v54 = vpop.f32.mrb[111].mxu0  ;;  %v16096_v14 = vpop.f32.mrb[111].mxu1 }
 0xc45   : > { %v10796_v19 = vmul.f32 2.0, %v13743_v47  ;;  %v13746_v55 = vadd.f32 -0.5, %v10353_v54 }
 0xc46   : > { %v14526_v0 = vpack.c.bf16 %v10797_v51, %v10797_v51  ;;  %v10798_v56 = vmul.f32 2.0, %v13745_v52  ;;  %v10800_v57 = vmul.f32 2.0, %v13747_v53 }
 0xc47   : > { %v14525_v23 = vpack.c.bf16 %v10796_v19, %v10795_v50  ;;  %v10799_v58 = vmul.f32 2.0, %v13746_v55 }
 0xc48   : > { %13913 = vst.msk [vmem:[%s16753_s27 + $0xd70] sm:$0xf] %vm1687_vm2, %v14526_v0  ;;  %v14528_v59 = vpack.c.bf16 %v10800_v57, %v10800_v57 }
 0xc49   : > { %13912 = vst [vmem:[%s16753_s27 + $0xd68] sm:$0xff] %v14525_v23  ;;  %v14527_v60 = vpack.c.bf16 %v10799_v58, %v10798_v56  ;;  %v10357_v12 = vpop.f32.mrb[112].mxu0  ;;  %v10558_v61 = vpop.f32.mrb[112].mxu1 }
 0xc4a   : > { %13915 = vst.msk [vmem:[%s16753_s27 + $0xd7c] sm:$0xf] %vm1687_vm2, %v14528_v59  ;;  %v13748_v62 = vadd.f32 -0.5, %v10357_v12  ;;  %v13750_v63 = vadd.f32 -0.5, %v10558_v61  ;;  %v10359_v1 = vpop.f32.mrb[113].mxu0  ;;  %v16099_v3 = vpop.f32.mrb[113].mxu1 }
 0xc4b   : > { %13914 = vst [vmem:[%s16753_s27 + $0xd74] sm:$0xff] %v14527_v60  ;;  %v13749_v16 = vadd.f32 -0.5, %v10359_v1  ;;  %v10361_v21 = vpop.f32.mrb[114].mxu0  ;;  %v10561_v26 = vpop.f32.mrb[114].mxu1 }
 0xc4c   : > { %v10801_v28 = vmul.f32 2.0, %v13748_v62  ;;  %v10803_v29 = vmul.f32 2.0, %v13750_v63  ;;  %v13751_v30 = vadd.f32 -0.5, %v10361_v21  ;;  %v13753_v31 = vadd.f32 -0.5, %v10561_v26  ;;  %v10363_v32 = vpop.f32.mrb[115].mxu0  ;;  %v16100_v33 = vpop.f32.mrb[115].mxu1 }
 0xc4d   : > { %v10802_v34 = vmul.f32 2.0, %v13749_v16  ;;  %v13752_v18 = vadd.f32 -0.5, %v10363_v32 }
 0xc4e   : > { %v14530_v35 = vpack.c.bf16 %v10803_v29, %v10803_v29  ;;  %v10804_v24 = vmul.f32 2.0, %v13751_v30  ;;  %v10806_v36 = vmul.f32 2.0, %v13753_v31 }
 0xc4f   : > { %v14529_v37 = vpack.c.bf16 %v10802_v34, %v10801_v28  ;;  %v10805_v38 = vmul.f32 2.0, %v13752_v18 }
 0xc50   : > { %13917 = vst.msk [vmem:[%s16753_s27 + $0xd88] sm:$0xf] %vm1687_vm2, %v14530_v35  ;;  %v14532_v39 = vpack.c.bf16 %v10806_v36, %v10806_v36 }
 0xc51   : > { %13916 = vst [vmem:[%s16753_s27 + $0xd80] sm:$0xff] %v14529_v37  ;;  %v14531_v40 = vpack.c.bf16 %v10805_v38, %v10804_v24  ;;  %v10367_v4 = vpop.f32.mrb[116].mxu0  ;;  %v10566_v13 = vpop.f32.mrb[116].mxu1 }
 0xc52   : > { %13919 = vst.msk [vmem:[%s16753_s27 + $0xd94] sm:$0xf] %vm1687_vm2, %v14532_v39  ;;  %v13754_v5 = vadd.f32 -0.5, %v10367_v4  ;;  %v13756_v6 = vadd.f32 -0.5, %v10566_v13  ;;  %v10369_v7 = vpop.f32.mrb[117].mxu0  ;;  %v16103_v8 = vpop.f32.mrb[117].mxu1 }
 0xc53   : > { %13918 = vst [vmem:[%s16753_s27 + $0xd8c] sm:$0xff] %v14531_v40  ;;  %v13755_v9 = vadd.f32 -0.5, %v10369_v7  ;;  %v10371_v22 = vpop.f32.mrb[118].mxu0  ;;  %v10569_v15 = vpop.f32.mrb[118].mxu1 }
 0xc54   : > { %v10807_v17 = vmul.f32 2.0, %v13754_v5  ;;  %v10809_v41 = vmul.f32 2.0, %v13756_v6  ;;  %v13757_v10 = vadd.f32 -0.5, %v10371_v22  ;;  %v13759_v42 = vadd.f32 -0.5, %v10569_v15  ;;  %v10373_v43 = vpop.f32.mrb[119].mxu0  ;;  %v16104_v44 = vpop.f32.mrb[119].mxu1 }
 0xc55   : > { %v10808_v45 = vmul.f32 2.0, %v13755_v9  ;;  %v13758_v46 = vadd.f32 -0.5, %v10373_v43 }
 0xc56   : > { %v14534_v11 = vpack.c.bf16 %v10809_v41, %v10809_v41  ;;  %v10810_v25 = vmul.f32 2.0, %v13757_v10  ;;  %v10812_v20 = vmul.f32 2.0, %v13759_v42 }
 0xc57   : > { %v14533_v47 = vpack.c.bf16 %v10808_v45, %v10807_v17  ;;  %v10811_v48 = vmul.f32 2.0, %v13758_v46 }
 0xc58   : > { %13921 = vst.msk [vmem:[%s16753_s27 + $0xda0] sm:$0xf] %vm1687_vm2, %v14534_v11  ;;  %v14536_v49 = vpack.c.bf16 %v10812_v20, %v10812_v20 }
 0xc59   : > { %13920 = vst [vmem:[%s16753_s27 + $0xd98] sm:$0xff] %v14533_v47  ;;  %v14535_v50 = vpack.c.bf16 %v10811_v48, %v10810_v25  ;;  %v10377_v51 = vpop.f32.mrb[120].mxu0  ;;  %v10574_v52 = vpop.f32.mrb[120].mxu1 }
 0xc5a   : > { %13923 = vst.msk [vmem:[%s16753_s27 + $0xdac] sm:$0xf] %vm1687_vm2, %v14536_v49  ;;  %v13760_v53 = vadd.f32 -0.5, %v10377_v51  ;;  %v13762_v54 = vadd.f32 -0.5, %v10574_v52  ;;  %v10379_v14 = vpop.f32.mrb[121].mxu0  ;;  %v16107_v19 = vpop.f32.mrb[121].mxu1 }
 0xc5b   : > { %13922 = vst [vmem:[%s16753_s27 + $0xda4] sm:$0xff] %v14535_v50  ;;  %v13761_v55 = vadd.f32 -0.5, %v10379_v14  ;;  %v10381_v0 = vpop.f32.mrb[122].mxu0  ;;  %v10577_v56 = vpop.f32.mrb[122].mxu1 }
 0xc5c   : > { %v10813_v57 = vmul.f32 2.0, %v13760_v53  ;;  %v10815_v23 = vmul.f32 2.0, %v13762_v54  ;;  %v13763_v58 = vadd.f32 -0.5, %v10381_v0  ;;  %v13765_v59 = vadd.f32 -0.5, %v10577_v56  ;;  %v10383_v60 = vpop.f32.mrb[123].mxu0  ;;  %v16108_v12 = vpop.f32.mrb[123].mxu1 }
 0xc5d   : > { %v10814_v61 = vmul.f32 2.0, %v13761_v55  ;;  %v13764_v62 = vadd.f32 -0.5, %v10383_v60 }
 0xc5e   : > { %v14538_v63 = vpack.c.bf16 %v10815_v23, %v10815_v23  ;;  %v10816_v1 = vmul.f32 2.0, %v13763_v58  ;;  %v10818_v3 = vmul.f32 2.0, %v13765_v59 }
 0xc5f   : > { %v14537_v16 = vpack.c.bf16 %v10814_v61, %v10813_v57  ;;  %v10817_v21 = vmul.f32 2.0, %v13764_v62 }
 0xc60   : > { %13925 = vst.msk [vmem:[%s16753_s27 + $0xdb8] sm:$0xf] %vm1687_vm2, %v14538_v63  ;;  %v14540_v26 = vpack.c.bf16 %v10818_v3, %v10818_v3 }
 0xc61   : > { %13924 = vst [vmem:[%s16753_s27 + $0xdb0] sm:$0xff] %v14537_v16  ;;  %v14539_v28 = vpack.c.bf16 %v10817_v21, %v10816_v1  ;;  %v10387_v29 = vpop.f32.mrb[124].mxu0  ;;  %v10582_v30 = vpop.f32.mrb[124].mxu1 }
 0xc62   : > { %13927 = vst.msk [vmem:[%s16753_s27 + $0xdc4] sm:$0xf] %vm1687_vm2, %v14540_v26  ;;  %v13766_v31 = vadd.f32 -0.5, %v10387_v29  ;;  %v13768_v32 = vadd.f32 -0.5, %v10582_v30  ;;  %v10389_v33 = vpop.f32.mrb[125].mxu0  ;;  %v16111_v34 = vpop.f32.mrb[125].mxu1 }
 0xc63   : > { %13926 = vst [vmem:[%s16753_s27 + $0xdbc] sm:$0xff] %v14539_v28  ;;  %v13767_v18 = vadd.f32 -0.5, %v10389_v33  ;;  %v10391_v35 = vpop.f32.mrb[126].mxu0  ;;  %v10585_v24 = vpop.f32.mrb[126].mxu1 }
 0xc64   : > { %v10819_v36 = vmul.f32 2.0, %v13766_v31  ;;  %v10821_v37 = vmul.f32 2.0, %v13768_v32  ;;  %v13769_v38 = vadd.f32 -0.5, %v10391_v35  ;;  %v13771_v39 = vadd.f32 -0.5, %v10585_v24  ;;  %v10393_v40 = vpop.f32.mrb[127].mxu0  ;;  %v16112_v4 = vpop.f32.mrb[127].mxu1 }
 0xc65   : > { %v10820_v13 = vmul.f32 2.0, %v13767_v18  ;;  %v13770_v5 = vadd.f32 -0.5, %v10393_v40 }
 0xc66   : > { %v14542_v6 = vpack.c.bf16 %v10821_v37, %v10821_v37  ;;  %v10822_v7 = vmul.f32 2.0, %v13769_v38  ;;  %v10824_v8 = vmul.f32 2.0, %v13771_v39 }
 0xc67   : > { %v14541_v9 = vpack.c.bf16 %v10820_v13, %v10819_v36  ;;  %v10823_v22 = vmul.f32 2.0, %v13770_v5 }
 0xc68   : > { %13929 = vst.msk [vmem:[%s16753_s27 + $0xdd0] sm:$0xf] %vm1687_vm2, %v14542_v6  ;;  %v14544_v15 = vpack.c.bf16 %v10824_v8, %v10824_v8 }
 0xc69   : > { %13928 = vst [vmem:[%s16753_s27 + $0xdc8] sm:$0xff] %v14541_v9  ;;  %v14543_v17 = vpack.c.bf16 %v10823_v22, %v10822_v7  ;;  %v10397_v41 = vpop.f32.mrb[128].mxu0  ;;  %v10590_v10 = vpop.f32.mrb[128].mxu1 }
 0xc6a   : > { %13931 = vst.msk [vmem:[%s16753_s27 + $0xddc] sm:$0xf] %vm1687_vm2, %v14544_v15  ;;  %v13772_v42 = vadd.f32 -0.5, %v10397_v41  ;;  %v13774_v43 = vadd.f32 -0.5, %v10590_v10  ;;  %v10399_v44 = vpop.f32.mrb[129].mxu0  ;;  %v16115_v45 = vpop.f32.mrb[129].mxu1 }
 0xc6b   : > { %13930 = vst [vmem:[%s16753_s27 + $0xdd4] sm:$0xff] %v14543_v17  ;;  %v13773_v46 = vadd.f32 -0.5, %v10399_v44  ;;  %v10401_v11 = vpop.f32.mrb[130].mxu0  ;;  %v10593_v25 = vpop.f32.mrb[130].mxu1 }
 0xc6c   : > { %v10825_v20 = vmul.f32 2.0, %v13772_v42  ;;  %v10827_v47 = vmul.f32 2.0, %v13774_v43  ;;  %v13775_v48 = vadd.f32 -0.5, %v10401_v11  ;;  %v13777_v49 = vadd.f32 -0.5, %v10593_v25  ;;  %v10403_v50 = vpop.f32.mrb[131].mxu0  ;;  %v16116_v51 = vpop.f32.mrb[131].mxu1 }
 0xc6d   : > { %v10826_v52 = vmul.f32 2.0, %v13773_v46  ;;  %v13776_v53 = vadd.f32 -0.5, %v10403_v50 }
 0xc6e   : > { %v14546_v54 = vpack.c.bf16 %v10827_v47, %v10827_v47  ;;  %v10828_v14 = vmul.f32 2.0, %v13775_v48  ;;  %v10830_v19 = vmul.f32 2.0, %v13777_v49 }
 0xc6f   : > { %v14545_v55 = vpack.c.bf16 %v10826_v52, %v10825_v20  ;;  %v10829_v0 = vmul.f32 2.0, %v13776_v53 }
 0xc70   : > { %13933 = vst.msk [vmem:[%s16753_s27 + $0xde8] sm:$0xf] %vm1687_vm2, %v14546_v54  ;;  %v14548_v56 = vpack.c.bf16 %v10830_v19, %v10830_v19 }
 0xc71   : > { %13932 = vst [vmem:[%s16753_s27 + $0xde0] sm:$0xff] %v14545_v55  ;;  %v14547_v57 = vpack.c.bf16 %v10829_v0, %v10828_v14  ;;  %v10407_v23 = vpop.f32.mrb[132].mxu0  ;;  %v10598_v58 = vpop.f32.mrb[132].mxu1 }
 0xc72   : > { %13935 = vst.msk [vmem:[%s16753_s27 + $0xdf4] sm:$0xf] %vm1687_vm2, %v14548_v56  ;;  %v13778_v59 = vadd.f32 -0.5, %v10407_v23  ;;  %v13780_v60 = vadd.f32 -0.5, %v10598_v58  ;;  %v10409_v12 = vpop.f32.mrb[133].mxu0  ;;  %v16119_v61 = vpop.f32.mrb[133].mxu1 }
 0xc73   : > { %13934 = vst [vmem:[%s16753_s27 + $0xdec] sm:$0xff] %v14547_v57  ;;  %v13779_v62 = vadd.f32 -0.5, %v10409_v12  ;;  %v10411_v63 = vpop.f32.mrb[134].mxu0  ;;  %v10601_v1 = vpop.f32.mrb[134].mxu1 }
 0xc74   : > { %v10831_v3 = vmul.f32 2.0, %v13778_v59  ;;  %v10833_v16 = vmul.f32 2.0, %v13780_v60  ;;  %v13781_v21 = vadd.f32 -0.5, %v10411_v63  ;;  %v13783_v26 = vadd.f32 -0.5, %v10601_v1  ;;  %v10413_v28 = vpop.f32.mrb[135].mxu0  ;;  %v16120_v29 = vpop.f32.mrb[135].mxu1 }
 0xc75   : > { %v10832_v30 = vmul.f32 2.0, %v13779_v62  ;;  %v13782_v31 = vadd.f32 -0.5, %v10413_v28  ;;  %v13948_v63 = vld [vmem:[%s16753_s27 + $0xe3c] sm:$0x3] }
 0xc76   : > { %v14550_v32 = vpack.c.bf16 %v10833_v16, %v10833_v16  ;;  %v10834_v33 = vmul.f32 2.0, %v13781_v21  ;;  %v10836_v34 = vmul.f32 2.0, %v13783_v26  ;;  %v13946_v16 = vld [vmem:[%s16753_s27 + $0xe34] sm:$0x33] }
 0xc77   : > { %v14549_v18 = vpack.c.bf16 %v10832_v30, %v10831_v3  ;;  %v10835_v35 = vmul.f32 2.0, %v13782_v31 }
 0xc78   : > { %13937 = vst.msk [vmem:[%s16753_s27 + $0xe00] sm:$0xf] %vm1687_vm2, %v14550_v32  ;;  %v14552_v24 = vpack.c.bf16 %v10836_v34, %v10836_v34 }
 0xc79   : > { %13936 = vst [vmem:[%s16753_s27 + $0xdf8] sm:$0xff] %v14549_v18  ;;  %v14551_v36 = vpack.c.bf16 %v10835_v35, %v10834_v33  ;;  %v10417_v37 = vpop.f32.mrb[136].mxu0  ;;  %v10606_v38 = vpop.f32.mrb[136].mxu1 }
 0xc7a   : > { %13939 = vst.msk [vmem:[%s16753_s27 + $0xe0c] sm:$0xf] %vm1687_vm2, %v14552_v24  ;;  %v13784_v39 = vadd.f32 -0.5, %v10417_v37  ;;  %v13786_v40 = vadd.f32 -0.5, %v10606_v38  ;;  %v10419_v4 = vpop.f32.mrb[137].mxu0  ;;  %v16123_v13 = vpop.f32.mrb[137].mxu1 }
 0xc7b   : > { %13938 = vst [vmem:[%s16753_s27 + $0xe04] sm:$0xff] %v14551_v36  ;;  %v13785_v5 = vadd.f32 -0.5, %v10419_v4  ;;  %v10421_v6 = vpop.f32.mrb[138].mxu0  ;;  %v10609_v7 = vpop.f32.mrb[138].mxu1 }
 0xc7c   : > { %v10837_v8 = vmul.f32 2.0, %v13784_v39  ;;  %v10839_v9 = vmul.f32 2.0, %v13786_v40  ;;  %v13787_v22 = vadd.f32 -0.5, %v10421_v6  ;;  %v13789_v15 = vadd.f32 -0.5, %v10609_v7  ;;  %v10423_v17 = vpop.f32.mrb[139].mxu0  ;;  %v16124_v41 = vpop.f32.mrb[139].mxu1 }
 0xc7d   : > { %v10838_v10 = vmul.f32 2.0, %v13785_v5  ;;  %v13788_v42 = vadd.f32 -0.5, %v10423_v17 }
 0xc7e   : > { %v14554_v43 = vpack.c.bf16 %v10839_v9, %v10839_v9  ;;  %v10840_v44 = vmul.f32 2.0, %v13787_v22  ;;  %v10842_v45 = vmul.f32 2.0, %v13789_v15 }
 0xc7f   : > { %v14553_v46 = vpack.c.bf16 %v10838_v10, %v10837_v8  ;;  %v10841_v11 = vmul.f32 2.0, %v13788_v42 }
 0xc80   : > { %13941 = vst.msk [vmem:[%s16753_s27 + $0xe18] sm:$0xf] %vm1687_vm2, %v14554_v43  ;;  %v14556_v25 = vpack.c.bf16 %v10842_v45, %v10842_v45 }
 0xc81   : > { %13940 = vst [vmem:[%s16753_s27 + $0xe10] sm:$0xff] %v14553_v46  ;;  %v14555_v20 = vpack.c.bf16 %v10841_v11, %v10840_v44  ;;  %v10427_v47 = vpop.f32.mrb[140].mxu0  ;;  %v10614_v48 = vpop.f32.mrb[140].mxu1 }
 0xc82   : > { %13943 = vst.msk [vmem:[%s16753_s27 + $0xe24] sm:$0xf] %vm1687_vm2, %v14556_v25  ;;  %v13790_v49 = vadd.f32 -0.5, %v10427_v47  ;;  %v13792_v50 = vadd.f32 -0.5, %v10614_v48  ;;  %v10429_v51 = vpop.f32.mrb[141].mxu0  ;;  %v16127_v52 = vpop.f32.mrb[141].mxu1 }
 0xc83   : > { %13942 = vst [vmem:[%s16753_s27 + $0xe1c] sm:$0xff] %v14555_v20  ;;  %v13791_v53 = vadd.f32 -0.5, %v10429_v51  ;;  %v10431_v54 = vpop.f32.mrb[142].mxu0  ;;  %v10617_v14 = vpop.f32.mrb[142].mxu1 }
 0xc84   : > { %v10843_v19 = vmul.f32 2.0, %v13790_v49  ;;  %v10845_v55 = vmul.f32 2.0, %v13792_v50  ;;  %v13793_v0 = vadd.f32 -0.5, %v10431_v54  ;;  %v13795_v56 = vadd.f32 -0.5, %v10617_v14  ;;  %v10433_v57 = vpop.f32.mrb[143].mxu0  ;;  %v16128_v23 = vpop.f32.mrb[143].mxu1 }
 0xc85   : > { %v10844_v58 = vmul.f32 2.0, %v13791_v53  ;;  %v13794_v59 = vadd.f32 -0.5, %v10433_v57 }
 0xc86   : > { %v14558_v60 = vpack.c.bf16 %v10845_v55, %v10845_v55  ;;  %v10846_v12 = vmul.f32 2.0, %v13793_v0  ;;  %v10848_v61 = vmul.f32 2.0, %v13795_v56 }
 0xc87   : > { %v14557_v62 = vpack.c.bf16 %v10844_v58, %v10843_v19  ;;  %v10847_v1 = vmul.f32 2.0, %v13794_v59 }
 0xc88   : > { %13945 = vst.msk [vmem:[%s16753_s27 + $0xe30] sm:$0xf] %vm1687_vm2, %v14558_v60  ;;  %v14560_v3 = vpack.c.bf16 %v10848_v61, %v10848_v61 }
 0xc89   : > { %13944 = vst [vmem:[%s16753_s27 + $0xe28] sm:$0xff] %v14557_v62  ;;  %v14559_v21 = vpack.c.bf16 %v10847_v1, %v10846_v12 }
 0xc8a   : > { %v11308_v26 = vsel %vm16919_vm10, %v14560_v3, %v13948_v63 }
 0xc8b   : > { %13949 = vst [vmem:[%s16753_s27 + $0xe3c] sm:$0x3] %v11308_v26  ;;  %v11305_v28 = vsel %vm16929_vm11, %v14559_v21, %v13946_v16 }
 0xc8c   : > { %13947 = vst [vmem:[%s16753_s27 + $0xe34] sm:$0x33] %v11305_v28 }
 0xc8d PF: > { %s14_s12 = sadd.s32 1, %s16347_s12  }
 0xc8e   : > { %p11_p3 = scmp.ge.s32.totalorder %s14_s12, 4  }
 0xc90   :  { %13 = sbr.rel (!%p11_p3) target bundleno = 1 (0x1), region = 81 }
 0xc97   :  { %11334 = vsyncpa [#allocation3], 1 }
 0xc98   :  { %11336 = vsyncpa [#allocation3 + $0x1], 1 }

</bundles_post_ra>
